<compile_context>
chip_gen: v7x
topology: tpu7x:2x2x1
jax: 0.10.0
libtpu: 0.0.40
codegen_flags: <defaults>
</compile_context>

<pallas_src>
import numpy as np
import jax
import jax.numpy as jnp
from jax.experimental import pallas as pl
from jax.experimental.pallas import tpu as pltpu

# ---- NGP default hyper-parameters (from the PyTorch __init__) ----
SCALE = 0.5
LEVELS = 16
F_PER_LEVEL = 2
LOG2_T = 19
T = 1 << LOG2_T
BASE_RES = 16
MAX_RES = 2048
XYZ_NET_WIDTH = 64          # xyz_encoder: net_depth=1, net_width=64
XYZ_OUT_DIM = 16            # xyz_net_out_dim
RGB_NET_WIDTH = 64          # rgb_net: net_depth=2, net_width=64
SH_DIM = 16                 # DirEncoder (spherical harmonics, degree 4)
EMB_DIM = LEVELS * F_PER_LEVEL      # 32
FOLD_DIM = RGB_NET_WIDTH + 1        # 65: rows 0-63 rgb layer-1 pre, row 64 sigma pre
TN = 4096                   # points per grid step (lane-dense tile width)

# ---- static hash-grid constants ----
_B = np.exp((np.log(MAX_RES) - np.log(BASE_RES)) / (LEVELS - 1))
_RES = np.floor(BASE_RES * _B ** np.arange(LEVELS)).astype(np.int64)        # (L,)
_PRIMES = np.array([1, 2654435761, 805459861], dtype=np.uint32)
_CORNERS = np.array([[(c >> 0) & 1, (c >> 1) & 1, (c >> 2) & 1]
                     for c in range(8)], dtype=np.uint32)                    # (8, 3)
_CORNERS_BOOL = _CORNERS.astype(bool)
# dense (non-hashed) indexing for coarse levels where the full grid fits the table
# TODO(synk): exact dense/hash switch of the reference CUDA HashEncoder is not
# available; this follows the standard instant-ngp/tcnn behavior.
_DENSE = (_RES + 1) ** 3 <= T                                                # (L,)
_LEVEL_OFFSETS = (np.arange(LEVELS) * T).astype(np.int32)                    # (L,)


# --------------------------- parameter init (deterministic) ---------------------------
def _xavier_uniform(key, fan_in, fan_out):
    bound = float(np.sqrt(6.0 / (fan_in + fan_out)))
    return jax.random.uniform(key, (fan_in, fan_out), jnp.float32, -bound, bound)


def init_params(key):
    ks = jax.random.split(key, 6)
    return {
        # hash tables, instant-ngp style init U(-1e-4, 1e-4): (levels, T, F)
        "tables": jax.random.uniform(ks[0], (LEVELS, T, F_PER_LEVEL),
                                     jnp.float32, -1e-4, 1e-4),
        # xyz_encoder (bias_enabled=False): Linear(32,64) ReLU, Linear(64,16)
        "w_x1": _xavier_uniform(ks[1], EMB_DIM, XYZ_NET_WIDTH),
        "w_xo": _xavier_uniform(ks[2], XYZ_NET_WIDTH, XYZ_OUT_DIM),
        # rgb_net (bias_enabled=False): Linear(32,64) ReLU, Linear(64,64) ReLU, Linear(64,3) Sigmoid
        "w_r1": _xavier_uniform(ks[3], SH_DIM + XYZ_OUT_DIM, RGB_NET_WIDTH),
        "w_r2": _xavier_uniform(ks[4], RGB_NET_WIDTH, RGB_NET_WIDTH),
        "w_ro": _xavier_uniform(ks[5], RGB_NET_WIDTH, 3),
    }


# --------------------------- hash-grid positional encoding (JAX glue) ---------------------------
def hash_encode(x01, tables_flat):
    """x01: (N,3) in [0,1], tables_flat: (LEVELS*T, F) -> (N, LEVELS*F) features.

    Single vectorized gather over all 16 levels x 8 corners; coarse levels use
    dense (non-hashed) indexing, fine levels use the spatial hash."""
    n = x01.shape[0]
    res = jnp.asarray(_RES, jnp.float32)                                   # (L,)
    x01 = jnp.clip(x01.astype(jnp.float32), 0.0, 1.0)
    pos = x01[:, None, :] * res[None, :, None]                             # (N, L, 3)
    # clamp base cell to res-1 so the +1 corner stays inside the dense grid (x01 == 1.0 case)
    pos0f = jnp.minimum(jnp.floor(pos), res[None, :, None] - 1.0)
    frac = pos - pos0f                                                     # (N, L, 3)
    pos0 = pos0f.astype(jnp.uint32)                                        # (N, L, 3)

    corners = jnp.asarray(_CORNERS)                                        # (8, 3) u32
    c = pos0[:, :, None, :] + corners[None, None, :, :]                    # (N, L, 8, 3)

    # spatial hash index
    primes = jnp.asarray(_PRIMES)
    hidx = (c[..., 0] * primes[0]) ^ (c[..., 1] * primes[1]) ^ (c[..., 2] * primes[2])
    hidx = hidx & jnp.uint32(T - 1)                                        # (N, L, 8)

    # dense index (only valid / selected on coarse levels)
    stride = jnp.asarray((_RES + 1).astype(np.uint32))                     # (L,)
    didx = (c[..., 0]
            + c[..., 1] * stride[None, :, None]
            + c[..., 2] * (stride * stride)[None, :, None])                # (N, L, 8)

    use_dense = jnp.asarray(_DENSE)[None, :, None]                         # (1, L, 1)
    idx = jnp.where(use_dense, didx, hidx).astype(jnp.int32)
    idx = idx + jnp.asarray(_LEVEL_OFFSETS)[None, :, None]                 # (N, L, 8)

    f = tables_flat[idx]                                                   # (N, L, 8, F) one gather
    w = jnp.prod(jnp.where(jnp.asarray(_CORNERS_BOOL)[None, None, :, :],
                           frac[:, :, None, :], 1.0 - frac[:, :, None, :]),
                 axis=-1)                                                  # (N, L, 8)
    feat = jnp.sum(w[..., None] * f, axis=2)                               # (N, L, F)
    return feat.reshape(n, LEVELS * F_PER_LEVEL)                           # (N, 32)


# --------------------------- in-kernel spherical harmonics (deg 4, tcnn convention) ---------------------------
def _sh_deg4(x, y, z):
    """Inputs (1, TN) normalized direction components -> (16, TN) SH features.
    The (d+1)/2 in the PyTorch forward is undone inside the SH encoder, so this
    consumes the normalized direction directly."""
    x2, y2, z2 = x * x, y * y, z * z
    xy, yz, xz = x * y, y * z, x * z
    one = jnp.ones_like(x)
    rows = [
        0.28209479177387814 * one,
        -0.48860251190291987 * y,
        0.48860251190291987 * z,
        -0.48860251190291987 * x,
        1.0925484305920792 * xy,
        -1.0925484305920792 * yz,
        0.94617469575755997 * z2 - 0.31539156525251999,
        -1.0925484305920792 * xz,
        0.54627421529603959 * (x2 - y2),
        0.59004358992664352 * y * (-3.0 * x2 + y2),
        2.8906114426405538 * xy * z,
        0.45704579946446572 * y * (1.0 - 5.0 * z2),
        0.3731763325901154 * z * (5.0 * z2 - 3.0),
        0.45704579946446572 * x * (1.0 - 5.0 * z2),
        1.4453057213202769 * z * (x2 - y2),
        0.59004358992664352 * x * (-x2 + 3.0 * y2),
    ]
    return jnp.concatenate(rows, axis=0)                                   # (16, TN)


# --------------------------- fused NGP head kernel (features-first) ---------------------------
def ngp_head_kernel(embT_ref, dT_ref, wx1_ref, wdc_ref, whc_ref, wr2_ref, wro_ref,
                    out_ref):
    # direction normalize + SH on VPU/EUP (hides under the MXU chain)
    dx = dT_ref[0:1, :]
    dy = dT_ref[1:2, :]
    dz = dT_ref[2:3, :]
    inv_n = jax.lax.rsqrt(dx * dx + dy * dy + dz * dz)
    sh = _sh_deg4(dx * inv_n, dy * inv_n, dz * inv_n)                      # (16, TN)

    # xyz MLP hidden layer: h1 = relu(Wx1^T @ emb)                         (64, TN)
    h1 = jnp.maximum(
        jnp.dot(wx1_ref[...], embT_ref[...], preferred_element_type=jnp.float32), 0.0)

    # folded head: rows 0-63 = rgb layer-1 pre-activation (w_xo folded in),
    # row 64 = sigma pre-activation (h[0])
    pre = (jnp.dot(wdc_ref[...], sh, preferred_element_type=jnp.float32)
           + jnp.dot(whc_ref[...], h1, preferred_element_type=jnp.float32))  # (65, TN)

    sigma = jnp.exp(pre[RGB_NET_WIDTH:FOLD_DIM, :])                        # TruncExp fwd, (1, TN)

    r1 = jnp.maximum(pre[0:RGB_NET_WIDTH, :], 0.0)                         # (64, TN)
    r2 = jnp.maximum(
        jnp.dot(wr2_ref[...], r1, preferred_element_type=jnp.float32), 0.0)  # (64, TN)
    rgb = jax.nn.sigmoid(
        jnp.dot(wro_ref[...], r2, preferred_element_type=jnp.float32))     # (3, TN)

    # single merged lane-dense store: rows 0-2 = rgb, row 3 = sigma
    out_ref[...] = jnp.concatenate([rgb, sigma], axis=0)


# --------------------------- wrapper ---------------------------
@jax.jit
def ngp_forward(params, x, d):
    """x: (N,3) in [-SCALE, SCALE], d: (N,3) directions -> (sigmas (N,), rgbs (N,3))"""
    n = x.shape[0]
    x01 = (x - (-SCALE)) / (2.0 * SCALE)

    tables_flat = params["tables"].reshape(LEVELS * T, F_PER_LEVEL)
    emb = hash_encode(x01, tables_flat)                                    # (N, 32) f32

    n_pad = pl.cdiv(n, TN) * TN
    pad = n_pad - n
    # features-first layouts (lane axis = points); f32 operands (see header note).
    embT = jnp.pad(emb, ((0, pad), (0, 0))).T                              # (32, n_pad)
    # pad directions with 1.0 so the in-kernel rsqrt stays finite on padded lanes
    dT = jnp.pad(d.astype(jnp.float32), ((0, pad), (0, 0)),
                 constant_values=1.0).T                                    # (3, n_pad)

    # ---- weight prep: fold w_xo into the rgb first layer + sigma row ----
    w_x1, w_xo = params["w_x1"], params["w_xo"]
    w_r1, w_r2, w_ro = params["w_r1"], params["w_r2"], params["w_ro"]
    wx1T = w_x1.T                                                          # (64, 32)
    wh_fold = w_r1[SH_DIM:].T @ w_xo.T                                     # (64, 64)
    whc = jnp.concatenate([wh_fold, w_xo[:, 0:1].T], axis=0)               # (65, 64)
    wdc = jnp.concatenate([w_r1[:SH_DIM].T,
                           jnp.zeros((1, SH_DIM), jnp.float32)], axis=0)   # (65, 16)
    wr2T = w_r2.T                                                          # (64, 64)
    wroT = w_ro.T                                                          # (3, 64)

    col = lambda i: (0, i)
    full = lambda i: (0, 0)

    flops_per_pt = 2 * (EMB_DIM * XYZ_NET_WIDTH
                        + SH_DIM * FOLD_DIM
                        + XYZ_NET_WIDTH * FOLD_DIM
                        + RGB_NET_WIDTH * RGB_NET_WIDTH
                        + RGB_NET_WIDTH * 3)
    weight_bytes = 4 * (wx1T.size + wdc.size + whc.size + wr2T.size + wroT.size)

    out = pl.pallas_call(
        ngp_head_kernel,
        out_shape=jax.ShapeDtypeStruct((4, n_pad), jnp.float32),
        grid=(n_pad // TN,),
        in_specs=[
            pl.BlockSpec((EMB_DIM, TN), col),
            pl.BlockSpec((3, TN), col),
            pl.BlockSpec((XYZ_NET_WIDTH, EMB_DIM), full),
            pl.BlockSpec((FOLD_DIM, SH_DIM), full),
            pl.BlockSpec((FOLD_DIM, XYZ_NET_WIDTH), full),
            pl.BlockSpec((RGB_NET_WIDTH, RGB_NET_WIDTH), full),
            pl.BlockSpec((3, RGB_NET_WIDTH), full),
        ],
        out_specs=pl.BlockSpec((4, TN), col),
        compiler_params=pltpu.CompilerParams(dimension_semantics=("parallel",)),
        cost_estimate=pl.CostEstimate(
            flops=flops_per_pt * n_pad,
            transcendentals=5 * n_pad,
            bytes_accessed=(EMB_DIM + 3 + 4) * 4 * n_pad + weight_bytes),
    )(embT, dT, wx1T, wdc, whc, wr2T, wroT)

    sigmas = out[3, :n]
    rgbs = out[:3, :n].T
    return sigmas, rgbs


if __name__ == "__main__":
    key = jax.random.PRNGKey(0)
    kp, kx, kd = jax.random.split(key, 3)
    params = init_params(kp)

    N = 256
    x = jax.random.uniform(kx, (N, 3), jnp.float32, -SCALE, SCALE)
    d = jax.random.normal(kd, (N, 3), jnp.float32)

    sigmas, rgbs = ngp_forward(params, x, d)
    jax.block_until_ready((sigmas, rgbs))

    assert sigmas.shape == (N,) and sigmas.dtype == jnp.float32
    assert rgbs.shape == (N, 3) and rgbs.dtype == jnp.float32
    assert bool(jnp.all(jnp.isfinite(sigmas))) and bool(jnp.all(jnp.isfinite(rgbs)))
    assert bool(jnp.all((rgbs >= 0.0) & (rgbs <= 1.0)))
    print("KERNEL_OK")
</pallas_src>

<mosaic_0001>
module attributes {stable_mosaic.version = 11 : i64} {
  func.func private @main(%arg0: i32) attributes {dimension_semantics = [#tpu.dimension_semantics<core_parallel>], iteration_bounds = array<i64: 2>, tpu.core_type = #tpu.core_type<sc_scalar_subcore>, window_params = []} {
    return
  }
}

module attributes {stable_mosaic.version = 11 : i64} {
  func.func private @main(%arg0: i32) attributes {dimension_semantics = [#tpu.dimension_semantics<core_parallel>], iteration_bounds = array<i64: 2>, tpu.core_type = #tpu.core_type<sc_scalar_subcore>, window_params = []} {
    return
  }
}

module attributes {stable_mosaic.version = 11 : i64} {
  func.func @ngp_head_kernel(%arg0: i32, %arg1: memref<32x4096xf32, #tpu.memory_space<vmem>>, %arg2: memref<3x4096xf32, #tpu.memory_space<vmem>>, %arg3: memref<64x32xf32, #tpu.memory_space<vmem>>, %arg4: memref<65x16xf32, #tpu.memory_space<vmem>>, %arg5: memref<65x64xf32, #tpu.memory_space<vmem>>, %arg6: memref<64x64xf32, #tpu.memory_space<vmem>>, %arg7: memref<3x64xf32, #tpu.memory_space<vmem>>, %arg8: memref<4x4096xf32, #tpu.memory_space<vmem>>) attributes {dimension_semantics = [#tpu.dimension_semantics<parallel>], iteration_bounds = array<i64: 1>, scalar_prefetch = 0 : i64, scratch_operands = 0 : i64, tpu.core_type = #tpu.core_type<tc>, window_params = [{transform_indices = @transform_0, window_bounds = array<i64: 32, 4096>}, {transform_indices = @transform_1, window_bounds = array<i64: 3, 4096>}, {pipeline_mode = #tpu.pipeline_mode<synchronous>, transform_indices = @transform_2, window_bounds = array<i64: 64, 32>}, {pipeline_mode = #tpu.pipeline_mode<synchronous>, transform_indices = @transform_3, window_bounds = array<i64: 65, 16>}, {pipeline_mode = #tpu.pipeline_mode<synchronous>, transform_indices = @transform_4, window_bounds = array<i64: 65, 64>}, {pipeline_mode = #tpu.pipeline_mode<synchronous>, transform_indices = @transform_5, window_bounds = array<i64: 64, 64>}, {pipeline_mode = #tpu.pipeline_mode<synchronous>, transform_indices = @transform_6, window_bounds = array<i64: 3, 64>}, {transform_indices = @transform_7, window_bounds = array<i64: 4, 4096>}]} {
    %c0 = arith.constant 0 : index
    %c0_0 = arith.constant 0 : index
    %0 = vector.load %arg2[%c0, %c0_0] : memref<3x4096xf32, #tpu.memory_space<vmem>>, vector<1x4096xf32>
    %c1 = arith.constant 1 : index
    %c0_1 = arith.constant 0 : index
    %1 = vector.load %arg2[%c1, %c0_1] : memref<3x4096xf32, #tpu.memory_space<vmem>>, vector<1x4096xf32>
    %c2 = arith.constant 2 : index
    %c0_2 = arith.constant 0 : index
    %2 = vector.load %arg2[%c2, %c0_2] : memref<3x4096xf32, #tpu.memory_space<vmem>>, vector<1x4096xf32>
    %3 = arith.mulf %0, %0 : vector<1x4096xf32>
    %4 = arith.mulf %1, %1 : vector<1x4096xf32>
    %5 = arith.addf %3, %4 : vector<1x4096xf32>
    %6 = arith.mulf %2, %2 : vector<1x4096xf32>
    %7 = arith.addf %5, %6 : vector<1x4096xf32>
    %8 = math.rsqrt %7 : vector<1x4096xf32>
    %9 = arith.mulf %0, %8 : vector<1x4096xf32>
    %10 = arith.mulf %1, %8 : vector<1x4096xf32>
    %11 = arith.mulf %2, %8 : vector<1x4096xf32>
    %12 = arith.mulf %9, %9 : vector<1x4096xf32>
    %13 = arith.mulf %10, %10 : vector<1x4096xf32>
    %14 = arith.mulf %11, %11 : vector<1x4096xf32>
    %15 = arith.mulf %9, %10 : vector<1x4096xf32>
    %16 = arith.mulf %10, %11 : vector<1x4096xf32>
    %17 = arith.mulf %9, %11 : vector<1x4096xf32>
    %cst = arith.constant 1.000000e+00 : f32
    %18 = vector.broadcast %cst : f32 to vector<1x4096xf32>
    %cst_3 = arith.constant 0.282094806 : f32
    %19 = vector.broadcast %cst_3 : f32 to vector<1x4096xf32>
    %20 = arith.mulf %19, %18 : vector<1x4096xf32>
    %cst_4 = arith.constant -0.488602519 : f32
    %21 = vector.broadcast %cst_4 : f32 to vector<1x4096xf32>
    %22 = arith.mulf %21, %10 : vector<1x4096xf32>
    %cst_5 = arith.constant 0.488602519 : f32
    %23 = vector.broadcast %cst_5 : f32 to vector<1x4096xf32>
    %24 = arith.mulf %23, %11 : vector<1x4096xf32>
    %cst_6 = arith.constant -0.488602519 : f32
    %25 = vector.broadcast %cst_6 : f32 to vector<1x4096xf32>
    %26 = arith.mulf %25, %9 : vector<1x4096xf32>
    %cst_7 = arith.constant 1.09254849 : f32
    %27 = vector.broadcast %cst_7 : f32 to vector<1x4096xf32>
    %28 = arith.mulf %27, %15 : vector<1x4096xf32>
    %cst_8 = arith.constant -1.09254849 : f32
    %29 = vector.broadcast %cst_8 : f32 to vector<1x4096xf32>
    %30 = arith.mulf %29, %16 : vector<1x4096xf32>
    %cst_9 = arith.constant 0.946174681 : f32
    %31 = vector.broadcast %cst_9 : f32 to vector<1x4096xf32>
    %32 = arith.mulf %31, %14 : vector<1x4096xf32>
    %cst_10 = arith.constant 0.31539157 : f32
    %33 = vector.broadcast %cst_10 : f32 to vector<1x4096xf32>
    %34 = arith.subf %32, %33 : vector<1x4096xf32>
    %cst_11 = arith.constant -1.09254849 : f32
    %35 = vector.broadcast %cst_11 : f32 to vector<1x4096xf32>
    %36 = arith.mulf %35, %17 : vector<1x4096xf32>
    %37 = arith.subf %12, %13 : vector<1x4096xf32>
    %cst_12 = arith.constant 0.546274245 : f32
    %38 = vector.broadcast %cst_12 : f32 to vector<1x4096xf32>
    %39 = arith.mulf %38, %37 : vector<1x4096xf32>
    %cst_13 = arith.constant 0.590043604 : f32
    %40 = vector.broadcast %cst_13 : f32 to vector<1x4096xf32>
    %41 = arith.mulf %40, %10 : vector<1x4096xf32>
    %cst_14 = arith.constant -3.000000e+00 : f32
    %42 = vector.broadcast %cst_14 : f32 to vector<1x4096xf32>
    %43 = arith.mulf %42, %12 : vector<1x4096xf32>
    %44 = arith.addf %43, %13 : vector<1x4096xf32>
    %45 = arith.mulf %41, %44 : vector<1x4096xf32>
    %cst_15 = arith.constant 2.89061141 : f32
    %46 = vector.broadcast %cst_15 : f32 to vector<1x4096xf32>
    %47 = arith.mulf %46, %15 : vector<1x4096xf32>
    %48 = arith.mulf %47, %11 : vector<1x4096xf32>
    %cst_16 = arith.constant 0.457045794 : f32
    %49 = vector.broadcast %cst_16 : f32 to vector<1x4096xf32>
    %50 = arith.mulf %49, %10 : vector<1x4096xf32>
    %cst_17 = arith.constant 5.000000e+00 : f32
    %51 = vector.broadcast %cst_17 : f32 to vector<1x4096xf32>
    %52 = arith.mulf %51, %14 : vector<1x4096xf32>
    %cst_18 = arith.constant 1.000000e+00 : f32
    %53 = vector.broadcast %cst_18 : f32 to vector<1x4096xf32>
    %54 = arith.subf %53, %52 : vector<1x4096xf32>
    %55 = arith.mulf %50, %54 : vector<1x4096xf32>
    %cst_19 = arith.constant 0.373176336 : f32
    %56 = vector.broadcast %cst_19 : f32 to vector<1x4096xf32>
    %57 = arith.mulf %56, %11 : vector<1x4096xf32>
    %cst_20 = arith.constant 5.000000e+00 : f32
    %58 = vector.broadcast %cst_20 : f32 to vector<1x4096xf32>
    %59 = arith.mulf %58, %14 : vector<1x4096xf32>
    %cst_21 = arith.constant 3.000000e+00 : f32
    %60 = vector.broadcast %cst_21 : f32 to vector<1x4096xf32>
    %61 = arith.subf %59, %60 : vector<1x4096xf32>
    %62 = arith.mulf %57, %61 : vector<1x4096xf32>
    %cst_22 = arith.constant 0.457045794 : f32
    %63 = vector.broadcast %cst_22 : f32 to vector<1x4096xf32>
    %64 = arith.mulf %63, %9 : vector<1x4096xf32>
    %cst_23 = arith.constant 5.000000e+00 : f32
    %65 = vector.broadcast %cst_23 : f32 to vector<1x4096xf32>
    %66 = arith.mulf %65, %14 : vector<1x4096xf32>
    %cst_24 = arith.constant 1.000000e+00 : f32
    %67 = vector.broadcast %cst_24 : f32 to vector<1x4096xf32>
    %68 = arith.subf %67, %66 : vector<1x4096xf32>
    %69 = arith.mulf %64, %68 : vector<1x4096xf32>
    %cst_25 = arith.constant 1.44530571 : f32
    %70 = vector.broadcast %cst_25 : f32 to vector<1x4096xf32>
    %71 = arith.mulf %70, %11 : vector<1x4096xf32>
    %72 = arith.subf %12, %13 : vector<1x4096xf32>
    %73 = arith.mulf %71, %72 : vector<1x4096xf32>
    %cst_26 = arith.constant 0.590043604 : f32
    %74 = vector.broadcast %cst_26 : f32 to vector<1x4096xf32>
    %75 = arith.mulf %74, %9 : vector<1x4096xf32>
    %cst_27 = arith.constant 0.000000e+00 : f32
    %76 = vector.broadcast %cst_27 : f32 to vector<1x4096xf32>
    %77 = arith.subf %76, %12 : vector<1x4096xf32>
    %cst_28 = arith.constant 3.000000e+00 : f32
    %78 = vector.broadcast %cst_28 : f32 to vector<1x4096xf32>
    %79 = arith.mulf %78, %13 : vector<1x4096xf32>
    %80 = arith.addf %77, %79 : vector<1x4096xf32>
    %81 = arith.mulf %75, %80 : vector<1x4096xf32>
    %82 = tpu.concatenate %20, %22, %24, %26, %28, %30, %34, %36, %39, %45, %48, %55, %62, %69, %73, %81 in 0 : vector<1x4096xf32>, vector<1x4096xf32>, vector<1x4096xf32>, vector<1x4096xf32>, vector<1x4096xf32>, vector<1x4096xf32>, vector<1x4096xf32>, vector<1x4096xf32>, vector<1x4096xf32>, vector<1x4096xf32>, vector<1x4096xf32>, vector<1x4096xf32>, vector<1x4096xf32>, vector<1x4096xf32>, vector<1x4096xf32>, vector<1x4096xf32> -> vector<16x4096xf32>
    %c0_29 = arith.constant 0 : index
    %c0_30 = arith.constant 0 : index
    %83 = vector.load %arg3[%c0_29, %c0_30] : memref<64x32xf32, #tpu.memory_space<vmem>>, vector<64x32xf32>
    %c0_31 = arith.constant 0 : index
    %c0_32 = arith.constant 0 : index
    %84 = vector.load %arg1[%c0_31, %c0_32] : memref<32x4096xf32, #tpu.memory_space<vmem>>, vector<32x4096xf32>
    %cst_33 = arith.constant dense<0.000000e+00> : vector<64x4096xf32>
    %85 = tpu.matmul %83, %84, %cst_33 {dimension_numbers = #tpu.dot_dimension_numbers<[1], [0], [0], [1], [0, 0, 1, 1], [], []>} : vector<64x32xf32>, vector<32x4096xf32>, vector<64x4096xf32> -> vector<64x4096xf32>
    %cst_34 = arith.constant 0.000000e+00 : f32
    %86 = vector.broadcast %cst_34 : f32 to vector<64x4096xf32>
    %87 = arith.maximumf %85, %86 : vector<64x4096xf32>
    %c0_35 = arith.constant 0 : index
    %c0_36 = arith.constant 0 : index
    %88 = vector.load %arg4[%c0_35, %c0_36] : memref<65x16xf32, #tpu.memory_space<vmem>>, vector<65x16xf32>
    %cst_37 = arith.constant dense<0.000000e+00> : vector<65x4096xf32>
    %89 = tpu.matmul %88, %82, %cst_37 {dimension_numbers = #tpu.dot_dimension_numbers<[1], [0], [0], [1], [0, 0, 1, 1], [], []>} : vector<65x16xf32>, vector<16x4096xf32>, vector<65x4096xf32> -> vector<65x4096xf32>
    %c0_38 = arith.constant 0 : index
    %c0_39 = arith.constant 0 : index
    %90 = vector.load %arg5[%c0_38, %c0_39] : memref<65x64xf32, #tpu.memory_space<vmem>>, vector<65x64xf32>
    %cst_40 = arith.constant dense<0.000000e+00> : vector<65x4096xf32>
    %91 = tpu.matmul %90, %87, %cst_40 {dimension_numbers = #tpu.dot_dimension_numbers<[1], [0], [0], [1], [0, 0, 1, 1], [], []>} : vector<65x64xf32>, vector<64x4096xf32>, vector<65x4096xf32> -> vector<65x4096xf32>
    %92 = arith.addf %89, %91 : vector<65x4096xf32>
    %93 = vector.extract_strided_slice %92 {offsets = [64, 0], sizes = [1, 4096], strides = [1, 1]} : vector<65x4096xf32> to vector<1x4096xf32>
    %94 = math.exp %93 : vector<1x4096xf32>
    %95 = vector.extract_strided_slice %92 {offsets = [0, 0], sizes = [64, 4096], strides = [1, 1]} : vector<65x4096xf32> to vector<64x4096xf32>
    %cst_41 = arith.constant 0.000000e+00 : f32
    %96 = vector.broadcast %cst_41 : f32 to vector<64x4096xf32>
    %97 = arith.maximumf %95, %96 : vector<64x4096xf32>
    %c0_42 = arith.constant 0 : index
    %c0_43 = arith.constant 0 : index
    %98 = vector.load %arg6[%c0_42, %c0_43] : memref<64x64xf32, #tpu.memory_space<vmem>>, vector<64x64xf32>
    %cst_44 = arith.constant dense<0.000000e+00> : vector<64x4096xf32>
    %99 = tpu.matmul %98, %97, %cst_44 {dimension_numbers = #tpu.dot_dimension_numbers<[1], [0], [0], [1], [0, 0, 1, 1], [], []>} : vector<64x64xf32>, vector<64x4096xf32>, vector<64x4096xf32> -> vector<64x4096xf32>
    %cst_45 = arith.constant 0.000000e+00 : f32
    %100 = vector.broadcast %cst_45 : f32 to vector<64x4096xf32>
    %101 = arith.maximumf %99, %100 : vector<64x4096xf32>
    %c0_46 = arith.constant 0 : index
    %c0_47 = arith.constant 0 : index
    %102 = vector.load %arg7[%c0_46, %c0_47] : memref<3x64xf32, #tpu.memory_space<vmem>>, vector<3x64xf32>
    %cst_48 = arith.constant dense<0.000000e+00> : vector<3x4096xf32>
    %103 = tpu.matmul %102, %101, %cst_48 {dimension_numbers = #tpu.dot_dimension_numbers<[1], [0], [0], [1], [0, 0, 1, 1], [], []>} : vector<3x64xf32>, vector<64x4096xf32>, vector<3x4096xf32> -> vector<3x4096xf32>
    %104 = arith.negf %103 : vector<3x4096xf32>
    %105 = math.exp %104 : vector<3x4096xf32>
    %cst_49 = arith.constant 1.000000e+00 : f32
    %106 = vector.broadcast %cst_49 : f32 to vector<3x4096xf32>
    %107 = arith.addf %106, %105 : vector<3x4096xf32>
    %108 = arith.divf %106, %107 : vector<3x4096xf32>
    %109 = tpu.concatenate %108, %94 in 0 : vector<3x4096xf32>, vector<1x4096xf32> -> vector<4x4096xf32>
    %c0_50 = arith.constant 0 : index
    %c0_51 = arith.constant 0 : index
    %110 = vector.load %arg8[%c0_50, %c0_51] : memref<4x4096xf32, #tpu.memory_space<vmem>>, vector<4x4096xf32>
    tpu.vector_store %arg8[%c0_50, %c0_51], %109 {strides = array<i32>} : memref<4x4096xf32, #tpu.memory_space<vmem>>, vector<4x4096xf32>,
    return
  }
  func.func @transform_0(%arg0: i32) -> (i32, i32) {
    %c0_i32 = arith.constant 0 : i32
    %c0_i32_0 = arith.constant 0 : i32
    return %c0_i32, %arg0 : i32, i32
  }
  func.func @transform_1(%arg0: i32) -> (i32, i32) {
    %c0_i32 = arith.constant 0 : i32
    %c0_i32_0 = arith.constant 0 : i32
    return %c0_i32, %arg0 : i32, i32
  }
  func.func @transform_2(%arg0: i32) -> (i32, i32) {
    %c0_i32 = arith.constant 0 : i32
    %c0_i32_0 = arith.constant 0 : i32
    %c0_i32_1 = arith.constant 0 : i32
    return %c0_i32, %c0_i32_0 : i32, i32
  }
  func.func @transform_3(%arg0: i32) -> (i32, i32) {
    %c0_i32 = arith.constant 0 : i32
    %c0_i32_0 = arith.constant 0 : i32
    %c0_i32_1 = arith.constant 0 : i32
    return %c0_i32, %c0_i32_0 : i32, i32
  }
  func.func @transform_4(%arg0: i32) -> (i32, i32) {
    %c0_i32 = arith.constant 0 : i32
    %c0_i32_0 = arith.constant 0 : i32
    %c0_i32_1 = arith.constant 0 : i32
    return %c0_i32, %c0_i32_0 : i32, i32
  }
  func.func @transform_5(%arg0: i32) -> (i32, i32) {
    %c0_i32 = arith.constant 0 : i32
    %c0_i32_0 = arith.constant 0 : i32
    %c0_i32_1 = arith.constant 0 : i32
    return %c0_i32, %c0_i32_0 : i32, i32
  }
  func.func @transform_6(%arg0: i32) -> (i32, i32) {
    %c0_i32 = arith.constant 0 : i32
    %c0_i32_0 = arith.constant 0 : i32
    %c0_i32_1 = arith.constant 0 : i32
    return %c0_i32, %c0_i32_0 : i32, i32
  }
  func.func @transform_7(%arg0: i32) -> (i32, i32) {
    %c0_i32 = arith.constant 0 : i32
    %c0_i32_0 = arith.constant 0 : i32
    return %c0_i32, %arg0 : i32, i32
  }
}

</mosaic_0001>

<bundles_post_ra>
// kernel: ngp_forward.1
= control target key start
LH: loop header
LB: loop body
LE: loop exit
PB: predicated region body
PF: predicated region fallthrough
CT: control target
= control target key end

     0   :  { %v20112_v3 = vmov 0.0   ;;  %vm3288_vm0 = vcmask 261120   ;;  %vm5395_vm1 = vcmask 523264   ;;  %vm2697_vm2 = vcmask 1040384   ;;  %s20104_s0 = inlined_call_operand.vmem [shape: f32[32,4096], index: 0, kind: input, shape index: {}]   ;;  %s20105_s2 = inlined_call_operand.vmem [shape: f32[64,32], index: 2, kind: input, shape index: {}]   ;;  %s20106_s4 = inlined_call_operand.vmem [shape: f32[65,64], index: 4, kind: input, shape index: {}]   ;;  %s20107_s1 = inlined_call_operand.vmem [shape: f32[3,4096], index: 1, kind: input, shape index: {}]   ;;  %s20108_s3 = inlined_call_operand.vmem [shape: f32[65,16], index: 3, kind: input, shape index: {}]   ;;  %s20109_s5 = inlined_call_operand.vmem [shape: f32[64,64], index: 5, kind: input, shape index: {}]   ;;  %s20110_s6 = inlined_call_operand.vmem [shape: f32[3,64], index: 6, kind: input, shape index: {}]   ;;  %s20111_s7 = inlined_call_operand.vmem [shape: f32[4,4096], index: 7, kind: output, shape index: {}]  }
   0x1   :  { %v3161_v0 = vld [vmem:[%s20104_s0 + $0x8] sm:$0xff]  ;;  %v3163_v2 = vld [vmem:[%s20104_s0 + $0x18] sm:$0xff]  ;;  %3377 = vmatprep.mubr.f32.mxu0 %v20112_v3  ;;  %3490 = vmatprep.mubr.f32.mxu1 %v20112_v3  ;;  %v3160_v6 = vld [vmem:[%s20104_s0] sm:$0xff]  ;;  %vm2730_vm3 = vcmask 1041408   ;;  %vm2763_vm4 = vcmask 1042432   ;;  %vm2796_vm5 = vcmask 1043456  }
   0x2   :  { %v3193_v1 = vld [vmem:[%s20104_s0 + $0x108] sm:$0xff]  ;;  %v3195_v5 = vld [vmem:[%s20104_s0 + $0x118] sm:$0xff]  ;;  %v3192_v7 = vld [vmem:[%s20104_s0 + $0x100] sm:$0xff]  ;;  %vm2829_vm6 = vcmask 1044480   ;;  %vm2862_vm7 = vcmask 1045504   ;;  %vm2895_vm8 = vcmask 1046528  }
   0x3   :  { %v13830_v4 = vpack.c.bf16 %v3193_v1, %v3161_v0  ;;  %v13838_v8 = vpack.c.bf16 %v3195_v5, %v3163_v2  ;;  %v13832_v9 = vpack.c.bf16 %v3192_v7, %v3160_v6  ;;  %v3162_v10 = vld [vmem:[%s20104_s0 + $0x10] sm:$0xff]  ;;  %v3225_v12 = vld [vmem:[%s20104_s0 + $0x208] sm:$0xff]  ;;  %v3227_v15 = vld [vmem:[%s20104_s0 + $0x218] sm:$0xff]  ;;  %vm7327_vm9 = vcmask 130048  }
   0x4   :  { %v3194_v11 = vld [vmem:[%s20104_s0 + $0x110] sm:$0xff]  ;;  %v3257_v14 = vld [vmem:[%s20104_s0 + $0x308] sm:$0xff]  ;;  %v3259_v16 = vld [vmem:[%s20104_s0 + $0x318] sm:$0xff] }
   0x5   :  { %13831 = vmatprep.subr.bf16.mxu0 %v13830_v4  ;;  %v13840_v13 = vpack.c.bf16 %v3194_v11, %v3162_v10  ;;  %13839 = vmatprep.subr.bf16.mxu1 %v13838_v8  ;;  %v13834_v17 = vpack.c.bf16 %v3257_v14, %v3225_v12  ;;  %v13842_v18 = vpack.c.bf16 %v3259_v16, %v3227_v15  ;;  %v3224_v19 = vld [vmem:[%s20104_s0 + $0x200] sm:$0xff]  ;;  %v3226_v21 = vld [vmem:[%s20104_s0 + $0x210] sm:$0xff]  ;;  %v3165_v24 = vld [vmem:[%s20104_s0 + $0x28] sm:$0xff] }
   0x6   :  { %13833 = vmatpush1.bf16.msra.mxu0 %v13832_v9  ;;  %v3256_v20 = vld [vmem:[%s20104_s0 + $0x300] sm:$0xff]  ;;  %v3258_v23 = vld [vmem:[%s20104_s0 + $0x310] sm:$0xff]  ;;  %v3197_v26 = vld [vmem:[%s20104_s0 + $0x128] sm:$0xff] }
   0x7   :  { %13841 = vmatpush1.bf16.msra.mxu1 %v13840_v13  ;;  %v13836_v22 = vpack.c.bf16 %v3256_v20, %v3224_v19  ;;  %13835 = vmatprep.subr.bf16.mxu0 %v13834_v17  ;;  %v13844_v25 = vpack.c.bf16 %v3258_v23, %v3226_v21  ;;  %v3167_v27 = vld [vmem:[%s20104_s0 + $0x38] sm:$0xff]  ;;  %v13846_v29 = vpack.c.bf16 %v3197_v26, %v3165_v24  ;;  %v3164_v31 = vld [vmem:[%s20104_s0 + $0x20] sm:$0xff]  ;;  %v3166_v33 = vld [vmem:[%s20104_s0 + $0x30] sm:$0xff] }
   0x8   :  { %13843 = vmatprep.subr.bf16.mxu1 %v13842_v18  ;;  %v3199_v28 = vld [vmem:[%s20104_s0 + $0x138] sm:$0xff]  ;;  %v3196_v32 = vld [vmem:[%s20104_s0 + $0x120] sm:$0xff]  ;;  %v3198_v36 = vld [vmem:[%s20104_s0 + $0x130] sm:$0xff] }
   0x9   :  { %v13854_v30 = vpack.c.bf16 %v3199_v28, %v3167_v27  ;;  %v15438_v34 = vld [vmem:[%s20105_s2] sm:$0xff]  ;;  %v13848_v35 = vpack.c.bf16 %v3196_v32, %v3164_v31  ;;  %v13856_v37 = vpack.c.bf16 %v3198_v36, %v3166_v33  ;;  %v3229_v38 = vld [vmem:[%s20104_s0 + $0x228] sm:$0xff]  ;;  %v3231_v40 = vld [vmem:[%s20104_s0 + $0x238] sm:$0xff] }
   0xa   :  { %13837 = vmatpush1.bf16.msra.mxu0 %v13836_v22  ;;  %v3261_v39 = vld [vmem:[%s20104_s0 + $0x328] sm:$0xff]  ;;  %v3263_v41 = vld [vmem:[%s20104_s0 + $0x338] sm:$0xff]  ;;  %v3228_v44 = vld [vmem:[%s20104_s0 + $0x220] sm:$0xff] }
   0xb   :  { %13845 = vmatpush1.bf16.msra.mxu1 %v13844_v25  ;;  %13847 = vmatprep.subr.bf16.mxu0 %v13846_v29  ;;  %v13850_v42 = vpack.c.bf16 %v3261_v39, %v3229_v38  ;;  %v13858_v43 = vpack.c.bf16 %v3263_v41, %v3231_v40  ;;  %v3260_v45 = vld [vmem:[%s20104_s0 + $0x320] sm:$0xff]  ;;  %v3230_v46 = vld [vmem:[%s20104_s0 + $0x230] sm:$0xff]  ;;  %v15471_v47 = vld [vmem:[%s20105_s2 + $0x8] sm:$0xff] }
   0xc   :  { %13855 = vmatprep.subr.bf16.mxu1 %v13854_v30  ;;  %v3262_v48 = vld [vmem:[%s20104_s0 + $0x330] sm:$0xff]  ;;  %v13852_v49 = vpack.c.bf16 %v3260_v45, %v3228_v44  ;;  %v3169_v50 = vld [vmem:[%s20104_s0 + $0x48] sm:$0xff]  ;;  %v3171_v54 = vld [vmem:[%s20104_s0 + $0x58] sm:$0xff] }
   0xd   :  { %13238 = vmatmul.mubr.msk.f32.vlgmr.msra.gmra.mrb[0].mxu0 %vm3288_vm0, %v15438_v34  ;;  %v3201_v51 = vld [vmem:[%s20104_s0 + $0x148] sm:$0xff]  ;;  %v13860_v52 = vpack.c.bf16 %v3262_v48, %v3230_v46  ;;  %v3203_v55 = vld [vmem:[%s20104_s0 + $0x158] sm:$0xff]  ;;  %v15498_v57 = vld [vmem:[%s20105_s2 + $0x10] sm:$0xff] }
   0xe   :  { %13246 = vmatmul.mubr.msk.f32.vlgmr.msra.gmra.mrb[0].mxu1 %vm3288_vm0, %v15438_v34  ;;  %13849 = vmatpush1.bf16.msra.mxu0 %v13848_v35  ;;  %v13862_v53 = vpack.c.bf16 %v3201_v51, %v3169_v50  ;;  %v13870_v56 = vpack.c.bf16 %v3203_v55, %v3171_v54  ;;  %v15509_v58 = vld [vmem:[%s20105_s2 + $0x18] sm:$0xff]  ;;  %v15520_v59 = vld [vmem:[%s20105_s2 + $0x20] sm:$0xff]  ;;  %v15531_v60 = vld [vmem:[%s20105_s2 + $0x28] sm:$0xff] }
   0xf   :  { %13857 = vmatpush1.bf16.msra.mxu1 %v13856_v37  ;;  %3383 = vmatprep.mubr.f32.mxu0 %v20112_v3  ;;  %v15542_v61 = vld [vmem:[%s20105_s2 + $0x30] sm:$0xff]  ;;  %v15553_v62 = vld [vmem:[%s20105_s2 + $0x38] sm:$0xff]  ;;  %v3168_v63 = vld [vmem:[%s20104_s0 + $0x40] sm:$0xff] }
  0x10   :  { %3496 = vmatprep.mubr.f32.mxu1 %v20112_v3  ;;  %13851 = vmatprep.subr.bf16.mxu0 %v13850_v42  ;;  %v3200_v0 = vld [vmem:[%s20104_s0 + $0x140] sm:$0xff]  ;;  %v3170_v1 = vld [vmem:[%s20104_s0 + $0x50] sm:$0xff]  ;;  %v3233_v4 = vld [vmem:[%s20104_s0 + $0x248] sm:$0xff] }
  0x11   :  { %13239 = vmatmul.mubr.msk.f32.gmra.mrb[2].mxu0 %vm3288_vm0, %v15471_v47  ;;  %13859 = vmatprep.subr.bf16.mxu1 %v13858_v43  ;;  %v3202_v2 = vld [vmem:[%s20104_s0 + $0x150] sm:$0xff]  ;;  %v3265_v5 = vld [vmem:[%s20104_s0 + $0x348] sm:$0xff]  ;;  %v13864_v6 = vpack.c.bf16 %v3200_v0, %v3168_v63  ;;  %v3235_v7 = vld [vmem:[%s20104_s0 + $0x258] sm:$0xff] }
  0x12   :  { %13247 = vmatmul.mubr.msk.f32.gmra.mrb[2].mxu1 %vm3288_vm0, %v15471_v47  ;;  %3389 = vmatprep.mubr.f32.mxu0 %v20112_v3  ;;  %v3267_v8 = vld [vmem:[%s20104_s0 + $0x358] sm:$0xff]  ;;  %v13872_v9 = vpack.c.bf16 %v3202_v2, %v3170_v1  ;;  %v13866_v10 = vpack.c.bf16 %v3265_v5, %v3233_v4  ;;  %v3232_v11 = vld [vmem:[%s20104_s0 + $0x240] sm:$0xff]  ;;  %v3234_v13 = vld [vmem:[%s20104_s0 + $0x250] sm:$0xff] }
  0x13   :  { %3502 = vmatprep.mubr.f32.mxu1 %v20112_v3  ;;  %13853 = vmatpush1.bf16.msra.mxu0 %v13852_v49  ;;  %v3264_v12 = vld [vmem:[%s20104_s0 + $0x340] sm:$0xff]  ;;  %v13874_v14 = vpack.c.bf16 %v3267_v8, %v3235_v7  ;;  %v3266_v15 = vld [vmem:[%s20104_s0 + $0x350] sm:$0xff]  ;;  %v3173_v16 = vld [vmem:[%s20104_s0 + $0x68] sm:$0xff] }
  0x14   :  { %13861 = vmatpush1.bf16.msra.mxu1 %v13860_v52  ;;  %13863 = vmatprep.subr.bf16.mxu0 %v13862_v53  ;;  %v3205_v17 = vld [vmem:[%s20104_s0 + $0x168] sm:$0xff]  ;;  %v3175_v18 = vld [vmem:[%s20104_s0 + $0x78] sm:$0xff]  ;;  %v13868_v20 = vpack.c.bf16 %v3264_v12, %v3232_v11  ;;  %v13876_v21 = vpack.c.bf16 %v3266_v15, %v3234_v13  ;;  %v3172_v24 = vld [vmem:[%s20104_s0 + $0x60] sm:$0xff] }
  0x15   :  { %13240 = vmatmul.mubr.msk.f32.gmra.mrb[4].mxu0 %vm3288_vm0, %v15498_v57  ;;  %13871 = vmatprep.subr.bf16.mxu1 %v13870_v56  ;;  %v3207_v19 = vld [vmem:[%s20104_s0 + $0x178] sm:$0xff]  ;;  %v13878_v22 = vpack.c.bf16 %v3205_v17, %v3173_v16  ;;  %v3204_v25 = vld [vmem:[%s20104_s0 + $0x160] sm:$0xff]  ;;  %v3174_v26 = vld [vmem:[%s20104_s0 + $0x70] sm:$0xff] }
  0x16   :  { %13248 = vmatmul.mubr.msk.f32.gmra.mrb[4].mxu1 %vm3288_vm0, %v15498_v57  ;;  %3395 = vmatprep.mubr.f32.mxu0 %v20112_v3  ;;  %v13886_v23 = vpack.c.bf16 %v3207_v19, %v3175_v18  ;;  %v3206_v27 = vld [vmem:[%s20104_s0 + $0x170] sm:$0xff]  ;;  %v3237_v28 = vld [vmem:[%s20104_s0 + $0x268] sm:$0xff]  ;;  %v13880_v30 = vpack.c.bf16 %v3204_v25, %v3172_v24  ;;  %v3239_v31 = vld [vmem:[%s20104_s0 + $0x278] sm:$0xff] }
  0x17   :  { %3508 = vmatprep.mubr.f32.mxu1 %v20112_v3  ;;  %v3269_v29 = vld [vmem:[%s20104_s0 + $0x368] sm:$0xff]  ;;  %v3271_v32 = vld [vmem:[%s20104_s0 + $0x378] sm:$0xff]  ;;  %v13888_v33 = vpack.c.bf16 %v3206_v27, %v3174_v26  ;;  %v3236_v36 = vld [vmem:[%s20104_s0 + $0x260] sm:$0xff] }
  0x18   :  { %v13882_v35 = vpack.c.bf16 %v3269_v29, %v3237_v28  ;;  %v3268_v37 = vld [vmem:[%s20104_s0 + $0x360] sm:$0xff]  ;;  %v3238_v38 = vld [vmem:[%s20104_s0 + $0x270] sm:$0xff]  ;;  %v13890_v39 = vpack.c.bf16 %v3271_v32, %v3239_v31  ;;  %v3177_v41 = vld [vmem:[%s20104_s0 + $0x88] sm:$0xff] }
  0x19   :  { %13241 = vmatmul.mubr.msk.f32.gmra.mrb[6].mxu0 %vm3288_vm0, %v15509_v58  ;;  %v3270_v40 = vld [vmem:[%s20104_s0 + $0x370] sm:$0xff]  ;;  %v3209_v42 = vld [vmem:[%s20104_s0 + $0x188] sm:$0xff]  ;;  %v3179_v43 = vld [vmem:[%s20104_s0 + $0x98] sm:$0xff]  ;;  %v13884_v45 = vpack.c.bf16 %v3268_v37, %v3236_v36 }
  0x1a   :  { %13249 = vmatmul.mubr.msk.f32.gmra.mrb[6].mxu1 %vm3288_vm0, %v15509_v58  ;;  %3401 = vmatprep.mubr.f32.mxu0 %v20112_v3  ;;  %v3211_v44 = vld [vmem:[%s20104_s0 + $0x198] sm:$0xff]  ;;  %v13892_v46 = vpack.c.bf16 %v3270_v40, %v3238_v38  ;;  %v13894_v48 = vpack.c.bf16 %v3209_v42, %v3177_v41  ;;  %v3176_v50 = vld [vmem:[%s20104_s0 + $0x80] sm:$0xff]  ;;  %v3178_v52 = vld [vmem:[%s20104_s0 + $0x90] sm:$0xff] }
  0x1b   :  { %3514 = vmatprep.mubr.f32.mxu1 %v20112_v3  ;;  %v13902_v49 = vpack.c.bf16 %v3211_v44, %v3179_v43  ;;  %v3208_v51 = vld [vmem:[%s20104_s0 + $0x180] sm:$0xff]  ;;  %v3210_v53 = vld [vmem:[%s20104_s0 + $0x190] sm:$0xff]  ;;  %v3241_v54 = vld [vmem:[%s20104_s0 + $0x288] sm:$0xff] }
  0x1c   :  { %v3273_v55 = vld [vmem:[%s20104_s0 + $0x388] sm:$0xff]  ;;  %v13896_v56 = vpack.c.bf16 %v3208_v51, %v3176_v50  ;;  %v3243_v63 = vld [vmem:[%s20104_s0 + $0x298] sm:$0xff]  ;;  %v13904_v1 = vpack.c.bf16 %v3210_v53, %v3178_v52  ;;  %v3240_v4 = vld [vmem:[%s20104_s0 + $0x280] sm:$0xff] }
  0x1d   :  { %13242 = vmatmul.mubr.msk.f32.gmra.mrb[8].mxu0 %vm3288_vm0, %v15520_v59  ;;  %v3275_v0 = vld [vmem:[%s20104_s0 + $0x398] sm:$0xff]  ;;  %v13898_v2 = vpack.c.bf16 %v3273_v55, %v3241_v54  ;;  %v3272_v5 = vld [vmem:[%s20104_s0 + $0x380] sm:$0xff]  ;;  %v3274_v8 = vld [vmem:[%s20104_s0 + $0x390] sm:$0xff] }
  0x1e   :  { %13250 = vmatmul.mubr.msk.f32.gmra.mrb[8].mxu1 %vm3288_vm0, %v15520_v59  ;;  %3407 = vmatprep.mubr.f32.mxu0 %v20112_v3  ;;  %v13906_v7 = vpack.c.bf16 %v3275_v0, %v3243_v63  ;;  %v3183_v11 = vld [vmem:[%s20104_s0 + $0xb8] sm:$0xff]  ;;  %v13900_v13 = vpack.c.bf16 %v3272_v5, %v3240_v4  ;;  %v3180_v17 = vld [vmem:[%s20104_s0 + $0xa0] sm:$0xff]  ;;  %v3182_v19 = vld [vmem:[%s20104_s0 + $0xb0] sm:$0xff] }
  0x1f   :  { %3520 = vmatprep.mubr.f32.mxu1 %v20112_v3  ;;  %v3215_v12 = vld [vmem:[%s20104_s0 + $0x1b8] sm:$0xff]  ;;  %v3212_v18 = vld [vmem:[%s20104_s0 + $0x1a0] sm:$0xff]  ;;  %v3278_v32 = vld [vmem:[%s20104_s0 + $0x3b0] sm:$0xff] }
  0x20   :  { %v13918_v16 = vpack.c.bf16 %v3215_v12, %v3183_v11  ;;  %v3247_v24 = vld [vmem:[%s20104_s0 + $0x2b8] sm:$0xff]  ;;  %v3244_v28 = vld [vmem:[%s20104_s0 + $0x2a0] sm:$0xff]  ;;  %v3186_v44 = vld [vmem:[%s20104_s0 + $0xd0] sm:$0xff] }
  0x21   :  { %13243 = vmatmul.mubr.msk.f32.gmra.mrb[10].mxu0 %vm3288_vm0, %v15531_v60  ;;  %v3279_v25 = vld [vmem:[%s20104_s0 + $0x3b8] sm:$0xff]  ;;  %v3276_v29 = vld [vmem:[%s20104_s0 + $0x3a0] sm:$0xff]  ;;  %v3282_v0 = vld [vmem:[%s20104_s0 + $0x3d0] sm:$0xff] }
  0x22   :  { %13251 = vmatmul.mubr.msk.f32.gmra.mrb[10].mxu1 %vm3288_vm0, %v15531_v60  ;;  %3413 = vmatprep.mubr.f32.mxu0 %v20112_v3  ;;  %v13922_v31 = vpack.c.bf16 %v3279_v25, %v3247_v24  ;;  %v3187_v36 = vld [vmem:[%s20104_s0 + $0xd8] sm:$0xff]  ;;  %v13916_v38 = vpack.c.bf16 %v3276_v29, %v3244_v28  ;;  %v3184_v42 = vld [vmem:[%s20104_s0 + $0xc0] sm:$0xff]  ;;  %v3190_v12 = vld [vmem:[%s20104_s0 + $0xf0] sm:$0xff] }
  0x23   :  { %3526 = vmatprep.mubr.f32.mxu1 %v20112_v3  ;;  %v3219_v37 = vld [vmem:[%s20104_s0 + $0x1d8] sm:$0xff]  ;;  %v3216_v43 = vld [vmem:[%s20104_s0 + $0x1c0] sm:$0xff]  ;;  %v3254_v24 = vld [vmem:[%s20104_s0 + $0x2f0] sm:$0xff] }
  0x24   :  { %v13934_v41 = vpack.c.bf16 %v3219_v37, %v3187_v36  ;;  %v3251_v50 = vld [vmem:[%s20104_s0 + $0x2d8] sm:$0xff]  ;;  %v3248_v54 = vld [vmem:[%s20104_s0 + $0x2c0] sm:$0xff]  ;;  %v3286_v25 = vld [vmem:[%s20104_s0 + $0x3f0] sm:$0xff] }
  0x25   :  { %13244 = vmatmul.mubr.msk.f32.gmra.mrb[12].mxu0 %vm3288_vm0, %v15542_v61  ;;  %v3283_v51 = vld [vmem:[%s20104_s0 + $0x3d8] sm:$0xff]  ;;  %v3280_v55 = vld [vmem:[%s20104_s0 + $0x3c0] sm:$0xff] }
  0x26   :  { %13252 = vmatmul.mubr.msk.f32.gmra.mrb[12].mxu1 %vm3288_vm0, %v15542_v61  ;;  %3419 = vmatprep.mubr.f32.mxu0 %v20112_v3  ;;  %v13938_v63 = vpack.c.bf16 %v3283_v51, %v3251_v50  ;;  %v3191_v4 = vld [vmem:[%s20104_s0 + $0xf8] sm:$0xff]  ;;  %v3220_v11 = vld [vmem:[%s20104_s0 + $0x1e0] sm:$0xff] }
  0x27   :  { %3532 = vmatprep.mubr.f32.mxu1 %v20112_v3  ;;  %v3223_v5 = vld [vmem:[%s20104_s0 + $0x1f8] sm:$0xff] }
  0x29   :  { %13245 = vmatmul.mubr.msk.f32.gmra.mrb[14].mxu0 %vm3288_vm0, %v15553_v62 }
  0x2a   :  { %13253 = vmatmul.mubr.msk.f32.gmra.mrb[14].mxu1 %vm3288_vm0, %v15553_v62  ;;  %3603 = vmatprep.mubr.f32.mxu0 %v20112_v3 }
  0x2b   :  { %3716 = vmatprep.mubr.f32.mxu1 %v20112_v3 }
  0x2d   :  { %13254 = vmatmul.mubr.msk.f32.vlgmr.msra.gmra.mrb[16].mxu0 %vm3288_vm0, %v15438_v34 }
  0x2e   :  { %13262 = vmatmul.mubr.msk.f32.vlgmr.msra.gmra.mrb[16].mxu1 %vm3288_vm0, %v15438_v34  ;;  %13865 = vmatpush1.bf16.msra.mxu0 %v13864_v6  ;;  %v3242_v6 = vld [vmem:[%s20104_s0 + $0x290] sm:$0xff] }
  0x2f   :  { %13873 = vmatpush1.bf16.msra.mxu1 %v13872_v9  ;;  %3609 = vmatprep.mubr.f32.mxu0 %v20112_v3  ;;  %v3181_v9 = vld [vmem:[%s20104_s0 + $0xa8] sm:$0xff] }
  0x30   :  { %3722 = vmatprep.mubr.f32.mxu1 %v20112_v3  ;;  %13867 = vmatprep.subr.bf16.mxu0 %v13866_v10  ;;  %v3213_v10 = vld [vmem:[%s20104_s0 + $0x1a8] sm:$0xff] }
  0x31   :  { %13255 = vmatmul.mubr.msk.f32.gmra.mrb[18].mxu0 %vm3288_vm0, %v15471_v47  ;;  %13875 = vmatprep.subr.bf16.mxu1 %v13874_v14  ;;  %v13908_v14 = vpack.c.bf16 %v3274_v8, %v3242_v6  ;;  %v13910_v15 = vpack.c.bf16 %v3213_v10, %v3181_v9  ;;  %v13932_v6 = vpack.c.bf16 %v3280_v55, %v3248_v54  ;;  %v3188_v10 = vld [vmem:[%s20104_s0 + $0xe0] sm:$0xff] }
  0x32   :  { %13263 = vmatmul.mubr.msk.f32.gmra.mrb[18].mxu1 %vm3288_vm0, %v15471_v47  ;;  %3615 = vmatprep.mubr.f32.mxu0 %v20112_v3  ;;  %v13950_v9 = vpack.c.bf16 %v3223_v5, %v3191_v4 }
  0x33   :  { %3728 = vmatprep.mubr.f32.mxu1 %v20112_v3  ;;  %13869 = vmatpush1.bf16.msra.mxu0 %v13868_v20  ;;  %v3214_v20 = vld [vmem:[%s20104_s0 + $0x1b0] sm:$0xff] }
  0x34   :  { %13877 = vmatpush1.bf16.msra.mxu1 %v13876_v21  ;;  %13879 = vmatprep.subr.bf16.mxu0 %v13878_v22  ;;  %v3245_v21 = vld [vmem:[%s20104_s0 + $0x2a8] sm:$0xff]  ;;  %v13920_v26 = vpack.c.bf16 %v3214_v20, %v3182_v19 }
  0x35   :  { %13256 = vmatmul.mubr.msk.f32.gmra.mrb[20].mxu0 %vm3288_vm0, %v15498_v57  ;;  %13887 = vmatprep.subr.bf16.mxu1 %v13886_v23  ;;  %v3277_v22 = vld [vmem:[%s20104_s0 + $0x3a8] sm:$0xff]  ;;  %v13912_v23 = vpack.c.bf16 %v3212_v18, %v3180_v17  ;;  %v3255_v17 = vld [vmem:[%s20104_s0 + $0x2f8] sm:$0xff] }
  0x36   :  { %13264 = vmatmul.mubr.msk.f32.gmra.mrb[20].mxu1 %vm3288_vm0, %v15498_v57  ;;  %3621 = vmatprep.mubr.f32.mxu0 %v20112_v3  ;;  %v13914_v27 = vpack.c.bf16 %v3277_v22, %v3245_v21  ;;  %v3287_v18 = vld [vmem:[%s20104_s0 + $0x3f8] sm:$0xff]  ;;  %v3252_v21 = vld [vmem:[%s20104_s0 + $0x2e0] sm:$0xff] }
  0x37   :  { %3734 = vmatprep.mubr.f32.mxu1 %v20112_v3  ;;  %v3284_v22 = vld [vmem:[%s20104_s0 + $0x3e0] sm:$0xff] }
  0x39   :  { %13257 = vmatmul.mubr.msk.f32.gmra.mrb[22].mxu0 %vm3288_vm0, %v15509_v58 }
  0x3a   :  { %13265 = vmatmul.mubr.msk.f32.gmra.mrb[22].mxu1 %vm3288_vm0, %v15509_v58  ;;  %3627 = vmatprep.mubr.f32.mxu0 %v20112_v3 }
  0x3b   :  { %3740 = vmatprep.mubr.f32.mxu1 %v20112_v3 }
  0x3d   :  { %13258 = vmatmul.mubr.msk.f32.gmra.mrb[24].mxu0 %vm3288_vm0, %v15520_v59 }
  0x3e   :  { %13266 = vmatmul.mubr.msk.f32.gmra.mrb[24].mxu1 %vm3288_vm0, %v15520_v59  ;;  %3633 = vmatprep.mubr.f32.mxu0 %v20112_v3 }
  0x3f   :  { %3746 = vmatprep.mubr.f32.mxu1 %v20112_v3 }
  0x41   :  { %13259 = vmatmul.mubr.msk.f32.gmra.mrb[26].mxu0 %vm3288_vm0, %v15531_v60 }
  0x42   :  { %13267 = vmatmul.mubr.msk.f32.gmra.mrb[26].mxu1 %vm3288_vm0, %v15531_v60  ;;  %3639 = vmatprep.mubr.f32.mxu0 %v20112_v3 }
  0x43   :  { %3752 = vmatprep.mubr.f32.mxu1 %v20112_v3 }
  0x45   :  { %13260 = vmatmul.mubr.msk.f32.gmra.mrb[28].mxu0 %vm3288_vm0, %v15542_v61 }
  0x46   :  { %13268 = vmatmul.mubr.msk.f32.gmra.mrb[28].mxu1 %vm3288_vm0, %v15542_v61  ;;  %3645 = vmatprep.mubr.f32.mxu0 %v20112_v3 }
  0x47   :  { %3758 = vmatprep.mubr.f32.mxu1 %v20112_v3 }
  0x49   :  { %13261 = vmatmul.mubr.msk.f32.gmra.mrb[30].mxu0 %vm3288_vm0, %v15553_v62 }
  0x4a   :  { %13269 = vmatmul.mubr.msk.f32.gmra.mrb[30].mxu1 %vm3288_vm0, %v15553_v62  ;;  %3829 = vmatprep.mubr.f32.mxu0 %v20112_v3 }
  0x4b   :  { %3942 = vmatprep.mubr.f32.mxu1 %v20112_v3 }
  0x4d   :  { %13270 = vmatmul.mubr.msk.f32.vlgmr.msra.gmra.mrb[32].mxu0 %vm3288_vm0, %v15438_v34 }
  0x4e   :  { %13278 = vmatmul.mubr.msk.f32.vlgmr.msra.gmra.mrb[32].mxu1 %vm3288_vm0, %v15438_v34  ;;  %13881 = vmatpush1.bf16.msra.mxu0 %v13880_v30  ;;  %v3246_v30 = vld [vmem:[%s20104_s0 + $0x2b0] sm:$0xff] }
  0x4f   :  { %13889 = vmatpush1.bf16.msra.mxu1 %v13888_v33  ;;  %3835 = vmatprep.mubr.f32.mxu0 %v20112_v3  ;;  %v3185_v33 = vld [vmem:[%s20104_s0 + $0xc8] sm:$0xff] }
  0x50   :  { %3948 = vmatprep.mubr.f32.mxu1 %v20112_v3  ;;  %13883 = vmatprep.subr.bf16.mxu0 %v13882_v35  ;;  %v3217_v35 = vld [vmem:[%s20104_s0 + $0x1c8] sm:$0xff] }
  0x51   :  { %13271 = vmatmul.mubr.msk.f32.gmra.mrb[34].mxu0 %vm3288_vm0, %v15471_v47  ;;  %13891 = vmatprep.subr.bf16.mxu1 %v13890_v39  ;;  %v13924_v39 = vpack.c.bf16 %v3278_v32, %v3246_v30  ;;  %v13926_v40 = vpack.c.bf16 %v3217_v35, %v3185_v33 }
  0x52   :  { %13279 = vmatmul.mubr.msk.f32.gmra.mrb[34].mxu1 %vm3288_vm0, %v15471_v47  ;;  %3841 = vmatprep.mubr.f32.mxu0 %v20112_v3 }
  0x53   :  { %3954 = vmatprep.mubr.f32.mxu1 %v20112_v3  ;;  %13885 = vmatpush1.bf16.msra.mxu0 %v13884_v45  ;;  %v3218_v45 = vld [vmem:[%s20104_s0 + $0x1d0] sm:$0xff] }
  0x54   :  { %13893 = vmatpush1.bf16.msra.mxu1 %v13892_v46  ;;  %13895 = vmatprep.subr.bf16.mxu0 %v13894_v48  ;;  %v3249_v46 = vld [vmem:[%s20104_s0 + $0x2c8] sm:$0xff]  ;;  %v13936_v52 = vpack.c.bf16 %v3218_v45, %v3186_v44 }
  0x55   :  { %13272 = vmatmul.mubr.msk.f32.gmra.mrb[36].mxu0 %vm3288_vm0, %v15498_v57  ;;  %13903 = vmatprep.subr.bf16.mxu1 %v13902_v49  ;;  %v3281_v48 = vld [vmem:[%s20104_s0 + $0x3c8] sm:$0xff]  ;;  %v13928_v49 = vpack.c.bf16 %v3216_v43, %v3184_v42 }
  0x56   :  { %13280 = vmatmul.mubr.msk.f32.gmra.mrb[36].mxu1 %vm3288_vm0, %v15498_v57  ;;  %3847 = vmatprep.mubr.f32.mxu0 %v20112_v3  ;;  %v13930_v53 = vpack.c.bf16 %v3281_v48, %v3249_v46 }
  0x57   :  { %3960 = vmatprep.mubr.f32.mxu1 %v20112_v3 }
  0x59   :  { %13273 = vmatmul.mubr.msk.f32.gmra.mrb[38].mxu0 %vm3288_vm0, %v15509_v58 }
  0x5a   :  { %13281 = vmatmul.mubr.msk.f32.gmra.mrb[38].mxu1 %vm3288_vm0, %v15509_v58  ;;  %3853 = vmatprep.mubr.f32.mxu0 %v20112_v3 }
  0x5b   :  { %3966 = vmatprep.mubr.f32.mxu1 %v20112_v3 }
  0x5d   :  { %13274 = vmatmul.mubr.msk.f32.gmra.mrb[40].mxu0 %vm3288_vm0, %v15520_v59 }
  0x5e   :  { %13282 = vmatmul.mubr.msk.f32.gmra.mrb[40].mxu1 %vm3288_vm0, %v15520_v59  ;;  %3859 = vmatprep.mubr.f32.mxu0 %v20112_v3 }
  0x5f   :  { %3972 = vmatprep.mubr.f32.mxu1 %v20112_v3 }
  0x61   :  { %13275 = vmatmul.mubr.msk.f32.gmra.mrb[42].mxu0 %vm3288_vm0, %v15531_v60 }
  0x62   :  { %13283 = vmatmul.mubr.msk.f32.gmra.mrb[42].mxu1 %vm3288_vm0, %v15531_v60  ;;  %3865 = vmatprep.mubr.f32.mxu0 %v20112_v3 }
  0x63   :  { %3978 = vmatprep.mubr.f32.mxu1 %v20112_v3 }
  0x65   :  { %13276 = vmatmul.mubr.msk.f32.gmra.mrb[44].mxu0 %vm3288_vm0, %v15542_v61 }
  0x66   :  { %13284 = vmatmul.mubr.msk.f32.gmra.mrb[44].mxu1 %vm3288_vm0, %v15542_v61  ;;  %3871 = vmatprep.mubr.f32.mxu0 %v20112_v3 }
  0x67   :  { %3984 = vmatprep.mubr.f32.mxu1 %v20112_v3 }
  0x69   :  { %13277 = vmatmul.mubr.msk.f32.gmra.mrb[46].mxu0 %vm3288_vm0, %v15553_v62 }
  0x6a   :  { %13285 = vmatmul.mubr.msk.f32.gmra.mrb[46].mxu1 %vm3288_vm0, %v15553_v62  ;;  %4055 = vmatprep.mubr.f32.mxu0 %v20112_v3 }
  0x6b   :  { %4168 = vmatprep.mubr.f32.mxu1 %v20112_v3 }
  0x6d   :  { %13286 = vmatmul.mubr.msk.f32.vlgmr.msra.gmra.mrb[48].mxu0 %vm3288_vm0, %v15438_v34 }
  0x6e   :  { %13294 = vmatmul.mubr.msk.f32.vlgmr.msra.gmra.mrb[48].mxu1 %vm3288_vm0, %v15438_v34  ;;  %13897 = vmatpush1.bf16.msra.mxu0 %v13896_v56  ;;  %v3250_v56 = vld [vmem:[%s20104_s0 + $0x2d0] sm:$0xff] }
  0x6f   :  { %13905 = vmatpush1.bf16.msra.mxu1 %v13904_v1  ;;  %4061 = vmatprep.mubr.f32.mxu0 %v20112_v3  ;;  %v3189_v1 = vld [vmem:[%s20104_s0 + $0xe8] sm:$0xff] }
  0x70   :  { %4174 = vmatprep.mubr.f32.mxu1 %v20112_v3  ;;  %13899 = vmatprep.subr.bf16.mxu0 %v13898_v2  ;;  %v3221_v2 = vld [vmem:[%s20104_s0 + $0x1e8] sm:$0xff] }
  0x71   :  { %13287 = vmatmul.mubr.msk.f32.gmra.mrb[50].mxu0 %vm3288_vm0, %v15471_v47  ;;  %13907 = vmatprep.subr.bf16.mxu1 %v13906_v7  ;;  %v13940_v7 = vpack.c.bf16 %v3282_v0, %v3250_v56  ;;  %v13942_v8 = vpack.c.bf16 %v3221_v2, %v3189_v1 }
  0x72   :  { %13295 = vmatmul.mubr.msk.f32.gmra.mrb[50].mxu1 %vm3288_vm0, %v15471_v47  ;;  %4067 = vmatprep.mubr.f32.mxu0 %v20112_v3 }
  0x73   :  { %4180 = vmatprep.mubr.f32.mxu1 %v20112_v3  ;;  %13901 = vmatpush1.bf16.msra.mxu0 %v13900_v13  ;;  %v3222_v13 = vld [vmem:[%s20104_s0 + $0x1f0] sm:$0xff] }
  0x74   :  { %13909 = vmatpush1.bf16.msra.mxu1 %v13908_v14  ;;  %13911 = vmatprep.subr.bf16.mxu0 %v13910_v15  ;;  %v3253_v14 = vld [vmem:[%s20104_s0 + $0x2e8] sm:$0xff]  ;;  %v13952_v19 = vpack.c.bf16 %v3222_v13, %v3190_v12 }
  0x75   :  { %13288 = vmatmul.mubr.msk.f32.gmra.mrb[52].mxu0 %vm3288_vm0, %v15498_v57  ;;  %13919 = vmatprep.subr.bf16.mxu1 %v13918_v16  ;;  %v3285_v15 = vld [vmem:[%s20104_s0 + $0x3e8] sm:$0xff]  ;;  %v13944_v16 = vpack.c.bf16 %v3220_v11, %v3188_v10 }
  0x76   :  { %13296 = vmatmul.mubr.msk.f32.gmra.mrb[52].mxu1 %vm3288_vm0, %v15498_v57  ;;  %4073 = vmatprep.mubr.f32.mxu0 %v20112_v3  ;;  %v13946_v20 = vpack.c.bf16 %v3285_v15, %v3253_v14 }
  0x77   :  { %4186 = vmatprep.mubr.f32.mxu1 %v20112_v3 }
  0x79   :  { %13289 = vmatmul.mubr.msk.f32.gmra.mrb[54].mxu0 %vm3288_vm0, %v15509_v58 }
  0x7a   :  { %13297 = vmatmul.mubr.msk.f32.gmra.mrb[54].mxu1 %vm3288_vm0, %v15509_v58  ;;  %4079 = vmatprep.mubr.f32.mxu0 %v20112_v3 }
  0x7b   :  { %4192 = vmatprep.mubr.f32.mxu1 %v20112_v3 }
  0x7d   :  { %13290 = vmatmul.mubr.msk.f32.gmra.mrb[56].mxu0 %vm3288_vm0, %v15520_v59 }
  0x7e   :  { %13298 = vmatmul.mubr.msk.f32.gmra.mrb[56].mxu1 %vm3288_vm0, %v15520_v59  ;;  %4085 = vmatprep.mubr.f32.mxu0 %v20112_v3 }
  0x7f   :  { %4198 = vmatprep.mubr.f32.mxu1 %v20112_v3 }
  0x81   :  { %13291 = vmatmul.mubr.msk.f32.gmra.mrb[58].mxu0 %vm3288_vm0, %v15531_v60 }
  0x82   :  { %13299 = vmatmul.mubr.msk.f32.gmra.mrb[58].mxu1 %vm3288_vm0, %v15531_v60  ;;  %4091 = vmatprep.mubr.f32.mxu0 %v20112_v3 }
  0x83   :  { %4204 = vmatprep.mubr.f32.mxu1 %v20112_v3 }
  0x85   :  { %13292 = vmatmul.mubr.msk.f32.gmra.mrb[60].mxu0 %vm3288_vm0, %v15542_v61 }
  0x86   :  { %13300 = vmatmul.mubr.msk.f32.gmra.mrb[60].mxu1 %vm3288_vm0, %v15542_v61  ;;  %4097 = vmatprep.mubr.f32.mxu0 %v20112_v3 }
  0x87   :  { %4210 = vmatprep.mubr.f32.mxu1 %v20112_v3 }
  0x89   :  { %13293 = vmatmul.mubr.msk.f32.gmra.mrb[62].mxu0 %vm3288_vm0, %v15553_v62 }
  0x8a   :  { %13301 = vmatmul.mubr.msk.f32.gmra.mrb[62].mxu1 %vm3288_vm0, %v15553_v62  ;;  %4281 = vmatprep.mubr.f32.mxu0 %v20112_v3 }
  0x8b   :  { %4394 = vmatprep.mubr.f32.mxu1 %v20112_v3 }
  0x8d   :  { %13302 = vmatmul.mubr.msk.f32.vlgmr.msra.gmra.mrb[64].mxu0 %vm3288_vm0, %v15438_v34 }
  0x8e   :  { %13310 = vmatmul.mubr.msk.f32.vlgmr.msra.gmra.mrb[64].mxu1 %vm3288_vm0, %v15438_v34  ;;  %13913 = vmatpush1.bf16.msra.mxu0 %v13912_v23  ;;  %v13954_v23 = vpack.c.bf16 %v3287_v18, %v3255_v17 }
  0x8f   :  { %13921 = vmatpush1.bf16.msra.mxu1 %v13920_v26  ;;  %4287 = vmatprep.mubr.f32.mxu0 %v20112_v3  ;;  %v13948_v26 = vpack.c.bf16 %v3284_v22, %v3252_v21 }
  0x90   :  { %4400 = vmatprep.mubr.f32.mxu1 %v20112_v3  ;;  %13915 = vmatprep.subr.bf16.mxu0 %v13914_v27  ;;  %v13956_v27 = vpack.c.bf16 %v3286_v25, %v3254_v24 }
  0x91   :  { %13303 = vmatmul.mubr.msk.f32.gmra.mrb[66].mxu0 %vm3288_vm0, %v15471_v47  ;;  %13923 = vmatprep.subr.bf16.mxu1 %v13922_v31 }
  0x92   :  { %13311 = vmatmul.mubr.msk.f32.gmra.mrb[66].mxu1 %vm3288_vm0, %v15471_v47  ;;  %4293 = vmatprep.mubr.f32.mxu0 %v20112_v3 }
  0x93   :  { %4406 = vmatprep.mubr.f32.mxu1 %v20112_v3  ;;  %13917 = vmatpush1.bf16.msra.mxu0 %v13916_v38 }
  0x94   :  { %13925 = vmatpush1.bf16.msra.mxu1 %v13924_v39  ;;  %13927 = vmatprep.subr.bf16.mxu0 %v13926_v40 }
  0x95   :  { %13304 = vmatmul.mubr.msk.f32.gmra.mrb[68].mxu0 %vm3288_vm0, %v15498_v57  ;;  %13935 = vmatprep.subr.bf16.mxu1 %v13934_v41 }
  0x96   :  { %13312 = vmatmul.mubr.msk.f32.gmra.mrb[68].mxu1 %vm3288_vm0, %v15498_v57  ;;  %4299 = vmatprep.mubr.f32.mxu0 %v20112_v3 }
  0x97   :  { %4412 = vmatprep.mubr.f32.mxu1 %v20112_v3 }
  0x99   :  { %13305 = vmatmul.mubr.msk.f32.gmra.mrb[70].mxu0 %vm3288_vm0, %v15509_v58 }
  0x9a   :  { %13313 = vmatmul.mubr.msk.f32.gmra.mrb[70].mxu1 %vm3288_vm0, %v15509_v58  ;;  %4305 = vmatprep.mubr.f32.mxu0 %v20112_v3 }
  0x9b   :  { %4418 = vmatprep.mubr.f32.mxu1 %v20112_v3 }
  0x9d   :  { %13306 = vmatmul.mubr.msk.f32.gmra.mrb[72].mxu0 %vm3288_vm0, %v15520_v59 }
  0x9e   :  { %13314 = vmatmul.mubr.msk.f32.gmra.mrb[72].mxu1 %vm3288_vm0, %v15520_v59  ;;  %4311 = vmatprep.mubr.f32.mxu0 %v20112_v3 }
  0x9f   :  { %4424 = vmatprep.mubr.f32.mxu1 %v20112_v3 }
  0xa1   :  { %13307 = vmatmul.mubr.msk.f32.gmra.mrb[74].mxu0 %vm3288_vm0, %v15531_v60 }
  0xa2   :  { %13315 = vmatmul.mubr.msk.f32.gmra.mrb[74].mxu1 %vm3288_vm0, %v15531_v60  ;;  %4317 = vmatprep.mubr.f32.mxu0 %v20112_v3 }
  0xa3   :  { %4430 = vmatprep.mubr.f32.mxu1 %v20112_v3 }
  0xa5   :  { %13308 = vmatmul.mubr.msk.f32.gmra.mrb[76].mxu0 %vm3288_vm0, %v15542_v61 }
  0xa6   :  { %13316 = vmatmul.mubr.msk.f32.gmra.mrb[76].mxu1 %vm3288_vm0, %v15542_v61  ;;  %4323 = vmatprep.mubr.f32.mxu0 %v20112_v3 }
  0xa7   :  { %4436 = vmatprep.mubr.f32.mxu1 %v20112_v3 }
  0xa9   :  { %13309 = vmatmul.mubr.msk.f32.gmra.mrb[78].mxu0 %vm3288_vm0, %v15553_v62 }
  0xaa   :  { %13317 = vmatmul.mubr.msk.f32.gmra.mrb[78].mxu1 %vm3288_vm0, %v15553_v62  ;;  %4507 = vmatprep.mubr.f32.mxu0 %v20112_v3 }
  0xab   :  { %4620 = vmatprep.mubr.f32.mxu1 %v20112_v3 }
  0xad   :  { %13318 = vmatmul.mubr.msk.f32.vlgmr.msra.gmra.mrb[80].mxu0 %vm3288_vm0, %v15438_v34 }
  0xae   :  { %13326 = vmatmul.mubr.msk.f32.vlgmr.msra.gmra.mrb[80].mxu1 %vm3288_vm0, %v15438_v34  ;;  %13929 = vmatpush1.bf16.msra.mxu0 %v13928_v49 }
  0xaf   :  { %13937 = vmatpush1.bf16.msra.mxu1 %v13936_v52  ;;  %4513 = vmatprep.mubr.f32.mxu0 %v20112_v3 }
  0xb0   :  { %4626 = vmatprep.mubr.f32.mxu1 %v20112_v3  ;;  %13931 = vmatprep.subr.bf16.mxu0 %v13930_v53 }
  0xb1   :  { %13319 = vmatmul.mubr.msk.f32.gmra.mrb[82].mxu0 %vm3288_vm0, %v15471_v47  ;;  %13939 = vmatprep.subr.bf16.mxu1 %v13938_v63 }
  0xb2   :  { %13327 = vmatmul.mubr.msk.f32.gmra.mrb[82].mxu1 %vm3288_vm0, %v15471_v47  ;;  %4519 = vmatprep.mubr.f32.mxu0 %v20112_v3 }
  0xb3   :  { %4632 = vmatprep.mubr.f32.mxu1 %v20112_v3  ;;  %13933 = vmatpush1.bf16.msra.mxu0 %v13932_v6 }
  0xb4   :  { %13941 = vmatpush1.bf16.msra.mxu1 %v13940_v7  ;;  %13943 = vmatprep.subr.bf16.mxu0 %v13942_v8 }
  0xb5   :  { %13320 = vmatmul.mubr.msk.f32.gmra.mrb[84].mxu0 %vm3288_vm0, %v15498_v57  ;;  %13951 = vmatprep.subr.bf16.mxu1 %v13950_v9 }
  0xb6   :  { %13328 = vmatmul.mubr.msk.f32.gmra.mrb[84].mxu1 %vm3288_vm0, %v15498_v57  ;;  %4525 = vmatprep.mubr.f32.mxu0 %v20112_v3 }
  0xb7   :  { %4638 = vmatprep.mubr.f32.mxu1 %v20112_v3 }
  0xb9   :  { %13321 = vmatmul.mubr.msk.f32.gmra.mrb[86].mxu0 %vm3288_vm0, %v15509_v58 }
  0xba   :  { %13329 = vmatmul.mubr.msk.f32.gmra.mrb[86].mxu1 %vm3288_vm0, %v15509_v58  ;;  %4531 = vmatprep.mubr.f32.mxu0 %v20112_v3 }
  0xbb   :  { %4644 = vmatprep.mubr.f32.mxu1 %v20112_v3 }
  0xbd   :  { %13322 = vmatmul.mubr.msk.f32.gmra.mrb[88].mxu0 %vm3288_vm0, %v15520_v59 }
  0xbe   :  { %13330 = vmatmul.mubr.msk.f32.gmra.mrb[88].mxu1 %vm3288_vm0, %v15520_v59  ;;  %4537 = vmatprep.mubr.f32.mxu0 %v20112_v3 }
  0xbf   :  { %4650 = vmatprep.mubr.f32.mxu1 %v20112_v3 }
  0xc1   :  { %13323 = vmatmul.mubr.msk.f32.gmra.mrb[90].mxu0 %vm3288_vm0, %v15531_v60 }
  0xc2   :  { %13331 = vmatmul.mubr.msk.f32.gmra.mrb[90].mxu1 %vm3288_vm0, %v15531_v60  ;;  %4543 = vmatprep.mubr.f32.mxu0 %v20112_v3 }
  0xc3   :  { %4656 = vmatprep.mubr.f32.mxu1 %v20112_v3 }
  0xc5   :  { %13324 = vmatmul.mubr.msk.f32.gmra.mrb[92].mxu0 %vm3288_vm0, %v15542_v61 }
  0xc6   :  { %13332 = vmatmul.mubr.msk.f32.gmra.mrb[92].mxu1 %vm3288_vm0, %v15542_v61  ;;  %4549 = vmatprep.mubr.f32.mxu0 %v20112_v3 }
  0xc7   :  { %4662 = vmatprep.mubr.f32.mxu1 %v20112_v3 }
  0xc9   :  { %13325 = vmatmul.mubr.msk.f32.gmra.mrb[94].mxu0 %vm3288_vm0, %v15553_v62 }
  0xca   :  { %13333 = vmatmul.mubr.msk.f32.gmra.mrb[94].mxu1 %vm3288_vm0, %v15553_v62  ;;  %4733 = vmatprep.mubr.f32.mxu0 %v20112_v3 }
  0xcb   :  { %4846 = vmatprep.mubr.f32.mxu1 %v20112_v3 }
  0xcd   :  { %13334 = vmatmul.mubr.msk.f32.vlgmr.msra.gmra.mrb[96].mxu0 %vm3288_vm0, %v15438_v34 }
  0xce   :  { %13342 = vmatmul.mubr.msk.f32.vlgmr.msra.gmra.mrb[96].mxu1 %vm3288_vm0, %v15438_v34  ;;  %13945 = vmatpush1.bf16.msra.mxu0 %v13944_v16 }
  0xcf   :  { %13953 = vmatpush1.bf16.msra.mxu1 %v13952_v19  ;;  %4739 = vmatprep.mubr.f32.mxu0 %v20112_v3 }
  0xd0   :  { %4852 = vmatprep.mubr.f32.mxu1 %v20112_v3  ;;  %13947 = vmatprep.subr.bf16.mxu0 %v13946_v20 }
  0xd1   :  { %13335 = vmatmul.mubr.msk.f32.gmra.mrb[98].mxu0 %vm3288_vm0, %v15471_v47  ;;  %13955 = vmatprep.subr.bf16.mxu1 %v13954_v23 }
  0xd2   :  { %13343 = vmatmul.mubr.msk.f32.gmra.mrb[98].mxu1 %vm3288_vm0, %v15471_v47  ;;  %4745 = vmatprep.mubr.f32.mxu0 %v20112_v3 }
  0xd3   :  { %4858 = vmatprep.mubr.f32.mxu1 %v20112_v3  ;;  %13949 = vmatpush1.bf16.msra.mxu0 %v13948_v26 }
  0xd4   :  { %13957 = vmatpush1.bf16.msra.mxu1 %v13956_v27 }
  0xd5   :  { %13336 = vmatmul.mubr.msk.f32.gmra.mrb[100].mxu0 %vm3288_vm0, %v15498_v57 }
  0xd6   :  { %13344 = vmatmul.mubr.msk.f32.gmra.mrb[100].mxu1 %vm3288_vm0, %v15498_v57  ;;  %4751 = vmatprep.mubr.f32.mxu0 %v20112_v3 }
  0xd7   :  { %4864 = vmatprep.mubr.f32.mxu1 %v20112_v3 }
  0xd9   :  { %13337 = vmatmul.mubr.msk.f32.gmra.mrb[102].mxu0 %vm3288_vm0, %v15509_v58 }
  0xda   :  { %13345 = vmatmul.mubr.msk.f32.gmra.mrb[102].mxu1 %vm3288_vm0, %v15509_v58  ;;  %4757 = vmatprep.mubr.f32.mxu0 %v20112_v3 }
  0xdb   :  { %4870 = vmatprep.mubr.f32.mxu1 %v20112_v3 }
  0xdd   :  { %13338 = vmatmul.mubr.msk.f32.gmra.mrb[104].mxu0 %vm3288_vm0, %v15520_v59 }
  0xde   :  { %13346 = vmatmul.mubr.msk.f32.gmra.mrb[104].mxu1 %vm3288_vm0, %v15520_v59  ;;  %4763 = vmatprep.mubr.f32.mxu0 %v20112_v3 }
  0xdf   :  { %4876 = vmatprep.mubr.f32.mxu1 %v20112_v3 }
  0xe0   :  { %v3379_v28 = vpop.f32.mrb[0].mxu0 }
  0xe1   :  { %v3492_v29 = vpop.f32.mrb[0].mxu1  ;;  %v3381_v30 = vpop.f32.mrb[1].mxu0  ;;  %13339 = vmatmul.mubr.msk.f32.gmra.mrb[106].mxu0 %vm3288_vm0, %v15531_v60  ;;  %v5121_v33 = vmax.f32 %v3379_v28, 0.0 }
  0xe2   :  { %v3494_v31 = vpop.f32.mrb[1].mxu1  ;;  %13347 = vmatmul.mubr.msk.f32.gmra.mrb[106].mxu1 %vm3288_vm0, %v15531_v60  ;;  %4769 = vmatprep.mubr.f32.mxu0 %v20112_v3  ;;  %v5123_v38 = vmax.f32 %v3492_v29, 0.0  ;;  %v5122_v39 = vmax.f32 %v3381_v30, 0.0 }
  0xe3   :  { %4882 = vmatprep.mubr.f32.mxu1 %v20112_v3  ;;  %v5124_v43 = vmax.f32 %v3494_v31, 0.0 }
  0xe4   :  { %v3385_v32 = vpop.f32.mrb[2].mxu0 }
  0xe5   :  { %v5153_v35 = vmax.f32 %v3385_v32, 0.0  ;;  %v3498_v36 = vpop.f32.mrb[2].mxu1  ;;  %v3387_v37 = vpop.f32.mrb[3].mxu0  ;;  %13340 = vmatmul.mubr.msk.f32.gmra.mrb[108].mxu0 %vm3288_vm0, %v15542_v61 }
  0xe6   :  { %v5155_v40 = vmax.f32 %v3498_v36, 0.0  ;;  %v5154_v41 = vmax.f32 %v3387_v37, 0.0  ;;  %v3500_v42 = vpop.f32.mrb[3].mxu1  ;;  %13348 = vmatmul.mubr.msk.f32.gmra.mrb[108].mxu1 %vm3288_vm0, %v15542_v61  ;;  %4775 = vmatprep.mubr.f32.mxu0 %v20112_v3 }
  0xe7   :  { %v5156_v44 = vmax.f32 %v3500_v42, 0.0  ;;  %4888 = vmatprep.mubr.f32.mxu1 %v20112_v3  ;;  %v13960_v45 = vpack.c.bf16 %v5153_v35, %v5121_v33 }
  0xe8   :  { %v3391_v46 = vpop.f32.mrb[4].mxu0  ;;  %v13958_v48 = vpack.c.bf16 %v5154_v41, %v5122_v39  ;;  %v13976_v49 = vpack.c.bf16 %v5155_v40, %v5123_v38 }
  0xe9   :  { %v3504_v50 = vpop.f32.mrb[4].mxu1  ;;  %v3393_v51 = vpop.f32.mrb[5].mxu0  ;;  %13341 = vmatmul.mubr.msk.f32.gmra.mrb[110].mxu0 %vm3288_vm0, %v15553_v62  ;;  %v13974_v52 = vpack.c.bf16 %v5156_v44, %v5124_v43  ;;  %v5185_v54 = vmax.f32 %v3391_v46, 0.0 }
  0xea   :  { %v3506_v53 = vpop.f32.mrb[5].mxu1  ;;  %13349 = vmatmul.mubr.msk.f32.gmra.mrb[110].mxu1 %vm3288_vm0, %v15553_v62  ;;  %13959 = vmatprep.subr.bf16.mxu0 %v13958_v48  ;;  %v5187_v0 = vmax.f32 %v3504_v50, 0.0  ;;  %v5186_v1 = vmax.f32 %v3393_v51, 0.0 }
  0xeb   :  { %13975 = vmatprep.subr.bf16.mxu1 %v13974_v52  ;;  %4959 = vmatprep.mubr.f32.mxu0 %v20112_v3  ;;  %v5188_v62 = vmax.f32 %v3506_v53, 0.0 }
  0xec   :  { %v3397_v61 = vpop.f32.mrb[6].mxu0  ;;  %5072 = vmatprep.mubr.f32.mxu1 %v20112_v3 }
  0xed   :  { %v5217_v55 = vmax.f32 %v3397_v61, 0.0  ;;  %v3510_v56 = vpop.f32.mrb[6].mxu1  ;;  %v3399_v63 = vpop.f32.mrb[7].mxu0  ;;  %13350 = vmatmul.mubr.msk.f32.vlgmr.msra.gmra.mrb[112].mxu0 %vm3288_vm0, %v15438_v34 }
  0xee   :  { %v5219_v2 = vmax.f32 %v3510_v56, 0.0  ;;  %v5218_v4 = vmax.f32 %v3399_v63, 0.0  ;;  %v3512_v5 = vpop.f32.mrb[7].mxu1  ;;  %13358 = vmatmul.mubr.msk.f32.vlgmr.msra.gmra.mrb[112].mxu1 %vm3288_vm0, %v15438_v34  ;;  %13961 = vmatpush1.bf16.msra.mxu0 %v13960_v45  ;;  %v15279_v56 = vld [vmem:[%s20105_s2 + $0x30] sm:$0xff] }
  0xef   :  { %v5220_v6 = vmax.f32 %v3512_v5, 0.0  ;;  %13977 = vmatpush1.bf16.msra.mxu1 %v13976_v49  ;;  %4965 = vmatprep.mubr.f32.mxu0 %v20112_v3  ;;  %v13964_v7 = vpack.c.bf16 %v5217_v55, %v5185_v54 }
  0xf0   :  { %v3403_v8 = vpop.f32.mrb[8].mxu0  ;;  %5078 = vmatprep.mubr.f32.mxu1 %v20112_v3  ;;  %v13962_v9 = vpack.c.bf16 %v5218_v4, %v5186_v1  ;;  %v13980_v10 = vpack.c.bf16 %v5219_v2, %v5187_v0 }
  0xf1   :  { %v3516_v11 = vpop.f32.mrb[8].mxu1  ;;  %v3405_v12 = vpop.f32.mrb[9].mxu0  ;;  %13351 = vmatmul.mubr.msk.f32.gmra.mrb[114].mxu0 %vm3288_vm0, %v15471_v47  ;;  %v13978_v13 = vpack.c.bf16 %v5220_v6, %v5188_v62  ;;  %v5249_v15 = vmax.f32 %v3403_v8, 0.0 }
  0xf2   :  { %v3518_v14 = vpop.f32.mrb[9].mxu1  ;;  %13359 = vmatmul.mubr.msk.f32.gmra.mrb[114].mxu1 %vm3288_vm0, %v15471_v47  ;;  %13963 = vmatprep.subr.bf16.mxu0 %v13962_v9  ;;  %v5251_v19 = vmax.f32 %v3516_v11, 0.0  ;;  %v5250_v20 = vmax.f32 %v3405_v12, 0.0  ;;  %v15280_v11 = vld [vmem:[%s20105_s2 + $0x38] sm:$0xff] }
  0xf3   :  { %13979 = vmatprep.subr.bf16.mxu1 %v13978_v13  ;;  %13965 = vmatpush1.bf16.msra.mxu0 %v13964_v7  ;;  %v5252_v23 = vmax.f32 %v3518_v14, 0.0  ;;  %v16177_v14 = vld [vmem:[%s20106_s4] sm:$0xff] }
  0xf4   :  { %13981 = vmatpush1.bf16.msra.mxu1 %v13980_v10  ;;  %v3409_v34 = vpop.f32.mrb[10].mxu0  ;;  %4971 = vmatprep.mubr.f32.mxu0 %v20112_v3 }
  0xf5   :  { %v5281_v16 = vmax.f32 %v3409_v34, 0.0  ;;  %v3522_v17 = vpop.f32.mrb[10].mxu1  ;;  %5084 = vmatprep.mubr.f32.mxu1 %v20112_v3  ;;  %v3411_v18 = vpop.f32.mrb[11].mxu0  ;;  %13352 = vmatmul.mubr.msk.f32.gmra.mrb[116].mxu0 %vm3288_vm0, %v15498_v57 }
  0xf6   :  { %v5283_v21 = vmax.f32 %v3522_v17, 0.0  ;;  %v5282_v47 = vmax.f32 %v3411_v18, 0.0  ;;  %v3524_v22 = vpop.f32.mrb[11].mxu1  ;;  %13360 = vmatmul.mubr.msk.f32.gmra.mrb[116].mxu1 %vm3288_vm0, %v15498_v57  ;;  %4977 = vmatprep.mubr.f32.mxu0 %v20112_v3 }
  0xf7   :  { %v5284_v24 = vmax.f32 %v3524_v22, 0.0  ;;  %5090 = vmatprep.mubr.f32.mxu1 %v20112_v3  ;;  %v13968_v25 = vpack.c.bf16 %v5281_v16, %v5249_v15 }
  0xf8   :  { %v3415_v26 = vpop.f32.mrb[12].mxu0  ;;  %v13966_v27 = vpack.c.bf16 %v5282_v47, %v5250_v20  ;;  %v13984_v28 = vpack.c.bf16 %v5283_v21, %v5251_v19 }
  0xf9   :  { %v3528_v29 = vpop.f32.mrb[12].mxu1  ;;  %v3417_v30 = vpop.f32.mrb[13].mxu0  ;;  %13353 = vmatmul.mubr.msk.f32.gmra.mrb[118].mxu0 %vm3288_vm0, %v15509_v58  ;;  %v13982_v31 = vpack.c.bf16 %v5284_v24, %v5252_v23  ;;  %v5313_v33 = vmax.f32 %v3415_v26, 0.0  ;;  %v16188_v23 = vld [vmem:[%s20106_s4 + $0x8] sm:$0xff] }
  0xfa   :  { %v3530_v32 = vpop.f32.mrb[13].mxu1  ;;  %13361 = vmatmul.mubr.msk.f32.gmra.mrb[118].mxu1 %vm3288_vm0, %v15509_v58  ;;  %13967 = vmatprep.subr.bf16.mxu0 %v13966_v27  ;;  %v5315_v38 = vmax.f32 %v3528_v29, 0.0  ;;  %v5314_v39 = vmax.f32 %v3417_v30, 0.0 }
  0xfb   :  { %13983 = vmatprep.subr.bf16.mxu1 %v13982_v31  ;;  %13969 = vmatpush1.bf16.msra.mxu0 %v13968_v25  ;;  %v5316_v42 = vmax.f32 %v3530_v32, 0.0 }
  0xfc   :  { %13985 = vmatpush1.bf16.msra.mxu1 %v13984_v28  ;;  %v3421_v57 = vpop.f32.mrb[14].mxu0  ;;  %4983 = vmatprep.mubr.f32.mxu0 %v20112_v3 }
  0xfd   :  { %v5345_v35 = vmax.f32 %v3421_v57, 0.0  ;;  %v3534_v36 = vpop.f32.mrb[14].mxu1  ;;  %5096 = vmatprep.mubr.f32.mxu1 %v20112_v3  ;;  %v3423_v37 = vpop.f32.mrb[15].mxu0  ;;  %13354 = vmatmul.mubr.msk.f32.gmra.mrb[120].mxu0 %vm3288_vm0, %v15520_v59 }
  0xfe   :  { %v5347_v40 = vmax.f32 %v3534_v36, 0.0  ;;  %v5346_v58 = vmax.f32 %v3423_v37, 0.0  ;;  %v3536_v41 = vpop.f32.mrb[15].mxu1  ;;  %13362 = vmatmul.mubr.msk.f32.gmra.mrb[120].mxu1 %vm3288_vm0, %v15520_v59  ;;  %4989 = vmatprep.mubr.f32.mxu0 %v20112_v3 }
  0xff   :  { %v5348_v43 = vmax.f32 %v3536_v41, 0.0  ;;  %5102 = vmatprep.mubr.f32.mxu1 %v20112_v3  ;;  %v13972_v44 = vpack.c.bf16 %v5345_v35, %v5313_v33  ;;  %v16199_v33 = vld [vmem:[%s20106_s4 + $0x10] sm:$0xff] }
 0x100   :  { %v3605_v45 = vpop.f32.mrb[16].mxu0  ;;  %v13970_v46 = vpack.c.bf16 %v5346_v58, %v5314_v39  ;;  %v13988_v48 = vpack.c.bf16 %v5347_v40, %v5315_v38 }
 0x101   :  { %v3718_v49 = vpop.f32.mrb[16].mxu1  ;;  %v3607_v50 = vpop.f32.mrb[17].mxu0  ;;  %13355 = vmatmul.mubr.msk.f32.gmra.mrb[122].mxu0 %vm3288_vm0, %v15531_v60  ;;  %v13986_v51 = vpack.c.bf16 %v5348_v43, %v5316_v42  ;;  %v5125_v53 = vmax.f32 %v3605_v45, 0.0 }
 0x102   :  { %v3720_v52 = vpop.f32.mrb[17].mxu1  ;;  %13363 = vmatmul.mubr.msk.f32.gmra.mrb[122].mxu1 %vm3288_vm0, %v15531_v60  ;;  %13971 = vmatprep.subr.bf16.mxu0 %v13970_v46  ;;  %v5127_v60 = vmax.f32 %v3718_v49, 0.0  ;;  %v5126_v63 = vmax.f32 %v3607_v50, 0.0 }
 0x103   :  { %13987 = vmatprep.subr.bf16.mxu1 %v13986_v51  ;;  %13973 = vmatpush1.bf16.msra.mxu0 %v13972_v44  ;;  %v5128_v4 = vmax.f32 %v3720_v52, 0.0  ;;  %v16211_v44 = vld [vmem:[%s20106_s4 + $0x18] sm:$0xff] }
 0x104   :  { %13989 = vmatpush1.bf16.msra.mxu1 %v13988_v48  ;;  %v3611_v59 = vpop.f32.mrb[18].mxu0  ;;  %4995 = vmatprep.mubr.f32.mxu0 %v20112_v3 }
 0x105   :  { %v5157_v61 = vmax.f32 %v3611_v59, 0.0  ;;  %v3724_v54 = vpop.f32.mrb[18].mxu1  ;;  %5108 = vmatprep.mubr.f32.mxu1 %v20112_v3  ;;  %v3613_v55 = vpop.f32.mrb[19].mxu0  ;;  %13356 = vmatmul.mubr.msk.f32.gmra.mrb[124].mxu0 %vm3288_vm0, %v15279_v56 }
 0x106   :  { %v5159_v0 = vmax.f32 %v3724_v54, 0.0  ;;  %v5158_v1 = vmax.f32 %v3613_v55, 0.0  ;;  %v3726_v2 = vpop.f32.mrb[19].mxu1  ;;  %13364 = vmatmul.mubr.msk.f32.gmra.mrb[124].mxu1 %vm3288_vm0, %v15279_v56  ;;  %5001 = vmatprep.mubr.f32.mxu0 %v20112_v3  ;;  %v16221_v54 = vld [vmem:[%s20106_s4 + $0x20] sm:$0xff] }
 0x107   :  { %v13992_v5 = vpack.c.bf16 %v5157_v61, %v5125_v53  ;;  %v5160_v62 = vmax.f32 %v3726_v2, 0.0  ;;  %5114 = vmatprep.mubr.f32.mxu1 %v20112_v3 }
 0x108   :  { %v14008_v6 = vpack.c.bf16 %v5159_v0, %v5127_v60  ;;  %v3617_v7 = vpop.f32.mrb[20].mxu0  ;;  %v13990_v8 = vpack.c.bf16 %v5158_v1, %v5126_v63 }
 0x109   :  { %v3730_v9 = vpop.f32.mrb[20].mxu1  ;;  %v3619_v10 = vpop.f32.mrb[21].mxu0  ;;  %13357 = vmatmul.mubr.msk.f32.gmra.mrb[126].mxu0 %vm3288_vm0, %v15280_v11  ;;  %v14006_v12 = vpack.c.bf16 %v5160_v62, %v5128_v4  ;;  %v5189_v15 = vmax.f32 %v3617_v7, 0.0 }
 0x10a   :  { %v3732_v13 = vpop.f32.mrb[21].mxu1  ;;  %13365 = vmatmul.mubr.msk.f32.gmra.mrb[126].mxu1 %vm3288_vm0, %v15280_v11  ;;  %13991 = vmatprep.subr.bf16.mxu0 %v13990_v8  ;;  %v5191_v19 = vmax.f32 %v3730_v9, 0.0  ;;  %v5190_v20 = vmax.f32 %v3619_v10, 0.0 }
 0x10b   :  { %14007 = vmatprep.subr.bf16.mxu1 %v14006_v12  ;;  %5487 = vmatprep.mubr.f32.mxu0 %v20112_v3  ;;  %v5192_v24 = vmax.f32 %v3732_v13, 0.0 }
 0x10c   :  { %v3623_v34 = vpop.f32.mrb[22].mxu0  ;;  %5606 = vmatprep.mubr.f32.mxu1 %v20112_v3 }
 0x10d   :  { %v5221_v16 = vmax.f32 %v3623_v34, 0.0  ;;  %v3736_v17 = vpop.f32.mrb[22].mxu1  ;;  %v3625_v18 = vpop.f32.mrb[23].mxu0  ;;  %13366 = vmatmul.mubr.msk.f32.vlgmr.msra.gmra.mrb[128].mxu0 %vm5395_vm1, %v16177_v14 }
 0x10e   :  { %v5223_v21 = vmax.f32 %v3736_v17, 0.0  ;;  %v5222_v47 = vmax.f32 %v3625_v18, 0.0  ;;  %v3738_v22 = vpop.f32.mrb[23].mxu1  ;;  %13375 = vmatmul.mubr.msk.f32.vlgmr.msra.gmra.mrb[128].mxu1 %vm5395_vm1, %v16177_v14  ;;  %13993 = vmatpush1.bf16.msra.mxu0 %v13992_v5  ;;  %v16243_v17 = vld [vmem:[%s20106_s4 + $0x30] sm:$0xff] }
 0x10f   :  { %v13996_v25 = vpack.c.bf16 %v5221_v16, %v5189_v15  ;;  %v5224_v26 = vmax.f32 %v3738_v22, 0.0  ;;  %14009 = vmatpush1.bf16.msra.mxu1 %v14008_v6  ;;  %5493 = vmatprep.mubr.f32.mxu0 %v20112_v3  ;;  %v16233_v6 = vld [vmem:[%s20106_s4 + $0x28] sm:$0xff] }
 0x110   :  { %v14012_v27 = vpack.c.bf16 %v5223_v21, %v5191_v19  ;;  %v3629_v28 = vpop.f32.mrb[24].mxu0  ;;  %5612 = vmatprep.mubr.f32.mxu1 %v20112_v3  ;;  %v13994_v29 = vpack.c.bf16 %v5222_v47, %v5190_v20 }
 0x111   :  { %v3742_v30 = vpop.f32.mrb[24].mxu1  ;;  %v3631_v31 = vpop.f32.mrb[25].mxu0  ;;  %13367 = vmatmul.mubr.msk.f32.gmra.mrb[130].mxu0 %vm5395_vm1, %v16188_v23  ;;  %v14010_v32 = vpack.c.bf16 %v5224_v26, %v5192_v24  ;;  %v5253_v36 = vmax.f32 %v3629_v28, 0.0  ;;  %v16255_v28 = vld [vmem:[%s20106_s4 + $0x38] sm:$0xff] }
 0x112   :  { %v3744_v57 = vpop.f32.mrb[25].mxu1  ;;  %13376 = vmatmul.mubr.msk.f32.gmra.mrb[130].mxu1 %vm5395_vm1, %v16188_v23  ;;  %13995 = vmatprep.subr.bf16.mxu0 %v13994_v29  ;;  %v5255_v40 = vmax.f32 %v3742_v30, 0.0  ;;  %v5254_v58 = vmax.f32 %v3631_v31, 0.0 }
 0x113   :  { %14011 = vmatprep.subr.bf16.mxu1 %v14010_v32  ;;  %13997 = vmatpush1.bf16.msra.mxu0 %v13996_v25  ;;  %v5256_v45 = vmax.f32 %v3744_v57, 0.0 }
 0x114   :  { %14013 = vmatpush1.bf16.msra.mxu1 %v14012_v27  ;;  %v3635_v35 = vpop.f32.mrb[26].mxu0  ;;  %5499 = vmatprep.mubr.f32.mxu0 %v20112_v3 }
 0x115   :  { %v5285_v37 = vmax.f32 %v3635_v35, 0.0  ;;  %v3748_v38 = vpop.f32.mrb[26].mxu1  ;;  %5618 = vmatprep.mubr.f32.mxu1 %v20112_v3  ;;  %v3637_v39 = vpop.f32.mrb[27].mxu0  ;;  %13368 = vmatmul.mubr.msk.f32.gmra.mrb[132].mxu0 %vm5395_vm1, %v16199_v33 }
 0x116   :  { %v5287_v41 = vmax.f32 %v3748_v38, 0.0  ;;  %v5286_v42 = vmax.f32 %v3637_v39, 0.0  ;;  %v3750_v43 = vpop.f32.mrb[27].mxu1  ;;  %13377 = vmatmul.mubr.msk.f32.gmra.mrb[132].mxu1 %vm5395_vm1, %v16199_v33  ;;  %5505 = vmatprep.mubr.f32.mxu0 %v20112_v3 }
 0x117   :  { %v14000_v46 = vpack.c.bf16 %v5285_v37, %v5253_v36  ;;  %v5288_v48 = vmax.f32 %v3750_v43, 0.0  ;;  %5624 = vmatprep.mubr.f32.mxu1 %v20112_v3 }
 0x118   :  { %v14016_v49 = vpack.c.bf16 %v5287_v41, %v5255_v40  ;;  %v3641_v50 = vpop.f32.mrb[28].mxu0  ;;  %v13998_v51 = vpack.c.bf16 %v5286_v42, %v5254_v58  ;;  %v16265_v40 = vld [vmem:[%s20106_s4 + $0x40] sm:$0x1] }
 0x119   :  { %v3754_v52 = vpop.f32.mrb[28].mxu1  ;;  %v3643_v59 = vpop.f32.mrb[29].mxu0  ;;  %13369 = vmatmul.mubr.msk.f32.gmra.mrb[134].mxu0 %vm5395_vm1, %v16211_v44  ;;  %v14014_v53 = vpack.c.bf16 %v5288_v48, %v5256_v45  ;;  %v5317_v56 = vmax.f32 %v3641_v50, 0.0 }
 0x11a   :  { %v3756_v61 = vpop.f32.mrb[29].mxu1  ;;  %13378 = vmatmul.mubr.msk.f32.gmra.mrb[134].mxu1 %vm5395_vm1, %v16211_v44  ;;  %13999 = vmatprep.subr.bf16.mxu0 %v13998_v51  ;;  %v5319_v1 = vmax.f32 %v3754_v52, 0.0  ;;  %v5318_v2 = vmax.f32 %v3643_v59, 0.0 }
 0x11b   :  { %14015 = vmatprep.subr.bf16.mxu1 %v14014_v53  ;;  %14001 = vmatpush1.bf16.msra.mxu0 %v14000_v46  ;;  %v5320_v7 = vmax.f32 %v3756_v61, 0.0 }
 0x11c   :  { %14017 = vmatpush1.bf16.msra.mxu1 %v14016_v49  ;;  %v3647_v55 = vpop.f32.mrb[30].mxu0  ;;  %5511 = vmatprep.mubr.f32.mxu0 %v20112_v3 }
 0x11d   :  { %v5349_v60 = vmax.f32 %v3647_v55, 0.0  ;;  %v3760_v63 = vpop.f32.mrb[30].mxu1  ;;  %5630 = vmatprep.mubr.f32.mxu1 %v20112_v3  ;;  %v3649_v0 = vpop.f32.mrb[31].mxu0  ;;  %13370 = vmatmul.mubr.msk.f32.gmra.mrb[136].mxu0 %vm5395_vm1, %v16221_v54 }
 0x11e   :  { %v5351_v4 = vmax.f32 %v3760_v63, 0.0  ;;  %v5350_v5 = vmax.f32 %v3649_v0, 0.0  ;;  %v3762_v62 = vpop.f32.mrb[31].mxu1  ;;  %13379 = vmatmul.mubr.msk.f32.gmra.mrb[136].mxu1 %vm5395_vm1, %v16221_v54  ;;  %5517 = vmatprep.mubr.f32.mxu0 %v20112_v3 }
 0x11f   :  { %v14004_v8 = vpack.c.bf16 %v5349_v60, %v5317_v56  ;;  %v5352_v9 = vmax.f32 %v3762_v62, 0.0  ;;  %5636 = vmatprep.mubr.f32.mxu1 %v20112_v3 }
 0x120   :  { %v14020_v10 = vpack.c.bf16 %v5351_v4, %v5319_v1  ;;  %v3831_v11 = vpop.f32.mrb[32].mxu0  ;;  %v14002_v12 = vpack.c.bf16 %v5350_v5, %v5318_v2 }
 0x121   :  { %v3944_v13 = vpop.f32.mrb[32].mxu1  ;;  %v3833_v34 = vpop.f32.mrb[33].mxu0  ;;  %13371 = vmatmul.mubr.msk.f32.gmra.mrb[138].mxu0 %vm5395_vm1, %v16233_v6  ;;  %v14018_v15 = vpack.c.bf16 %v5352_v9, %v5320_v7  ;;  %v5129_v19 = vmax.f32 %v3831_v11, 0.0 }
 0x122   :  { %v3946_v16 = vpop.f32.mrb[33].mxu1  ;;  %13380 = vmatmul.mubr.msk.f32.gmra.mrb[138].mxu1 %vm5395_vm1, %v16233_v6  ;;  %14003 = vmatprep.subr.bf16.mxu0 %v14002_v12  ;;  %v5131_v22 = vmax.f32 %v3944_v13, 0.0  ;;  %v5130_v24 = vmax.f32 %v3833_v34, 0.0 }
 0x123   :  { %14019 = vmatprep.subr.bf16.mxu1 %v14018_v15  ;;  %14005 = vmatpush1.bf16.msra.mxu0 %v14004_v8  ;;  %v5132_v29 = vmax.f32 %v3946_v16, 0.0 }
 0x124   :  { %14021 = vmatpush1.bf16.msra.mxu1 %v14020_v10  ;;  %v3837_v18 = vpop.f32.mrb[34].mxu0  ;;  %5523 = vmatprep.mubr.f32.mxu0 %v20112_v3 }
 0x125   :  { %v5161_v20 = vmax.f32 %v3837_v18, 0.0  ;;  %v3950_v21 = vpop.f32.mrb[34].mxu1  ;;  %5642 = vmatprep.mubr.f32.mxu1 %v20112_v3  ;;  %v3839_v47 = vpop.f32.mrb[35].mxu0  ;;  %13372 = vmatmul.mubr.msk.f32.gmra.mrb[140].mxu0 %vm5395_vm1, %v16243_v17 }
 0x126   :  { %v5163_v25 = vmax.f32 %v3950_v21, 0.0  ;;  %v5162_v26 = vmax.f32 %v3839_v47, 0.0  ;;  %v3952_v27 = vpop.f32.mrb[35].mxu1  ;;  %13381 = vmatmul.mubr.msk.f32.gmra.mrb[140].mxu1 %vm5395_vm1, %v16243_v17  ;;  %5529 = vmatprep.mubr.f32.mxu0 %v20112_v3 }
 0x127   :  { %v14024_v30 = vpack.c.bf16 %v5161_v20, %v5129_v19  ;;  %v5164_v31 = vmax.f32 %v3952_v27, 0.0  ;;  %5648 = vmatprep.mubr.f32.mxu1 %v20112_v3 }
 0x128   :  { %v14040_v32 = vpack.c.bf16 %v5163_v25, %v5131_v22  ;;  %v3843_v57 = vpop.f32.mrb[36].mxu0  ;;  %v14022_v35 = vpack.c.bf16 %v5162_v26, %v5130_v24 }
 0x129   :  { %v3956_v36 = vpop.f32.mrb[36].mxu1  ;;  %v3845_v37 = vpop.f32.mrb[37].mxu0  ;;  %13373 = vmatmul.mubr.msk.f32.gmra.mrb[142].mxu0 %vm5395_vm1, %v16255_v28  ;;  %v14038_v38 = vpack.c.bf16 %v5164_v31, %v5132_v29  ;;  %v5193_v41 = vmax.f32 %v3843_v57, 0.0 }
 0x12a   :  { %v3958_v39 = vpop.f32.mrb[37].mxu1  ;;  %13382 = vmatmul.mubr.msk.f32.gmra.mrb[142].mxu1 %vm5395_vm1, %v16255_v28  ;;  %14023 = vmatprep.subr.bf16.mxu0 %v14022_v35  ;;  %v5195_v46 = vmax.f32 %v3956_v36, 0.0  ;;  %v5194_v48 = vmax.f32 %v3845_v37, 0.0 }
 0x12b   :  { %14039 = vmatprep.subr.bf16.mxu1 %v14038_v38  ;;  %5535 = vmatprep.mubr.f32.mxu0 %v20112_v3  ;;  %v5196_v52 = vmax.f32 %v3958_v39, 0.0 }
 0x12c   :  { %v3849_v58 = vpop.f32.mrb[38].mxu0  ;;  %5654 = vmatprep.mubr.f32.mxu1 %v20112_v3 }
 0x12d   :  { %v5225_v42 = vmax.f32 %v3849_v58, 0.0  ;;  %v3962_v43 = vpop.f32.mrb[38].mxu1  ;;  %v3851_v45 = vpop.f32.mrb[39].mxu0  ;;  %13374 = vmatmul.mubr.msk.f32.gmra.mrb[144].mxu0 %vm5395_vm1, %v16265_v40 }
 0x12e   :  { %v5227_v49 = vmax.f32 %v3962_v43, 0.0  ;;  %v5226_v50 = vmax.f32 %v3851_v45, 0.0  ;;  %v3964_v51 = vpop.f32.mrb[39].mxu1  ;;  %13383 = vmatmul.mubr.msk.f32.gmra.mrb[144].mxu1 %vm5395_vm1, %v16265_v40  ;;  %5725 = vmatprep.mubr.f32.mxu0 %v20112_v3 }
 0x12f   :  { %v14028_v59 = vpack.c.bf16 %v5225_v42, %v5193_v41  ;;  %v5228_v53 = vmax.f32 %v3964_v51, 0.0  ;;  %5844 = vmatprep.mubr.f32.mxu1 %v20112_v3 }
 0x130   :  { %v14044_v61 = vpack.c.bf16 %v5227_v49, %v5195_v46  ;;  %v3855_v55 = vpop.f32.mrb[40].mxu0  ;;  %v14026_v56 = vpack.c.bf16 %v5226_v50, %v5194_v48 }
 0x131   :  { %v3968_v60 = vpop.f32.mrb[40].mxu1  ;;  %v3857_v63 = vpop.f32.mrb[41].mxu0  ;;  %13384 = vmatmul.mubr.msk.f32.vlgmr.msra.gmra.mrb[146].mxu0 %vm5395_vm1, %v16177_v14  ;;  %v14042_v0 = vpack.c.bf16 %v5228_v53, %v5196_v52  ;;  %v5257_v4 = vmax.f32 %v3855_v55, 0.0 }
 0x132   :  { %v3970_v1 = vpop.f32.mrb[41].mxu1  ;;  %13393 = vmatmul.mubr.msk.f32.vlgmr.msra.gmra.mrb[146].mxu1 %vm5395_vm1, %v16177_v14  ;;  %14025 = vmatpush1.bf16.msra.mxu0 %v14024_v30  ;;  %v5259_v8 = vmax.f32 %v3968_v60, 0.0  ;;  %v5258_v9 = vmax.f32 %v3857_v63, 0.0 }
 0x133   :  { %14041 = vmatpush1.bf16.msra.mxu1 %v14040_v32  ;;  %14027 = vmatprep.subr.bf16.mxu0 %v14026_v56  ;;  %v5260_v13 = vmax.f32 %v3970_v1, 0.0 }
 0x134   :  { %14043 = vmatprep.subr.bf16.mxu1 %v14042_v0  ;;  %v3861_v2 = vpop.f32.mrb[42].mxu0  ;;  %5731 = vmatprep.mubr.f32.mxu0 %v20112_v3 }
 0x135   :  { %v5289_v5 = vmax.f32 %v3861_v2, 0.0  ;;  %v3974_v62 = vpop.f32.mrb[42].mxu1  ;;  %5850 = vmatprep.mubr.f32.mxu1 %v20112_v3  ;;  %v3863_v7 = vpop.f32.mrb[43].mxu0  ;;  %13385 = vmatmul.mubr.msk.f32.gmra.mrb[148].mxu0 %vm5395_vm1, %v16188_v23 }
 0x136   :  { %v5291_v10 = vmax.f32 %v3974_v62, 0.0  ;;  %v5290_v11 = vmax.f32 %v3863_v7, 0.0  ;;  %v3976_v12 = vpop.f32.mrb[43].mxu1  ;;  %13394 = vmatmul.mubr.msk.f32.gmra.mrb[148].mxu1 %vm5395_vm1, %v16188_v23  ;;  %14029 = vmatpush1.bf16.msra.mxu0 %v14028_v59 }
 0x137   :  { %v14032_v34 = vpack.c.bf16 %v5289_v5, %v5257_v4  ;;  %v5292_v15 = vmax.f32 %v3976_v12, 0.0  ;;  %14045 = vmatpush1.bf16.msra.mxu1 %v14044_v61  ;;  %5737 = vmatprep.mubr.f32.mxu0 %v20112_v3 }
 0x138   :  { %v14048_v16 = vpack.c.bf16 %v5291_v10, %v5259_v8  ;;  %v3867_v18 = vpop.f32.mrb[44].mxu0  ;;  %5856 = vmatprep.mubr.f32.mxu1 %v20112_v3  ;;  %v14030_v19 = vpack.c.bf16 %v5290_v11, %v5258_v9 }
 0x139   :  { %v3980_v20 = vpop.f32.mrb[44].mxu1  ;;  %v3869_v21 = vpop.f32.mrb[45].mxu0  ;;  %13386 = vmatmul.mubr.msk.f32.gmra.mrb[150].mxu0 %vm5395_vm1, %v16199_v33  ;;  %v14046_v47 = vpack.c.bf16 %v5292_v15, %v5260_v13  ;;  %v5321_v25 = vmax.f32 %v3867_v18, 0.0 }
 0x13a   :  { %v3982_v22 = vpop.f32.mrb[45].mxu1  ;;  %13395 = vmatmul.mubr.msk.f32.gmra.mrb[150].mxu1 %vm5395_vm1, %v16199_v33  ;;  %14031 = vmatprep.subr.bf16.mxu0 %v14030_v19  ;;  %v5323_v30 = vmax.f32 %v3980_v20, 0.0  ;;  %v5322_v31 = vmax.f32 %v3869_v21, 0.0 }
 0x13b   :  { %14047 = vmatprep.subr.bf16.mxu1 %v14046_v47  ;;  %14033 = vmatpush1.bf16.msra.mxu0 %v14032_v34  ;;  %v5324_v36 = vmax.f32 %v3982_v22, 0.0 }
 0x13c   :  { %14049 = vmatpush1.bf16.msra.mxu1 %v14048_v16  ;;  %v3873_v24 = vpop.f32.mrb[46].mxu0  ;;  %5743 = vmatprep.mubr.f32.mxu0 %v20112_v3 }
 0x13d   :  { %v5353_v26 = vmax.f32 %v3873_v24, 0.0  ;;  %v3986_v27 = vpop.f32.mrb[46].mxu1  ;;  %5862 = vmatprep.mubr.f32.mxu1 %v20112_v3  ;;  %v3875_v29 = vpop.f32.mrb[47].mxu0  ;;  %13387 = vmatmul.mubr.msk.f32.gmra.mrb[152].mxu0 %vm5395_vm1, %v16211_v44 }
 0x13e   :  { %v5355_v32 = vmax.f32 %v3986_v27, 0.0  ;;  %v5354_v57 = vmax.f32 %v3875_v29, 0.0  ;;  %v3988_v35 = vpop.f32.mrb[47].mxu1  ;;  %13396 = vmatmul.mubr.msk.f32.gmra.mrb[152].mxu1 %vm5395_vm1, %v16211_v44  ;;  %5749 = vmatprep.mubr.f32.mxu0 %v20112_v3 }
 0x13f   :  { %v14036_v37 = vpack.c.bf16 %v5353_v26, %v5321_v25  ;;  %v5356_v38 = vmax.f32 %v3988_v35, 0.0  ;;  %5868 = vmatprep.mubr.f32.mxu1 %v20112_v3 }
 0x140   :  { %v14052_v39 = vpack.c.bf16 %v5355_v32, %v5323_v30  ;;  %v4057_v58 = vpop.f32.mrb[48].mxu0  ;;  %v14034_v41 = vpack.c.bf16 %v5354_v57, %v5322_v31 }
 0x141   :  { %v4170_v42 = vpop.f32.mrb[48].mxu1  ;;  %v4059_v43 = vpop.f32.mrb[49].mxu0  ;;  %13388 = vmatmul.mubr.msk.f32.gmra.mrb[154].mxu0 %vm5395_vm1, %v16221_v54  ;;  %v14050_v45 = vpack.c.bf16 %v5356_v38, %v5324_v36  ;;  %v5133_v49 = vmax.f32 %v4057_v58, 0.0 }
 0x142   :  { %v4172_v46 = vpop.f32.mrb[49].mxu1  ;;  %13397 = vmatmul.mubr.msk.f32.gmra.mrb[154].mxu1 %vm5395_vm1, %v16221_v54  ;;  %14035 = vmatprep.subr.bf16.mxu0 %v14034_v41  ;;  %v5135_v59 = vmax.f32 %v4170_v42, 0.0  ;;  %v5134_v53 = vmax.f32 %v4059_v43, 0.0 }
 0x143   :  { %14051 = vmatprep.subr.bf16.mxu1 %v14050_v45  ;;  %14037 = vmatpush1.bf16.msra.mxu0 %v14036_v37  ;;  %v5136_v60 = vmax.f32 %v4172_v46, 0.0 }
 0x144   :  { %14053 = vmatpush1.bf16.msra.mxu1 %v14052_v39  ;;  %v4063_v48 = vpop.f32.mrb[50].mxu0  ;;  %5755 = vmatprep.mubr.f32.mxu0 %v20112_v3 }
 0x145   :  { %v5165_v50 = vmax.f32 %v4063_v48, 0.0  ;;  %v4176_v51 = vpop.f32.mrb[50].mxu1  ;;  %5874 = vmatprep.mubr.f32.mxu1 %v20112_v3  ;;  %v4065_v52 = vpop.f32.mrb[51].mxu0  ;;  %13389 = vmatmul.mubr.msk.f32.gmra.mrb[156].mxu0 %vm5395_vm1, %v16233_v6 }
 0x146   :  { %v5167_v61 = vmax.f32 %v4176_v51, 0.0  ;;  %v5166_v55 = vmax.f32 %v4065_v52, 0.0  ;;  %v4178_v56 = vpop.f32.mrb[51].mxu1  ;;  %13398 = vmatmul.mubr.msk.f32.gmra.mrb[156].mxu1 %vm5395_vm1, %v16233_v6  ;;  %5761 = vmatprep.mubr.f32.mxu0 %v20112_v3 }
 0x147   :  { %v14056_v63 = vpack.c.bf16 %v5165_v50, %v5133_v49  ;;  %v5168_v0 = vmax.f32 %v4178_v56, 0.0  ;;  %5880 = vmatprep.mubr.f32.mxu1 %v20112_v3 }
 0x148   :  { %v14072_v1 = vpack.c.bf16 %v5167_v61, %v5135_v59  ;;  %v4069_v2 = vpop.f32.mrb[52].mxu0  ;;  %v14054_v4 = vpack.c.bf16 %v5166_v55, %v5134_v53 }
 0x149   :  { %v4182_v5 = vpop.f32.mrb[52].mxu1  ;;  %v4071_v62 = vpop.f32.mrb[53].mxu0  ;;  %13390 = vmatmul.mubr.msk.f32.gmra.mrb[158].mxu0 %vm5395_vm1, %v16243_v17  ;;  %v14070_v7 = vpack.c.bf16 %v5168_v0, %v5136_v60  ;;  %v5197_v10 = vmax.f32 %v4069_v2, 0.0 }
 0x14a   :  { %v4184_v8 = vpop.f32.mrb[53].mxu1  ;;  %13399 = vmatmul.mubr.msk.f32.gmra.mrb[158].mxu1 %vm5395_vm1, %v16243_v17  ;;  %14055 = vmatprep.subr.bf16.mxu0 %v14054_v4  ;;  %v5199_v34 = vmax.f32 %v4182_v5, 0.0  ;;  %v5198_v15 = vmax.f32 %v4071_v62, 0.0 }
 0x14b   :  { %14071 = vmatprep.subr.bf16.mxu1 %v14070_v7  ;;  %5767 = vmatprep.mubr.f32.mxu0 %v20112_v3  ;;  %v5200_v20 = vmax.f32 %v4184_v8, 0.0 }
 0x14c   :  { %v4075_v9 = vpop.f32.mrb[54].mxu0  ;;  %5886 = vmatprep.mubr.f32.mxu1 %v20112_v3 }
 0x14d   :  { %v5229_v11 = vmax.f32 %v4075_v9, 0.0  ;;  %v4188_v12 = vpop.f32.mrb[54].mxu1  ;;  %v4077_v13 = vpop.f32.mrb[55].mxu0  ;;  %13391 = vmatmul.mubr.msk.f32.gmra.mrb[160].mxu0 %vm5395_vm1, %v16255_v28 }
 0x14e   :  { %v5231_v16 = vmax.f32 %v4188_v12, 0.0  ;;  %v5230_v18 = vmax.f32 %v4077_v13, 0.0  ;;  %v4190_v19 = vpop.f32.mrb[55].mxu1  ;;  %13400 = vmatmul.mubr.msk.f32.gmra.mrb[160].mxu1 %vm5395_vm1, %v16255_v28  ;;  %5773 = vmatprep.mubr.f32.mxu0 %v20112_v3 }
 0x14f   :  { %v14060_v21 = vpack.c.bf16 %v5229_v11, %v5197_v10  ;;  %v5232_v47 = vmax.f32 %v4190_v19, 0.0  ;;  %5892 = vmatprep.mubr.f32.mxu1 %v20112_v3 }
 0x150   :  { %v14076_v22 = vpack.c.bf16 %v5231_v16, %v5199_v34  ;;  %v4081_v24 = vpop.f32.mrb[56].mxu0  ;;  %v14058_v25 = vpack.c.bf16 %v5230_v18, %v5198_v15 }
 0x151   :  { %v4194_v26 = vpop.f32.mrb[56].mxu1  ;;  %v4083_v27 = vpop.f32.mrb[57].mxu0  ;;  %13392 = vmatmul.mubr.msk.f32.gmra.mrb[162].mxu0 %vm5395_vm1, %v16265_v40  ;;  %v14074_v29 = vpack.c.bf16 %v5232_v47, %v5200_v20  ;;  %v5261_v32 = vmax.f32 %v4081_v24, 0.0 }
 0x152   :  { %v4196_v30 = vpop.f32.mrb[57].mxu1  ;;  %13401 = vmatmul.mubr.msk.f32.gmra.mrb[162].mxu1 %vm5395_vm1, %v16265_v40  ;;  %5963 = vmatprep.mubr.f32.mxu0 %v20112_v3  ;;  %v5263_v37 = vmax.f32 %v4194_v26, 0.0  ;;  %v5262_v38 = vmax.f32 %v4083_v27, 0.0 }
 0x153   :  { %6082 = vmatprep.mubr.f32.mxu1 %v20112_v3  ;;  %v5264_v42 = vmax.f32 %v4196_v30, 0.0 }
 0x154   :  { %v4087_v31 = vpop.f32.mrb[58].mxu0 }
 0x155   :  { %v5293_v57 = vmax.f32 %v4087_v31, 0.0  ;;  %v4200_v35 = vpop.f32.mrb[58].mxu1  ;;  %v4089_v36 = vpop.f32.mrb[59].mxu0  ;;  %13402 = vmatmul.mubr.msk.f32.vlgmr.msra.gmra.mrb[164].mxu0 %vm5395_vm1, %v16177_v14 }
 0x156   :  { %v5295_v39 = vmax.f32 %v4200_v35, 0.0  ;;  %v5294_v58 = vmax.f32 %v4089_v36, 0.0  ;;  %v4202_v41 = vpop.f32.mrb[59].mxu1  ;;  %13411 = vmatmul.mubr.msk.f32.vlgmr.msra.gmra.mrb[164].mxu1 %vm5395_vm1, %v16177_v14  ;;  %14057 = vmatpush1.bf16.msra.mxu0 %v14056_v63 }
 0x157   :  { %v14064_v43 = vpack.c.bf16 %v5293_v57, %v5261_v32  ;;  %v5296_v45 = vmax.f32 %v4202_v41, 0.0  ;;  %14073 = vmatpush1.bf16.msra.mxu1 %v14072_v1  ;;  %14059 = vmatprep.subr.bf16.mxu0 %v14058_v25 }
 0x158   :  { %v14080_v46 = vpack.c.bf16 %v5295_v39, %v5263_v37  ;;  %14075 = vmatprep.subr.bf16.mxu1 %v14074_v29  ;;  %v4093_v48 = vpop.f32.mrb[60].mxu0  ;;  %5969 = vmatprep.mubr.f32.mxu0 %v20112_v3  ;;  %v14062_v49 = vpack.c.bf16 %v5294_v58, %v5262_v38 }
 0x159   :  { %v4206_v50 = vpop.f32.mrb[60].mxu1  ;;  %6088 = vmatprep.mubr.f32.mxu1 %v20112_v3  ;;  %v4095_v51 = vpop.f32.mrb[61].mxu0  ;;  %13403 = vmatmul.mubr.msk.f32.gmra.mrb[166].mxu0 %vm5395_vm1, %v16188_v23  ;;  %v14078_v52 = vpack.c.bf16 %v5296_v45, %v5264_v42  ;;  %v5325_v61 = vmax.f32 %v4093_v48, 0.0 }
 0x15a   :  { %v4208_v59 = vpop.f32.mrb[61].mxu1  ;;  %13412 = vmatmul.mubr.msk.f32.gmra.mrb[166].mxu1 %vm5395_vm1, %v16188_v23  ;;  %14061 = vmatpush1.bf16.msra.mxu0 %v14060_v21  ;;  %v5327_v63 = vmax.f32 %v4206_v50, 0.0  ;;  %v5326_v0 = vmax.f32 %v4095_v51, 0.0 }
 0x15b   :  { %14077 = vmatpush1.bf16.msra.mxu1 %v14076_v22  ;;  %14063 = vmatprep.subr.bf16.mxu0 %v14062_v49  ;;  %v5328_v5 = vmax.f32 %v4208_v59, 0.0 }
 0x15c   :  { %14079 = vmatprep.subr.bf16.mxu1 %v14078_v52  ;;  %v4099_v53 = vpop.f32.mrb[62].mxu0  ;;  %5975 = vmatprep.mubr.f32.mxu0 %v20112_v3 }
 0x15d   :  { %v5357_v55 = vmax.f32 %v4099_v53, 0.0  ;;  %v4212_v56 = vpop.f32.mrb[62].mxu1  ;;  %6094 = vmatprep.mubr.f32.mxu1 %v20112_v3  ;;  %v4101_v60 = vpop.f32.mrb[63].mxu0  ;;  %13404 = vmatmul.mubr.msk.f32.gmra.mrb[168].mxu0 %vm5395_vm1, %v16199_v33 }
 0x15e   :  { %v5359_v1 = vmax.f32 %v4212_v56, 0.0  ;;  %v5358_v2 = vmax.f32 %v4101_v60, 0.0  ;;  %v4214_v4 = vpop.f32.mrb[63].mxu1  ;;  %13413 = vmatmul.mubr.msk.f32.gmra.mrb[168].mxu1 %vm5395_vm1, %v16199_v33  ;;  %14065 = vmatpush1.bf16.msra.mxu0 %v14064_v43 }
 0x15f   :  { %v14068_v62 = vpack.c.bf16 %v5357_v55, %v5325_v61  ;;  %v5360_v7 = vmax.f32 %v4214_v4, 0.0  ;;  %14081 = vmatpush1.bf16.msra.mxu1 %v14080_v46  ;;  %5981 = vmatprep.mubr.f32.mxu0 %v20112_v3 }
 0x160   :  { %v14084_v8 = vpack.c.bf16 %v5359_v1, %v5327_v63  ;;  %v4283_v9 = vpop.f32.mrb[64].mxu0  ;;  %6100 = vmatprep.mubr.f32.mxu1 %v20112_v3  ;;  %v14066_v10 = vpack.c.bf16 %v5358_v2, %v5326_v0 }
 0x161   :  { %v4396_v11 = vpop.f32.mrb[64].mxu1  ;;  %v4285_v12 = vpop.f32.mrb[65].mxu0  ;;  %13405 = vmatmul.mubr.msk.f32.gmra.mrb[170].mxu0 %vm5395_vm1, %v16211_v44  ;;  %v14082_v13 = vpack.c.bf16 %v5360_v7, %v5328_v5  ;;  %v5137_v16 = vmax.f32 %v4283_v9, 0.0 }
 0x162   :  { %v4398_v34 = vpop.f32.mrb[65].mxu1  ;;  %13414 = vmatmul.mubr.msk.f32.gmra.mrb[170].mxu1 %vm5395_vm1, %v16211_v44  ;;  %14067 = vmatprep.subr.bf16.mxu0 %v14066_v10  ;;  %v5139_v21 = vmax.f32 %v4396_v11, 0.0  ;;  %v5138_v47 = vmax.f32 %v4285_v12, 0.0 }
 0x163   :  { %14083 = vmatprep.subr.bf16.mxu1 %v14082_v13  ;;  %14069 = vmatpush1.bf16.msra.mxu0 %v14068_v62  ;;  %v5140_v26 = vmax.f32 %v4398_v34, 0.0 }
 0x164   :  { %14085 = vmatpush1.bf16.msra.mxu1 %v14084_v8  ;;  %v4289_v15 = vpop.f32.mrb[66].mxu0  ;;  %5987 = vmatprep.mubr.f32.mxu0 %v20112_v3 }
 0x165   :  { %v5169_v18 = vmax.f32 %v4289_v15, 0.0  ;;  %v4402_v19 = vpop.f32.mrb[66].mxu1  ;;  %6106 = vmatprep.mubr.f32.mxu1 %v20112_v3  ;;  %v4291_v20 = vpop.f32.mrb[67].mxu0  ;;  %13406 = vmatmul.mubr.msk.f32.gmra.mrb[172].mxu0 %vm5395_vm1, %v16221_v54 }
 0x166   :  { %v5171_v22 = vmax.f32 %v4402_v19, 0.0  ;;  %v5170_v24 = vmax.f32 %v4291_v20, 0.0  ;;  %v4404_v25 = vpop.f32.mrb[67].mxu1  ;;  %13415 = vmatmul.mubr.msk.f32.gmra.mrb[172].mxu1 %vm5395_vm1, %v16221_v54  ;;  %5993 = vmatprep.mubr.f32.mxu0 %v20112_v3 }
 0x167   :  { %v16358_v27 = vpack.c.bf16 %v5169_v18, %v5137_v16  ;;  %v5172_v29 = vmax.f32 %v4404_v25, 0.0  ;;  %6112 = vmatprep.mubr.f32.mxu1 %v20112_v3 }
 0x168   :  { %v16361_v30 = vpack.c.bf16 %v5171_v22, %v5139_v21  ;;  %v4295_v31 = vpop.f32.mrb[68].mxu0  ;;  %v14086_v32 = vpack.c.bf16 %v5170_v24, %v5138_v47 }
 0x169   :  { %v4408_v57 = vpop.f32.mrb[68].mxu1  ;;  %v4297_v35 = vpop.f32.mrb[69].mxu0  ;;  %13407 = vmatmul.mubr.msk.f32.gmra.mrb[174].mxu0 %vm5395_vm1, %v16233_v6  ;;  %v14102_v36 = vpack.c.bf16 %v5172_v29, %v5140_v26  ;;  %v5201_v39 = vmax.f32 %v4295_v31, 0.0 }
 0x16a   :  { %v4410_v37 = vpop.f32.mrb[69].mxu1  ;;  %13416 = vmatmul.mubr.msk.f32.gmra.mrb[174].mxu1 %vm5395_vm1, %v16233_v6  ;;  %14087 = vmatprep.subr.bf16.mxu0 %v14086_v32  ;;  %v5203_v43 = vmax.f32 %v4408_v57, 0.0  ;;  %v5202_v45 = vmax.f32 %v4297_v35, 0.0 }
 0x16b   :  { %14103 = vmatprep.subr.bf16.mxu1 %v14102_v36  ;;  %5999 = vmatprep.mubr.f32.mxu0 %v20112_v3  ;;  %v5204_v50 = vmax.f32 %v4410_v37, 0.0 }
 0x16c   :  { %v4301_v38 = vpop.f32.mrb[70].mxu0  ;;  %6118 = vmatprep.mubr.f32.mxu1 %v20112_v3 }
 0x16d   :  { %v5233_v58 = vmax.f32 %v4301_v38, 0.0  ;;  %v4414_v41 = vpop.f32.mrb[70].mxu1  ;;  %v4303_v42 = vpop.f32.mrb[71].mxu0  ;;  %13408 = vmatmul.mubr.msk.f32.gmra.mrb[176].mxu0 %vm5395_vm1, %v16243_v17 }
 0x16e   :  { %v5235_v46 = vmax.f32 %v4414_v41, 0.0  ;;  %v5234_v48 = vmax.f32 %v4303_v42, 0.0  ;;  %v4416_v49 = vpop.f32.mrb[71].mxu1  ;;  %13417 = vmatmul.mubr.msk.f32.gmra.mrb[176].mxu1 %vm5395_vm1, %v16243_v17  ;;  %6005 = vmatprep.mubr.f32.mxu0 %v20112_v3 }
 0x16f   :  { %v14092_v51 = vpack.c.bf16 %v5233_v58, %v5201_v39  ;;  %v5236_v52 = vmax.f32 %v4416_v49, 0.0  ;;  %6124 = vmatprep.mubr.f32.mxu1 %v20112_v3 }
 0x170   :  { %v14108_v59 = vpack.c.bf16 %v5235_v46, %v5203_v43  ;;  %v4307_v53 = vpop.f32.mrb[72].mxu0  ;;  %v14090_v61 = vpack.c.bf16 %v5234_v48, %v5202_v45  ;;  %v16409_v46 = vld [vmem:[%s20107_s1] ss:$4 sm:$0xff]  ;;  %v16414_v48 = vld [vmem:[%s20107_s1 + $0x1] ss:$4 sm:$0xff] }
 0x171   :  { %v4420_v55 = vpop.f32.mrb[72].mxu1  ;;  %v4309_v56 = vpop.f32.mrb[73].mxu0  ;;  %13409 = vmatmul.mubr.msk.f32.gmra.mrb[178].mxu0 %vm5395_vm1, %v16255_v28  ;;  %v14106_v60 = vpack.c.bf16 %v5236_v52, %v5204_v50  ;;  %v5265_v1 = vmax.f32 %v4307_v53, 0.0  ;;  %v49_v52 = vmul.f32 %v16409_v46, %v16409_v46 }
 0x172   :  { %v4422_v63 = vpop.f32.mrb[73].mxu1  ;;  %13418 = vmatmul.mubr.msk.f32.gmra.mrb[178].mxu1 %vm5395_vm1, %v16255_v28  ;;  %6011 = vmatprep.mubr.f32.mxu0 %v20112_v3  ;;  %v5267_v62 = vmax.f32 %v4420_v55, 0.0  ;;  %v5266_v7 = vmax.f32 %v4309_v56, 0.0 }
 0x173   :  { %6130 = vmatprep.mubr.f32.mxu1 %v20112_v3  ;;  %v5268_v11 = vmax.f32 %v4422_v63, 0.0 }
 0x174   :  { %v4313_v0 = vpop.f32.mrb[74].mxu0 }
 0x175   :  { %v5297_v2 = vmax.f32 %v4313_v0, 0.0  ;;  %v4426_v4 = vpop.f32.mrb[74].mxu1  ;;  %v4315_v5 = vpop.f32.mrb[75].mxu0  ;;  %13410 = vmatmul.mubr.msk.f32.gmra.mrb[180].mxu0 %vm5395_vm1, %v16265_v40 }
 0x176   :  { %v5299_v8 = vmax.f32 %v4426_v4, 0.0  ;;  %v5298_v9 = vmax.f32 %v4315_v5, 0.0  ;;  %v4428_v10 = vpop.f32.mrb[75].mxu1  ;;  %13419 = vmatmul.mubr.msk.f32.gmra.mrb[180].mxu1 %vm5395_vm1, %v16265_v40  ;;  %6201 = vmatprep.mubr.f32.mxu0 %v20112_v3 }
 0x177   :  { %v14096_v12 = vpack.c.bf16 %v5297_v2, %v5265_v1  ;;  %v5300_v13 = vmax.f32 %v4428_v10, 0.0  ;;  %6320 = vmatprep.mubr.f32.mxu1 %v20112_v3 }
 0x178   :  { %v14112_v34 = vpack.c.bf16 %v5299_v8, %v5267_v62  ;;  %v4319_v15 = vpop.f32.mrb[76].mxu0  ;;  %v14094_v16 = vpack.c.bf16 %v5298_v9, %v5266_v7 }
 0x179   :  { %v4432_v18 = vpop.f32.mrb[76].mxu1  ;;  %v4321_v19 = vpop.f32.mrb[77].mxu0  ;;  %13420 = vmatmul.mubr.msk.f32.vlgmr.msra.gmra.mrb[182].mxu0 %vm5395_vm1, %v16177_v14  ;;  %v14110_v20 = vpack.c.bf16 %v5300_v13, %v5268_v11  ;;  %v5329_v22 = vmax.f32 %v4319_v15, 0.0 }
 0x17a   :  { %v4434_v21 = vpop.f32.mrb[77].mxu1  ;;  %13429 = vmatmul.mubr.msk.f32.vlgmr.msra.gmra.mrb[182].mxu1 %vm5395_vm1, %v16177_v14  ;;  %14089 = vmatpush1.bf16.msra.mxu0 %v16358_v27  ;;  %v5331_v29 = vmax.f32 %v4432_v18, 0.0  ;;  %v5330_v14 = vmax.f32 %v4321_v19, 0.0 }
 0x17b   :  { %14105 = vmatpush1.bf16.msra.mxu1 %v16361_v30  ;;  %14091 = vmatprep.subr.bf16.mxu0 %v14090_v61  ;;  %v5332_v30 = vmax.f32 %v4434_v21, 0.0 }
 0x17c   :  { %14107 = vmatprep.subr.bf16.mxu1 %v14106_v60  ;;  %v4325_v47 = vpop.f32.mrb[78].mxu0  ;;  %6207 = vmatprep.mubr.f32.mxu0 %v20112_v3  ;;  %v16428_v60 = vld [vmem:[%s20107_s1 + $0x2] ss:$4 sm:$0xff] }
 0x17d   :  { %v5361_v24 = vmax.f32 %v4325_v47, 0.0  ;;  %v4438_v25 = vpop.f32.mrb[78].mxu1  ;;  %6326 = vmatprep.mubr.f32.mxu1 %v20112_v3  ;;  %v4327_v26 = vpop.f32.mrb[79].mxu0  ;;  %13421 = vmatmul.mubr.msk.f32.gmra.mrb[184].mxu0 %vm5395_vm1, %v16188_v23  ;;  %v61_v2 = vmul.f32 %v16428_v60, %v16428_v60 }
 0x17e   :  { %v5363_v31 = vmax.f32 %v4438_v25, 0.0  ;;  %v5362_v27 = vmax.f32 %v4327_v26, 0.0  ;;  %v4440_v32 = vpop.f32.mrb[79].mxu1  ;;  %13430 = vmatmul.mubr.msk.f32.gmra.mrb[184].mxu1 %vm5395_vm1, %v16188_v23  ;;  %14093 = vmatpush1.bf16.msra.mxu0 %v14092_v51 }
 0x17f   :  { %v14100_v57 = vpack.c.bf16 %v5361_v24, %v5329_v22  ;;  %v5364_v35 = vmax.f32 %v4440_v32, 0.0  ;;  %14109 = vmatpush1.bf16.msra.mxu1 %v14108_v59  ;;  %14095 = vmatprep.subr.bf16.mxu0 %v14094_v16  ;;  %v53_v59 = vmul.f32 %v16414_v48, %v16414_v48  ;;  %v241_v32 = vlaneseq }
 0x180   :  { %v14116_v36 = vpack.c.bf16 %v5363_v31, %v5331_v29  ;;  %14111 = vmatprep.subr.bf16.mxu1 %v14110_v20  ;;  %v4509_v37 = vpop.f32.mrb[80].mxu0  ;;  %6213 = vmatprep.mubr.f32.mxu0 %v20112_v3  ;;  %v14098_v38 = vpack.c.bf16 %v5362_v27, %v5330_v14 }
 0x181   :  { %v4622_v39 = vpop.f32.mrb[80].mxu1  ;;  %6332 = vmatprep.mubr.f32.mxu1 %v20112_v3  ;;  %v4511_v58 = vpop.f32.mrb[81].mxu0  ;;  %13422 = vmatmul.mubr.msk.f32.gmra.mrb[186].mxu0 %vm5395_vm1, %v16199_v33  ;;  %v14114_v23 = vpack.c.bf16 %v5364_v35, %v5332_v30  ;;  %v5141_v42 = vmax.f32 %v4509_v37, 0.0  ;;  %v57_v1 = vadd.f32 %v53_v59, %v49_v52  ;;  %v16480_v52 = vshrl.u32 %v241_v32, 7 }
 0x182   :  { %v4624_v41 = vpop.f32.mrb[81].mxu1  ;;  %13431 = vmatmul.mubr.msk.f32.gmra.mrb[186].mxu1 %vm5395_vm1, %v16199_v33  ;;  %14097 = vmatpush1.bf16.msra.mxu0 %v14096_v12  ;;  %v5143_v43 = vmax.f32 %v4622_v39, 0.0  ;;  %v5142_v33 = vmax.f32 %v4511_v58, 0.0 }
 0x183   :  { %14113 = vmatpush1.bf16.msra.mxu1 %v14112_v34  ;;  %14099 = vmatprep.subr.bf16.mxu0 %v14098_v38  ;;  %v5144_v53 = vmax.f32 %v4624_v41, 0.0  ;;  %v65_v9 = vadd.f32 %v61_v2, %v57_v1 }
 0x184   :  { %14115 = vmatprep.subr.bf16.mxu1 %v14114_v23  ;;  %v4515_v45 = vpop.f32.mrb[82].mxu0  ;;  %6219 = vmatprep.mubr.f32.mxu0 %v20112_v3 }
 0x185   :  { %v5173_v49 = vmax.f32 %v4515_v45, 0.0  ;;  %v4628_v50 = vpop.f32.mrb[82].mxu1  ;;  %6338 = vmatprep.mubr.f32.mxu1 %v20112_v3  ;;  %v4517_v51 = vpop.f32.mrb[83].mxu0  ;;  %13423 = vmatmul.mubr.msk.f32.gmra.mrb[188].mxu0 %vm5395_vm1, %v16211_v44  ;;  %15079 = vrsqrt.f32 %v65_v9 }
 0x186   :  { %v5175_v61 = vmax.f32 %v4628_v50, 0.0  ;;  %v5174_v55 = vmax.f32 %v4517_v51, 0.0  ;;  %v4630_v56 = vpop.f32.mrb[83].mxu1  ;;  %13432 = vmatmul.mubr.msk.f32.gmra.mrb[188].mxu1 %vm5395_vm1, %v16211_v44  ;;  %14101 = vmatpush1.bf16.msra.mxu0 %v14100_v57 }
 0x187   :  { %v16430_v63 = vpack.c.bf16 %v5173_v49, %v5141_v42  ;;  %v5176_v0 = vmax.f32 %v4630_v56, 0.0  ;;  %14117 = vmatpush1.bf16.msra.mxu1 %v14116_v36  ;;  %6225 = vmatprep.mubr.f32.mxu0 %v20112_v3 }
 0x188   :  { %v16435_v4 = vpack.c.bf16 %v5175_v61, %v5143_v43  ;;  %v4521_v5 = vpop.f32.mrb[84].mxu0  ;;  %6344 = vmatprep.mubr.f32.mxu1 %v20112_v3  ;;  %v14118_v44 = vpack.c.bf16 %v5174_v55, %v5142_v33 }
 0x189   :  { %v4634_v62 = vpop.f32.mrb[84].mxu1  ;;  %v4523_v7 = vpop.f32.mrb[85].mxu0  ;;  %13424 = vmatmul.mubr.msk.f32.gmra.mrb[190].mxu0 %vm5395_vm1, %v16221_v54  ;;  %v14134_v8 = vpack.c.bf16 %v5176_v0, %v5144_v53  ;;  %v5205_v12 = vmax.f32 %v4521_v5, 0.0  ;;  %v16505_v5 = vld [vmem:[%s20106_s4] sm:$0xff] }
 0x18a   :  { %v4636_v10 = vpop.f32.mrb[85].mxu1  ;;  %13433 = vmatmul.mubr.msk.f32.gmra.mrb[190].mxu1 %vm5395_vm1, %v16221_v54  ;;  %14119 = vmatprep.subr.bf16.mxu0 %v14118_v44  ;;  %v5207_v16 = vmax.f32 %v4634_v62, 0.0  ;;  %v5206_v18 = vmax.f32 %v4523_v7, 0.0  ;;  %20135 = vst [vmem:[#allocation3_spill] sm:$0xff] %v16505_v5 }
 0x18b   :  { %14135 = vmatprep.subr.bf16.mxu1 %v14134_v8  ;;  %6231 = vmatprep.mubr.f32.mxu0 %v20112_v3  ;;  %v5208_v21 = vmax.f32 %v4636_v10, 0.0 }
 0x18c   :  { %v4527_v11 = vpop.f32.mrb[86].mxu0  ;;  %6350 = vmatprep.mubr.f32.mxu1 %v20112_v3 }
 0x18d   :  { %v5237_v13 = vmax.f32 %v4527_v11, 0.0  ;;  %v4640_v34 = vpop.f32.mrb[86].mxu1  ;;  %v4529_v15 = vpop.f32.mrb[87].mxu0  ;;  %13425 = vmatmul.mubr.msk.f32.gmra.mrb[192].mxu0 %vm5395_vm1, %v16233_v6 }
 0x18e   :  { %v5239_v19 = vmax.f32 %v4640_v34, 0.0  ;;  %v5238_v20 = vmax.f32 %v4529_v15, 0.0  ;;  %v4642_v54 = vpop.f32.mrb[87].mxu1  ;;  %13434 = vmatmul.mubr.msk.f32.gmra.mrb[192].mxu1 %vm5395_vm1, %v16233_v6  ;;  %6237 = vmatprep.mubr.f32.mxu0 %v20112_v3 }
 0x18f   :  { %v16449_v47 = vpack.c.bf16 %v5237_v13, %v5205_v12  ;;  %v5240_v22 = vmax.f32 %v4642_v54, 0.0  ;;  %6356 = vmatprep.mubr.f32.mxu1 %v20112_v3  ;;  %v15080_v30 = vpop.eup %15079 }
 0x190   :  { %v16452_v24 = vpack.c.bf16 %v5239_v19, %v5207_v16  ;;  %v4533_v25 = vpop.f32.mrb[88].mxu0  ;;  %v16454_v26 = vpack.c.bf16 %v5238_v20, %v5206_v18  ;;  %v16473_v45 = vmul.f32 %v15080_v30, %v16409_v46  ;;  %v16478_v51 = vmul.f32 %v15080_v30, %v16414_v48 }
 0x191   :  { %v4646_v29 = vpop.f32.mrb[88].mxu1  ;;  %v4535_v14 = vpop.f32.mrb[89].mxu0  ;;  %13426 = vmatmul.mubr.msk.f32.gmra.mrb[194].mxu0 %vm5395_vm1, %v16243_v17  ;;  %v16458_v31 = vpack.c.bf16 %v5240_v22, %v5208_v21  ;;  %v5269_v57 = vmax.f32 %v4533_v25, 0.0  ;;  %v16485_v61 = vmul.f32 %v15080_v30, %v16428_v60  ;;  %v16500_v60 = vsub.s32 1, %v16480_v52  ;;  %v16540_v21 = vld [vmem:[%s20106_s4 + $0x8] sm:$0xff] }
 0x192   :  { %v4648_v6 = vpop.f32.mrb[89].mxu1  ;;  %13435 = vmatmul.mubr.msk.f32.gmra.mrb[194].mxu1 %vm5395_vm1, %v16243_v17  ;;  %6243 = vmatprep.mubr.f32.mxu0 %v20112_v3  ;;  %v5271_v38 = vmax.f32 %v4646_v29, 0.0  ;;  %v5270_v39 = vmax.f32 %v4535_v14, 0.0  ;;  %v16493_v48 = vmul.f32 %v16473_v45, %v16473_v45  ;;  %v16497_v56 = vmul.f32 %v16478_v51, %v16478_v51 }
 0x193   :  { %6362 = vmatprep.mubr.f32.mxu1 %v20112_v3  ;;  %v5272_v17 = vmax.f32 %v4648_v6, 0.0  ;;  %20134 = vst [vmem:[#allocation2_spill] sm:$0xff] %v16500_v60  ;;  %v16511_v44 = vmul.f32 %v16485_v61, %v16485_v61  ;;  %v16515_v62 = vmul.f32 %v16478_v51, %v16473_v45  ;;  %v16552_v29 = vmul.f32 0.48860252, %v16485_v61 }
 0x194   :  { %v4539_v27 = vpop.f32.mrb[90].mxu0  ;;  %v153_v15 = vmul.f32 -3.0, %v16493_v48  ;;  %v16534_v20 = vsub.f32 %v16493_v48, %v16497_v56  ;;  %v16555_v14 = vmul.f32 -0.48860252, %v16473_v45 }
 0x195   :  { %v5301_v35 = vmax.f32 %v4539_v27, 0.0  ;;  %v4652_v36 = vpop.f32.mrb[90].mxu1  ;;  %v4541_v37 = vpop.f32.mrb[91].mxu0  ;;  %13427 = vmatmul.mubr.msk.f32.gmra.mrb[196].mxu0 %vm5395_vm1, %v16255_v28  ;;  %v16545_v25 = vmul.f32 5.0, %v16511_v44  ;;  %v165_v32 = vmul.f32 2.8906114, %v16515_v62 }
 0x196   :  { %v5303_v58 = vmax.f32 %v4652_v36, 0.0  ;;  %v5302_v23 = vmax.f32 %v4541_v37, 0.0  ;;  %v4654_v41 = vpop.f32.mrb[91].mxu1  ;;  %13436 = vmatmul.mubr.msk.f32.gmra.mrb[196].mxu1 %vm5395_vm1, %v16255_v28  ;;  %6249 = vmatprep.mubr.f32.mxu0 %v20112_v3  ;;  %v157_v6 = vadd.f32 %v153_v15, %v16497_v56  ;;  %v225_v15 = vmul.f32 3.0, %v16497_v56 }
 0x197   :  { %v16469_v42 = vpack.c.bf16 %v5301_v35, %v5269_v57  ;;  %v5304_v43 = vmax.f32 %v4654_v41, 0.0  ;;  %6368 = vmatprep.mubr.f32.mxu1 %v20112_v3 }
 0x198   :  { %v16475_v33 = vpack.c.bf16 %v5303_v58, %v5271_v38  ;;  %v4545_v49 = vpop.f32.mrb[92].mxu0  ;;  %v14126_v50 = vpack.c.bf16 %v5302_v23, %v5270_v39  ;;  %v16574_v39 = vld [vmem:[%s20106_s4 + $0x10] sm:$0xff]  ;;  %v181_v58 = vsub.f32 1.0, %v16545_v25 }
 0x199   :  { %v4658_v28 = vpop.f32.mrb[92].mxu1  ;;  %v4547_v59 = vpop.f32.mrb[93].mxu0  ;;  %13428 = vmatmul.mubr.msk.f32.gmra.mrb[198].mxu0 %vm5395_vm1, %v16265_v40  ;;  %v14142_v53 = vpack.c.bf16 %v5304_v43, %v5272_v17  ;;  %v5333_v0 = vmax.f32 %v4545_v49, 0.0  ;;  %v173_v49 = vmul.f32 0.4570458, %v16478_v51 }
 0x19a   :  { %v4660_v46 = vpop.f32.mrb[93].mxu1  ;;  %13437 = vmatmul.mubr.msk.f32.gmra.mrb[198].mxu1 %vm5395_vm1, %v16265_v40  ;;  %6439 = vmatprep.mubr.f32.mxu0 %v20112_v3  ;;  %v5335_v7 = vmax.f32 %v4658_v28, 0.0  ;;  %v5334_v8 = vmax.f32 %v4547_v59, 0.0 }
 0x19b   :  { %6558 = vmatprep.mubr.f32.mxu1 %v20112_v3  ;;  %v5336_v12 = vmax.f32 %v4660_v46, 0.0 }
 0x19c   :  { %v4551_v55 = vpop.f32.mrb[94].mxu0 }
 0x19d   :  { %v5365_v1 = vmax.f32 %v4551_v55, 0.0  ;;  %v4664_v2 = vpop.f32.mrb[94].mxu1  ;;  %v4553_v40 = vpop.f32.mrb[95].mxu0  ;;  %13438 = vmatmul.mubr.msk.f32.vlgmr.msra.gmra.mrb[200].mxu0 %vm5395_vm1, %v16505_v5 }
 0x19e   :  { %v5367_v9 = vmax.f32 %v4664_v2, 0.0  ;;  %v5366_v10 = vmax.f32 %v4553_v40, 0.0  ;;  %v4666_v11 = vpop.f32.mrb[95].mxu1  ;;  %13447 = vmatmul.mubr.msk.f32.vlgmr.msra.gmra.mrb[200].mxu1 %vm5395_vm1, %v16505_v5  ;;  %14121 = vmatpush1.bf16.msra.mxu0 %v16430_v63  ;;  %v16530_v63 = vmul.f32 -0.48860252, %v16478_v51 }
 0x19f   :  { %v16520_v13 = vpack.c.bf16 %v5365_v1, %v5333_v0  ;;  %v5368_v34 = vmax.f32 %v4666_v11, 0.0  ;;  %14137 = vmatpush1.bf16.msra.mxu1 %v16435_v4  ;;  %14123 = vmatprep.subr.bf16.mxu0 %v16454_v26  ;;  %v105_v11 = vmul.f32 %v16485_v61, %v16473_v45 }
 0x1a0   :  { %v16525_v16 = vpack.c.bf16 %v5367_v9, %v5335_v7  ;;  %14139 = vmatprep.subr.bf16.mxu1 %v16458_v31  ;;  %v4735_v18 = vpop.f32.mrb[96].mxu0  ;;  %6445 = vmatprep.mubr.f32.mxu0 %v20112_v3  ;;  %v14130_v19 = vpack.c.bf16 %v5366_v10, %v5334_v8  ;;  %v149_v31 = vmul.f32 0.5900436, %v16478_v51  ;;  %v248_v30 = vrot.slane %v16530_v63, %v16500_v60 }
 0x1a1   :  { %v4848_v4 = vpop.f32.mrb[96].mxu1  ;;  %6564 = vmatprep.mubr.f32.mxu1 %v20112_v3  ;;  %v4737_v54 = vpop.f32.mrb[97].mxu0  ;;  %13439 = vmatmul.mubr.msk.f32.gmra.mrb[202].mxu0 %vm5395_vm1, %v16540_v21  ;;  %v14146_v22 = vpack.c.bf16 %v5368_v34, %v5336_v12  ;;  %v5145_v57 = vmax.f32 %v4735_v18, 0.0  ;;  %v16602_v7 = vmul.f32 1.0925485, %v16515_v62  ;;  %v16608_v9 = vmul.f32 %v165_v32, %v16485_v61 }
 0x1a2   :  { %v4850_v26 = vpop.f32.mrb[97].mxu1  ;;  %13448 = vmatmul.mubr.msk.f32.gmra.mrb[202].mxu1 %vm5395_vm1, %v16540_v21  ;;  %14125 = vmatpush1.bf16.msra.mxu0 %v16449_v47  ;;  %v16562_v47 = vmul.f32 %v16485_v61, %v16478_v51  ;;  %v5147_v35 = vmax.f32 %v4848_v4, 0.0  ;;  %v5146_v23 = vmax.f32 %v4737_v54, 0.0  ;;  %v13234_v51 = vadd.f32 -3.0, %v16545_v25 }
 0x1a3   :  { %14141 = vmatpush1.bf16.msra.mxu1 %v16452_v24  ;;  %14127 = vmatprep.subr.bf16.mxu0 %v14126_v50  ;;  %v16565_v24 = vmul.f32 0.54627424, %v16534_v20  ;;  %v5148_v50 = vmax.f32 %v4850_v26, 0.0  ;;  %v16605_v8 = vmul.f32 0.9461747, %v16511_v44  ;;  %v16617_v62 = vmul.f32 %v181_v58, %v173_v49 }
 0x1a4   :  { %14143 = vmatprep.subr.bf16.mxu1 %v14142_v53  ;;  %v4741_v27 = vpop.f32.mrb[98].mxu0  ;;  %6451 = vmatprep.mubr.f32.mxu0 %v20112_v3  ;;  %v16586_v53 = vmul.f32 %v157_v6, %v149_v31  ;;  %v201_v44 = vmul.f32 0.4570458, %v16473_v45  ;;  %v209_v12 = vmul.f32 1.4453057, %v16485_v61  ;;  %v221_v34 = vsub.f32 0.0, %v16493_v48 }
 0x1a5   :  { %v5177_v36 = vmax.f32 %v4741_v27, 0.0  ;;  %v4854_v37 = vpop.f32.mrb[98].mxu1  ;;  %6570 = vmatprep.mubr.f32.mxu1 %v20112_v3  ;;  %v4743_v38 = vpop.f32.mrb[99].mxu0  ;;  %13440 = vmatmul.mubr.msk.f32.gmra.mrb[204].mxu0 %vm5395_vm1, %v16574_v39  ;;  %v2699_v48 = vsel %vm2697_vm2, 0.2820948, %v248_v30  ;;  %v16639_v6 = vld [vmem:[%s20106_s4 + $0x20] sm:$0xff]  ;;  %v576_v49 = vrot.slane %v16555_v14, %v16500_v60 }
 0x1a6   :  { %v5179_v41 = vmax.f32 %v4854_v37, 0.0  ;;  %v5178_v17 = vmax.f32 %v4743_v38, 0.0  ;;  %v4856_v43 = vpop.f32.mrb[99].mxu1  ;;  %13449 = vmatmul.mubr.msk.f32.gmra.mrb[204].mxu1 %vm5395_vm1, %v16574_v39  ;;  %14129 = vmatpush1.bf16.msra.mxu0 %v16469_v42  ;;  %v189_v42 = vmul.f32 0.37317634, %v16485_v61  ;;  %v1560_v18 = vrot.slane %v16586_v53, %v16500_v60  ;;  %20137 = vst [vmem:[#allocation5_spill] sm:$0xff] %v16639_v6 }
 0x1a7   :  { %v16583_v28 = vpack.c.bf16 %v5177_v36, %v5145_v57  ;;  %v5180_v59 = vmax.f32 %v4856_v43, 0.0  ;;  %14145 = vmatpush1.bf16.msra.mxu1 %v16475_v33  ;;  %14131 = vmatprep.subr.bf16.mxu0 %v14130_v19  ;;  %v16597_v33 = vld [vmem:[%s20106_s4 + $0x18] sm:$0xff]  ;;  %v217_v61 = vmul.f32 0.5900436, %v16473_v45  ;;  %v1724_v45 = vrot.slane %v16608_v9, %v16500_v60 }
 0x1a8   :  { %v16588_v46 = vpack.c.bf16 %v5179_v41, %v5147_v35  ;;  %14147 = vmatprep.subr.bf16.mxu1 %v14146_v22  ;;  %v4747_v55 = vpop.f32.mrb[100].mxu0  ;;  %6457 = vmatprep.mubr.f32.mxu0 %v20112_v3  ;;  %v14150_v0 = vpack.c.bf16 %v5178_v17, %v5146_v23  ;;  %20136 = vst [vmem:[#allocation4_spill] sm:$0xff] %v16597_v33 }
 0x1a9   :  { %v4860_v1 = vpop.f32.mrb[100].mxu1  ;;  %6576 = vmatprep.mubr.f32.mxu1 %v20112_v3  ;;  %v4749_v2 = vpop.f32.mrb[101].mxu0  ;;  %13441 = vmatmul.mubr.msk.f32.gmra.mrb[206].mxu0 %vm5395_vm1, %v16597_v33  ;;  %v14166_v40 = vpack.c.bf16 %v5180_v59, %v5148_v50  ;;  %v16629_v4 = vmul.f32 %v13234_v51, %v189_v42  ;;  %v5209_v56 = vmax.f32 %v4747_v55, 0.0  ;;  %v229_v23 = vadd.f32 %v225_v15, %v221_v34 }
 0x1aa   :  { %v4862_v10 = vpop.f32.mrb[101].mxu1  ;;  %13450 = vmatmul.mubr.msk.f32.gmra.mrb[206].mxu1 %vm5395_vm1, %v16597_v33  ;;  %14133 = vmatpush1.bf16.msra.mxu0 %v16520_v13  ;;  %v1396_v13 = vrot.slane %v16565_v24, %v16500_v60  ;;  %v5211_v54 = vmax.f32 %v4860_v1, 0.0  ;;  %v5210_v27 = vmax.f32 %v4749_v2, 0.0  ;;  %v1888_v50 = vrot.slane %v16617_v62, %v16500_v60 }
 0x1ab   :  { %14149 = vmatpush1.bf16.msra.mxu1 %v16525_v16  ;;  %14151 = vmatprep.subr.bf16.mxu0 %v14150_v0  ;;  %v412_v16 = vrot.slane %v16552_v29, %v16500_v60  ;;  %v5212_v36 = vmax.f32 %v4862_v10, 0.0  ;;  %v16663_v0 = vld [vmem:[%s20106_s4 + $0x28] sm:$0xff]  ;;  %v16677_v10 = vmul.f32 -1.0925485, %v105_v11  ;;  %v16680_v34 = vsub.s32 3, %v16480_v52 }
 0x1ac   :  { %14167 = vmatprep.subr.bf16.mxu1 %v14166_v40  ;;  %v4753_v19 = vpop.f32.mrb[102].mxu0  ;;  %6463 = vmatprep.mubr.f32.mxu0 %v20112_v3  ;;  %v2929_v35 = vsel %vm2697_vm2, %v1396_v13, %v1560_v18  ;;  %20138 = vst [vmem:[#allocation6_spill] sm:$0xff] %v16663_v0  ;;  %v16675_v40 = vmul.f32 -1.0925485, %v16562_v47  ;;  %v16684_v15 = vadd.f32 -0.31539157, %v16605_v8  ;;  %v16688_v13 = vmul.f32 %v201_v44, %v181_v58 }
 0x1ad   :  { %v5241_v22 = vmax.f32 %v4753_v19, 0.0  ;;  %v4866_v26 = vpop.f32.mrb[102].mxu1  ;;  %6582 = vmatprep.mubr.f32.mxu1 %v20112_v3  ;;  %v4755_v31 = vpop.f32.mrb[103].mxu0  ;;  %13442 = vmatmul.mubr.msk.f32.gmra.mrb[208].mxu0 %vm5395_vm1, %v16639_v6  ;;  %v2732_v51 = vsel %vm2730_vm3, %v2699_v48, %v412_v16  ;;  %v2961_v1 = vsel %vm2730_vm3, %v2929_v35, %v1724_v45  ;;  %20139 = vst [vmem:[#allocation7_spill] sm:$0xff] %v16680_v34 }
 0x1ae   :  { %v5243_v32 = vmax.f32 %v4866_v26, 0.0  ;;  %v5242_v30 = vmax.f32 %v4755_v31, 0.0  ;;  %v4868_v57 = vpop.f32.mrb[103].mxu1  ;;  %13451 = vmatmul.mubr.msk.f32.gmra.mrb[208].mxu1 %vm5395_vm1, %v16639_v6  ;;  %6469 = vmatprep.mubr.f32.mxu0 %v20112_v3  ;;  %v16691_v18 = vmul.f32 %v209_v12, %v16534_v20  ;;  %v16693_v19 = vmul.f32 %v229_v23, %v217_v61  ;;  %v16704_v61 = vld [vmem:[%s20106_s4 + $0x30] sm:$0xff] }
 0x1af   :  { %v16649_v37 = vpack.c.bf16 %v5241_v22, %v5209_v56  ;;  %v5244_v38 = vmax.f32 %v4868_v57, 0.0  ;;  %6588 = vmatprep.mubr.f32.mxu1 %v20112_v3  ;;  %v740_v11 = vrot.slane %v16602_v7, %v16500_v60  ;;  %v2052_v16 = vrot.slane %v16629_v4, %v16500_v60  ;;  %20140 = vst [vmem:[#allocation8_spill] sm:$0xff] %v16704_v61 }
 0x1b0   :  { %v16652_v41 = vpack.c.bf16 %v5243_v32, %v5211_v54  ;;  %v4759_v17 = vpop.f32.mrb[104].mxu0  ;;  %v16654_v43 = vpack.c.bf16 %v5242_v30, %v5210_v27  ;;  %v2765_v48 = vsel %vm2763_vm4, %v2732_v51, %v576_v49  ;;  %v2993_v8 = vsel %vm2763_vm4, %v2961_v1, %v1888_v50 }
 0x1b1   :  { %v4872_v59 = vpop.f32.mrb[104].mxu1  ;;  %v4761_v55 = vpop.f32.mrb[105].mxu0  ;;  %13443 = vmatmul.mubr.msk.f32.gmra.mrb[210].mxu0 %vm5395_vm1, %v16663_v0  ;;  %v16667_v42 = vpack.c.bf16 %v5244_v38, %v5212_v36  ;;  %v5273_v25 = vmax.f32 %v4759_v17, 0.0  ;;  %v256_v45 = vrot.slane %v16530_v63, %v16680_v34  ;;  %v1404_v30 = vrot.slane %v16565_v24, %v16680_v34 }
 0x1b2   :  { %v4874_v2 = vpop.f32.mrb[105].mxu1  ;;  %13452 = vmatmul.mubr.msk.f32.gmra.mrb[210].mxu1 %vm5395_vm1, %v16663_v0  ;;  %6475 = vmatprep.mubr.f32.mxu0 %v20112_v3  ;;  %v5275_v58 = vmax.f32 %v4872_v59, 0.0  ;;  %v5274_v44 = vmax.f32 %v4761_v55, 0.0  ;;  %v1568_v57 = vrot.slane %v16586_v53, %v16680_v34  ;;  %v904_v23 = vrot.slane %v16675_v40, %v16500_v60  ;;  %v16731_v59 = vld [vmem:[%s20106_s4 + $0x38] sm:$0xff] }
 0x1b3   :  { %6594 = vmatprep.mubr.f32.mxu1 %v20112_v3  ;;  %v5276_v54 = vmax.f32 %v4874_v2, 0.0  ;;  %v2216_v17 = vrot.slane %v16688_v13, %v16500_v60  ;;  %20141 = vst [vmem:[#allocation9_spill] sm:$0xff] %v16731_v59  ;;  %v1068_v51 = vrot.slane %v16684_v15, %v16500_v60  ;;  %v2798_v1 = vsel %vm2796_vm5, %v2765_v48, %v740_v11 }
 0x1b4   :  { %v4765_v47 = vpop.f32.mrb[106].mxu0  ;;  %v3025_v2 = vsel %vm2796_vm5, %v2993_v8, %v2052_v16  ;;  %v2380_v11 = vrot.slane %v16691_v18, %v16500_v60  ;;  %v2701_v48 = vsel %vm2697_vm2, 0.2820948, %v256_v45  ;;  %v2931_v8 = vsel %vm2697_vm2, %v1404_v30, %v1568_v57  ;;  %v16769_v45 = vld [vmem:[%s20106_s4 + $0x40] sm:$0x1] }
 0x1b5   :  { %v5305_v56 = vmax.f32 %v4765_v47, 0.0  ;;  %v4878_v20 = vpop.f32.mrb[106].mxu1  ;;  %v4767_v12 = vpop.f32.mrb[107].mxu0  ;;  %13444 = vmatmul.mubr.msk.f32.gmra.mrb[212].mxu0 %vm5395_vm1, %v16704_v61  ;;  %20142 = vst [vmem:[#allocation10_spill] sm:$0xff] %v16769_v45 }
 0x1b6   :  { %v5307_v22 = vmax.f32 %v4878_v20, 0.0  ;;  %v5306_v26 = vmax.f32 %v4767_v12, 0.0  ;;  %v4880_v31 = vpop.f32.mrb[107].mxu1  ;;  %13453 = vmatmul.mubr.msk.f32.gmra.mrb[212].mxu1 %vm5395_vm1, %v16704_v61  ;;  %6481 = vmatprep.mubr.f32.mxu0 %v20112_v3  ;;  %v2831_v12 = vsel %vm2829_vm6, %v2798_v1, %v904_v23 }
 0x1b7   :  { %v16713_v27 = vpack.c.bf16 %v5305_v56, %v5273_v25  ;;  %v5308_v32 = vmax.f32 %v4880_v31, 0.0  ;;  %6600 = vmatprep.mubr.f32.mxu1 %v20112_v3  ;;  %v16751_v56 = vsub.s32 0, %v16480_v52 }
 0x1b8   :  { %v16720_v35 = vpack.c.bf16 %v5307_v22, %v5275_v58  ;;  %v4771_v36 = vpop.f32.mrb[108].mxu0  ;;  %v16722_v38 = vpack.c.bf16 %v5306_v26, %v5274_v44  ;;  %v420_v58 = vrot.slane %v16552_v29, %v16680_v34  ;;  %v1732_v44 = vrot.slane %v16608_v9, %v16680_v34 }
 0x1b9   :  { %v4884_v49 = vpop.f32.mrb[108].mxu1  ;;  %v4773_v50 = vpop.f32.mrb[109].mxu0  ;;  %13445 = vmatmul.mubr.msk.f32.gmra.mrb[214].mxu0 %vm5395_vm1, %v16731_v59  ;;  %v16735_v55 = vpack.c.bf16 %v5308_v32, %v5276_v54  ;;  %v3057_v54 = vsel %vm2829_vm6, %v3025_v2, %v2216_v17  ;;  %v584_v22 = vrot.slane %v16555_v14, %v16680_v34  ;;  %v1896_v26 = vrot.slane %v16617_v62, %v16680_v34 }
 0x1ba   :  { %v4886_v47 = vpop.f32.mrb[109].mxu1  ;;  %13454 = vmatmul.mubr.msk.f32.gmra.mrb[214].mxu1 %vm5395_vm1, %v16731_v59  ;;  %6487 = vmatprep.mubr.f32.mxu0 %v20112_v3  ;;  %v5337_v31 = vmax.f32 %v4771_v36, 0.0  ;;  %v5339_v32 = vmax.f32 %v4884_v49, 0.0  ;;  %v5338_v25 = vmax.f32 %v4773_v50, 0.0  ;;  %v20143_v36 = vmov 0.0  }
 0x1bb   :  { %6606 = vmatprep.mubr.f32.mxu1 %v20112_v3  ;;  %v2734_v17 = vsel %vm2730_vm3, %v2701_v48, %v420_v58  ;;  %v2963_v49 = vsel %vm2730_vm3, %v2931_v8, %v1732_v44  ;;  %v5340_v50 = vmax.f32 %v4886_v47, 0.0  ;;  %v2060_v58 = vrot.slane %v16629_v4, %v16680_v34 }
 0x1bc   :  { %v4777_v20 = vpop.f32.mrb[110].mxu0  ;;  %v2767_v48 = vsel %vm2763_vm4, %v2734_v17, %v584_v22  ;;  %v244_v22 = vrot.slane %v16530_v63, %v16751_v56 }
 0x1bd   :  { %v5369_v3 = vmax.f32 %v4777_v20, 0.0  ;;  %v4890_v16 = vpop.f32.mrb[110].mxu1  ;;  %v4779_v59 = vpop.f32.mrb[111].mxu0  ;;  %13446 = vmatmul.mubr.msk.f32.gmra.mrb[216].mxu0 %vm5395_vm1, %v16769_v45  ;;  %v16782_v20 = vsel %vm2862_vm7, %v2831_v12, %v1068_v51  ;;  %v16797_v51 = vsel %vm2862_vm7, %v3057_v54, %v2380_v11  ;;  %v912_v12 = vrot.slane %v16675_v40, %v16680_v34 }
 0x1be   :  { %v5371_v30 = vmax.f32 %v4890_v16, 0.0  ;;  %v5370_v57 = vmax.f32 %v4779_v59, 0.0  ;;  %v4892_v23 = vpop.f32.mrb[111].mxu1  ;;  %13455 = vmatmul.mubr.msk.f32.gmra.mrb[216].mxu1 %vm5395_vm1, %v16769_v45  ;;  %6677 = vmatprep.mubr.f32.mxu0 %v20143_v36  ;;  %v748_v45 = vrot.slane %v16602_v7, %v16680_v34  ;;  %v2224_v11 = vrot.slane %v16688_v13, %v16680_v34 }
 0x1bf   :  { %v16778_v1 = vpack.c.bf16 %v5369_v3, %v5337_v31  ;;  %v5372_v2 = vmax.f32 %v4892_v23, 0.0  ;;  %6796 = vmatprep.mubr.f32.mxu1 %v20143_v36  ;;  %v1076_v31 = vrot.slane %v16684_v15, %v16680_v34  ;;  %v2388_v54 = vrot.slane %v16691_v18, %v16680_v34 }
 0x1c0   :  { %v16784_v59 = vpack.c.bf16 %v5371_v30, %v5339_v32  ;;  %v4961_v16 = vpop.f32.mrb[112].mxu0  ;;  %v16786_v61 = vpack.c.bf16 %v5370_v57, %v5338_v25  ;;  %v2995_v25 = vsel %vm2763_vm4, %v2963_v49, %v1896_v26  ;;  %v2800_v32 = vsel %vm2796_vm5, %v2767_v48, %v748_v45 }
 0x1c1   :  { %v5074_v47 = vpop.f32.mrb[112].mxu1  ;;  %v4963_v3 = vpop.f32.mrb[113].mxu0  ;;  %13456 = vmatmul.mubr.msk.f32.vlgmr.msra.gmra.mrb[218].mxu0 %vm5395_vm1, %v16505_v5  ;;  %v16794_v44 = vpack.c.bf16 %v5372_v2, %v5340_v50  ;;  %v5149_v30 = vmax.f32 %v4961_v16, 0.0  ;;  %v1392_v45 = vrot.slane %v16565_v24, %v16751_v56  ;;  %v1556_v16 = vrot.slane %v16586_v53, %v16751_v56 }
 0x1c2   :  { %v5076_v8 = vpop.f32.mrb[113].mxu1  ;;  %13465 = vmatmul.mubr.msk.f32.vlgmr.msra.gmra.mrb[218].mxu1 %vm5395_vm1, %v16505_v5  ;;  %14153 = vmatpush1.bf16.msra.mxu0 %v16583_v28  ;;  %v408_v28 = vrot.slane %v16552_v29, %v16751_v56  ;;  %v5151_v57 = vmax.f32 %v5074_v47, 0.0  ;;  %v5150_v23 = vmax.f32 %v4963_v3, 0.0  ;;  %v2698_v48 = vsel %vm2697_vm2, 0.2820948, %v244_v22 }
 0x1c3   :  { %14169 = vmatpush1.bf16.msra.mxu1 %v16588_v46  ;;  %14155 = vmatprep.subr.bf16.mxu0 %v16654_v43  ;;  %v3027_v46 = vsel %vm2796_vm5, %v2995_v25, %v2060_v58  ;;  %v572_v43 = vrot.slane %v16555_v14, %v16751_v56  ;;  %v5152_v58 = vmax.f32 %v5076_v8, 0.0  ;;  %v1720_v22 = vrot.slane %v16608_v9, %v16751_v56 }
 0x1c4   :  { %14171 = vmatprep.subr.bf16.mxu1 %v16667_v42  ;;  %v4967_v26 = vpop.f32.mrb[114].mxu0  ;;  %6683 = vmatprep.mubr.f32.mxu0 %v20143_v36 }
 0x1c5   :  { %v5181_v17 = vmax.f32 %v4967_v26, 0.0  ;;  %v5080_v49 = vpop.f32.mrb[114].mxu1  ;;  %6802 = vmatprep.mubr.f32.mxu1 %v20143_v36  ;;  %v4969_v50 = vpop.f32.mrb[115].mxu0  ;;  %13457 = vmatmul.mubr.msk.f32.gmra.mrb[220].mxu0 %vm5395_vm1, %v16540_v21 }
 0x1c6   :  { %v5183_v42 = vmax.f32 %v5080_v49, 0.0  ;;  %v5182_v2 = vmax.f32 %v4969_v50, 0.0  ;;  %v5082_v5 = vpop.f32.mrb[115].mxu1  ;;  %13466 = vmatmul.mubr.msk.f32.gmra.mrb[220].mxu1 %vm5395_vm1, %v16540_v21  ;;  %14157 = vmatpush1.bf16.msra.mxu0 %v16649_v37  ;;  %v2833_v49 = vsel %vm2829_vm6, %v2800_v32, %v912_v12  ;;  %v1240_v12 = vrot.slane %v16677_v10, %v16680_v34 }
 0x1c7   :  { %v16834_v47 = vpack.c.bf16 %v5181_v17, %v5149_v30  ;;  %v5184_v3 = vmax.f32 %v5082_v5, 0.0  ;;  %14173 = vmatpush1.bf16.msra.mxu1 %v16652_v41  ;;  %14159 = vmatprep.subr.bf16.mxu0 %v16722_v38  ;;  %v3059_v38 = vsel %vm2829_vm6, %v3027_v46, %v2224_v11  ;;  %v2731_v32 = vsel %vm2730_vm3, %v2698_v48, %v408_v28 }
 0x1c8   :  { %v16839_v25 = vpack.c.bf16 %v5183_v42, %v5151_v57  ;;  %14175 = vmatprep.subr.bf16.mxu1 %v16735_v55  ;;  %v4973_v37 = vpop.f32.mrb[116].mxu0  ;;  %6689 = vmatprep.mubr.f32.mxu0 %v20143_v36  ;;  %v14182_v26 = vpack.c.bf16 %v5182_v2, %v5150_v23  ;;  %v2928_v30 = vsel %vm2697_vm2, %v1392_v45, %v1556_v16  ;;  %v16872_v23 = vsub.s32 2, %v16480_v52 }
 0x1c9   :  { %v5086_v8 = vpop.f32.mrb[116].mxu1  ;;  %6808 = vmatprep.mubr.f32.mxu1 %v20143_v36  ;;  %v4975_v5 = vpop.f32.mrb[117].mxu0  ;;  %13458 = vmatmul.mubr.msk.f32.gmra.mrb[222].mxu0 %vm5395_vm1, %v16574_v39  ;;  %v14198_v41 = vpack.c.bf16 %v5184_v3, %v5152_v58  ;;  %v2552_v11 = vrot.slane %v16693_v19, %v16680_v34  ;;  %v2866_v46 = vsel %vm2862_vm7, %v2833_v49, %v1076_v31  ;;  %v5213_v31 = vmax.f32 %v4973_v37, 0.0 }
 0x1ca   :  { %v5088_v55 = vpop.f32.mrb[117].mxu1  ;;  %13467 = vmatmul.mubr.msk.f32.gmra.mrb[222].mxu1 %vm5395_vm1, %v16574_v39  ;;  %14161 = vmatpush1.bf16.msra.mxu0 %v16713_v27  ;;  %v736_v27 = vrot.slane %v16602_v7, %v16751_v56  ;;  %v3091_v28 = vsel %vm2862_vm7, %v3059_v38, %v2388_v54  ;;  %v2764_v54 = vsel %vm2763_vm4, %v2731_v32, %v572_v43  ;;  %v5215_v2 = vmax.f32 %v5086_v8, 0.0 }
 0x1cb   :  { %14177 = vmatpush1.bf16.msra.mxu1 %v16720_v35  ;;  %14163 = vmatprep.subr.bf16.mxu0 %v16786_v61  ;;  %v900_v35 = vrot.slane %v16675_v40, %v16751_v56  ;;  %v1884_v61 = vrot.slane %v16617_v62, %v16751_v56  ;;  %v2960_v42 = vsel %vm2730_vm3, %v2928_v30, %v1720_v22  ;;  %v5214_v45 = vmax.f32 %v4975_v5, 0.0 }
 0x1cc   :  { %14179 = vmatprep.subr.bf16.mxu1 %v16794_v44  ;;  %v4979_v57 = vpop.f32.mrb[118].mxu0  ;;  %6695 = vmatprep.mubr.f32.mxu0 %v20143_v36  ;;  %v5216_v48 = vmax.f32 %v5088_v55, 0.0  ;;  %v2048_v43 = vrot.slane %v16629_v4, %v16751_v56  ;;  %v20144_v30 = vrot.slane %v16677_v10, %v16500_v60 }
 0x1cd   :  { %v5245_v17 = vmax.f32 %v4979_v57, 0.0  ;;  %v5092_v50 = vpop.f32.mrb[118].mxu1  ;;  %6814 = vmatprep.mubr.f32.mxu1 %v20143_v36  ;;  %v4981_v44 = vpop.f32.mrb[119].mxu0  ;;  %13459 = vmatmul.mubr.msk.f32.gmra.mrb[224].mxu0 %vm5395_vm1, %v16597_v33  ;;  %v20145_v57 = vrot.slane %v16693_v19, %v16500_v60 }
 0x1ce   :  { %v5247_v16 = vmax.f32 %v5092_v50, 0.0  ;;  %v5246_v58 = vmax.f32 %v4981_v44, 0.0  ;;  %v5094_v3 = vpop.f32.mrb[119].mxu1  ;;  %13468 = vmatmul.mubr.msk.f32.gmra.mrb[224].mxu1 %vm5395_vm1, %v16597_v33  ;;  %14165 = vmatpush1.bf16.msra.mxu0 %v16778_v1  ;;  %v2797_v1 = vsel %vm2796_vm5, %v2764_v54, %v736_v27  ;;  %v16909_v27 = vsel %vm2895_vm8, %v16782_v20, %v20144_v30 }
 0x1cf   :  { %v16882_v37 = vpack.c.bf16 %v5245_v17, %v5213_v31  ;;  %v5248_v49 = vmax.f32 %v5094_v3, 0.0  ;;  %14181 = vmatpush1.bf16.msra.mxu1 %v16784_v59  ;;  %14183 = vmatprep.subr.bf16.mxu0 %v14182_v26  ;;  %v2992_v26 = vsel %vm2763_vm4, %v2960_v42, %v1884_v61  ;;  %v16917_v61 = vsel %vm2895_vm8, %v16797_v51, %v20145_v57 }
 0x1d0   :  { %v16887_v8 = vpack.c.bf16 %v5247_v16, %v5215_v2  ;;  %14199 = vmatprep.subr.bf16.mxu1 %v14198_v41  ;;  %v4985_v5 = vpop.f32.mrb[120].mxu0  ;;  %6701 = vmatprep.mubr.f32.mxu0 %v20143_v36  ;;  %v16890_v38 = vpack.c.bf16 %v5246_v58, %v5214_v45  ;;  %v252_v41 = vrot.slane %v16530_v63, %v16872_v23  ;;  %v16932_v51 = vsub.s32 5, %v16480_v52 }
 0x1d1   :  { %v5098_v22 = vpop.f32.mrb[120].mxu1  ;;  %6820 = vmatprep.mubr.f32.mxu1 %v20143_v36  ;;  %v4987_v55 = vpop.f32.mrb[121].mxu0  ;;  %13460 = vmatmul.mubr.msk.f32.gmra.mrb[226].mxu0 %vm5395_vm1, %v16639_v6  ;;  %v16896_v59 = vpack.c.bf16 %v5248_v49, %v5216_v48  ;;  %v16920_v31 = vsel %vm2895_vm8, %v2866_v46, %v1240_v12  ;;  %v16923_v17 = vsel %vm2895_vm8, %v3091_v28, %v2552_v11  ;;  %v5277_v2 = vmax.f32 %v4985_v5, 0.0 }
 0x1d2   :  { %v5100_v32 = vpop.f32.mrb[121].mxu1  ;;  %13469 = vmatmul.mubr.msk.f32.gmra.mrb[226].mxu1 %vm5395_vm1, %v16639_v6  ;;  %6707 = vmatprep.mubr.f32.mxu0 %v20143_v36  ;;  %v1064_v50 = vrot.slane %v16684_v15, %v16751_v56  ;;  %v2212_v44 = vrot.slane %v16688_v13, %v16751_v56  ;;  %v2830_v54 = vsel %vm2829_vm6, %v2797_v1, %v900_v35  ;;  %v2700_v28 = vsel %vm2697_vm2, 0.2820948, %v252_v41 }
 0x1d3   :  { %6826 = vmatprep.mubr.f32.mxu1 %v20143_v36  ;;  %v3024_v42 = vsel %vm2796_vm5, %v2992_v26, %v2048_v43  ;;  %v416_v11 = vrot.slane %v16552_v29, %v16872_v23  ;;  %v5279_v16 = vmax.f32 %v5098_v22, 0.0  ;;  %v5278_v58 = vmax.f32 %v4987_v55, 0.0 }
 0x1d4   :  { %v4991_v20 = vpop.f32.mrb[122].mxu0  ;;  %v5280_v49 = vmax.f32 %v5100_v32, 0.0  ;;  %v580_v1 = vrot.slane %v16555_v14, %v16872_v23  ;;  %v1400_v41 = vrot.slane %v16565_v24, %v16872_v23  ;;  %v1564_v30 = vrot.slane %v16586_v53, %v16872_v23 }
 0x1d5   :  { %v5309_v12 = vmax.f32 %v4991_v20, 0.0  ;;  %v5104_v46 = vpop.f32.mrb[122].mxu1  ;;  %v4993_v45 = vpop.f32.mrb[123].mxu0  ;;  %13461 = vmatmul.mubr.msk.f32.gmra.mrb[228].mxu0 %vm5395_vm1, %v16663_v0  ;;  %v20148_v20 = vld [vmem:[#allocation8_spill] sm:$0xff]  ;;  %v1412_v6 = vrot.slane %v16565_v24, %v16932_v51 }
 0x1d6   :  { %v5311_v35 = vmax.f32 %v5104_v46, 0.0  ;;  %v5310_v3 = vmax.f32 %v4993_v45, 0.0  ;;  %v5106_v48 = vpop.f32.mrb[123].mxu1  ;;  %13470 = vmatmul.mubr.msk.f32.gmra.mrb[228].mxu1 %vm5395_vm1, %v16663_v0  ;;  %6713 = vmatprep.mubr.f32.mxu0 %v20143_v36  ;;  %v2376_v46 = vrot.slane %v16691_v18, %v16751_v56  ;;  %v2733_v45 = vsel %vm2730_vm3, %v2700_v28, %v416_v11  ;;  %v20149_v0 = vld [vmem:[#allocation9_spill] sm:$0xff] }
 0x1d7   :  { %v16942_v43 = vpack.c.bf16 %v5309_v12, %v5277_v2  ;;  %v5312_v5 = vmax.f32 %v5106_v48, 0.0  ;;  %6832 = vmatprep.mubr.f32.mxu1 %v20143_v36  ;;  %v3056_v48 = vsel %vm2829_vm6, %v3024_v42, %v2212_v44  ;;  %v744_v11 = vrot.slane %v16602_v7, %v16872_v23 }
 0x1d8   :  { %v16947_v26 = vpack.c.bf16 %v5311_v35, %v5279_v16  ;;  %v4997_v22 = vpop.f32.mrb[124].mxu0  ;;  %v16949_v55 = vpack.c.bf16 %v5310_v3, %v5278_v58  ;;  %v2863_v35 = vsel %vm2862_vm7, %v2830_v54, %v1064_v50  ;;  %v264_v3 = vrot.slane %v16530_v63, %v16932_v51 }
 0x1d9   :  { %20146 = vst [vmem:[#allocation11_spill] sm:$0xff] %v16942_v43  ;;  %v5110_v32 = vpop.f32.mrb[124].mxu1  ;;  %v4999_v57 = vpop.f32.mrb[125].mxu0  ;;  %13462 = vmatmul.mubr.msk.f32.gmra.mrb[230].mxu0 %vm5395_vm1, %v20148_v20  ;;  %v16957_v2 = vpack.c.bf16 %v5312_v5, %v5280_v49  ;;  %v1728_v28 = vrot.slane %v16608_v9, %v16872_v23  ;;  %v1892_v49 = vrot.slane %v16617_v62, %v16872_v23  ;;  %v5341_v5 = vmax.f32 %v4997_v22, 0.0  ;;  %v20150_v43 = vld [vmem:[#allocation10_spill] sm:$0xff] }
 0x1da   :  { %20147 = vst [vmem:[#allocation12_spill] sm:$0xff] %v16947_v26  ;;  %v5112_v16 = vpop.f32.mrb[125].mxu1  ;;  %13471 = vmatmul.mubr.msk.f32.gmra.mrb[230].mxu1 %vm5395_vm1, %v20148_v20  ;;  %6719 = vmatprep.mubr.f32.mxu0 %v20143_v36  ;;  %v2766_v50 = vsel %vm2763_vm4, %v2733_v45, %v580_v1  ;;  %v2930_v54 = vsel %vm2697_vm2, %v1400_v41, %v1564_v30  ;;  %v5343_v34 = vmax.f32 %v5110_v32, 0.0  ;;  %v5342_v44 = vmax.f32 %v4999_v57, 0.0 }
 0x1db   :  { %6838 = vmatprep.mubr.f32.mxu1 %v20143_v36  ;;  %v428_v12 = vrot.slane %v16552_v29, %v16932_v51  ;;  %v1576_v1 = vrot.slane %v16586_v53, %v16932_v51  ;;  %v2703_v41 = vsel %vm2697_vm2, 0.2820948, %v264_v3  ;;  %v5344_v30 = vmax.f32 %v5112_v16, 0.0 }
 0x1dc   :  { %v5003_v58 = vpop.f32.mrb[126].mxu0  ;;  %v2799_v3 = vsel %vm2796_vm5, %v2766_v50, %v744_v11  ;;  %v1072_v11 = vrot.slane %v16684_v15, %v16872_v23 }
 0x1dd   :  { %v5373_v42 = vmax.f32 %v5003_v58, 0.0  ;;  %v5116_v60 = vpop.f32.mrb[126].mxu1  ;;  %v5005_v20 = vpop.f32.mrb[127].mxu0  ;;  %13463 = vmatmul.mubr.msk.f32.gmra.mrb[232].mxu0 %vm5395_vm1, %v20149_v0  ;;  %v908_v58 = vrot.slane %v16675_v40, %v16872_v23 }
 0x1de   :  { %v5375_v22 = vmax.f32 %v5116_v60, 0.0  ;;  %v5374_v33 = vmax.f32 %v5005_v20, 0.0  ;;  %v5118_v26 = vpop.f32.mrb[127].mxu1  ;;  %13472 = vmatmul.mubr.msk.f32.gmra.mrb[232].mxu1 %vm5395_vm1, %v20149_v0  ;;  %6725 = vmatprep.mubr.f32.mxu0 %v20143_v36  ;;  %v2962_v60 = vsel %vm2730_vm3, %v2930_v54, %v1728_v28  ;;  %v592_v0 = vrot.slane %v16555_v14, %v16932_v51 }
 0x1df   :  { %v16994_v32 = vpack.c.bf16 %v5373_v42, %v5341_v5  ;;  %v5376_v57 = vmax.f32 %v5118_v26, 0.0  ;;  %6844 = vmatprep.mubr.f32.mxu1 %v20143_v36  ;;  %v2056_v26 = vrot.slane %v16629_v4, %v16872_v23  ;;  %v2994_v28 = vsel %vm2763_vm4, %v2962_v60, %v1892_v49 }
 0x1e0   :  { %v16998_v20 = vpack.c.bf16 %v5375_v22, %v5343_v34  ;;  %v17000_v45 = vpack.c.bf16 %v5374_v33, %v5342_v44  ;;  %v1740_v34 = vrot.slane %v16608_v9, %v16932_v51  ;;  %v2736_v33 = vsel %vm2730_vm3, %v2703_v41, %v428_v12  ;;  %v20151_v22 = vld [vmem:[#allocation3_spill] sm:$0xff] }
 0x1e1   :  { %13464 = vmatmul.mubr.msk.f32.gmra.mrb[234].mxu0 %vm5395_vm1, %v20150_v43  ;;  %v17008_v16 = vpack.c.bf16 %v5376_v57, %v5344_v30  ;;  %v2933_v5 = vsel %vm2697_vm2, %v1412_v6, %v1576_v1  ;;  %v14214_v54 = vpack.c.bf16 %v16917_v61, %v16909_v27  ;;  %v14218_v44 = vpack.c.bf16 %v16923_v17, %v16920_v31 }
 0x1e2   :  { %13473 = vmatmul.mubr.msk.f32.gmra.mrb[234].mxu1 %vm5395_vm1, %v20150_v43  ;;  %6915 = vmatprep.mubr.f32.mxu0 %v20143_v36  ;;  %v3088_v12 = vsel %vm2862_vm7, %v3056_v48, %v2376_v46  ;;  %v756_v42 = vrot.slane %v16602_v7, %v16932_v51  ;;  %v2220_v49 = vrot.slane %v16688_v13, %v16872_v23 }
 0x1e3   :  { %7034 = vmatprep.mubr.f32.mxu1 %v20143_v36  ;;  %v1904_v6 = vrot.slane %v16617_v62, %v16932_v51  ;;  %v2769_v50 = vsel %vm2763_vm4, %v2736_v33, %v592_v0  ;;  %v20152_v46 = vrot.slane %v16677_v10, %v16751_v56  ;;  %v2832_v1 = vsel %vm2829_vm6, %v2799_v3, %v908_v58 }
 0x1e4   :  { %v3026_v41 = vsel %vm2796_vm5, %v2994_v28, %v2056_v26  ;;  %v2965_v30 = vsel %vm2730_vm3, %v2933_v5, %v1740_v34  ;;  %v20153_v0 = vrot.slane %v16693_v19, %v16751_v56  ;;  %v920_v60 = vrot.slane %v16675_v40, %v16932_v51 }
 0x1e5   :  { %13474 = vmatmul.mubr.msk.f32.vlgmr.msra.gmra.mrb[236].mxu0 %vm5395_vm1, %v20151_v22  ;;  %v17042_v48 = vsel %vm2895_vm8, %v2863_v35, %v20152_v46  ;;  %v1236_v35 = vrot.slane %v16677_v10, %v16872_v23  ;;  %v17061_v58 = vsub.s32 7, %v16480_v52  ;;  %v2068_v26 = vrot.slane %v16629_v4, %v16932_v51 }
 0x1e6   :  { %13483 = vmatmul.mubr.msk.f32.vlgmr.msra.gmra.mrb[236].mxu1 %vm5395_vm1, %v20151_v22  ;;  %14185 = vmatpush1.bf16.msra.mxu0 %v16834_v47  ;;  %v17054_v57 = vsel %vm2895_vm8, %v3088_v12, %v20153_v0  ;;  %v2384_v47 = vrot.slane %v16691_v18, %v16872_v23  ;;  %v2802_v34 = vsel %vm2796_vm5, %v2769_v50, %v756_v42  ;;  %v20154_v22 = vld [vmem:[#allocation11_spill] sm:$0xff]  ;;  %v20155_v0 = vld [vmem:[#allocation12_spill] sm:$0xff] }
 0x1e7   :  { %14201 = vmatpush1.bf16.msra.mxu1 %v16839_v25  ;;  %14187 = vmatprep.subr.bf16.mxu0 %v16890_v38  ;;  %v2865_v33 = vsel %vm2862_vm7, %v2832_v1, %v1072_v11  ;;  %v3058_v3 = vsel %vm2829_vm6, %v3026_v41, %v2220_v49  ;;  %v2997_v25 = vsel %vm2763_vm4, %v2965_v30, %v1904_v6  ;;  %v17124_v30 = vsub.s32 4, %v16480_v52 }
 0x1e8   :  { %14203 = vmatprep.subr.bf16.mxu1 %v16896_v59  ;;  %6921 = vmatprep.mubr.f32.mxu0 %v20143_v36  ;;  %v14216_v38 = vpack.c.bf16 %v17054_v57, %v17042_v48  ;;  %v2548_v28 = vrot.slane %v16693_v19, %v16872_v23  ;;  %v1084_v59 = vrot.slane %v16684_v15, %v16932_v51 }
 0x1e9   :  { %7040 = vmatprep.mubr.f32.mxu1 %v20143_v36  ;;  %13475 = vmatmul.mubr.msk.f32.gmra.mrb[238].mxu0 %vm5395_vm1, %v16540_v21  ;;  %v2232_v5 = vrot.slane %v16688_v13, %v16932_v51  ;;  %v2835_v12 = vsel %vm2829_vm6, %v2802_v34, %v920_v60  ;;  %v272_v42 = vrot.slane %v16530_v63, %v17061_v58  ;;  %v17143_v34 = vsub.s32 6, %v16480_v52 }
 0x1ea   :  { %13484 = vmatmul.mubr.msk.f32.gmra.mrb[238].mxu1 %vm5395_vm1, %v16540_v21  ;;  %14189 = vmatpush1.bf16.msra.mxu0 %v16882_v37  ;;  %v17095_v11 = vsel %vm2895_vm8, %v2865_v33, %v1236_v35  ;;  %v3090_v49 = vsel %vm2862_vm7, %v3058_v3, %v2384_v47  ;;  %v3029_v21 = vsel %vm2796_vm5, %v2997_v25, %v2068_v26  ;;  %v20156_v33 = vld [vmem:[#allocation4_spill] sm:$0xff] }
 0x1eb   :  { %14205 = vmatpush1.bf16.msra.mxu1 %v16887_v8  ;;  %14191 = vmatprep.subr.bf16.mxu0 %v16949_v55  ;;  %v1248_v37 = vrot.slane %v16677_v10, %v16932_v51  ;;  %v1420_v6 = vrot.slane %v16565_v24, %v17061_v58  ;;  %v1584_v8 = vrot.slane %v16586_v53, %v17061_v58  ;;  %v2705_v41 = vsel %vm2697_vm2, 0.2820948, %v272_v42 }
 0x1ec   :  { %14207 = vmatprep.subr.bf16.mxu1 %v16957_v2  ;;  %6927 = vmatprep.mubr.f32.mxu0 %v20143_v36  ;;  %v2396_v55 = vrot.slane %v16691_v18, %v16932_v51  ;;  %v2868_v2 = vsel %vm2862_vm7, %v2835_v12, %v1084_v59  ;;  %v436_v50 = vrot.slane %v16552_v29, %v17061_v58 }
 0x1ed   :  { %7046 = vmatprep.mubr.f32.mxu1 %v20143_v36  ;;  %13476 = vmatmul.mubr.msk.f32.gmra.mrb[240].mxu0 %vm5395_vm1, %v16574_v39  ;;  %v17119_v46 = vsel %vm2895_vm8, %v3090_v49, %v2548_v28  ;;  %v3061_v1 = vsel %vm2829_vm6, %v3029_v21, %v2232_v5  ;;  %v2560_v35 = vrot.slane %v16693_v19, %v16932_v51  ;;  %v20157_v21 = vld [vmem:[#allocation5_spill] sm:$0xff] }
 0x1ee   :  { %13485 = vmatmul.mubr.msk.f32.gmra.mrb[240].mxu1 %vm5395_vm1, %v16574_v39  ;;  %14193 = vmatpush1.bf16.msra.mxu0 %v20154_v22  ;;  %v600_v39 = vrot.slane %v16555_v14, %v17061_v58  ;;  %v1748_v60 = vrot.slane %v16608_v9, %v17061_v58  ;;  %v17137_v47 = vsel %vm2895_vm8, %v2868_v2, %v1248_v37 }
 0x1ef   :  { %14209 = vmatpush1.bf16.msra.mxu1 %v20155_v0  ;;  %14195 = vmatprep.subr.bf16.mxu0 %v17000_v45  ;;  %v764_v26 = vrot.slane %v16602_v7, %v17061_v58  ;;  %v2935_v45 = vsel %vm2697_vm2, %v1420_v6, %v1584_v8  ;;  %v928_v3 = vrot.slane %v16675_v40, %v17061_v58  ;;  %v20158_v0 = vld [vmem:[#allocation6_spill] sm:$0xff] }
 0x1f0   :  { %14211 = vmatprep.subr.bf16.mxu1 %v17008_v16  ;;  %6933 = vmatprep.mubr.f32.mxu0 %v20143_v36  ;;  %v17149_v16 = vsel %vm2862_vm7, %v3061_v1, %v2396_v55  ;;  %v2738_v25 = vsel %vm2730_vm3, %v2705_v41, %v436_v50  ;;  %v1092_v52 = vrot.slane %v16684_v15, %v17061_v58  ;;  %v17216_v41 = vld [vmem:[%s20107_s1 + $0x20] ss:$4 sm:$0xff] }
 0x1f1   :  { %7052 = vmatprep.mubr.f32.mxu1 %v20143_v36  ;;  %13477 = vmatmul.mubr.msk.f32.gmra.mrb[242].mxu0 %vm5395_vm1, %v20156_v33  ;;  %v1912_v28 = vrot.slane %v16617_v62, %v17061_v58  ;;  %v260_v59 = vrot.slane %v16530_v63, %v17124_v30  ;;  %v2967_v5 = vsel %vm2730_vm3, %v2935_v45, %v1748_v60  ;;  %v17234_v60 = vld [vmem:[%s20107_s1 + $0x22] ss:$4 sm:$0xff] }
 0x1f2   :  { %13486 = vmatmul.mubr.msk.f32.gmra.mrb[242].mxu1 %vm5395_vm1, %v20156_v33  ;;  %14197 = vmatpush1.bf16.msra.mxu0 %v16994_v32  ;;  %v1408_v12 = vrot.slane %v16565_v24, %v17124_v30  ;;  %v1572_v32 = vrot.slane %v16586_v53, %v17124_v30  ;;  %v1256_v42 = vrot.slane %v16677_v10, %v17061_v58 }
 0x1f3   :  { %14213 = vmatpush1.bf16.msra.mxu1 %v16998_v20  ;;  %6939 = vmatprep.mubr.f32.mxu0 %v20143_v36  ;;  %v2771_v20 = vsel %vm2763_vm4, %v2738_v25, %v600_v39  ;;  %v268_v49 = vrot.slane %v16530_v63, %v17143_v34  ;;  %v2076_v37 = vrot.slane %v16629_v4, %v17061_v58 }
 0x1f4   :  { %7058 = vmatprep.mubr.f32.mxu1 %v20143_v36  ;;  %14215 = vmatprep.subr.bf16.mxu0 %v14214_v54  ;;  %v2240_v27 = vrot.slane %v16688_v13, %v17061_v58  ;;  %v424_v61 = vrot.slane %v16552_v29, %v17124_v30  ;;  %v2404_v63 = vrot.slane %v16691_v18, %v17061_v58  ;;  %v2702_v54 = vsel %vm2697_vm2, 0.2820948, %v260_v59 }
 0x1f5   :  { %13478 = vmatmul.mubr.msk.f32.gmra.mrb[244].mxu0 %vm5395_vm1, %v20157_v21  ;;  %14219 = vmatprep.subr.bf16.mxu1 %v14218_v44  ;;  %v2999_v31 = vsel %vm2763_vm4, %v2967_v5, %v1912_v28  ;;  %v1736_v17 = vrot.slane %v16608_v9, %v17124_v30  ;;  %v2568_v44 = vrot.slane %v16693_v19, %v17061_v58  ;;  %v2704_v1 = vsel %vm2697_vm2, 0.2820948, %v268_v49 }
 0x1f6   :  { %13487 = vmatmul.mubr.msk.f32.gmra.mrb[244].mxu1 %vm5395_vm1, %v20157_v21  ;;  %6945 = vmatprep.mubr.f32.mxu0 %v20143_v36  ;;  %v2804_v6 = vsel %vm2796_vm5, %v2771_v20, %v764_v26  ;;  %v2932_v8 = vsel %vm2697_vm2, %v1408_v12, %v1572_v32  ;;  %v432_v55 = vrot.slane %v16552_v29, %v17143_v34  ;;  %v17221_v29 = vld [vmem:[%s20107_s1 + $0x21] ss:$4 sm:$0xff] }
 0x1f7   :  { %7064 = vmatprep.mubr.f32.mxu1 %v20143_v36  ;;  %v1416_v2 = vrot.slane %v16565_v24, %v17143_v34  ;;  %v1580_v50 = vrot.slane %v16586_v53, %v17143_v34  ;;  %v1744_v22 = vrot.slane %v16608_v9, %v17143_v34  ;;  %v3031_v24 = vsel %vm2796_vm5, %v2999_v31, %v2076_v37  ;;  %v20159_v20 = vld [vmem:[#allocation8_spill] sm:$0xff] }
 0x1f8   :  { %v588_v53 = vrot.slane %v16555_v14, %v17124_v30  ;;  %v1900_v9 = vrot.slane %v16617_v62, %v17124_v30  ;;  %v2735_v39 = vsel %vm2730_vm3, %v2702_v54, %v424_v61  ;;  %v2964_v26 = vsel %vm2730_vm3, %v2932_v8, %v1736_v17 }
 0x1f9   :  { %13479 = vmatmul.mubr.msk.f32.gmra.mrb[246].mxu0 %vm5395_vm1, %v20158_v0  ;;  %v596_v45 = vrot.slane %v16555_v14, %v17143_v34  ;;  %v1908_v33 = vrot.slane %v16617_v62, %v17143_v34  ;;  %v2737_v25 = vsel %vm2730_vm3, %v2704_v1, %v432_v55  ;;  %v2934_v28 = vsel %vm2697_vm2, %v1416_v2, %v1580_v50 }
 0x1fa   :  { %13488 = vmatmul.mubr.msk.f32.gmra.mrb[246].mxu1 %vm5395_vm1, %v20158_v0  ;;  %6951 = vmatprep.mubr.f32.mxu0 %v20143_v36  ;;  %v50_v59 = vmul.f32 %v17216_v41, %v17216_v41  ;;  %v54_v5 = vmul.f32 %v17221_v29, %v17221_v29  ;;  %v752_v12 = vrot.slane %v16602_v7, %v17124_v30  ;;  %v20160_v0 = vld [vmem:[#allocation9_spill] sm:$0xff] }
 0x1fb   :  { %7070 = vmatprep.mubr.f32.mxu1 %v20143_v36  ;;  %v2064_v14 = vrot.slane %v16629_v4, %v17124_v30  ;;  %v2966_v62 = vsel %vm2730_vm3, %v2934_v28, %v1744_v22  ;;  %v62_v32 = vmul.f32 %v17234_v60, %v17234_v60  ;;  %v2768_v49 = vsel %vm2763_vm4, %v2735_v39, %v588_v53 }
 0x1fc   :  { %v760_v21 = vrot.slane %v16602_v7, %v17143_v34  ;;  %v2072_v37 = vrot.slane %v16629_v4, %v17143_v34  ;;  %v58_v61 = vadd.f32 %v54_v5, %v50_v59  ;;  %v2996_v31 = vsel %vm2763_vm4, %v2964_v26, %v1900_v9 }
 0x1fd   :  { %13480 = vmatmul.mubr.msk.f32.gmra.mrb[248].mxu0 %vm5395_vm1, %v20159_v20  ;;  %v2770_v17 = vsel %vm2763_vm4, %v2737_v25, %v596_v45  ;;  %v2998_v54 = vsel %vm2763_vm4, %v2966_v62, %v1908_v33  ;;  %v2837_v7 = vsel %vm2829_vm6, %v2804_v6, %v928_v3  ;;  %v3063_v4 = vsel %vm2829_vm6, %v3031_v24, %v2240_v27 }
 0x1fe   :  { %13489 = vmatmul.mubr.msk.f32.gmra.mrb[248].mxu1 %vm5395_vm1, %v20159_v20  ;;  %6957 = vmatprep.mubr.f32.mxu0 %v20143_v36  ;;  %v916_v8 = vrot.slane %v16675_v40, %v17124_v30  ;;  %v66_v55 = vadd.f32 %v62_v32, %v58_v61  ;;  %v2228_v2 = vrot.slane %v16688_v13, %v17124_v30 }
 0x1ff   :  { %7076 = vmatprep.mubr.f32.mxu1 %v20143_v36  ;;  %v2801_v50 = vsel %vm2796_vm5, %v2768_v49, %v752_v12  ;;  %v924_v22 = vrot.slane %v16675_v40, %v17143_v34  ;;  %v2236_v1 = vrot.slane %v16688_v13, %v17143_v34  ;;  %v3028_v3 = vsel %vm2796_vm5, %v2996_v31, %v2064_v14 }
 0x200   :  { %v2803_v27 = vsel %vm2796_vm5, %v2770_v17, %v760_v21  ;;  %v3030_v6 = vsel %vm2796_vm5, %v2998_v54, %v2072_v37  ;;  %15081 = vrsqrt.f32 %v66_v55  ;;  %v2870_v40 = vsel %vm2862_vm7, %v2837_v7, %v1092_v52  ;;  %v15292_v55 = vld [vmem:[%s20106_s4 + $0x10] sm:$0xff] }
 0x201   :  { %13481 = vmatmul.mubr.msk.f32.gmra.mrb[250].mxu0 %vm5395_vm1, %v20160_v0  ;;  %v3095_v13 = vsel %vm2862_vm7, %v3063_v4, %v2404_v63  ;;  %v1080_v24 = vrot.slane %v16684_v15, %v17124_v30  ;;  %v2392_v53 = vrot.slane %v16691_v18, %v17124_v30  ;;  %v2834_v9 = vsel %vm2829_vm6, %v2801_v50, %v916_v8 }
 0x202   :  { %13490 = vmatmul.mubr.msk.f32.gmra.mrb[250].mxu1 %vm5395_vm1, %v20160_v0  ;;  %6963 = vmatprep.mubr.f32.mxu0 %v20143_v36  ;;  %v1088_v39 = vrot.slane %v16684_v15, %v17143_v34  ;;  %v2400_v52 = vrot.slane %v16691_v18, %v17143_v34  ;;  %v3125_v63 = vsel %vm2895_vm8, %v17149_v16, %v2560_v35 }
 0x203   :  { %7082 = vmatprep.mubr.f32.mxu1 %v20143_v36  ;;  %v3060_v26 = vsel %vm2829_vm6, %v3028_v3, %v2228_v2  ;;  %v2836_v45 = vsel %vm2829_vm6, %v2803_v27, %v924_v22  ;;  %v3062_v33 = vsel %vm2829_vm6, %v3030_v6, %v2236_v1  ;;  %v2903_v15 = vsel %vm2895_vm8, %v2870_v40, %v1256_v42  ;;  %v20161_v1 = vld [vmem:[#allocation2_spill] sm:$0xff] }
 0x204   :  { %v3127_v18 = vsel %vm2895_vm8, %v3095_v13, %v2568_v44  ;;  %v1244_v35 = vrot.slane %v16677_v10, %v17124_v30  ;;  %v2556_v16 = vrot.slane %v16693_v19, %v17124_v30  ;;  %v2867_v25 = vsel %vm2862_vm7, %v2834_v9, %v1080_v24 }
 0x205   :  { %13482 = vmatmul.mubr.msk.f32.gmra.mrb[252].mxu0 %vm5395_vm1, %v20150_v43  ;;  %v1252_v42 = vrot.slane %v16677_v10, %v17143_v34  ;;  %v2564_v28 = vrot.slane %v16693_v19, %v17143_v34  ;;  %v14220_v44 = vpack.c.bf16 %v17119_v46, %v17095_v11  ;;  %v3092_v59 = vsel %vm2862_vm7, %v3060_v26, %v2392_v53  ;;  %v15290_v10 = vld [vmem:[%s20106_s4] sm:$0xff] }
 0x206   :  { %13491 = vmatmul.mubr.msk.f32.gmra.mrb[252].mxu1 %vm5395_vm1, %v20150_v43  ;;  %7153 = vmatprep.mubr.f32.mxu0 %v20143_v36  ;;  %v2869_v5 = vsel %vm2862_vm7, %v2836_v45, %v1088_v39  ;;  %v3094_v43 = vsel %vm2862_vm7, %v3062_v33, %v2400_v52  ;;  %v14222_v12 = vpack.c.bf16 %v3125_v63, %v17137_v47  ;;  %v15293_v45 = vld [vmem:[%s20106_s4 + $0x18] sm:$0xff] }
 0x207   :  { %7272 = vmatprep.mubr.f32.mxu1 %v20143_v36  ;;  %v14226_v19 = vpack.c.bf16 %v3127_v18, %v2903_v15  ;;  %v17354_v14 = vsel %vm2895_vm8, %v2867_v25, %v1244_v35  ;;  %v17361_v11 = vsel %vm2895_vm8, %v3092_v59, %v2556_v16  ;;  %v17364_v46 = vsel %vm2895_vm8, %v2869_v5, %v1252_v42 }
 0x208   :  { %v17367_v47 = vsel %vm2895_vm8, %v3094_v43, %v2564_v28  ;;  %v14224_v20 = vpack.c.bf16 %v17361_v11, %v17354_v14 }
 0x209   :  { %13492 = vmatmul.mubr.msk.f32.vlgmr.msra.gmra.mrb[254].mxu0 %vm5395_vm1, %v15290_v10  ;;  %v14228_v49 = vpack.c.bf16 %v17367_v47, %v17364_v46 }
 0x20a   :  { %13501 = vmatmul.mubr.msk.f32.vlgmr.msra.gmra.mrb[254].mxu1 %vm5395_vm1, %v15290_v10  ;;  %14217 = vmatpush1.bf16.msra.mxu0 %v14216_v38  ;;  %v15082_v62 = vpop.eup %15081  ;;  %v15291_v38 = vld [vmem:[%s20106_s4 + $0x8] sm:$0xff] }
 0x20b   :  { %14221 = vmatpush1.bf16.msra.mxu1 %v14220_v44  ;;  %7159 = vmatprep.mubr.f32.mxu0 %v20143_v36  ;;  %v74_v32 = vmul.f32 %v15082_v62, %v17216_v41  ;;  %v78_v48 = vmul.f32 %v15082_v62, %v17221_v29  ;;  %v82_v57 = vmul.f32 %v15082_v62, %v17234_v60 }
 0x20c   :  { %7278 = vmatprep.mubr.f32.mxu1 %v20143_v36  ;;  %14223 = vmatprep.subr.bf16.mxu0 %v14222_v12 }
 0x20d   :  { %13493 = vmatmul.mubr.msk.f32.gmra.mrb[0].mxu0 %vm5395_vm1, %v15291_v38  ;;  %14227 = vmatprep.subr.bf16.mxu1 %v14226_v19  ;;  %v86_v41 = vmul.f32 %v74_v32, %v74_v32  ;;  %v90_v29 = vmul.f32 %v78_v48, %v78_v48  ;;  %v94_v60 = vmul.f32 %v82_v57, %v82_v57  ;;  %v17384_v21 = vmul.f32 -0.48860252, %v78_v48 }
 0x20e   :  { %13502 = vmatmul.mubr.msk.f32.gmra.mrb[0].mxu1 %vm5395_vm1, %v15291_v38  ;;  %7165 = vmatprep.mubr.f32.mxu0 %v20143_v36  ;;  %v98_v37 = vmul.f32 %v78_v48, %v74_v32  ;;  %v102_v61 = vmul.f32 %v82_v57, %v78_v48  ;;  %v106_v31 = vmul.f32 %v82_v57, %v74_v32  ;;  %v17387_v17 = vmul.f32 0.48860252, %v82_v57 }
 0x20f   :  { %7284 = vmatprep.mubr.f32.mxu1 %v20143_v36  ;;  %v17389_v54 = vmul.f32 -0.48860252, %v74_v32  ;;  %v130_v7 = vmul.f32 0.9461747, %v94_v60  ;;  %v142_v4 = vsub.f32 %v86_v41, %v90_v29  ;;  %v150_v8 = vmul.f32 0.5900436, %v78_v48 }
 0x210   :  { %v17395_v2 = vmul.f32 1.0925485, %v98_v37  ;;  %v17397_v50 = vmul.f32 -1.0925485, %v102_v61  ;;  %v17399_v22 = vmul.f32 -1.0925485, %v106_v31  ;;  %v280_v0 = vrot.slane %v17384_v21, %v20161_v1 }
 0x211   :  { %13494 = vmatmul.mubr.msk.f32.gmra.mrb[2].mxu0 %vm5395_vm1, %v15292_v55  ;;  %v17405_v3 = vadd.f32 -0.31539157, %v130_v7  ;;  %v17407_v27 = vmul.f32 0.54627424, %v142_v4  ;;  %v154_v6 = vmul.f32 -3.0, %v86_v41  ;;  %v178_v40 = vmul.f32 5.0, %v94_v60 }
 0x212   :  { %13503 = vmatmul.mubr.msk.f32.gmra.mrb[2].mxu1 %vm5395_vm1, %v15292_v55  ;;  %7171 = vmatprep.mubr.f32.mxu0 %v20143_v36  ;;  %v166_v13 = vmul.f32 2.8906114, %v98_v37  ;;  %v174_v24 = vmul.f32 0.4570458, %v78_v48  ;;  %v190_v53 = vmul.f32 0.37317634, %v82_v57  ;;  %v444_v9 = vrot.slane %v17387_v17, %v20161_v1 }
 0x213   :  { %7290 = vmatprep.mubr.f32.mxu1 %v20143_v36  ;;  %v158_v39 = vadd.f32 %v154_v6, %v90_v29  ;;  %v182_v52 = vsub.f32 1.0, %v178_v40  ;;  %v13235_v63 = vadd.f32 -3.0, %v178_v40  ;;  %v202_v26 = vmul.f32 0.4570458, %v74_v32 }
 0x214   :  { %v17416_v33 = vmul.f32 %v166_v13, %v82_v57  ;;  %v210_v15 = vmul.f32 1.4453057, %v82_v57  ;;  %v218_v18 = vmul.f32 0.5900436, %v74_v32  ;;  %v222_v35 = vsub.f32 0.0, %v86_v41  ;;  %v15294_v32 = vld [vmem:[%s20106_s4 + $0x20] sm:$0xff] }
 0x215   :  { %13495 = vmatmul.mubr.msk.f32.gmra.mrb[4].mxu0 %vm5395_vm1, %v15293_v45  ;;  %v17420_v16 = vmul.f32 %v158_v39, %v150_v8  ;;  %v17422_v25 = vmul.f32 %v182_v52, %v174_v24  ;;  %v17424_v42 = vmul.f32 %v13235_v63, %v190_v53  ;;  %v226_v28 = vmul.f32 3.0, %v90_v29  ;;  %v20162_v8 = vld [vmem:[#allocation7_spill] sm:$0xff] }
 0x216   :  { %13504 = vmatmul.mubr.msk.f32.gmra.mrb[4].mxu1 %vm5395_vm1, %v15293_v45  ;;  %7177 = vmatprep.mubr.f32.mxu0 %v20143_v36  ;;  %v17427_v44 = vmul.f32 %v202_v26, %v182_v52  ;;  %v17429_v59 = vmul.f32 %v210_v15, %v142_v4  ;;  %v608_v5 = vrot.slane %v17389_v54, %v20161_v1  ;;  %v2707_v61 = vsel %vm2697_vm2, 0.2820948, %v280_v0  ;;  %v15295_v24 = vld [vmem:[%s20106_s4 + $0x28] sm:$0xff] }
 0x217   :  { %7296 = vmatprep.mubr.f32.mxu1 %v20143_v36  ;;  %v772_v43 = vrot.slane %v17395_v2, %v20161_v1  ;;  %v230_v12 = vadd.f32 %v226_v28, %v222_v35  ;;  %v936_v10 = vrot.slane %v17397_v50, %v20161_v1  ;;  %v1100_v19 = vrot.slane %v17405_v3, %v20161_v1 }
 0x218   :  { %v1264_v62 = vrot.slane %v17399_v22, %v20161_v1  ;;  %v1428_v48 = vrot.slane %v17407_v27, %v20161_v1  ;;  %v1592_v57 = vrot.slane %v17420_v16, %v20161_v1  ;;  %v1756_v38 = vrot.slane %v17416_v33, %v20161_v1 }
 0x219   :  { %13496 = vmatmul.mubr.msk.f32.gmra.mrb[6].mxu0 %vm5395_vm1, %v15294_v32  ;;  %v1920_v41 = vrot.slane %v17422_v25, %v20161_v1  ;;  %v17455_v29 = vmul.f32 %v230_v12, %v218_v18  ;;  %v2084_v60 = vrot.slane %v17424_v42, %v20161_v1  ;;  %v2248_v37 = vrot.slane %v17427_v44, %v20161_v1 }
 0x21a   :  { %13505 = vmatmul.mubr.msk.f32.gmra.mrb[6].mxu1 %vm5395_vm1, %v15294_v32  ;;  %7183 = vmatprep.mubr.f32.mxu0 %v20143_v36  ;;  %v2412_v31 = vrot.slane %v17429_v59, %v20161_v1  ;;  %v2740_v7 = vsel %vm2730_vm3, %v2707_v61, %v444_v9  ;;  %v2937_v4 = vsel %vm2697_vm2, %v1428_v48, %v1592_v57 }
 0x21b   :  { %7302 = vmatprep.mubr.f32.mxu1 %v20143_v36  ;;  %v288_v55 = vrot.slane %v17384_v21, %v20162_v8  ;;  %v2576_v6 = vrot.slane %v17455_v29, %v20161_v1  ;;  %v2773_v40 = vsel %vm2763_vm4, %v2740_v7, %v608_v5  ;;  %v2969_v13 = vsel %vm2730_vm3, %v2937_v4, %v1756_v38 }
 0x21c   :  { %v452_v0 = vrot.slane %v17387_v17, %v20162_v8  ;;  %v2806_v53 = vsel %vm2796_vm5, %v2773_v40, %v772_v43  ;;  %v3001_v9 = vsel %vm2763_vm4, %v2969_v13, %v1920_v41  ;;  %v616_v39 = vrot.slane %v17389_v54, %v20162_v8 }
 0x21d   :  { %13497 = vmatmul.mubr.msk.f32.gmra.mrb[8].mxu0 %vm5395_vm1, %v15295_v24  ;;  %v780_v52 = vrot.slane %v17395_v2, %v20162_v8  ;;  %v2839_v63 = vsel %vm2829_vm6, %v2806_v53, %v936_v10  ;;  %v3033_v26 = vsel %vm2796_vm5, %v3001_v9, %v2084_v60  ;;  %v944_v45 = vrot.slane %v17397_v50, %v20162_v8 }
 0x21e   :  { %13506 = vmatmul.mubr.msk.f32.gmra.mrb[8].mxu1 %vm5395_vm1, %v15295_v24  ;;  %7189 = vmatprep.mubr.f32.mxu0 %v20143_v36  ;;  %v2709_v15 = vsel %vm2697_vm2, 0.2820948, %v288_v55  ;;  %v2872_v18 = vsel %vm2862_vm7, %v2839_v63, %v1100_v19  ;;  %v3065_v35 = vsel %vm2829_vm6, %v3033_v26, %v2248_v37  ;;  %v1108_v28 = vrot.slane %v17405_v3, %v20162_v8  ;;  %v15296_v19 = vld [vmem:[%s20106_s4 + $0x30] sm:$0xff]  ;;  %v15297_v24 = vld [vmem:[%s20106_s4 + $0x38] sm:$0xff] }
 0x21f   :  { %7308 = vmatprep.mubr.f32.mxu1 %v20143_v36  ;;  %v1272_v5 = vrot.slane %v17399_v22, %v20162_v8  ;;  %v17500_v43 = vsel %vm2895_vm8, %v2872_v18, %v1264_v62  ;;  %v3097_v12 = vsel %vm2862_vm7, %v3065_v35, %v2412_v31  ;;  %v1436_v10 = vrot.slane %v17407_v27, %v20162_v8 }
 0x220   :  { %v1600_v32 = vrot.slane %v17420_v16, %v20162_v8  ;;  %v17512_v48 = vsel %vm2895_vm8, %v3097_v12, %v2576_v6  ;;  %v1764_v62 = vrot.slane %v17416_v33, %v20162_v8  ;;  %v1928_v57 = vrot.slane %v17422_v25, %v20162_v8 }
 0x221   :  { %13498 = vmatmul.mubr.msk.f32.gmra.mrb[10].mxu0 %vm5395_vm1, %v15296_v19  ;;  %v2092_v38 = vrot.slane %v17424_v42, %v20162_v8  ;;  %v14230_v41 = vpack.c.bf16 %v17512_v48, %v17500_v43  ;;  %v2256_v60 = vrot.slane %v17427_v44, %v20162_v8  ;;  %v2420_v37 = vrot.slane %v17429_v59, %v20162_v8 }
 0x222   :  { %13507 = vmatmul.mubr.msk.f32.gmra.mrb[10].mxu1 %vm5395_vm1, %v15296_v19  ;;  %7195 = vmatprep.mubr.f32.mxu0 %v20143_v36  ;;  %v2584_v61 = vrot.slane %v17455_v29, %v20162_v8  ;;  %v2742_v31 = vsel %vm2730_vm3, %v2709_v15, %v452_v0  ;;  %v2939_v7 = vsel %vm2697_vm2, %v1436_v10, %v1600_v32 }
 0x223   :  { %7314 = vmatprep.mubr.f32.mxu1 %v20143_v36  ;;  %v276_v4 = vrot.slane %v17384_v21, %v16751_v56  ;;  %v2775_v55 = vsel %vm2763_vm4, %v2742_v31, %v616_v39  ;;  %v2971_v6 = vsel %vm2730_vm3, %v2939_v7, %v1764_v62  ;;  %v440_v40 = vrot.slane %v17387_v17, %v16751_v56 }
 0x224   :  { %v604_v13 = vrot.slane %v17389_v54, %v16751_v56  ;;  %v2808_v0 = vsel %vm2796_vm5, %v2775_v55, %v780_v52  ;;  %v3003_v53 = vsel %vm2763_vm4, %v2971_v6, %v1928_v57  ;;  %v768_v9 = vrot.slane %v17395_v2, %v16751_v56 }
 0x225   :  { %13499 = vmatmul.mubr.msk.f32.gmra.mrb[12].mxu0 %vm5395_vm1, %v15297_v24  ;;  %v932_v39 = vrot.slane %v17397_v50, %v16751_v56  ;;  %v2841_v63 = vsel %vm2829_vm6, %v2808_v0, %v944_v45  ;;  %v3035_v26 = vsel %vm2796_vm5, %v3003_v53, %v2092_v38  ;;  %v1096_v15 = vrot.slane %v17405_v3, %v16751_v56 }
 0x226   :  { %13508 = vmatmul.mubr.msk.f32.gmra.mrb[12].mxu1 %vm5395_vm1, %v15297_v24  ;;  %7201 = vmatprep.mubr.f32.mxu0 %v20143_v36  ;;  %v2706_v52 = vsel %vm2697_vm2, 0.2820948, %v276_v4  ;;  %v2874_v18 = vsel %vm2862_vm7, %v2841_v63, %v1108_v28  ;;  %v3067_v35 = vsel %vm2829_vm6, %v3035_v26, %v2256_v60  ;;  %v1260_v12 = vrot.slane %v17399_v22, %v16751_v56  ;;  %v15298_v28 = vld [vmem:[%s20106_s4 + $0x40] sm:$0x1] }
 0x227   :  { %7320 = vmatprep.mubr.f32.mxu1 %v20143_v36  ;;  %v1424_v10 = vrot.slane %v17407_v27, %v16751_v56  ;;  %v2907_v45 = vsel %vm2895_vm8, %v2874_v18, %v1272_v5  ;;  %v3099_v32 = vsel %vm2862_vm7, %v3067_v35, %v2420_v37  ;;  %v1588_v19 = vrot.slane %v17420_v16, %v16751_v56  ;;  %v17587_v37 = vld [vmem:[%s20108_s3] sm:$0xff]  ;;  %v17622_v35 = vld [vmem:[%s20108_s3 + $0x8] sm:$0xff] }
 0x228   :  { %v1752_v62 = vrot.slane %v17416_v33, %v16751_v56  ;;  %v3131_v57 = vsel %vm2895_vm8, %v3099_v32, %v2584_v61  ;;  %v1916_v38 = vrot.slane %v17422_v25, %v16751_v56  ;;  %v2080_v5 = vrot.slane %v17424_v42, %v16751_v56 }
 0x229   :  { %13500 = vmatmul.mubr.msk.f32.gmra.mrb[14].mxu0 %vm5395_vm1, %v15298_v28  ;;  %v2244_v60 = vrot.slane %v17427_v44, %v16751_v56  ;;  %v14234_v61 = vpack.c.bf16 %v3131_v57, %v2907_v45  ;;  %v2408_v31 = vrot.slane %v17429_v59, %v16751_v56  ;;  %v2572_v7 = vrot.slane %v17455_v29, %v16751_v56 }
 0x22a   :  { %13509 = vmatmul.mubr.msk.f32.gmra.mrb[14].mxu1 %vm5395_vm1, %v15298_v28  ;;  %7419 = vmatprep.mubr.f32.mxu0 %v20143_v36  ;;  %v2739_v4 = vsel %vm2730_vm3, %v2706_v52, %v440_v40  ;;  %v2936_v55 = vsel %vm2697_vm2, %v1424_v10, %v1588_v19  ;;  %v284_v6 = vrot.slane %v17384_v21, %v16872_v23 }
 0x22b   :  { %7538 = vmatprep.mubr.f32.mxu1 %v20143_v36  ;;  %v448_v24 = vrot.slane %v17387_v17, %v16872_v23  ;;  %v2772_v0 = vsel %vm2763_vm4, %v2739_v4, %v604_v13  ;;  %v2968_v53 = vsel %vm2730_vm3, %v2936_v55, %v1752_v62  ;;  %v612_v63 = vrot.slane %v17389_v54, %v16872_v23 }
 0x22c   :  { %v776_v26 = vrot.slane %v17395_v2, %v16872_v23  ;;  %v2805_v40 = vsel %vm2796_vm5, %v2772_v0, %v768_v9  ;;  %v3000_v52 = vsel %vm2763_vm4, %v2968_v53, %v1916_v38  ;;  %v940_v18 = vrot.slane %v17397_v50, %v16872_v23 }
 0x22d   :  { %13510 = vmatmul.mubr.msk.f32.vlgmr.msra.gmra.mrb[128].mxu0 %vm7327_vm9, %v17587_v37  ;;  %v1104_v13 = vrot.slane %v17405_v3, %v16872_v23  ;;  %v2838_v9 = vsel %vm2829_vm6, %v2805_v40, %v932_v39  ;;  %v3032_v10 = vsel %vm2796_vm5, %v3000_v52, %v2080_v5  ;;  %v1268_v45 = vrot.slane %v17399_v22, %v16872_v23 }
 0x22e   :  { %13519 = vmatmul.mubr.msk.f32.vlgmr.msra.gmra.mrb[128].mxu1 %vm7327_vm9, %v17587_v37  ;;  %14225 = vmatpush1.bf16.msra.mxu0 %v14224_v20  ;;  %v2871_v14 = vsel %vm2862_vm7, %v2838_v9, %v1096_v15  ;;  %v3064_v11 = vsel %vm2829_vm6, %v3032_v10, %v2244_v60  ;;  %v1432_v20 = vrot.slane %v17407_v27, %v16872_v23 }
 0x22f   :  { %14229 = vmatpush1.bf16.msra.mxu1 %v14228_v49  ;;  %7425 = vmatprep.mubr.f32.mxu0 %v20143_v36  ;;  %v17641_v39 = vsel %vm2895_vm8, %v2871_v14, %v1260_v12  ;;  %v3096_v46 = vsel %vm2862_vm7, %v3064_v11, %v2408_v31  ;;  %v1596_v47 = vrot.slane %v17420_v16, %v16872_v23  ;;  %v2708_v49 = vsel %vm2697_vm2, 0.2820948, %v284_v6 }
 0x230   :  { %7544 = vmatprep.mubr.f32.mxu1 %v20143_v36  ;;  %14231 = vmatprep.subr.bf16.mxu0 %v14230_v41  ;;  %v17650_v15 = vsel %vm2895_vm8, %v3096_v46, %v2572_v7  ;;  %v1760_v43 = vrot.slane %v17416_v33, %v16872_v23  ;;  %v1924_v48 = vrot.slane %v17422_v25, %v16872_v23  ;;  %v17662_v41 = vld [vmem:[%s20108_s3 + $0x10] sm:$0xff] }
 0x231   :  { %13511 = vmatmul.mubr.msk.f32.gmra.mrb[130].mxu0 %vm7327_vm9, %v17622_v35  ;;  %14235 = vmatprep.subr.bf16.mxu1 %v14234_v61  ;;  %v14232_v12 = vpack.c.bf16 %v17650_v15, %v17641_v39  ;;  %v2088_v32 = vrot.slane %v17424_v42, %v16872_v23  ;;  %v2252_v19 = vrot.slane %v17427_v44, %v16872_v23 }
 0x232   :  { %13520 = vmatmul.mubr.msk.f32.gmra.mrb[130].mxu1 %vm7327_vm9, %v17622_v35  ;;  %7431 = vmatprep.mubr.f32.mxu0 %v20143_v36  ;;  %v2416_v62 = vrot.slane %v17429_v59, %v16872_v23  ;;  %v2580_v28 = vrot.slane %v17455_v29, %v16872_v23  ;;  %v2741_v57 = vsel %vm2730_vm3, %v2708_v49, %v448_v24  ;;  %v17697_v24 = vld [vmem:[%s20108_s3 + $0x18] sm:$0xff]  ;;  %v17736_v49 = vld [vmem:[%s20108_s3 + $0x20] sm:$0xff] }
 0x233   :  { %7550 = vmatprep.mubr.f32.mxu1 %v20143_v36  ;;  %v2938_v38 = vsel %vm2697_vm2, %v1432_v20, %v1596_v47  ;;  %v2774_v5 = vsel %vm2763_vm4, %v2741_v57, %v612_v63  ;;  %v296_v61 = vrot.slane %v17384_v21, %v16932_v51  ;;  %v460_v31 = vrot.slane %v17387_v17, %v16932_v51 }
 0x234   :  { %v2970_v60 = vsel %vm2730_vm3, %v2938_v38, %v1760_v43  ;;  %v2807_v7 = vsel %vm2796_vm5, %v2774_v5, %v776_v26  ;;  %v624_v55 = vrot.slane %v17389_v54, %v16932_v51  ;;  %v788_v6 = vrot.slane %v17395_v2, %v16932_v51 }
 0x235   :  { %13512 = vmatmul.mubr.msk.f32.gmra.mrb[132].mxu0 %vm7327_vm9, %v17662_v41  ;;  %v3002_v4 = vsel %vm2763_vm4, %v2970_v60, %v1924_v48  ;;  %v2840_v0 = vsel %vm2829_vm6, %v2807_v7, %v940_v18  ;;  %v952_v63 = vrot.slane %v17397_v50, %v16932_v51  ;;  %v2711_v26 = vsel %vm2697_vm2, 0.2820948, %v296_v61 }
 0x236   :  { %13521 = vmatmul.mubr.msk.f32.gmra.mrb[132].mxu1 %vm7327_vm9, %v17662_v41  ;;  %7437 = vmatprep.mubr.f32.mxu0 %v20143_v36  ;;  %v3034_v53 = vsel %vm2796_vm5, %v3002_v4, %v2088_v32  ;;  %v2873_v40 = vsel %vm2862_vm7, %v2840_v0, %v1104_v13  ;;  %v1116_v9 = vrot.slane %v17405_v3, %v16932_v51  ;;  %v17771_v0 = vld [vmem:[%s20108_s3 + $0x28] sm:$0xff] }
 0x237   :  { %7556 = vmatprep.mubr.f32.mxu1 %v20143_v36  ;;  %v3066_v52 = vsel %vm2829_vm6, %v3034_v53, %v2252_v19  ;;  %v1280_v10 = vrot.slane %v17399_v22, %v16932_v51  ;;  %v17712_v18 = vsel %vm2895_vm8, %v2873_v40, %v1268_v45  ;;  %v1444_v11 = vrot.slane %v17407_v27, %v16932_v51 }
 0x238   :  { %v3098_v14 = vsel %vm2862_vm7, %v3066_v52, %v2416_v62  ;;  %v1608_v20 = vrot.slane %v17420_v16, %v16932_v51  ;;  %v1772_v46 = vrot.slane %v17416_v33, %v16932_v51  ;;  %v1936_v45 = vrot.slane %v17422_v25, %v16932_v51 }
 0x239   :  { %13513 = vmatmul.mubr.msk.f32.gmra.mrb[134].mxu0 %vm7327_vm9, %v17697_v24  ;;  %v17722_v13 = vsel %vm2895_vm8, %v3098_v14, %v2580_v28  ;;  %v2100_v47 = vrot.slane %v17424_v42, %v16932_v51  ;;  %v2264_v48 = vrot.slane %v17427_v44, %v16932_v51  ;;  %v2428_v32 = vrot.slane %v17429_v59, %v16932_v51 }
 0x23a   :  { %13522 = vmatmul.mubr.msk.f32.gmra.mrb[134].mxu1 %vm7327_vm9, %v17697_v24  ;;  %7443 = vmatprep.mubr.f32.mxu0 %v20143_v36  ;;  %v2592_v19 = vrot.slane %v17455_v29, %v16932_v51  ;;  %v2744_v62 = vsel %vm2730_vm3, %v2711_v26, %v460_v31  ;;  %v2941_v28 = vsel %vm2697_vm2, %v1444_v11, %v1608_v20 }
 0x23b   :  { %7562 = vmatprep.mubr.f32.mxu1 %v20143_v36  ;;  %v304_v57 = vrot.slane %v17384_v21, %v17061_v58  ;;  %v2777_v38 = vsel %vm2763_vm4, %v2744_v62, %v624_v55  ;;  %v2973_v5 = vsel %vm2730_vm3, %v2941_v28, %v1772_v46  ;;  %v468_v60 = vrot.slane %v17387_v17, %v17061_v58  ;;  %v17810_v62 = vld [vmem:[%s20108_s3 + $0x30] sm:$0xff] }
 0x23c   :  { %v632_v61 = vrot.slane %v17389_v54, %v17061_v58  ;;  %v2810_v31 = vsel %vm2796_vm5, %v2777_v38, %v788_v6  ;;  %v3005_v7 = vsel %vm2763_vm4, %v2973_v5, %v1936_v45  ;;  %v796_v4 = vrot.slane %v17395_v2, %v17061_v58 }
 0x23d   :  { %13514 = vmatmul.mubr.msk.f32.gmra.mrb[136].mxu0 %vm7327_vm9, %v17736_v49  ;;  %v960_v55 = vrot.slane %v17397_v50, %v17061_v58  ;;  %v2843_v6 = vsel %vm2829_vm6, %v2810_v31, %v952_v63  ;;  %v3037_v53 = vsel %vm2796_vm5, %v3005_v7, %v2100_v47  ;;  %v1124_v26 = vrot.slane %v17405_v3, %v17061_v58 }
 0x23e   :  { %13523 = vmatmul.mubr.msk.f32.gmra.mrb[136].mxu1 %vm7327_vm9, %v17736_v49  ;;  %7449 = vmatprep.mubr.f32.mxu0 %v20143_v36  ;;  %v2713_v40 = vsel %vm2697_vm2, 0.2820948, %v304_v57  ;;  %v2876_v52 = vsel %vm2862_vm7, %v2843_v6, %v1116_v9  ;;  %v3069_v14 = vsel %vm2829_vm6, %v3037_v53, %v2264_v48  ;;  %v1288_v11 = vrot.slane %v17399_v22, %v17061_v58 }
 0x23f   :  { %7568 = vmatprep.mubr.f32.mxu1 %v20143_v36  ;;  %v1452_v20 = vrot.slane %v17407_v27, %v17061_v58  ;;  %v17786_v63 = vsel %vm2895_vm8, %v2876_v52, %v1280_v10  ;;  %v3101_v46 = vsel %vm2862_vm7, %v3069_v14, %v2428_v32  ;;  %v1616_v45 = vrot.slane %v17420_v16, %v17061_v58 }
 0x240   :  { %v1780_v47 = vrot.slane %v17416_v33, %v17061_v58  ;;  %v17796_v9 = vsel %vm2895_vm8, %v3101_v46, %v2592_v19  ;;  %v1944_v48 = vrot.slane %v17422_v25, %v17061_v58  ;;  %v2108_v10 = vrot.slane %v17424_v42, %v17061_v58  ;;  %v17845_v46 = vld [vmem:[%s20108_s3 + $0x38] sm:$0xff] }
 0x241   :  { %13515 = vmatmul.mubr.msk.f32.gmra.mrb[138].mxu0 %vm7327_vm9, %v17771_v0  ;;  %v2272_v32 = vrot.slane %v17427_v44, %v17061_v58  ;;  %v2436_v28 = vrot.slane %v17429_v59, %v17061_v58  ;;  %v2600_v57 = vrot.slane %v17455_v29, %v17061_v58  ;;  %v2746_v38 = vsel %vm2730_vm3, %v2713_v40, %v468_v60 }
 0x242   :  { %13524 = vmatmul.mubr.msk.f32.gmra.mrb[138].mxu1 %vm7327_vm9, %v17771_v0  ;;  %7455 = vmatprep.mubr.f32.mxu0 %v20143_v36  ;;  %v2943_v5 = vsel %vm2697_vm2, %v1452_v20, %v1616_v45  ;;  %v292_v31 = vrot.slane %v17384_v21, %v17124_v30  ;;  %v456_v7 = vrot.slane %v17387_v17, %v17124_v30 }
 0x243   :  { %7574 = vmatprep.mubr.f32.mxu1 %v20143_v36  ;;  %v2779_v6 = vsel %vm2763_vm4, %v2746_v38, %v632_v61  ;;  %v2975_v53 = vsel %vm2730_vm3, %v2943_v5, %v1780_v47  ;;  %v620_v52 = vrot.slane %v17389_v54, %v17124_v30  ;;  %v784_v14 = vrot.slane %v17395_v2, %v17124_v30 }
 0x244   :  { %v2812_v60 = vsel %vm2796_vm5, %v2779_v6, %v796_v4  ;;  %v3007_v40 = vsel %vm2763_vm4, %v2975_v53, %v1944_v48  ;;  %v948_v20 = vrot.slane %v17397_v50, %v17124_v30  ;;  %v1112_v61 = vrot.slane %v17405_v3, %v17124_v30 }
 0x245   :  { %13516 = vmatmul.mubr.msk.f32.gmra.mrb[140].mxu0 %vm7327_vm9, %v17810_v62  ;;  %v2845_v4 = vsel %vm2829_vm6, %v2812_v60, %v960_v55  ;;  %v3039_v45 = vsel %vm2796_vm5, %v3007_v40, %v2108_v10  ;;  %v1276_v47 = vrot.slane %v17399_v22, %v17124_v30  ;;  %v2710_v48 = vsel %vm2697_vm2, 0.2820948, %v292_v31  ;;  %v17884_v40 = vld [vmem:[%s20108_s3 + $0x40] sm:$0x1] }
 0x246   :  { %13525 = vmatmul.mubr.msk.f32.gmra.mrb[140].mxu1 %vm7327_vm9, %v17810_v62  ;;  %7461 = vmatprep.mubr.f32.mxu0 %v20143_v36  ;;  %v2878_v38 = vsel %vm2862_vm7, %v2845_v4, %v1124_v26  ;;  %v3071_v5 = vsel %vm2829_vm6, %v3039_v45, %v2272_v32  ;;  %v1440_v6 = vrot.slane %v17407_v27, %v17124_v30 }
 0x247   :  { %7580 = vmatprep.mubr.f32.mxu1 %v20143_v36  ;;  %v1604_v53 = vrot.slane %v17420_v16, %v17124_v30  ;;  %v17860_v55 = vsel %vm2895_vm8, %v2878_v38, %v1288_v11  ;;  %v3103_v10 = vsel %vm2862_vm7, %v3071_v5, %v2436_v28  ;;  %v1768_v31 = vrot.slane %v17416_v33, %v17124_v30 }
 0x248   :  { %v1932_v60 = vrot.slane %v17422_v25, %v17124_v30  ;;  %v17870_v26 = vsel %vm2895_vm8, %v3103_v10, %v2600_v57  ;;  %v2096_v32 = vrot.slane %v17424_v42, %v17124_v30  ;;  %v2260_v11 = vrot.slane %v17427_v44, %v17124_v30 }
 0x249   :  { %13517 = vmatmul.mubr.msk.f32.gmra.mrb[142].mxu0 %vm7327_vm9, %v17845_v46  ;;  %v2424_v28 = vrot.slane %v17429_v59, %v17124_v30  ;;  %v14242_v57 = vpack.c.bf16 %v17870_v26, %v17860_v55  ;;  %v2588_v4 = vrot.slane %v17455_v29, %v17124_v30  ;;  %v2743_v45 = vsel %vm2730_vm3, %v2710_v48, %v456_v7 }
 0x24a   :  { %13526 = vmatmul.mubr.msk.f32.gmra.mrb[142].mxu1 %vm7327_vm9, %v17845_v46  ;;  %7467 = vmatprep.mubr.f32.mxu0 %v20143_v36  ;;  %v2776_v38 = vsel %vm2763_vm4, %v2743_v45, %v620_v52  ;;  %v2940_v5 = vsel %vm2697_vm2, %v1440_v6, %v1604_v53  ;;  %v300_v10 = vrot.slane %v17384_v21, %v17143_v34 }
 0x24b   :  { %7586 = vmatprep.mubr.f32.mxu1 %v20143_v36  ;;  %v464_v19 = vrot.slane %v17387_v17, %v17143_v34  ;;  %v2809_v43 = vsel %vm2796_vm5, %v2776_v38, %v784_v14  ;;  %v2972_v55 = vsel %vm2730_vm3, %v2940_v5, %v1768_v31  ;;  %v628_v26 = vrot.slane %v17389_v54, %v17143_v34  ;;  %v13220_v31 = vld [vmem:[%s20107_s1 + $0x40] ss:$4 sm:$0xff] }
 0x24c   :  { %v792_v7 = vrot.slane %v17395_v2, %v17143_v34  ;;  %v2842_v52 = vsel %vm2829_vm6, %v2809_v43, %v948_v20  ;;  %v3004_v21 = vsel %vm2763_vm4, %v2972_v55, %v1932_v60  ;;  %v956_v17 = vrot.slane %v17397_v50, %v17143_v34 }
 0x24d   :  { %13518 = vmatmul.mubr.msk.f32.gmra.mrb[144].mxu0 %vm7327_vm9, %v17884_v40  ;;  %v1120_v14 = vrot.slane %v17405_v3, %v17143_v34  ;;  %v2875_v54 = vsel %vm2862_vm7, %v2842_v52, %v1112_v61  ;;  %v3036_v2 = vsel %vm2796_vm5, %v3004_v21, %v2096_v32  ;;  %v1284_v43 = vrot.slane %v17399_v22, %v17143_v34  ;;  %v18010_v52 = vld [vmem:[%s20107_s1 + $0x61] ss:$4 sm:$0xff] }
 0x24e   :  { %13527 = vmatmul.mubr.msk.f32.gmra.mrb[144].mxu1 %vm7327_vm9, %v17884_v40  ;;  %7657 = vmatprep.mubr.f32.mxu0 %v20143_v36  ;;  %v2712_v20 = vsel %vm2697_vm2, 0.2820948, %v300_v10  ;;  %v17922_v50 = vsel %vm2895_vm8, %v2875_v54, %v1276_v47  ;;  %v3068_v3 = vsel %vm2829_vm6, %v3036_v2, %v2260_v11  ;;  %v1448_v48 = vrot.slane %v17407_v27, %v17143_v34 }
 0x24f   :  { %7776 = vmatprep.mubr.f32.mxu1 %v20143_v36  ;;  %v1612_v61 = vrot.slane %v17420_v16, %v17143_v34  ;;  %v3100_v6 = vsel %vm2862_vm7, %v3068_v3, %v2424_v28  ;;  %v1776_v22 = vrot.slane %v17416_v33, %v17143_v34  ;;  %v1940_v53 = vrot.slane %v17422_v25, %v17143_v34 }
 0x250   :  { %v2104_v47 = vrot.slane %v17424_v42, %v17143_v34  ;;  %v17942_v27 = vsel %vm2895_vm8, %v3100_v6, %v2588_v4  ;;  %v2268_v16 = vrot.slane %v17427_v44, %v17143_v34  ;;  %v2432_v33 = vrot.slane %v17429_v59, %v17143_v34  ;;  %v13224_v42 = vld [vmem:[%s20107_s1 + $0x41] ss:$4 sm:$0xff] }
 0x251   :  { %13528 = vmatmul.mubr.msk.f32.vlgmr.msra.gmra.mrb[146].mxu0 %vm7327_vm9, %v17587_v37  ;;  %v2596_v25 = vrot.slane %v17455_v29, %v17143_v34  ;;  %v14240_v44 = vpack.c.bf16 %v17942_v27, %v17922_v50  ;;  %v2745_v60 = vsel %vm2730_vm3, %v2712_v20, %v464_v19  ;;  %v2942_v59 = vsel %vm2697_vm2, %v1448_v48, %v1612_v61  ;;  %v13228_v29 = vld [vmem:[%s20107_s1 + $0x42] ss:$4 sm:$0xff] }
 0x252   :  { %13537 = vmatmul.mubr.msk.f32.vlgmr.msra.gmra.mrb[146].mxu1 %vm7327_vm9, %v17587_v37  ;;  %14233 = vmatpush1.bf16.msra.mxu0 %v14232_v12  ;;  %v20163_v32 = vpack.c.bf16 %v17722_v13, %v17712_v18  ;;  %v2778_v39 = vsel %vm2763_vm4, %v2745_v60, %v628_v26  ;;  %v2974_v15 = vsel %vm2730_vm3, %v2942_v59, %v1776_v22 }
 0x253   :  { %7663 = vmatprep.mubr.f32.mxu0 %v20143_v36  ;;  %v51_v12 = vmul.f32 %v13220_v31, %v13220_v31  ;;  %7782 = vmatprep.mubr.f32.mxu1 %v20143_v36  ;;  %v20164_v19 = vpack.c.bf16 %v17796_v9, %v17786_v63  ;;  %v2811_v11 = vsel %vm2796_vm5, %v2778_v39, %v792_v7  ;;  %v18005_v7 = vld [vmem:[%s20107_s1 + $0x60] ss:$4 sm:$0xff] }
 0x254   :  { %14237 = vmatpush1.bf16.msra.mxu1 %v20163_v32  ;;  %v3006_v28 = vsel %vm2763_vm4, %v2974_v15, %v1940_v53  ;;  %v55_v4 = vmul.f32 %v13224_v42, %v13224_v42  ;;  %v2844_v18 = vsel %vm2829_vm6, %v2811_v11, %v956_v17  ;;  %v63_v45 = vmul.f32 %v13228_v29, %v13228_v29 }
 0x255   :  { %14239 = vmatprep.subr.bf16.mxu0 %v20164_v19  ;;  %13529 = vmatmul.mubr.msk.f32.gmra.mrb[148].mxu0 %vm7327_vm9, %v17622_v35  ;;  %v3038_v13 = vsel %vm2796_vm5, %v3006_v28, %v2104_v47  ;;  %v2877_v63 = vsel %vm2862_vm7, %v2844_v18, %v1120_v14  ;;  %v52_v21 = vmul.f32 %v18005_v7, %v18005_v7  ;;  %v18025_v14 = vld [vmem:[%s20107_s1 + $0x62] ss:$4 sm:$0xff] }
 0x256   :  { %14243 = vmatprep.subr.bf16.mxu1 %v14242_v57  ;;  %13538 = vmatmul.mubr.msk.f32.gmra.mrb[148].mxu1 %vm7327_vm9, %v17622_v35  ;;  %v3070_v9 = vsel %vm2829_vm6, %v3038_v13, %v2268_v16  ;;  %v59_v38 = vadd.f32 %v55_v4, %v51_v12  ;;  %v17988_v5 = vsel %vm2895_vm8, %v2877_v63, %v1284_v43 }
 0x257   :  { %7669 = vmatprep.mubr.f32.mxu0 %v20143_v36  ;;  %7788 = vmatprep.mubr.f32.mxu1 %v20143_v36  ;;  %v3102_v57 = vsel %vm2862_vm7, %v3070_v9, %v2432_v33  ;;  %v56_v17 = vmul.f32 %v18010_v52, %v18010_v52  ;;  %v64_v2 = vmul.f32 %v18025_v14, %v18025_v14 }
 0x258   :  { %v17992_v10 = vsel %vm2895_vm8, %v3102_v57, %v2596_v25  ;;  %v67_v55 = vadd.f32 %v63_v45, %v59_v38 }
 0x259   :  { %13530 = vmatmul.mubr.msk.f32.gmra.mrb[150].mxu0 %vm7327_vm9, %v17662_v41  ;;  %v60_v54 = vadd.f32 %v56_v17, %v52_v21 }
 0x25a   :  { %13539 = vmatmul.mubr.msk.f32.gmra.mrb[150].mxu1 %vm7327_vm9, %v17662_v41  ;;  %7675 = vmatprep.mubr.f32.mxu0 %v20143_v36  ;;  %15083 = vrsqrt.f32 %v67_v55 }
 0x25b   :  { %7794 = vmatprep.mubr.f32.mxu1 %v20143_v36  ;;  %v18040_v61 = vadd.f32 %v64_v2, %v60_v54 }
 0x25d   :  { %13531 = vmatmul.mubr.msk.f32.gmra.mrb[152].mxu0 %vm7327_vm9, %v17697_v24  ;;  %15085 = vrsqrt.f32 %v18040_v61 }
 0x25e   :  { %13540 = vmatmul.mubr.msk.f32.gmra.mrb[152].mxu1 %vm7327_vm9, %v17697_v24  ;;  %7681 = vmatprep.mubr.f32.mxu0 %v20143_v36 }
 0x25f   :  { %7800 = vmatprep.mubr.f32.mxu1 %v20143_v36 }
 0x261   :  { %13532 = vmatmul.mubr.msk.f32.gmra.mrb[154].mxu0 %vm7327_vm9, %v17736_v49 }
 0x262   :  { %13541 = vmatmul.mubr.msk.f32.gmra.mrb[154].mxu1 %vm7327_vm9, %v17736_v49  ;;  %7687 = vmatprep.mubr.f32.mxu0 %v20143_v36 }
 0x263   :  { %7806 = vmatprep.mubr.f32.mxu1 %v20143_v36 }
 0x264   :  { %v15084_v43 = vpop.eup %15083 }
 0x265   :  { %13533 = vmatmul.mubr.msk.f32.gmra.mrb[156].mxu0 %vm7327_vm9, %v17771_v0  ;;  %v75_v20 = vmul.f32 %v15084_v43, %v13220_v31  ;;  %v79_v3 = vmul.f32 %v15084_v43, %v13224_v42  ;;  %v83_v48 = vmul.f32 %v15084_v43, %v13228_v29 }
 0x266   :  { %13542 = vmatmul.mubr.msk.f32.gmra.mrb[156].mxu1 %vm7327_vm9, %v17771_v0  ;;  %7693 = vmatprep.mubr.f32.mxu0 %v20143_v36 }
 0x267   :  { %7812 = vmatprep.mubr.f32.mxu1 %v20143_v36  ;;  %v87_v6 = vmul.f32 %v75_v20, %v75_v20  ;;  %v91_v22 = vmul.f32 %v79_v3, %v79_v3  ;;  %v95_v53 = vmul.f32 %v83_v48, %v83_v48  ;;  %v99_v47 = vmul.f32 %v79_v3, %v75_v20 }
 0x268   :  { %v103_v16 = vmul.f32 %v83_v48, %v79_v3  ;;  %v107_v33 = vmul.f32 %v83_v48, %v75_v20  ;;  %v18043_v25 = vmul.f32 -0.48860252, %v79_v3  ;;  %v18045_v31 = vmul.f32 0.48860252, %v83_v48 }
 0x269   :  { %13534 = vmatmul.mubr.msk.f32.gmra.mrb[158].mxu0 %vm7327_vm9, %v17810_v62  ;;  %v18049_v42 = vmul.f32 -0.48860252, %v75_v20  ;;  %v18051_v60 = vmul.f32 1.0925485, %v99_v47  ;;  %v131_v59 = vmul.f32 0.9461747, %v95_v53  ;;  %v143_v29 = vsub.f32 %v87_v6, %v91_v22 }
 0x26a   :  { %13543 = vmatmul.mubr.msk.f32.gmra.mrb[158].mxu1 %vm7327_vm9, %v17810_v62  ;;  %7699 = vmatprep.mubr.f32.mxu0 %v20143_v36  ;;  %v18056_v32 = vmul.f32 -1.0925485, %v103_v16  ;;  %v18058_v39 = vmul.f32 -1.0925485, %v107_v33  ;;  %v151_v15 = vmul.f32 0.5900436, %v79_v3  ;;  %v312_v12 = vrot.slane %v18043_v25, %v20161_v1 }
 0x26b   :  { %7818 = vmatprep.mubr.f32.mxu1 %v20143_v36  ;;  %v18063_v19 = vadd.f32 -0.31539157, %v131_v59  ;;  %v18065_v11 = vmul.f32 0.54627424, %v143_v29  ;;  %v155_v28 = vmul.f32 -3.0, %v87_v6  ;;  %v179_v4 = vmul.f32 5.0, %v95_v53 }
 0x26c   :  { %v167_v18 = vmul.f32 2.8906114, %v99_v47  ;;  %v175_v13 = vmul.f32 0.4570458, %v79_v3  ;;  %v191_v45 = vmul.f32 0.37317634, %v83_v48  ;;  %v476_v63 = vrot.slane %v18045_v31, %v20161_v1 }
 0x26d   :  { %13535 = vmatmul.mubr.msk.f32.gmra.mrb[160].mxu0 %vm7327_vm9, %v17845_v46  ;;  %v159_v9 = vadd.f32 %v155_v28, %v91_v22  ;;  %v183_v38 = vsub.f32 1.0, %v179_v4  ;;  %v13236_v57 = vadd.f32 -3.0, %v179_v4  ;;  %v203_v55 = vmul.f32 0.4570458, %v75_v20 }
 0x26e   :  { %13544 = vmatmul.mubr.msk.f32.gmra.mrb[160].mxu1 %vm7327_vm9, %v17845_v46  ;;  %7705 = vmatprep.mubr.f32.mxu0 %v20143_v36  ;;  %v18074_v21 = vmul.f32 %v167_v18, %v83_v48  ;;  %v211_v17 = vmul.f32 1.4453057, %v83_v48  ;;  %v219_v54 = vmul.f32 0.5900436, %v75_v20  ;;  %v223_v2 = vsub.f32 0.0, %v87_v6 }
 0x26f   :  { %7824 = vmatprep.mubr.f32.mxu1 %v20143_v36  ;;  %v18077_v43 = vmul.f32 %v159_v9, %v151_v15  ;;  %v18079_v3 = vmul.f32 %v183_v38, %v175_v13  ;;  %v18081_v53 = vmul.f32 %v13236_v57, %v191_v45  ;;  %v18083_v47 = vmul.f32 %v203_v55, %v183_v38 }
 0x270   :  { %v18085_v16 = vmul.f32 %v211_v17, %v143_v29  ;;  %v227_v33 = vmul.f32 3.0, %v91_v22  ;;  %v640_v59 = vrot.slane %v18049_v42, %v20161_v1  ;;  %v804_v20 = vrot.slane %v18051_v60, %v20161_v1 }
 0x271   :  { %13536 = vmatmul.mubr.msk.f32.gmra.mrb[162].mxu0 %vm7327_vm9, %v17884_v40  ;;  %v968_v48 = vrot.slane %v18056_v32, %v20161_v1  ;;  %v1132_v6 = vrot.slane %v18063_v19, %v20161_v1  ;;  %v1296_v29 = vrot.slane %v18058_v39, %v20161_v1  ;;  %v1460_v22 = vrot.slane %v18065_v11, %v20161_v1 }
 0x272   :  { %13545 = vmatmul.mubr.msk.f32.gmra.mrb[162].mxu1 %vm7327_vm9, %v17884_v40  ;;  %7895 = vmatprep.mubr.f32.mxu0 %v20143_v36  ;;  %v231_v15 = vadd.f32 %v227_v33, %v223_v2  ;;  %v1624_v28 = vrot.slane %v18077_v43, %v20161_v1  ;;  %v1788_v4 = vrot.slane %v18074_v21, %v20161_v1  ;;  %v2715_v18 = vsel %vm2697_vm2, 0.2820948, %v312_v12 }
 0x273   :  { %8014 = vmatprep.mubr.f32.mxu1 %v20143_v36  ;;  %v1952_v13 = vrot.slane %v18079_v3, %v20161_v1  ;;  %v2116_v45 = vrot.slane %v18081_v53, %v20161_v1  ;;  %v2280_v9 = vrot.slane %v18083_v47, %v20161_v1  ;;  %v2444_v38 = vrot.slane %v18085_v16, %v20161_v1 }
 0x274   :  { %v18118_v57 = vmul.f32 %v231_v15, %v219_v54  ;;  %v2748_v55 = vsel %vm2730_vm3, %v2715_v18, %v476_v63  ;;  %v2945_v12 = vsel %vm2697_vm2, %v1460_v22, %v1624_v28  ;;  %v320_v17 = vrot.slane %v18043_v25, %v20162_v8 }
 0x275   :  { %13546 = vmatmul.mubr.msk.f32.vlgmr.msra.gmra.mrb[164].mxu0 %vm7327_vm9, %v17587_v37  ;;  %v2781_v2 = vsel %vm2763_vm4, %v2748_v55, %v640_v59  ;;  %v2977_v33 = vsel %vm2730_vm3, %v2945_v12, %v1788_v4  ;;  %v484_v26 = vrot.slane %v18045_v31, %v20162_v8  ;;  %v648_v54 = vrot.slane %v18049_v42, %v20162_v8 }
 0x276   :  { %13555 = vmatmul.mubr.msk.f32.vlgmr.msra.gmra.mrb[164].mxu1 %vm7327_vm9, %v17587_v37  ;;  %14241 = vmatpush1.bf16.msra.mxu0 %v14240_v44  ;;  %v2608_v63 = vrot.slane %v18118_v57, %v20161_v1  ;;  %v2814_v59 = vsel %vm2796_vm5, %v2781_v2, %v804_v20  ;;  %v3009_v22 = vsel %vm2763_vm4, %v2977_v33, %v1952_v13  ;;  %v2717_v27 = vsel %vm2697_vm2, 0.2820948, %v320_v17 }
 0x277   :  { %v20165_v15 = vpack.c.bf16 %v17992_v10, %v17988_v5  ;;  %7901 = vmatprep.mubr.f32.mxu0 %v20143_v36  ;;  %v2847_v28 = vsel %vm2829_vm6, %v2814_v59, %v968_v48  ;;  %v3041_v37 = vsel %vm2796_vm5, %v3009_v22, %v2116_v45  ;;  %v812_v50 = vrot.slane %v18051_v60, %v20162_v8 }
 0x278   :  { %8020 = vmatprep.mubr.f32.mxu1 %v20143_v36  ;;  %v2880_v44 = vsel %vm2862_vm7, %v2847_v28, %v1132_v6  ;;  %v3073_v20 = vsel %vm2829_vm6, %v3041_v37, %v2280_v9  ;;  %v976_v5 = vrot.slane %v18056_v32, %v20162_v8  ;;  %v1140_v10 = vrot.slane %v18063_v19, %v20162_v8 }
 0x279   :  { %14245 = vmatpush1.bf16.msra.mxu1 %v20165_v15  ;;  %13547 = vmatmul.mubr.msk.f32.gmra.mrb[166].mxu0 %vm7327_vm9, %v17622_v35  ;;  %v2913_v48 = vsel %vm2895_vm8, %v2880_v44, %v1296_v29  ;;  %v3105_v4 = vsel %vm2862_vm7, %v3073_v20, %v2444_v38  ;;  %v1304_v18 = vrot.slane %v18058_v39, %v20162_v8 }
 0x27a   :  { %v1468_v6 = vrot.slane %v18065_v11, %v20162_v8  ;;  %13556 = vmatmul.mubr.msk.f32.gmra.mrb[166].mxu1 %vm7327_vm9, %v17622_v35  ;;  %7907 = vmatprep.mubr.f32.mxu0 %v20143_v36  ;;  %v3137_v13 = vsel %vm2895_vm8, %v3105_v4, %v2608_v63  ;;  %v1632_v45 = vrot.slane %v18077_v43, %v20162_v8 }
 0x27b   :  { %v1796_v29 = vrot.slane %v18074_v21, %v20162_v8  ;;  %8026 = vmatprep.mubr.f32.mxu1 %v20143_v36  ;;  %v14246_v9 = vpack.c.bf16 %v3137_v13, %v2913_v48  ;;  %v1960_v38 = vrot.slane %v18079_v3, %v20162_v8  ;;  %v2124_v55 = vrot.slane %v18081_v53, %v20162_v8 }
 0x27c   :  { %v2288_v12 = vrot.slane %v18083_v47, %v20162_v8  ;;  %v2452_v17 = vrot.slane %v18085_v16, %v20162_v8  ;;  %v2616_v2 = vrot.slane %v18118_v57, %v20162_v8  ;;  %v2750_v33 = vsel %vm2730_vm3, %v2717_v27, %v484_v26 }
 0x27d   :  { %v2947_v63 = vsel %vm2697_vm2, %v1468_v6, %v1632_v45  ;;  %13548 = vmatmul.mubr.msk.f32.gmra.mrb[168].mxu0 %vm7327_vm9, %v17662_v41  ;;  %14247 = vmatprep.subr.bf16.mxu0 %v14246_v9  ;;  %v2783_v59 = vsel %vm2763_vm4, %v2750_v33, %v648_v54  ;;  %v308_v15 = vrot.slane %v18043_v25, %v16751_v56 }
 0x27e   :  { %v2979_v22 = vsel %vm2730_vm3, %v2947_v63, %v1796_v29  ;;  %13557 = vmatmul.mubr.msk.f32.gmra.mrb[168].mxu1 %vm7327_vm9, %v17662_v41  ;;  %7913 = vmatprep.mubr.f32.mxu0 %v20143_v36  ;;  %v2816_v26 = vsel %vm2796_vm5, %v2783_v59, %v812_v50  ;;  %v472_v37 = vrot.slane %v18045_v31, %v16751_v56 }
 0x27f   :  { %v3011_v28 = vsel %vm2763_vm4, %v2979_v22, %v1960_v38  ;;  %8032 = vmatprep.mubr.f32.mxu1 %v20143_v36  ;;  %v2849_v54 = vsel %vm2829_vm6, %v2816_v26, %v976_v5  ;;  %v636_v44 = vrot.slane %v18049_v42, %v16751_v56  ;;  %v800_v20 = vrot.slane %v18051_v60, %v16751_v56 }
 0x280   :  { %v3043_v27 = vsel %vm2796_vm5, %v3011_v28, %v2124_v55  ;;  %v2882_v48 = vsel %vm2862_vm7, %v2849_v54, %v1140_v10  ;;  %v964_v4 = vrot.slane %v18056_v32, %v16751_v56  ;;  %v1128_v6 = vrot.slane %v18063_v19, %v16751_v56 }
 0x281   :  { %v3075_v50 = vsel %vm2829_vm6, %v3043_v27, %v2288_v12  ;;  %13549 = vmatmul.mubr.msk.f32.gmra.mrb[170].mxu0 %vm7327_vm9, %v17697_v24  ;;  %v2915_v5 = vsel %vm2895_vm8, %v2882_v48, %v1304_v18  ;;  %v1292_v45 = vrot.slane %v18058_v39, %v16751_v56  ;;  %v1456_v10 = vrot.slane %v18065_v11, %v16751_v56 }
 0x282   :  { %v3107_v13 = vsel %vm2862_vm7, %v3075_v50, %v2452_v17  ;;  %13558 = vmatmul.mubr.msk.f32.gmra.mrb[170].mxu1 %vm7327_vm9, %v17697_v24  ;;  %7919 = vmatprep.mubr.f32.mxu0 %v20143_v36  ;;  %v1620_v9 = vrot.slane %v18077_v43, %v16751_v56  ;;  %v1784_v18 = vrot.slane %v18074_v21, %v16751_v56  ;;  %v2714_v38 = vsel %vm2697_vm2, 0.2820948, %v308_v15 }
 0x283   :  { %v3139_v29 = vsel %vm2895_vm8, %v3107_v13, %v2616_v2  ;;  %8038 = vmatprep.mubr.f32.mxu1 %v20143_v36  ;;  %v1948_v12 = vrot.slane %v18079_v3, %v16751_v56  ;;  %v2112_v17 = vrot.slane %v18081_v53, %v16751_v56  ;;  %v2276_v2 = vrot.slane %v18083_v47, %v16751_v56 }
 0x284   :  { %v14250_v55 = vpack.c.bf16 %v3139_v29, %v2915_v5  ;;  %v2440_v33 = vrot.slane %v18085_v16, %v16751_v56  ;;  %v2604_v63 = vrot.slane %v18118_v57, %v16751_v56  ;;  %v2747_v59 = vsel %vm2730_vm3, %v2714_v38, %v472_v37 }
 0x285   :  { %v2944_v22 = vsel %vm2697_vm2, %v1456_v10, %v1620_v9  ;;  %13550 = vmatmul.mubr.msk.f32.gmra.mrb[172].mxu0 %vm7327_vm9, %v17736_v49  ;;  %v2780_v15 = vsel %vm2763_vm4, %v2747_v59, %v636_v44  ;;  %v316_v28 = vrot.slane %v18043_v25, %v16872_v23  ;;  %v480_v27 = vrot.slane %v18045_v31, %v16872_v23 }
 0x286   :  { %14251 = vmatprep.subr.bf16.mxu1 %v14250_v55  ;;  %v2976_v26 = vsel %vm2730_vm3, %v2944_v22, %v1784_v18  ;;  %13559 = vmatmul.mubr.msk.f32.gmra.mrb[172].mxu1 %vm7327_vm9, %v17736_v49  ;;  %v2813_v37 = vsel %vm2796_vm5, %v2780_v15, %v800_v20  ;;  %v644_v50 = vrot.slane %v18049_v42, %v16872_v23 }
 0x287   :  { %7925 = vmatprep.mubr.f32.mxu0 %v20143_v36  ;;  %v3008_v54 = vsel %vm2763_vm4, %v2976_v26, %v1948_v12  ;;  %8044 = vmatprep.mubr.f32.mxu1 %v20143_v36  ;;  %v2846_v44 = vsel %vm2829_vm6, %v2813_v37, %v964_v4  ;;  %v808_v5 = vrot.slane %v18051_v60, %v16872_v23  ;;  %v2716_v12 = vsel %vm2697_vm2, 0.2820948, %v316_v28 }
 0x288   :  { %v3040_v48 = vsel %vm2796_vm5, %v3008_v54, %v2112_v17  ;;  %v2879_v13 = vsel %vm2862_vm7, %v2846_v44, %v1128_v6  ;;  %v972_v10 = vrot.slane %v18056_v32, %v16872_v23  ;;  %v1136_v29 = vrot.slane %v18063_v19, %v16872_v23 }
 0x289   :  { %v3072_v20 = vsel %vm2829_vm6, %v3040_v48, %v2276_v2  ;;  %13551 = vmatmul.mubr.msk.f32.gmra.mrb[174].mxu0 %vm7327_vm9, %v17771_v0  ;;  %v18271_v4 = vsel %vm2895_vm8, %v2879_v13, %v1292_v45  ;;  %v1300_v18 = vrot.slane %v18058_v39, %v16872_v23  ;;  %v1464_v6 = vrot.slane %v18065_v11, %v16872_v23 }
 0x28a   :  { %v3104_v9 = vsel %vm2862_vm7, %v3072_v20, %v2440_v33  ;;  %13560 = vmatmul.mubr.msk.f32.gmra.mrb[174].mxu1 %vm7327_vm9, %v17771_v0  ;;  %7931 = vmatprep.mubr.f32.mxu0 %v20143_v36  ;;  %v1628_v45 = vrot.slane %v18077_v43, %v16872_v23  ;;  %v1792_v55 = vrot.slane %v18074_v21, %v16872_v23 }
 0x28b   :  { %v18282_v38 = vsel %vm2895_vm8, %v3104_v9, %v2604_v63  ;;  %8050 = vmatprep.mubr.f32.mxu1 %v20143_v36  ;;  %v1956_v2 = vrot.slane %v18079_v3, %v16872_v23  ;;  %v2120_v33 = vrot.slane %v18081_v53, %v16872_v23  ;;  %v2284_v63 = vrot.slane %v18083_v47, %v16872_v23 }
 0x28c   :  { %v14248_v17 = vpack.c.bf16 %v18282_v38, %v18271_v4  ;;  %v2448_v59 = vrot.slane %v18085_v16, %v16872_v23  ;;  %v2612_v22 = vrot.slane %v18118_v57, %v16872_v23  ;;  %v2749_v15 = vsel %vm2730_vm3, %v2716_v12, %v480_v27 }
 0x28d   :  { %v2946_v26 = vsel %vm2697_vm2, %v1464_v6, %v1628_v45  ;;  %13552 = vmatmul.mubr.msk.f32.gmra.mrb[176].mxu0 %vm7327_vm9, %v17810_v62  ;;  %v2782_v28 = vsel %vm2763_vm4, %v2749_v15, %v644_v50  ;;  %v328_v54 = vrot.slane %v18043_v25, %v16932_v51  ;;  %v492_v44 = vrot.slane %v18045_v31, %v16932_v51 }
 0x28e   :  { %v2978_v37 = vsel %vm2730_vm3, %v2946_v26, %v1792_v55  ;;  %13561 = vmatmul.mubr.msk.f32.gmra.mrb[176].mxu1 %vm7327_vm9, %v17810_v62  ;;  %7937 = vmatprep.mubr.f32.mxu0 %v20143_v36  ;;  %v2815_v27 = vsel %vm2796_vm5, %v2782_v28, %v808_v5  ;;  %v656_v50 = vrot.slane %v18049_v42, %v16932_v51 }
 0x28f   :  { %v3010_v48 = vsel %vm2763_vm4, %v2978_v37, %v1956_v2  ;;  %8056 = vmatprep.mubr.f32.mxu1 %v20143_v36  ;;  %v2848_v13 = vsel %vm2829_vm6, %v2815_v27, %v972_v10  ;;  %v820_v9 = vrot.slane %v18051_v60, %v16932_v51  ;;  %v984_v6 = vrot.slane %v18056_v32, %v16932_v51 }
 0x290   :  { %v3042_v20 = vsel %vm2796_vm5, %v3010_v48, %v2120_v33  ;;  %v2881_v45 = vsel %vm2862_vm7, %v2848_v13, %v1136_v29  ;;  %v1148_v55 = vrot.slane %v18063_v19, %v16932_v51  ;;  %v1312_v12 = vrot.slane %v18058_v39, %v16932_v51 }
 0x291   :  { %v3074_v5 = vsel %vm2829_vm6, %v3042_v20, %v2284_v63  ;;  %13553 = vmatmul.mubr.msk.f32.gmra.mrb[178].mxu0 %vm7327_vm9, %v17845_v46  ;;  %v2914_v10 = vsel %vm2895_vm8, %v2881_v45, %v1300_v18  ;;  %v1476_v33 = vrot.slane %v18065_v11, %v16932_v51  ;;  %v1640_v29 = vrot.slane %v18077_v43, %v16932_v51 }
 0x292   :  { %v3106_v2 = vsel %vm2862_vm7, %v3074_v5, %v2448_v59  ;;  %13562 = vmatmul.mubr.msk.f32.gmra.mrb[178].mxu1 %vm7327_vm9, %v17845_v46  ;;  %7943 = vmatprep.mubr.f32.mxu0 %v20143_v36  ;;  %v1804_v15 = vrot.slane %v18074_v21, %v16932_v51  ;;  %v1968_v18 = vrot.slane %v18079_v3, %v16932_v51  ;;  %v2719_v59 = vsel %vm2697_vm2, 0.2820948, %v328_v54 }
 0x293   :  { %v3138_v63 = vsel %vm2895_vm8, %v3106_v2, %v2612_v22  ;;  %8062 = vmatprep.mubr.f32.mxu1 %v20143_v36  ;;  %v2132_v28 = vrot.slane %v18081_v53, %v16932_v51  ;;  %v2296_v37 = vrot.slane %v18083_v47, %v16932_v51  ;;  %v2460_v22 = vrot.slane %v18085_v16, %v16932_v51 }
 0x294   :  { %v14252_v26 = vpack.c.bf16 %v3138_v63, %v2914_v10  ;;  %v2624_v27 = vrot.slane %v18118_v57, %v16932_v51  ;;  %v2752_v48 = vsel %vm2730_vm3, %v2719_v59, %v492_v44  ;;  %v2949_v13 = vsel %vm2697_vm2, %v1476_v33, %v1640_v29 }
 0x295   :  { %v336_v54 = vrot.slane %v18043_v25, %v17061_v58  ;;  %13554 = vmatmul.mubr.msk.f32.gmra.mrb[180].mxu0 %vm7327_vm9, %v17884_v40  ;;  %v2785_v20 = vsel %vm2763_vm4, %v2752_v48, %v656_v50  ;;  %v2981_v45 = vsel %vm2730_vm3, %v2949_v13, %v1804_v15  ;;  %v500_v5 = vrot.slane %v18045_v31, %v17061_v58 }
 0x296   :  { %v664_v10 = vrot.slane %v18049_v42, %v17061_v58  ;;  %13563 = vmatmul.mubr.msk.f32.gmra.mrb[180].mxu1 %vm7327_vm9, %v17884_v40  ;;  %8133 = vmatprep.mubr.f32.mxu0 %v20143_v36  ;;  %v2818_v44 = vsel %vm2796_vm5, %v2785_v20, %v820_v9  ;;  %v3013_v2 = vsel %vm2763_vm4, %v2981_v45, %v1968_v18 }
 0x297   :  { %v828_v50 = vrot.slane %v18051_v60, %v17061_v58  ;;  %v2721_v33 = vsel %vm2697_vm2, 0.2820948, %v336_v54  ;;  %8252 = vmatprep.mubr.f32.mxu1 %v20143_v36  ;;  %v2851_v29 = vsel %vm2829_vm6, %v2818_v44, %v984_v6  ;;  %v3045_v63 = vsel %vm2796_vm5, %v3013_v2, %v2132_v28  ;;  %v18394_v6 = vld [vmem:[%s20108_s3] sm:$0xff] }
 0x298   :  { %v992_v15 = vrot.slane %v18056_v32, %v17061_v58  ;;  %v1156_v59 = vrot.slane %v18063_v19, %v17061_v58  ;;  %v2884_v9 = vsel %vm2862_vm7, %v2851_v29, %v1148_v55  ;;  %v3077_v18 = vsel %vm2829_vm6, %v3045_v63, %v2296_v37 }
 0x299   :  { %v1320_v48 = vrot.slane %v18058_v39, %v17061_v58  ;;  %v1484_v13 = vrot.slane %v18065_v11, %v17061_v58  ;;  %13564 = vmatmul.mubr.msk.f32.vlgmr.msra.gmra.mrb[182].mxu0 %vm7327_vm9, %v18394_v6  ;;  %v2917_v28 = vsel %vm2895_vm8, %v2884_v9, %v1312_v12  ;;  %v3109_v55 = vsel %vm2862_vm7, %v3077_v18, %v2460_v22 }
 0x29a   :  { %v1648_v37 = vrot.slane %v18077_v43, %v17061_v58  ;;  %v1812_v54 = vrot.slane %v18074_v21, %v17061_v58  ;;  %13573 = vmatmul.mubr.msk.f32.vlgmr.msra.gmra.mrb[182].mxu1 %vm7327_vm9, %v18394_v6  ;;  %14249 = vmatpush1.bf16.msra.mxu0 %v14248_v17  ;;  %v3141_v20 = vsel %vm2895_vm8, %v3109_v55, %v2624_v27 }
 0x29b   :  { %v1976_v12 = vrot.slane %v18079_v3, %v17061_v58  ;;  %v2140_v22 = vrot.slane %v18081_v53, %v17061_v58  ;;  %14253 = vmatpush1.bf16.msra.mxu1 %v14252_v26  ;;  %8139 = vmatprep.mubr.f32.mxu0 %v20143_v36  ;;  %v14254_v45 = vpack.c.bf16 %v3141_v20, %v2917_v28 }
 0x29c   :  { %v2304_v44 = vrot.slane %v18083_v47, %v17061_v58  ;;  %v2468_v2 = vrot.slane %v18085_v16, %v17061_v58  ;;  %8258 = vmatprep.mubr.f32.mxu1 %v20143_v36  ;;  %v2632_v4 = vrot.slane %v18118_v57, %v17061_v58  ;;  %v2754_v38 = vsel %vm2730_vm3, %v2721_v33, %v500_v5  ;;  %v18436_v5 = vld [vmem:[%s20108_s3 + $0x8] sm:$0xff] }
 0x29d   :  { %v2951_v17 = vsel %vm2697_vm2, %v1484_v13, %v1648_v37  ;;  %v324_v26 = vrot.slane %v18043_v25, %v17124_v30  ;;  %13565 = vmatmul.mubr.msk.f32.gmra.mrb[184].mxu0 %vm7327_vm9, %v17622_v35  ;;  %14255 = vmatprep.subr.bf16.mxu0 %v14254_v45  ;;  %v2787_v27 = vsel %vm2763_vm4, %v2754_v38, %v664_v10 }
 0x29e   :  { %v2983_v29 = vsel %vm2730_vm3, %v2951_v17, %v1812_v54  ;;  %v488_v63 = vrot.slane %v18045_v31, %v17124_v30  ;;  %13574 = vmatmul.mubr.msk.f32.gmra.mrb[184].mxu1 %vm7327_vm9, %v18436_v5  ;;  %8145 = vmatprep.mubr.f32.mxu0 %v20143_v36  ;;  %v2820_v35 = vsel %vm2796_vm5, %v2787_v27, %v828_v50 }
 0x29f   :  { %v3015_v10 = vsel %vm2763_vm4, %v2983_v29, %v1976_v12  ;;  %v652_v33 = vrot.slane %v18049_v42, %v17124_v30  ;;  %v2718_v9 = vsel %vm2697_vm2, 0.2820948, %v324_v26  ;;  %8264 = vmatprep.mubr.f32.mxu1 %v20143_v36  ;;  %v2853_v61 = vsel %vm2829_vm6, %v2820_v35, %v992_v15 }
 0x2a0   :  { %v3047_v18 = vsel %vm2796_vm5, %v3015_v10, %v2140_v22  ;;  %v816_v13 = vrot.slane %v18051_v60, %v17124_v30  ;;  %v980_v28 = vrot.slane %v18056_v32, %v17124_v30  ;;  %v2886_v50 = vsel %vm2862_vm7, %v2853_v61, %v1156_v59  ;;  %v18470_v22 = vld [vmem:[%s20108_s3 + $0x10] sm:$0xff] }
 0x2a1   :  { %v3079_v55 = vsel %vm2829_vm6, %v3047_v18, %v2304_v44  ;;  %v1144_v37 = vrot.slane %v18063_v19, %v17124_v30  ;;  %v1308_v54 = vrot.slane %v18058_v39, %v17124_v30  ;;  %13566 = vmatmul.mubr.msk.f32.gmra.mrb[186].mxu0 %vm7327_vm9, %v17662_v41  ;;  %v2919_v15 = vsel %vm2895_vm8, %v2886_v50, %v1320_v48 }
 0x2a2   :  { %v3111_v20 = vsel %vm2862_vm7, %v3079_v55, %v2468_v2  ;;  %v1472_v12 = vrot.slane %v18065_v11, %v17124_v30  ;;  %v1636_v59 = vrot.slane %v18077_v43, %v17124_v30  ;;  %13575 = vmatmul.mubr.msk.f32.gmra.mrb[186].mxu1 %vm7327_vm9, %v18470_v22  ;;  %8151 = vmatprep.mubr.f32.mxu0 %v20143_v36 }
 0x2a3   :  { %v3143_v41 = vsel %vm2895_vm8, %v3111_v20, %v2632_v4  ;;  %v1800_v48 = vrot.slane %v18074_v21, %v17124_v30  ;;  %v1964_v45 = vrot.slane %v18079_v3, %v17124_v30  ;;  %8270 = vmatprep.mubr.f32.mxu1 %v20143_v36  ;;  %v2128_v2 = vrot.slane %v18081_v53, %v17124_v30 }
 0x2a4   :  { %v14258_v44 = vpack.c.bf16 %v3143_v41, %v2919_v15  ;;  %v2292_v38 = vrot.slane %v18083_v47, %v17124_v30  ;;  %v2456_v17 = vrot.slane %v18085_v16, %v17124_v30  ;;  %v2620_v4 = vrot.slane %v18118_v57, %v17124_v30 }
 0x2a5   :  { %v2751_v26 = vsel %vm2730_vm3, %v2718_v9, %v488_v63  ;;  %v2948_v27 = vsel %vm2697_vm2, %v1472_v12, %v1636_v59  ;;  %v332_v29 = vrot.slane %v18043_v25, %v17143_v34  ;;  %13567 = vmatmul.mubr.msk.f32.gmra.mrb[188].mxu0 %vm7327_vm9, %v17697_v24  ;;  %v496_v61 = vrot.slane %v18045_v31, %v17143_v34  ;;  %v18502_v63 = vld [vmem:[%s20108_s3 + $0x18] sm:$0xff]  ;;  %v15086_v31 = vpop.eup %15085 }
 0x2a6   :  { %14259 = vmatprep.subr.bf16.mxu1 %v14258_v44  ;;  %v2784_v35 = vsel %vm2763_vm4, %v2751_v26, %v652_v33  ;;  %v2980_v10 = vsel %vm2730_vm3, %v2948_v27, %v1800_v48  ;;  %13576 = vmatmul.mubr.msk.f32.gmra.mrb[188].mxu1 %vm7327_vm9, %v18502_v63  ;;  %v660_v33 = vrot.slane %v18049_v42, %v17143_v34 }
 0x2a7   :  { %8157 = vmatprep.mubr.f32.mxu0 %v20143_v36  ;;  %v2817_v24 = vsel %vm2796_vm5, %v2784_v35, %v816_v13  ;;  %v3012_v25 = vsel %vm2763_vm4, %v2980_v10, %v1964_v45  ;;  %v2720_v9 = vsel %vm2697_vm2, 0.2820948, %v332_v29  ;;  %8276 = vmatprep.mubr.f32.mxu1 %v20143_v36  ;;  %v824_v55 = vrot.slane %v18051_v60, %v17143_v34 }
 0x2a8   :  { %v2850_v18 = vsel %vm2829_vm6, %v2817_v24, %v980_v28  ;;  %v3044_v50 = vsel %vm2796_vm5, %v3012_v25, %v2128_v2  ;;  %v988_v13 = vrot.slane %v18056_v32, %v17143_v34  ;;  %v1152_v42 = vrot.slane %v18063_v19, %v17143_v34  ;;  %v18538_v19 = vld [vmem:[%s20108_s3 + $0x20] sm:$0xff] }
 0x2a9   :  { %v2883_v15 = vsel %vm2862_vm7, %v2850_v18, %v1144_v37  ;;  %v3076_v20 = vsel %vm2829_vm6, %v3044_v50, %v2292_v38  ;;  %v1316_v12 = vrot.slane %v18058_v39, %v17143_v34  ;;  %13568 = vmatmul.mubr.msk.f32.gmra.mrb[190].mxu0 %vm7327_vm9, %v17736_v49  ;;  %v1480_v32 = vrot.slane %v18065_v11, %v17143_v34 }
 0x2aa   :  { %v18528_v28 = vsel %vm2895_vm8, %v2883_v15, %v1308_v54  ;;  %v3108_v60 = vsel %vm2862_vm7, %v3076_v20, %v2456_v17  ;;  %v1644_v37 = vrot.slane %v18077_v43, %v17143_v34  ;;  %13577 = vmatmul.mubr.msk.f32.gmra.mrb[190].mxu1 %vm7327_vm9, %v18538_v19  ;;  %8163 = vmatprep.mubr.f32.mxu0 %v20143_v36 }
 0x2ab   :  { %v18544_v49 = vsel %vm2895_vm8, %v3108_v60, %v2620_v4  ;;  %v1808_v39 = vrot.slane %v18074_v21, %v17143_v34  ;;  %v1972_v11 = vrot.slane %v18079_v3, %v17143_v34  ;;  %8282 = vmatprep.mubr.f32.mxu1 %v20143_v36  ;;  %v2136_v54 = vrot.slane %v18081_v53, %v17143_v34 }
 0x2ac   :  { %v14256_v43 = vpack.c.bf16 %v18544_v49, %v18528_v28  ;;  %v2300_v59 = vrot.slane %v18083_v47, %v17143_v34  ;;  %v2464_v41 = vrot.slane %v18085_v16, %v17143_v34  ;;  %v2628_v21 = vrot.slane %v18118_v57, %v17143_v34  ;;  %v18573_v57 = vld [vmem:[%s20108_s3 + $0x28] sm:$0xff] }
 0x2ad   :  { %v2753_v48 = vsel %vm2730_vm3, %v2720_v9, %v496_v61  ;;  %v2950_v3 = vsel %vm2697_vm2, %v1480_v32, %v1644_v37  ;;  %v76_v45 = vmul.f32 %v15086_v31, %v18005_v7  ;;  %13569 = vmatmul.mubr.msk.f32.gmra.mrb[192].mxu0 %vm7327_vm9, %v17771_v0  ;;  %v80_v47 = vmul.f32 %v15086_v31, %v18010_v52 }
 0x2ae   :  { %v2786_v53 = vsel %vm2763_vm4, %v2753_v48, %v660_v33  ;;  %v2982_v44 = vsel %vm2730_vm3, %v2950_v3, %v1808_v39  ;;  %v84_v16 = vmul.f32 %v15086_v31, %v18025_v14  ;;  %13578 = vmatmul.mubr.msk.f32.gmra.mrb[192].mxu1 %vm7327_vm9, %v18573_v57  ;;  %8169 = vmatprep.mubr.f32.mxu0 %v20143_v36 }
 0x2af   :  { %v2819_v0 = vsel %vm2796_vm5, %v2786_v53, %v824_v55  ;;  %v3014_v7 = vsel %vm2763_vm4, %v2982_v44, %v1972_v11  ;;  %v88_v2 = vmul.f32 %v76_v45, %v76_v45  ;;  %8288 = vmatprep.mubr.f32.mxu1 %v20143_v36  ;;  %v92_v38 = vmul.f32 %v80_v47, %v80_v47 }
 0x2b0   :  { %v2852_v52 = vsel %vm2829_vm6, %v2819_v0, %v988_v13  ;;  %v3046_v14 = vsel %vm2796_vm5, %v3014_v7, %v2136_v54  ;;  %v96_v17 = vmul.f32 %v84_v16, %v84_v16  ;;  %v100_v27 = vmul.f32 %v80_v47, %v76_v45 }
 0x2b1   :  { %v2885_v4 = vsel %vm2862_vm7, %v2852_v52, %v1152_v42  ;;  %v3078_v26 = vsel %vm2829_vm6, %v3046_v14, %v2300_v59  ;;  %v104_v29 = vmul.f32 %v84_v16, %v80_v47  ;;  %13570 = vmatmul.mubr.msk.f32.gmra.mrb[194].mxu0 %vm7327_vm9, %v17810_v62  ;;  %v18591_v61 = vmul.f32 -0.48860252, %v80_v47 }
 0x2b2   :  { %v18588_v35 = vsel %vm2895_vm8, %v2885_v4, %v1316_v12  ;;  %v3110_v10 = vsel %vm2862_vm7, %v3078_v26, %v2464_v41  ;;  %v18593_v24 = vmul.f32 -0.48860252, %v76_v45  ;;  %13579 = vmatmul.mubr.msk.f32.gmra.mrb[194].mxu1 %vm7327_vm9, %v17810_v62  ;;  %8175 = vmatprep.mubr.f32.mxu0 %v20143_v36  ;;  %v108_v33 = vmul.f32 %v84_v16, %v76_v45 }
 0x2b3   :  { %v18599_v25 = vsel %vm2895_vm8, %v3110_v10, %v2628_v21  ;;  %v18601_v9 = vmul.f32 0.48860252, %v84_v16  ;;  %v18603_v31 = vmul.f32 1.0925485, %v100_v27  ;;  %8294 = vmatprep.mubr.f32.mxu1 %v20143_v36  ;;  %v18608_v50 = vmul.f32 -1.0925485, %v104_v29 }
 0x2b4   :  { %v14260_v18 = vpack.c.bf16 %v18599_v25, %v18588_v35  ;;  %v132_v55 = vmul.f32 0.9461747, %v96_v17  ;;  %v144_v13 = vsub.f32 %v88_v2, %v92_v38  ;;  %v152_v62 = vmul.f32 0.5900436, %v80_v47 }
 0x2b5   :  { %v156_v15 = vmul.f32 -3.0, %v88_v2  ;;  %v168_v20 = vmul.f32 2.8906114, %v100_v27  ;;  %v180_v42 = vmul.f32 5.0, %v96_v17  ;;  %13571 = vmatmul.mubr.msk.f32.gmra.mrb[196].mxu0 %vm7327_vm9, %v17845_v46  ;;  %v176_v32 = vmul.f32 0.4570458, %v80_v47 }
 0x2b6   :  { %v18612_v12 = vadd.f32 -0.31539157, %v132_v55  ;;  %v18614_v60 = vmul.f32 0.54627424, %v144_v13  ;;  %v344_v37 = vrot.slane %v18591_v61, %v20161_v1  ;;  %13580 = vmatmul.mubr.msk.f32.gmra.mrb[196].mxu1 %vm7327_vm9, %v17845_v46  ;;  %8181 = vmatprep.mubr.f32.mxu0 %v20143_v36  ;;  %v192_v59 = vmul.f32 0.37317634, %v84_v16 }
 0x2b7   :  { %v160_v39 = vadd.f32 %v156_v15, %v92_v38  ;;  %v18621_v11 = vmul.f32 %v168_v20, %v84_v16  ;;  %v184_v54 = vsub.f32 1.0, %v180_v42  ;;  %8300 = vmatprep.mubr.f32.mxu1 %v20143_v36  ;;  %v13237_v41 = vadd.f32 -3.0, %v180_v42 }
 0x2b8   :  { %v204_v21 = vmul.f32 0.4570458, %v76_v45  ;;  %v212_v48 = vmul.f32 1.4453057, %v84_v16  ;;  %v224_v3 = vsub.f32 0.0, %v88_v2  ;;  %v228_v0 = vmul.f32 3.0, %v92_v38 }
 0x2b9   :  { %v18624_v53 = vmul.f32 %v160_v39, %v152_v62  ;;  %v18626_v44 = vmul.f32 %v184_v54, %v176_v32  ;;  %v220_v47 = vmul.f32 0.5900436, %v76_v45  ;;  %13572 = vmatmul.mubr.msk.f32.gmra.mrb[198].mxu0 %vm7327_vm9, %v17884_v40  ;;  %v18630_v46 = vmul.f32 -1.0925485, %v108_v33 }
 0x2ba   :  { %v18632_v7 = vmul.f32 %v13237_v41, %v192_v59  ;;  %v18634_v52 = vmul.f32 %v204_v21, %v184_v54  ;;  %v508_v14 = vrot.slane %v18601_v9, %v20161_v1  ;;  %13581 = vmatmul.mubr.msk.f32.gmra.mrb[198].mxu1 %vm7327_vm9, %v17884_v40  ;;  %8371 = vmatprep.mubr.f32.mxu0 %v20143_v36  ;;  %v2723_v38 = vsel %vm2697_vm2, 0.2820948, %v344_v37 }
 0x2bb   :  { %v18641_v16 = vmul.f32 %v212_v48, %v144_v13  ;;  %v232_v45 = vadd.f32 %v228_v0, %v224_v3  ;;  %v672_v2 = vrot.slane %v18593_v24, %v20161_v1  ;;  %8490 = vmatprep.mubr.f32.mxu1 %v20143_v36  ;;  %v836_v17 = vrot.slane %v18603_v31, %v20161_v1 }
 0x2bc   :  { %v1000_v4 = vrot.slane %v18608_v50, %v20161_v1  ;;  %v1164_v40 = vrot.slane %v18612_v12, %v20161_v1  ;;  %v1492_v26 = vrot.slane %v18614_v60, %v20161_v1  ;;  %v1656_v29 = vrot.slane %v18624_v53, %v20161_v1 }
 0x2bd   :  { %v18655_v27 = vmul.f32 %v232_v45, %v220_v47  ;;  %v1820_v35 = vrot.slane %v18621_v11, %v20161_v1  ;;  %v1984_v10 = vrot.slane %v18626_v44, %v20161_v1  ;;  %13582 = vmatmul.mubr.msk.f32.vlgmr.msra.gmra.mrb[200].mxu0 %vm7327_vm9, %v18394_v6  ;;  %v1328_v25 = vrot.slane %v18630_v46, %v20161_v1 }
 0x2be   :  { %v2148_v33 = vrot.slane %v18632_v7, %v20161_v1  ;;  %v2312_v55 = vrot.slane %v18634_v52, %v20161_v1  ;;  %v2756_v13 = vsel %vm2730_vm3, %v2723_v38, %v508_v14  ;;  %13591 = vmatmul.mubr.msk.f32.vlgmr.msra.gmra.mrb[200].mxu1 %vm7327_vm9, %v18394_v6  ;;  %14257 = vmatpush1.bf16.msra.mxu0 %v14256_v43 }
 0x2bf   :  { %v2476_v62 = vrot.slane %v18641_v16, %v20161_v1  ;;  %v2789_v15 = vsel %vm2763_vm4, %v2756_v13, %v672_v2  ;;  %v2953_v20 = vsel %vm2697_vm2, %v1492_v26, %v1656_v29  ;;  %14261 = vmatpush1.bf16.msra.mxu1 %v14260_v18  ;;  %8377 = vmatprep.mubr.f32.mxu0 %v20143_v36 }
 0x2c0   :  { %v2822_v42 = vsel %vm2796_vm5, %v2789_v15, %v836_v17  ;;  %v2985_v32 = vsel %vm2730_vm3, %v2953_v20, %v1820_v35  ;;  %v352_v37 = vrot.slane %v18591_v61, %v20162_v8  ;;  %8496 = vmatprep.mubr.f32.mxu1 %v20143_v36  ;;  %v2640_v28 = vrot.slane %v18655_v27, %v20161_v1 }
 0x2c1   :  { %v2855_v49 = vsel %vm2829_vm6, %v2822_v42, %v1000_v4  ;;  %v3017_v43 = vsel %vm2763_vm4, %v2985_v32, %v1984_v10  ;;  %v516_v18 = vrot.slane %v18601_v9, %v20162_v8  ;;  %13583 = vmatmul.mubr.msk.f32.gmra.mrb[202].mxu0 %vm7327_vm9, %v18436_v5  ;;  %v680_v59 = vrot.slane %v18593_v24, %v20162_v8 }
 0x2c2   :  { %v2888_v39 = vsel %vm2862_vm7, %v2855_v49, %v1164_v40  ;;  %v3049_v54 = vsel %vm2796_vm5, %v3017_v43, %v2148_v33  ;;  %v844_v1 = vrot.slane %v18603_v31, %v20162_v8  ;;  %13592 = vmatmul.mubr.msk.f32.gmra.mrb[202].mxu1 %vm7327_vm9, %v18436_v5  ;;  %8383 = vmatprep.mubr.f32.mxu0 %v20143_v36  ;;  %v2725_v14 = vsel %vm2697_vm2, 0.2820948, %v352_v37 }
 0x2c3   :  { %v2921_v41 = vsel %vm2895_vm8, %v2888_v39, %v1328_v25  ;;  %v3081_v21 = vsel %vm2829_vm6, %v3049_v54, %v2312_v55  ;;  %v1008_v48 = vrot.slane %v18608_v50, %v20162_v8  ;;  %8502 = vmatprep.mubr.f32.mxu1 %v20143_v36  ;;  %v1500_v47 = vrot.slane %v18614_v60, %v20162_v8 }
 0x2c4   :  { %v3113_v3 = vsel %vm2862_vm7, %v3081_v21, %v2476_v62  ;;  %v1664_v0 = vrot.slane %v18624_v53, %v20162_v8  ;;  %v1172_v2 = vrot.slane %v18612_v12, %v20162_v8  ;;  %v1828_v38 = vrot.slane %v18621_v11, %v20162_v8 }
 0x2c5   :  { %v3145_v45 = vsel %vm2895_vm8, %v3113_v3, %v2640_v28  ;;  %v1992_v17 = vrot.slane %v18626_v44, %v20162_v8  ;;  %13584 = vmatmul.mubr.msk.f32.gmra.mrb[204].mxu0 %vm7327_vm9, %v18470_v22  ;;  %v1336_v40 = vrot.slane %v18630_v46, %v20162_v8  ;;  %v2156_v26 = vrot.slane %v18632_v7, %v20162_v8 }
 0x2c6   :  { %v14262_v4 = vpack.c.bf16 %v3145_v45, %v2921_v41  ;;  %v2320_v29 = vrot.slane %v18634_v52, %v20162_v8  ;;  %13593 = vmatmul.mubr.msk.f32.gmra.mrb[204].mxu1 %vm7327_vm9, %v18470_v22  ;;  %8389 = vmatprep.mubr.f32.mxu0 %v20143_v36  ;;  %v2758_v35 = vsel %vm2730_vm3, %v2725_v14, %v516_v18 }
 0x2c7   :  { %v2955_v10 = vsel %vm2697_vm2, %v1500_v47, %v1664_v0  ;;  %v340_v25 = vrot.slane %v18591_v61, %v16751_v56  ;;  %8508 = vmatprep.mubr.f32.mxu1 %v20143_v36  ;;  %v2484_v33 = vrot.slane %v18641_v16, %v20162_v8  ;;  %v2791_v55 = vsel %vm2763_vm4, %v2758_v35, %v680_v59 }
 0x2c8   :  { %14263 = vmatprep.subr.bf16.mxu0 %v14262_v4  ;;  %v2987_v13 = vsel %vm2730_vm3, %v2955_v10, %v1828_v38  ;;  %v2648_v62 = vrot.slane %v18655_v27, %v20162_v8  ;;  %v2824_v15 = vsel %vm2796_vm5, %v2791_v55, %v844_v1  ;;  %v504_v42 = vrot.slane %v18601_v9, %v16751_v56 }
 0x2c9   :  { %v3019_v20 = vsel %vm2763_vm4, %v2987_v13, %v1992_v17  ;;  %13585 = vmatmul.mubr.msk.f32.gmra.mrb[206].mxu0 %vm7327_vm9, %v18502_v63  ;;  %v2857_v32 = vsel %vm2829_vm6, %v2824_v15, %v1008_v48  ;;  %v668_v28 = vrot.slane %v18593_v24, %v16751_v56  ;;  %v832_v8 = vrot.slane %v18603_v31, %v16751_v56 }
 0x2ca   :  { %v3051_v37 = vsel %vm2796_vm5, %v3019_v20, %v2156_v26  ;;  %13594 = vmatmul.mubr.msk.f32.gmra.mrb[206].mxu1 %vm7327_vm9, %v18502_v63  ;;  %8395 = vmatprep.mubr.f32.mxu0 %v20143_v36  ;;  %v2890_v49 = vsel %vm2862_vm7, %v2857_v32, %v1172_v2  ;;  %v996_v18 = vrot.slane %v18608_v50, %v16751_v56  ;;  %v2722_v39 = vsel %vm2697_vm2, 0.2820948, %v340_v25 }
 0x2cb   :  { %v3083_v43 = vsel %vm2829_vm6, %v3051_v37, %v2320_v29  ;;  %8514 = vmatprep.mubr.f32.mxu1 %v20143_v36  ;;  %v2923_v54 = vsel %vm2895_vm8, %v2890_v49, %v1336_v40  ;;  %v1488_v1 = vrot.slane %v18614_v60, %v16751_v56  ;;  %v1652_v41 = vrot.slane %v18624_v53, %v16751_v56 }
 0x2cc   :  { %v3115_v59 = vsel %vm2862_vm7, %v3083_v43, %v2484_v33  ;;  %v1160_v48 = vrot.slane %v18612_v12, %v16751_v56  ;;  %v1816_v3 = vrot.slane %v18621_v11, %v16751_v56  ;;  %v1980_v47 = vrot.slane %v18626_v44, %v16751_v56 }
 0x2cd   :  { %v3147_v21 = vsel %vm2895_vm8, %v3115_v59, %v2648_v62  ;;  %13586 = vmatmul.mubr.msk.f32.gmra.mrb[208].mxu0 %vm7327_vm9, %v18538_v19  ;;  %v1324_v14 = vrot.slane %v18630_v46, %v16751_v56  ;;  %v2144_v45 = vrot.slane %v18632_v7, %v16751_v56  ;;  %v2308_v2 = vrot.slane %v18634_v52, %v16751_v56  ;;  %v18841_v59 = vld [vmem:[%s20108_s3 + $0x30] sm:$0xff] }
 0x2ce   :  { %v14266_v0 = vpack.c.bf16 %v3147_v21, %v2923_v54  ;;  %13595 = vmatmul.mubr.msk.f32.gmra.mrb[208].mxu1 %vm7327_vm9, %v18538_v19  ;;  %8401 = vmatprep.mubr.f32.mxu0 %v20143_v36  ;;  %v2755_v38 = vsel %vm2730_vm3, %v2722_v39, %v504_v42  ;;  %v2952_v17 = vsel %vm2697_vm2, %v1488_v1, %v1652_v41 }
 0x2cf   :  { %v348_v4 = vrot.slane %v18591_v61, %v16872_v23  ;;  %8520 = vmatprep.mubr.f32.mxu1 %v20143_v36  ;;  %v2472_v40 = vrot.slane %v18641_v16, %v16751_v56  ;;  %v2788_v26 = vsel %vm2763_vm4, %v2755_v38, %v668_v28  ;;  %v2984_v29 = vsel %vm2730_vm3, %v2952_v17, %v1816_v3 }
 0x2d0   :  { %14267 = vmatprep.subr.bf16.mxu1 %v14266_v0  ;;  %v2636_v35 = vrot.slane %v18655_v27, %v16751_v56  ;;  %v2821_v10 = vsel %vm2796_vm5, %v2788_v26, %v832_v8  ;;  %v3016_v25 = vsel %vm2763_vm4, %v2984_v29, %v1980_v47  ;;  %v512_v33 = vrot.slane %v18601_v9, %v16872_v23  ;;  %v18876_v29 = vld [vmem:[%s20108_s3 + $0x38] sm:$0xff] }
 0x2d1   :  { %13587 = vmatmul.mubr.msk.f32.gmra.mrb[210].mxu0 %vm7327_vm9, %v18573_v57  ;;  %v2854_v55 = vsel %vm2829_vm6, %v2821_v10, %v996_v18  ;;  %v3048_v13 = vsel %vm2796_vm5, %v3016_v25, %v2144_v45  ;;  %v676_v62 = vrot.slane %v18593_v24, %v16872_v23  ;;  %v840_v56 = vrot.slane %v18603_v31, %v16872_v23 }
 0x2d2   :  { %13596 = vmatmul.mubr.msk.f32.gmra.mrb[210].mxu1 %vm7327_vm9, %v18573_v57  ;;  %8407 = vmatprep.mubr.f32.mxu0 %v20143_v36  ;;  %v2887_v15 = vsel %vm2862_vm7, %v2854_v55, %v1160_v48  ;;  %v3080_v20 = vsel %vm2829_vm6, %v3048_v13, %v2308_v2  ;;  %v1004_v42 = vrot.slane %v18608_v50, %v16872_v23  ;;  %v2724_v32 = vsel %vm2697_vm2, 0.2820948, %v348_v4 }
 0x2d3   :  { %8526 = vmatprep.mubr.f32.mxu1 %v20143_v36  ;;  %v18822_v37 = vsel %vm2895_vm8, %v2887_v15, %v1324_v14  ;;  %v3112_v28 = vsel %vm2862_vm7, %v3080_v20, %v2472_v40  ;;  %v1496_v8 = vrot.slane %v18614_v60, %v16872_v23  ;;  %v1660_v49 = vrot.slane %v18624_v53, %v16872_v23 }
 0x2d4   :  { %v18830_v43 = vsel %vm2895_vm8, %v3112_v28, %v2636_v35  ;;  %v1168_v18 = vrot.slane %v18612_v12, %v16872_v23  ;;  %v1824_v39 = vrot.slane %v18621_v11, %v16872_v23  ;;  %v1988_v54 = vrot.slane %v18626_v44, %v16872_v23 }
 0x2d5   :  { %13588 = vmatmul.mubr.msk.f32.gmra.mrb[212].mxu0 %vm7327_vm9, %v18841_v59  ;;  %v14264_v1 = vpack.c.bf16 %v18830_v43, %v18822_v37  ;;  %v1332_v41 = vrot.slane %v18630_v46, %v16872_v23  ;;  %v2152_v21 = vrot.slane %v18632_v7, %v16872_v23  ;;  %v2316_v48 = vrot.slane %v18634_v52, %v16872_v23 }
 0x2d6   :  { %13597 = vmatmul.mubr.msk.f32.gmra.mrb[212].mxu1 %vm7327_vm9, %v18841_v59  ;;  %8413 = vmatprep.mubr.f32.mxu0 %v20143_v36  ;;  %v2757_v3 = vsel %vm2730_vm3, %v2724_v32, %v512_v33  ;;  %v2954_v47 = vsel %vm2697_vm2, %v1496_v8, %v1660_v49  ;;  %v360_v0 = vrot.slane %v18591_v61, %v16932_v51 }
 0x2d7   :  { %8532 = vmatprep.mubr.f32.mxu1 %v20143_v36  ;;  %v2480_v14 = vrot.slane %v18641_v16, %v16872_v23  ;;  %v2644_v45 = vrot.slane %v18655_v27, %v16872_v23  ;;  %v2790_v2 = vsel %vm2763_vm4, %v2757_v3, %v676_v62  ;;  %v2986_v38 = vsel %vm2730_vm3, %v2954_v47, %v1824_v39 }
 0x2d8   :  { %v2823_v17 = vsel %vm2796_vm5, %v2790_v2, %v840_v56  ;;  %v3018_v4 = vsel %vm2763_vm4, %v2986_v38, %v1988_v54  ;;  %v524_v40 = vrot.slane %v18601_v9, %v16932_v51  ;;  %v688_v26 = vrot.slane %v18593_v24, %v16932_v51 }
 0x2d9   :  { %13589 = vmatmul.mubr.msk.f32.gmra.mrb[214].mxu0 %vm7327_vm9, %v18876_v29  ;;  %v2856_v23 = vsel %vm2829_vm6, %v2823_v17, %v1004_v42  ;;  %v3050_v35 = vsel %vm2796_vm5, %v3018_v4, %v2152_v21  ;;  %v852_v10 = vrot.slane %v18603_v31, %v16932_v51  ;;  %v1016_v25 = vrot.slane %v18608_v50, %v16932_v51 }
 0x2da   :  { %13598 = vmatmul.mubr.msk.f32.gmra.mrb[214].mxu1 %vm7327_vm9, %v18876_v29  ;;  %8419 = vmatprep.mubr.f32.mxu0 %v20143_v36  ;;  %v2889_v33 = vsel %vm2862_vm7, %v2856_v23, %v1168_v18  ;;  %v3082_v55 = vsel %vm2829_vm6, %v3050_v35, %v2316_v48  ;;  %v1508_v13 = vrot.slane %v18614_v60, %v16932_v51  ;;  %v2727_v62 = vsel %vm2697_vm2, 0.2820948, %v360_v0  ;;  %v18911_v18 = vld [vmem:[%s20108_s3 + $0x40] sm:$0x1] }
 0x2db   :  { %8538 = vmatprep.mubr.f32.mxu1 %v20143_v36  ;;  %v2922_v56 = vsel %vm2895_vm8, %v2889_v33, %v1332_v41  ;;  %v3114_v15 = vsel %vm2862_vm7, %v3082_v55, %v2480_v14  ;;  %v1672_v20 = vrot.slane %v18624_v53, %v16932_v51  ;;  %v1836_v42 = vrot.slane %v18621_v11, %v16932_v51 }
 0x2dc   :  { %v3146_v32 = vsel %vm2895_vm8, %v3114_v15, %v2644_v45  ;;  %v1180_v28 = vrot.slane %v18612_v12, %v16932_v51  ;;  %v1344_v8 = vrot.slane %v18630_v46, %v16932_v51  ;;  %v2000_v49 = vrot.slane %v18626_v44, %v16932_v51 }
 0x2dd   :  { %13590 = vmatmul.mubr.msk.f32.gmra.mrb[216].mxu0 %vm7327_vm9, %v18911_v18  ;;  %v14268_v39 = vpack.c.bf16 %v3146_v32, %v2922_v56  ;;  %v2164_v54 = vrot.slane %v18632_v7, %v16932_v51  ;;  %v2328_v41 = vrot.slane %v18634_v52, %v16932_v51  ;;  %v2760_v21 = vsel %vm2730_vm3, %v2727_v62, %v524_v40 }
 0x2de   :  { %13599 = vmatmul.mubr.msk.f32.gmra.mrb[216].mxu1 %vm7327_vm9, %v18911_v18  ;;  %8609 = vmatprep.mubr.f32.mxu0 %v20143_v36  ;;  %v2793_v48 = vsel %vm2763_vm4, %v2760_v21, %v688_v26  ;;  %v2957_v3 = vsel %vm2697_vm2, %v1508_v13, %v1672_v20  ;;  %v368_v47 = vrot.slane %v18591_v61, %v17061_v58 }
 0x2df   :  { %8728 = vmatprep.mubr.f32.mxu1 %v20143_v36  ;;  %v2492_v0 = vrot.slane %v18641_v16, %v16932_v51  ;;  %v2656_v14 = vrot.slane %v18655_v27, %v16932_v51  ;;  %v2826_v45 = vsel %vm2796_vm5, %v2793_v48, %v852_v10  ;;  %v2989_v2 = vsel %vm2730_vm3, %v2957_v3, %v1836_v42 }
 0x2e0   :  { %v2859_v38 = vsel %vm2829_vm6, %v2826_v45, %v1016_v25  ;;  %v3021_v17 = vsel %vm2763_vm4, %v2989_v2, %v2000_v49  ;;  %v532_v4 = vrot.slane %v18601_v9, %v17061_v58  ;;  %v696_v40 = vrot.slane %v18593_v24, %v17061_v58 }
 0x2e1   :  { %13600 = vmatmul.mubr.msk.f32.vlgmr.msra.gmra.mrb[218].mxu0 %vm7327_vm9, %v18394_v6  ;;  %v2892_v26 = vsel %vm2862_vm7, %v2859_v38, %v1180_v28  ;;  %v3053_v51 = vsel %vm2796_vm5, %v3021_v17, %v2164_v54  ;;  %v860_v23 = vrot.slane %v18603_v31, %v17061_v58  ;;  %v1024_v35 = vrot.slane %v18608_v50, %v17061_v58 }
 0x2e2   :  { %13609 = vmatmul.mubr.msk.f32.vlgmr.msra.gmra.mrb[218].mxu1 %vm7327_vm9, %v18394_v6  ;;  %14265 = vmatpush1.bf16.msra.mxu0 %v14264_v1  ;;  %v2925_v10 = vsel %vm2895_vm8, %v2892_v26, %v1344_v8  ;;  %v3085_v25 = vsel %vm2829_vm6, %v3053_v51, %v2328_v41  ;;  %v1516_v33 = vrot.slane %v18614_v60, %v17061_v58  ;;  %v2729_v55 = vsel %vm2697_vm2, 0.2820948, %v368_v47 }
 0x2e3   :  { %14269 = vmatpush1.bf16.msra.mxu1 %v14268_v39  ;;  %8615 = vmatprep.mubr.f32.mxu0 %v20143_v36  ;;  %v3117_v13 = vsel %vm2862_vm7, %v3085_v25, %v2492_v0  ;;  %v1680_v62 = vrot.slane %v18624_v53, %v17061_v58  ;;  %v1844_v37 = vrot.slane %v18621_v11, %v17061_v58 }
 0x2e4   :  { %8734 = vmatprep.mubr.f32.mxu1 %v20143_v36  ;;  %v3149_v43 = vsel %vm2895_vm8, %v3117_v13, %v2656_v14  ;;  %v1188_v1 = vrot.slane %v18612_v12, %v17061_v58  ;;  %v1352_v56 = vrot.slane %v18630_v46, %v17061_v58  ;;  %v2008_v15 = vrot.slane %v18626_v44, %v17061_v58 }
 0x2e5   :  { %13601 = vmatmul.mubr.msk.f32.gmra.mrb[220].mxu0 %vm7327_vm9, %v18436_v5  ;;  %v14270_v20 = vpack.c.bf16 %v3149_v43, %v2925_v10  ;;  %v2172_v42 = vrot.slane %v18632_v7, %v17061_v58  ;;  %v2336_v32 = vrot.slane %v18634_v52, %v17061_v58  ;;  %v2762_v28 = vsel %vm2730_vm3, %v2729_v55, %v532_v4 }
 0x2e6   :  { %13610 = vmatmul.mubr.msk.f32.gmra.mrb[220].mxu1 %vm7327_vm9, %v18436_v5  ;;  %8621 = vmatprep.mubr.f32.mxu0 %v20143_v36  ;;  %v2795_v8 = vsel %vm2763_vm4, %v2762_v28, %v696_v40  ;;  %v2959_v49 = vsel %vm2697_vm2, %v1516_v33, %v1680_v62  ;;  %v356_v39 = vrot.slane %v18591_v61, %v17124_v30 }
 0x2e7   :  { %8740 = vmatprep.mubr.f32.mxu1 %v20143_v36  ;;  %14271 = vmatprep.subr.bf16.mxu0 %v14270_v20  ;;  %v2500_v54 = vrot.slane %v18641_v16, %v17061_v58  ;;  %v2828_v41 = vsel %vm2796_vm5, %v2795_v8, %v860_v23  ;;  %v2991_v21 = vsel %vm2730_vm3, %v2959_v49, %v1844_v37 }
 0x2e8   :  { %v2664_v48 = vrot.slane %v18655_v27, %v17061_v58  ;;  %v2861_v3 = vsel %vm2829_vm6, %v2828_v41, %v1024_v35  ;;  %v3023_v47 = vsel %vm2763_vm4, %v2991_v21, %v2008_v15  ;;  %v520_v0 = vrot.slane %v18601_v9, %v17124_v30 }
 0x2e9   :  { %13602 = vmatmul.mubr.msk.f32.gmra.mrb[222].mxu0 %vm7327_vm9, %v18470_v22  ;;  %v2894_v14 = vsel %vm2862_vm7, %v2861_v3, %v1188_v1  ;;  %v3055_v45 = vsel %vm2796_vm5, %v3023_v47, %v2172_v42  ;;  %v684_v2 = vrot.slane %v18593_v24, %v17124_v30  ;;  %v848_v58 = vrot.slane %v18603_v31, %v17124_v30 }
 0x2ea   :  { %13611 = vmatmul.mubr.msk.f32.gmra.mrb[222].mxu1 %vm7327_vm9, %v18470_v22  ;;  %8627 = vmatprep.mubr.f32.mxu0 %v20143_v36  ;;  %v2927_v38 = vsel %vm2895_vm8, %v2894_v14, %v1352_v56  ;;  %v3087_v17 = vsel %vm2829_vm6, %v3055_v45, %v2336_v32  ;;  %v1012_v4 = vrot.slane %v18608_v50, %v17124_v30  ;;  %v2726_v40 = vsel %vm2697_vm2, 0.2820948, %v356_v39 }
 0x2eb   :  { %8746 = vmatprep.mubr.f32.mxu1 %v20143_v36  ;;  %v3119_v26 = vsel %vm2862_vm7, %v3087_v17, %v2500_v54  ;;  %v1504_v51 = vrot.slane %v18614_v60, %v17124_v30  ;;  %v1668_v23 = vrot.slane %v18624_v53, %v17124_v30  ;;  %v1832_v35 = vrot.slane %v18621_v11, %v17124_v30 }
 0x2ec   :  { %v3151_v10 = vsel %vm2895_vm8, %v3119_v26, %v2664_v48  ;;  %v1176_v25 = vrot.slane %v18612_v12, %v17124_v30  ;;  %v1340_v33 = vrot.slane %v18630_v46, %v17124_v30  ;;  %v1996_v55 = vrot.slane %v18626_v44, %v17124_v30 }
 0x2ed   :  { %13603 = vmatmul.mubr.msk.f32.gmra.mrb[224].mxu0 %vm7327_vm9, %v18502_v63  ;;  %v14274_v13 = vpack.c.bf16 %v3151_v10, %v2927_v38  ;;  %v2160_v62 = vrot.slane %v18632_v7, %v17124_v30  ;;  %v2324_v37 = vrot.slane %v18634_v52, %v17124_v30  ;;  %v2759_v43 = vsel %vm2730_vm3, %v2726_v40, %v520_v0 }
 0x2ee   :  { %13612 = vmatmul.mubr.msk.f32.gmra.mrb[224].mxu1 %vm7327_vm9, %v18502_v63  ;;  %8633 = vmatprep.mubr.f32.mxu0 %v20143_v36  ;;  %v2792_v1 = vsel %vm2763_vm4, %v2759_v43, %v684_v2  ;;  %v2956_v56 = vsel %vm2697_vm2, %v1504_v51, %v1668_v23  ;;  %v364_v15 = vrot.slane %v18591_v61, %v17143_v34 }
 0x2ef   :  { %8752 = vmatprep.mubr.f32.mxu1 %v20143_v36  ;;  %14275 = vmatprep.subr.bf16.mxu1 %v14274_v13  ;;  %v2488_v20 = vrot.slane %v18641_v16, %v17124_v30  ;;  %v2825_v42 = vsel %vm2796_vm5, %v2792_v1, %v848_v58  ;;  %v2988_v32 = vsel %vm2730_vm3, %v2956_v56, %v1832_v35 }
 0x2f0   :  { %v2652_v28 = vrot.slane %v18655_v27, %v17124_v30  ;;  %v2858_v8 = vsel %vm2829_vm6, %v2825_v42, %v1012_v4  ;;  %v3020_v49 = vsel %vm2763_vm4, %v2988_v32, %v1996_v55  ;;  %v528_v54 = vrot.slane %v18601_v9, %v17143_v34 }
 0x2f1   :  { %13604 = vmatmul.mubr.msk.f32.gmra.mrb[226].mxu0 %vm7327_vm9, %v18538_v19  ;;  %v2891_v61 = vsel %vm2862_vm7, %v2858_v8, %v1176_v25  ;;  %v3052_v39 = vsel %vm2796_vm5, %v3020_v49, %v2160_v62  ;;  %v692_v41 = vrot.slane %v18593_v24, %v17143_v34  ;;  %v856_v48 = vrot.slane %v18603_v31, %v17143_v34 }
 0x2f2   :  { %13613 = vmatmul.mubr.msk.f32.gmra.mrb[226].mxu1 %vm7327_vm9, %v18538_v19  ;;  %8639 = vmatprep.mubr.f32.mxu0 %v20143_v36  ;;  %v19063_v30 = vsel %vm2895_vm8, %v2891_v61, %v1340_v33  ;;  %v3084_v21 = vsel %vm2829_vm6, %v3052_v39, %v2324_v37  ;;  %v2728_v3 = vsel %vm2697_vm2, 0.2820948, %v364_v15  ;;  %v1512_v24 = vrot.slane %v18614_v60, %v17143_v34 }
 0x2f3   :  { %8758 = vmatprep.mubr.f32.mxu1 %v20143_v36  ;;  %v3116_v9 = vsel %vm2862_vm7, %v3084_v21, %v2488_v20  ;;  %v1676_v47 = vrot.slane %v18624_v53, %v17143_v34  ;;  %v1840_v0 = vrot.slane %v18621_v11, %v17143_v34  ;;  %v1020_v31 = vrot.slane %v18608_v50, %v17143_v34 }
 0x2f4   :  { %v3148_v14 = vsel %vm2895_vm8, %v3116_v9, %v2652_v28  ;;  %v1184_v45 = vrot.slane %v18612_v12, %v17143_v34  ;;  %v2004_v2 = vrot.slane %v18626_v44, %v17143_v34  ;;  %v1348_v53 = vrot.slane %v18630_v46, %v17143_v34 }
 0x2f5   :  { %13605 = vmatmul.mubr.msk.f32.gmra.mrb[228].mxu0 %vm7327_vm9, %v18573_v57  ;;  %v14272_v60 = vpack.c.bf16 %v3148_v14, %v19063_v30  ;;  %v2168_v11 = vrot.slane %v18632_v7, %v17143_v34  ;;  %v2761_v58 = vsel %vm2730_vm3, %v2728_v3, %v528_v54  ;;  %v2332_v50 = vrot.slane %v18634_v52, %v17143_v34 }
 0x2f6   :  { %13614 = vmatmul.mubr.msk.f32.gmra.mrb[228].mxu1 %vm7327_vm9, %v18573_v57  ;;  %8645 = vmatprep.mubr.f32.mxu0 %v20143_v36  ;;  %v2794_v12 = vsel %vm2763_vm4, %v2761_v58, %v692_v41  ;;  %v2958_v44 = vsel %vm2697_vm2, %v1512_v24, %v1676_v47  ;;  %v2496_v46 = vrot.slane %v18641_v16, %v17143_v34 }
 0x2f7   :  { %8764 = vmatprep.mubr.f32.mxu1 %v20143_v36  ;;  %v2827_v7 = vsel %vm2796_vm5, %v2794_v12, %v856_v48  ;;  %v2990_v38 = vsel %vm2730_vm3, %v2958_v44, %v1840_v0  ;;  %v2660_v17 = vrot.slane %v18655_v27, %v17143_v34 }
 0x2f8   :  { %v2860_v4 = vsel %vm2829_vm6, %v2827_v7, %v1020_v31  ;;  %v3022_v52 = vsel %vm2763_vm4, %v2990_v38, %v2004_v2 }
 0x2f9   :  { %13606 = vmatmul.mubr.msk.f32.gmra.mrb[230].mxu0 %vm7327_vm9, %v18841_v59  ;;  %v2893_v40 = vsel %vm2862_vm7, %v2860_v4, %v1184_v45  ;;  %v3054_v26 = vsel %vm2796_vm5, %v3022_v52, %v2168_v11 }
 0x2fa   :  { %13615 = vmatmul.mubr.msk.f32.gmra.mrb[230].mxu1 %vm7327_vm9, %v18841_v59  ;;  %8651 = vmatprep.mubr.f32.mxu0 %v20143_v36  ;;  %v2926_v16 = vsel %vm2895_vm8, %v2893_v40, %v1348_v53  ;;  %v3086_v34 = vsel %vm2829_vm6, %v3054_v26, %v2332_v50 }
 0x2fb   :  { %8770 = vmatprep.mubr.f32.mxu1 %v20143_v36  ;;  %v3118_v27 = vsel %vm2862_vm7, %v3086_v34, %v2496_v46 }
 0x2fc   :  { %v3150_v51 = vsel %vm2895_vm8, %v3118_v27, %v2660_v17 }
 0x2fd   :  { %13607 = vmatmul.mubr.msk.f32.gmra.mrb[232].mxu0 %vm7327_vm9, %v18876_v29  ;;  %v14276_v23 = vpack.c.bf16 %v3150_v51, %v2926_v16 }
 0x2fe   :  { %13616 = vmatmul.mubr.msk.f32.gmra.mrb[232].mxu1 %vm7327_vm9, %v18876_v29  ;;  %8657 = vmatprep.mubr.f32.mxu0 %v20143_v36 }
 0x2ff   :  { %8776 = vmatprep.mubr.f32.mxu1 %v20143_v36 }
 0x300   :  { %v7421_v35 = vpop.f32.mrb[128].mxu0 }
 0x301   :  { %v7540_v10 = vpop.f32.mrb[128].mxu1  ;;  %v7423_v25 = vpop.f32.mrb[129].mxu0  ;;  %13608 = vmatmul.mubr.msk.f32.gmra.mrb[234].mxu0 %vm7327_vm9, %v18911_v18  ;;  %v9323_v13 = vmax.f32 %v7421_v35, 0.0 }
 0x302   :  { %v7542_v33 = vpop.f32.mrb[129].mxu1  ;;  %13617 = vmatmul.mubr.msk.f32.gmra.mrb[234].mxu1 %vm7327_vm9, %v18911_v18  ;;  %8847 = vmatprep.mubr.f32.mxu0 %v20143_v36  ;;  %v9325_v1 = vmax.f32 %v7540_v10, 0.0  ;;  %v9324_v56 = vmax.f32 %v7423_v25, 0.0 }
 0x303   :  { %8966 = vmatprep.mubr.f32.mxu1 %v20143_v36  ;;  %v9326_v32 = vmax.f32 %v7542_v33, 0.0 }
 0x304   :  { %v7427_v55 = vpop.f32.mrb[130].mxu0 }
 0x305   :  { %v9355_v62 = vmax.f32 %v7427_v55, 0.0  ;;  %v7546_v37 = vpop.f32.mrb[130].mxu1  ;;  %v7429_v43 = vpop.f32.mrb[131].mxu0  ;;  %13618 = vmatmul.mubr.msk.f32.vlgmr.msra.gmra.mrb[236].mxu0 %vm7327_vm9, %v18394_v6 }
 0x306   :  { %v9357_v15 = vmax.f32 %v7546_v37, 0.0  ;;  %v9356_v20 = vmax.f32 %v7429_v43, 0.0  ;;  %v7548_v42 = vpop.f32.mrb[131].mxu1  ;;  %13627 = vmatmul.mubr.msk.f32.vlgmr.msra.gmra.mrb[236].mxu1 %vm7327_vm9, %v18394_v6  ;;  %14273 = vmatpush1.bf16.msra.mxu0 %v14272_v60 }
 0x307   :  { %v19136_v28 = vpack.c.bf16 %v9355_v62, %v9323_v13  ;;  %v9358_v8 = vmax.f32 %v7548_v42, 0.0  ;;  %14277 = vmatpush1.bf16.msra.mxu1 %v14276_v23  ;;  %8853 = vmatprep.mubr.f32.mxu0 %v20143_v36 }
 0x308   :  { %v19139_v49 = vpack.c.bf16 %v9357_v15, %v9325_v1  ;;  %v7433_v61 = vpop.f32.mrb[132].mxu0  ;;  %8972 = vmatprep.mubr.f32.mxu1 %v20143_v36  ;;  %v14278_v39 = vpack.c.bf16 %v9356_v20, %v9324_v56 }
 0x309   :  { %v7552_v54 = vpop.f32.mrb[132].mxu1  ;;  %v7435_v41 = vpop.f32.mrb[133].mxu0  ;;  %13619 = vmatmul.mubr.msk.f32.gmra.mrb[238].mxu0 %vm7327_vm9, %v18436_v5  ;;  %v14294_v6 = vpack.c.bf16 %v9358_v8, %v9326_v32  ;;  %v9387_v48 = vmax.f32 %v7433_v61, 0.0 }
 0x30a   :  { %v7554_v30 = vpop.f32.mrb[133].mxu1  ;;  %13628 = vmatmul.mubr.msk.f32.gmra.mrb[238].mxu1 %vm7327_vm9, %v18436_v5  ;;  %14279 = vmatprep.subr.bf16.mxu0 %v14278_v39  ;;  %v9389_v47 = vmax.f32 %v7552_v54, 0.0  ;;  %v9388_v0 = vmax.f32 %v7435_v41, 0.0 }
 0x30b   :  { %14295 = vmatprep.subr.bf16.mxu1 %v14294_v6  ;;  %8859 = vmatprep.mubr.f32.mxu0 %v20143_v36  ;;  %v9390_v5 = vmax.f32 %v7554_v30, 0.0 }
 0x30c   :  { %v7439_v21 = vpop.f32.mrb[134].mxu0  ;;  %8978 = vmatprep.mubr.f32.mxu1 %v20143_v36 }
 0x30d   :  { %v9419_v3 = vmax.f32 %v7439_v21, 0.0  ;;  %v7558_v9 = vpop.f32.mrb[134].mxu1  ;;  %v7441_v24 = vpop.f32.mrb[135].mxu0  ;;  %13620 = vmatmul.mubr.msk.f32.gmra.mrb[240].mxu0 %vm7327_vm9, %v18470_v22 }
 0x30e   :  { %v9421_v14 = vmax.f32 %v7558_v9, 0.0  ;;  %v9420_v31 = vmax.f32 %v7441_v24, 0.0  ;;  %v7560_v45 = vpop.f32.mrb[135].mxu1  ;;  %13629 = vmatmul.mubr.msk.f32.gmra.mrb[240].mxu1 %vm7327_vm9, %v18470_v22  ;;  %8865 = vmatprep.mubr.f32.mxu0 %v20143_v36 }
 0x30f   :  { %v19153_v2 = vpack.c.bf16 %v9419_v3, %v9387_v48  ;;  %v9422_v60 = vmax.f32 %v7560_v45, 0.0  ;;  %8984 = vmatprep.mubr.f32.mxu1 %v20143_v36 }
 0x310   :  { %v19156_v53 = vpack.c.bf16 %v9421_v14, %v9389_v47  ;;  %v7445_v11 = vpop.f32.mrb[136].mxu0  ;;  %v19158_v58 = vpack.c.bf16 %v9420_v31, %v9388_v0 }
 0x311   :  { %v7564_v50 = vpop.f32.mrb[136].mxu1  ;;  %v7447_v12 = vpop.f32.mrb[137].mxu0  ;;  %13621 = vmatmul.mubr.msk.f32.gmra.mrb[242].mxu0 %vm7327_vm9, %v18502_v63  ;;  %v19162_v44 = vpack.c.bf16 %v9422_v60, %v9390_v5  ;;  %v9451_v7 = vmax.f32 %v7445_v11, 0.0  ;;  %v15308_v60 = vld [vmem:[%s20108_s3] sm:$0xff] }
 0x312   :  { %v7566_v22 = vpop.f32.mrb[137].mxu1  ;;  %13630 = vmatmul.mubr.msk.f32.gmra.mrb[242].mxu1 %vm7327_vm9, %v18502_v63  ;;  %8871 = vmatprep.mubr.f32.mxu0 %v20143_v36  ;;  %v9453_v52 = vmax.f32 %v7564_v50, 0.0  ;;  %v9452_v40 = vmax.f32 %v7447_v12, 0.0 }
 0x313   :  { %8990 = vmatprep.mubr.f32.mxu1 %v20143_v36  ;;  %v9454_v63 = vmax.f32 %v7566_v22, 0.0 }
 0x314   :  { %v7451_v46 = vpop.f32.mrb[138].mxu0 }
 0x315   :  { %v9483_v38 = vmax.f32 %v7451_v46, 0.0  ;;  %v7570_v17 = vpop.f32.mrb[138].mxu1  ;;  %v7453_v4 = vpop.f32.mrb[139].mxu0  ;;  %13622 = vmatmul.mubr.msk.f32.gmra.mrb[244].mxu0 %vm7327_vm9, %v18538_v19 }
 0x316   :  { %v9485_v26 = vmax.f32 %v7570_v17, 0.0  ;;  %v9484_v16 = vmax.f32 %v7453_v4, 0.0  ;;  %v7572_v34 = vpop.f32.mrb[139].mxu1  ;;  %13631 = vmatmul.mubr.msk.f32.gmra.mrb[244].mxu1 %vm7327_vm9, %v18538_v19  ;;  %8877 = vmatprep.mubr.f32.mxu0 %v20143_v36 }
 0x317   :  { %v19173_v27 = vpack.c.bf16 %v9483_v38, %v9451_v7  ;;  %v9486_v51 = vmax.f32 %v7572_v34, 0.0  ;;  %8996 = vmatprep.mubr.f32.mxu1 %v20143_v36 }
 0x318   :  { %v19176_v23 = vpack.c.bf16 %v9485_v26, %v9453_v52  ;;  %v7457_v35 = vpop.f32.mrb[140].mxu0  ;;  %v19178_v10 = vpack.c.bf16 %v9484_v16, %v9452_v40  ;;  %v15309_v16 = vld [vmem:[%s20108_s3 + $0x8] sm:$0xff] }
 0x319   :  { %v7576_v25 = vpop.f32.mrb[140].mxu1  ;;  %v7459_v33 = vpop.f32.mrb[141].mxu0  ;;  %13623 = vmatmul.mubr.msk.f32.gmra.mrb[246].mxu0 %vm7327_vm9, %v18573_v57  ;;  %v19182_v55 = vpack.c.bf16 %v9486_v51, %v9454_v63  ;;  %v9515_v62 = vmax.f32 %v7457_v35, 0.0 }
 0x31a   :  { %v7578_v19 = vpop.f32.mrb[141].mxu1  ;;  %13632 = vmatmul.mubr.msk.f32.gmra.mrb[246].mxu1 %vm7327_vm9, %v18573_v57  ;;  %8883 = vmatprep.mubr.f32.mxu0 %v20143_v36  ;;  %v9517_v56 = vmax.f32 %v7576_v25, 0.0  ;;  %v9516_v15 = vmax.f32 %v7459_v33, 0.0  ;;  %v15310_v25 = vld [vmem:[%s20108_s3 + $0x10] sm:$0xff] }
 0x31b   :  { %9002 = vmatprep.mubr.f32.mxu1 %v20143_v36  ;;  %v9518_v57 = vmax.f32 %v7578_v19, 0.0 }
 0x31c   :  { %v7463_v13 = vpop.f32.mrb[142].mxu0 }
 0x31d   :  { %v9547_v37 = vmax.f32 %v7463_v13, 0.0  ;;  %v7582_v43 = vpop.f32.mrb[142].mxu1  ;;  %v7465_v1 = vpop.f32.mrb[143].mxu0  ;;  %13624 = vmatmul.mubr.msk.f32.gmra.mrb[248].mxu0 %vm7327_vm9, %v18841_v59 }
 0x31e   :  { %v9549_v20 = vmax.f32 %v7582_v43, 0.0  ;;  %v9548_v42 = vmax.f32 %v7465_v1, 0.0  ;;  %v7584_v32 = vpop.f32.mrb[143].mxu1  ;;  %13633 = vmatmul.mubr.msk.f32.gmra.mrb[248].mxu1 %vm7327_vm9, %v18841_v59  ;;  %8889 = vmatprep.mubr.f32.mxu0 %v20143_v36 }
 0x31f   :  { %v19193_v8 = vpack.c.bf16 %v9547_v37, %v9515_v62  ;;  %v9550_v61 = vmax.f32 %v7584_v32, 0.0  ;;  %9008 = vmatprep.mubr.f32.mxu1 %v20143_v36 }
 0x320   :  { %v19196_v39 = vpack.c.bf16 %v9549_v20, %v9517_v56  ;;  %v19198_v54 = vpop.f32.mrb[144].mxu0  ;;  %v19200_v41 = vpack.c.bf16 %v9548_v42, %v9516_v15  ;;  %v15311_v15 = vld [vmem:[%s20108_s3 + $0x18] sm:$0xff] }
 0x321   :  { %v19202_v6 = vpop.f32.mrb[144].mxu1  ;;  %v19204_v30 = vpop.f32.mrb[145].mxu0  ;;  %13625 = vmatmul.mubr.msk.f32.gmra.mrb[250].mxu0 %vm7327_vm9, %v18876_v29  ;;  %v19208_v21 = vpack.c.bf16 %v9550_v61, %v9518_v57 }
 0x322   :  { %v19210_v48 = vpop.f32.mrb[145].mxu1  ;;  %13634 = vmatmul.mubr.msk.f32.gmra.mrb[250].mxu1 %vm7327_vm9, %v18876_v29  ;;  %8895 = vmatprep.mubr.f32.mxu0 %v20143_v36 }
 0x323   :  { %9014 = vmatprep.mubr.f32.mxu1 %v20143_v36 }
 0x324   :  { %v7659_v3 = vpop.f32.mrb[146].mxu0 }
 0x325   :  { %v7778_v9 = vpop.f32.mrb[146].mxu1  ;;  %v7661_v24 = vpop.f32.mrb[147].mxu0  ;;  %13626 = vmatmul.mubr.msk.f32.gmra.mrb[252].mxu0 %vm7327_vm9, %v18911_v18  ;;  %v9327_v14 = vmax.f32 %v7659_v3, 0.0 }
 0x326   :  { %v7780_v47 = vpop.f32.mrb[147].mxu1  ;;  %13635 = vmatmul.mubr.msk.f32.gmra.mrb[252].mxu1 %vm7327_vm9, %v18911_v18  ;;  %9085 = vmatprep.mubr.f32.mxu0 %v20143_v36  ;;  %v9329_v11 = vmax.f32 %v7778_v9, 0.0  ;;  %v9328_v50 = vmax.f32 %v7661_v24, 0.0 }
 0x327   :  { %9204 = vmatprep.mubr.f32.mxu1 %v20143_v36  ;;  %v9330_v7 = vmax.f32 %v7780_v47, 0.0 }
 0x328   :  { %v7665_v0 = vpop.f32.mrb[148].mxu0 }
 0x329   :  { %v9359_v31 = vmax.f32 %v7665_v0, 0.0  ;;  %v7784_v45 = vpop.f32.mrb[148].mxu1  ;;  %v7667_v5 = vpop.f32.mrb[149].mxu0  ;;  %13636 = vmatmul.mubr.msk.f32.vlgmr.msra.gmra.mrb[254].mxu0 %vm7327_vm9, %v15308_v60 }
 0x32a   :  { %v9361_v12 = vmax.f32 %v7784_v45, 0.0  ;;  %v9360_v22 = vmax.f32 %v7667_v5, 0.0  ;;  %v7786_v46 = vpop.f32.mrb[149].mxu1  ;;  %13645 = vmatmul.mubr.msk.f32.vlgmr.msra.gmra.mrb[254].mxu1 %vm7327_vm9, %v15308_v60  ;;  %14281 = vmatpush1.bf16.msra.mxu0 %v19136_v28 }
 0x32b   :  { %v19228_v38 = vpack.c.bf16 %v9359_v31, %v9327_v14  ;;  %v9362_v17 = vmax.f32 %v7786_v46, 0.0  ;;  %14297 = vmatpush1.bf16.msra.mxu1 %v19139_v49  ;;  %14283 = vmatprep.subr.bf16.mxu0 %v19158_v58 }
 0x32c   :  { %v19232_v4 = vpack.c.bf16 %v9361_v12, %v9329_v11  ;;  %14299 = vmatprep.subr.bf16.mxu1 %v19162_v44  ;;  %v7671_v52 = vpop.f32.mrb[150].mxu0  ;;  %9091 = vmatprep.mubr.f32.mxu0 %v20143_v36  ;;  %v14310_v40 = vpack.c.bf16 %v9360_v22, %v9328_v50  ;;  %v15313_v50 = vld [vmem:[%s20108_s3 + $0x28] sm:$0xff] }
 0x32d   :  { %v7790_v26 = vpop.f32.mrb[150].mxu1  ;;  %9210 = vmatprep.mubr.f32.mxu1 %v20143_v36  ;;  %v7673_v28 = vpop.f32.mrb[151].mxu0  ;;  %13637 = vmatmul.mubr.msk.f32.gmra.mrb[0].mxu0 %vm7327_vm9, %v15309_v16  ;;  %v14326_v49 = vpack.c.bf16 %v9362_v17, %v9330_v7  ;;  %v9391_v34 = vmax.f32 %v7671_v52, 0.0 }
 0x32e   :  { %v7792_v58 = vpop.f32.mrb[151].mxu1  ;;  %13646 = vmatmul.mubr.msk.f32.gmra.mrb[0].mxu1 %vm7327_vm9, %v15309_v16  ;;  %14285 = vmatpush1.bf16.msra.mxu0 %v19153_v2  ;;  %v9393_v2 = vmax.f32 %v7790_v26, 0.0 }
 0x32f   :  { %14301 = vmatpush1.bf16.msra.mxu1 %v19156_v53  ;;  %14287 = vmatprep.subr.bf16.mxu0 %v19178_v10  ;;  %v9392_v53 = vmax.f32 %v7673_v28, 0.0  ;;  %v9394_v19 = vmax.f32 %v7792_v58, 0.0 }
 0x330   :  { %14303 = vmatprep.subr.bf16.mxu1 %v19182_v55  ;;  %v7677_v44 = vpop.f32.mrb[152].mxu0  ;;  %9097 = vmatprep.mubr.f32.mxu0 %v20143_v36 }
 0x331   :  { %v9423_v63 = vmax.f32 %v7677_v44, 0.0  ;;  %v7796_v51 = vpop.f32.mrb[152].mxu1  ;;  %9216 = vmatprep.mubr.f32.mxu1 %v20143_v36  ;;  %v7679_v35 = vpop.f32.mrb[153].mxu0  ;;  %13638 = vmatmul.mubr.msk.f32.gmra.mrb[2].mxu0 %vm7327_vm9, %v15310_v25 }
 0x332   :  { %v9425_v10 = vmax.f32 %v7796_v51, 0.0  ;;  %v9424_v33 = vmax.f32 %v7679_v35, 0.0  ;;  %v7798_v55 = vpop.f32.mrb[153].mxu1  ;;  %13647 = vmatmul.mubr.msk.f32.gmra.mrb[2].mxu1 %vm7327_vm9, %v15310_v25  ;;  %14289 = vmatpush1.bf16.msra.mxu0 %v19173_v27 }
 0x333   :  { %v19254_v13 = vpack.c.bf16 %v9423_v63, %v9391_v34  ;;  %v9426_v62 = vmax.f32 %v7798_v55, 0.0  ;;  %14305 = vmatpush1.bf16.msra.mxu1 %v19176_v23  ;;  %14291 = vmatprep.subr.bf16.mxu0 %v19200_v41 }
 0x334   :  { %v19258_v37 = vpack.c.bf16 %v9425_v10, %v9393_v2  ;;  %14307 = vmatprep.subr.bf16.mxu1 %v19208_v21  ;;  %v7683_v43 = vpop.f32.mrb[154].mxu0  ;;  %9103 = vmatprep.mubr.f32.mxu0 %v20143_v36  ;;  %v19262_v1 = vpack.c.bf16 %v9424_v33, %v9392_v53  ;;  %v15312_v21 = vld [vmem:[%s20108_s3 + $0x20] sm:$0xff] }
 0x335   :  { %v7802_v56 = vpop.f32.mrb[154].mxu1  ;;  %9222 = vmatprep.mubr.f32.mxu1 %v20143_v36  ;;  %v7685_v27 = vpop.f32.mrb[155].mxu0  ;;  %13639 = vmatmul.mubr.msk.f32.gmra.mrb[4].mxu0 %vm7327_vm9, %v15311_v15  ;;  %v19269_v23 = vpack.c.bf16 %v9426_v62, %v9394_v19  ;;  %v9455_v32 = vmax.f32 %v7683_v43, 0.0 }
 0x336   :  { %v7804_v20 = vpop.f32.mrb[155].mxu1  ;;  %13648 = vmatmul.mubr.msk.f32.gmra.mrb[4].mxu1 %vm7327_vm9, %v15311_v15  ;;  %14293 = vmatpush1.bf16.msra.mxu0 %v19193_v8  ;;  %v9457_v8 = vmax.f32 %v7802_v56, 0.0  ;;  %v9456_v3 = vmax.f32 %v7685_v27, 0.0 }
 0x337   :  { %14309 = vmatpush1.bf16.msra.mxu1 %v19196_v39  ;;  %14311 = vmatprep.subr.bf16.mxu0 %v14310_v40  ;;  %v9458_v47 = vmax.f32 %v7804_v20, 0.0 }
 0x338   :  { %14327 = vmatprep.subr.bf16.mxu1 %v14326_v49  ;;  %v7689_v42 = vpop.f32.mrb[156].mxu0  ;;  %9109 = vmatprep.mubr.f32.mxu0 %v20143_v36 }
 0x339   :  { %v9487_v57 = vmax.f32 %v7689_v42, 0.0  ;;  %v7808_v61 = vpop.f32.mrb[156].mxu1  ;;  %9228 = vmatprep.mubr.f32.mxu1 %v20143_v36  ;;  %v7691_v41 = vpop.f32.mrb[157].mxu0  ;;  %13640 = vmatmul.mubr.msk.f32.gmra.mrb[6].mxu0 %vm7327_vm9, %v15312_v21 }
 0x33a   :  { %v9489_v39 = vmax.f32 %v7808_v61, 0.0  ;;  %v9488_v9 = vmax.f32 %v7691_v41, 0.0  ;;  %v7810_v24 = vpop.f32.mrb[157].mxu1  ;;  %13649 = vmatmul.mubr.msk.f32.gmra.mrb[6].mxu1 %vm7327_vm9, %v15312_v21  ;;  %9115 = vmatprep.mubr.f32.mxu0 %v20143_v36  ;;  %v19345_v41 = vld [vmem:[%s20109_s5 + $0x8] sm:$0xff] }
 0x33b   :  { %v19282_v0 = vpack.c.bf16 %v9487_v57, %v9455_v32  ;;  %v9490_v14 = vmax.f32 %v7810_v24, 0.0  ;;  %9234 = vmatprep.mubr.f32.mxu1 %v20143_v36 }
 0x33c   :  { %v19285_v31 = vpack.c.bf16 %v9489_v39, %v9457_v8  ;;  %v7695_v45 = vpop.f32.mrb[158].mxu0  ;;  %v19287_v5 = vpack.c.bf16 %v9488_v9, %v9456_v3 }
 0x33d   :  { %v7814_v60 = vpop.f32.mrb[158].mxu1  ;;  %v7697_v11 = vpop.f32.mrb[159].mxu0  ;;  %13641 = vmatmul.mubr.msk.f32.gmra.mrb[8].mxu0 %vm7327_vm9, %v15313_v50  ;;  %v19293_v12 = vpack.c.bf16 %v9490_v14, %v9458_v47  ;;  %v9519_v7 = vmax.f32 %v7695_v45, 0.0 }
 0x33e   :  { %v7816_v22 = vpop.f32.mrb[159].mxu1  ;;  %13650 = vmatmul.mubr.msk.f32.gmra.mrb[8].mxu1 %vm7327_vm9, %v15313_v50  ;;  %9121 = vmatprep.mubr.f32.mxu0 %v20143_v36  ;;  %v9521_v26 = vmax.f32 %v7814_v60, 0.0  ;;  %v9520_v28 = vmax.f32 %v7697_v11, 0.0 }
 0x33f   :  { %9240 = vmatprep.mubr.f32.mxu1 %v20143_v36  ;;  %v9522_v44 = vmax.f32 %v7816_v22, 0.0 }
 0x340   :  { %v7701_v46 = vpop.f32.mrb[160].mxu0 }
 0x341   :  { %v9551_v17 = vmax.f32 %v7701_v46, 0.0  ;;  %v7820_v52 = vpop.f32.mrb[160].mxu1  ;;  %v7703_v40 = vpop.f32.mrb[161].mxu0  ;;  %13642 = vmatmul.mubr.msk.f32.gmra.mrb[10].mxu0 %vm7327_vm9, %v18841_v59 }
 0x342   :  { %v9553_v16 = vmax.f32 %v7820_v52, 0.0  ;;  %v9552_v49 = vmax.f32 %v7703_v40, 0.0  ;;  %v7822_v58 = vpop.f32.mrb[161].mxu1  ;;  %13651 = vmatmul.mubr.msk.f32.gmra.mrb[10].mxu1 %vm7327_vm9, %v18841_v59  ;;  %9127 = vmatprep.mubr.f32.mxu0 %v20143_v36 }
 0x343   :  { %v19303_v34 = vpack.c.bf16 %v9551_v17, %v9519_v7  ;;  %v9554_v63 = vmax.f32 %v7822_v58, 0.0  ;;  %9246 = vmatprep.mubr.f32.mxu1 %v20143_v36  ;;  %v19402_v58 = vld [vmem:[%s20109_s5 + $0x20] sm:$0xff] }
 0x344   :  { %v19306_v51 = vpack.c.bf16 %v9553_v16, %v9521_v26  ;;  %v19308_v35 = vpack.c.bf16 %v9552_v49, %v9520_v28  ;;  %v19310_v25 = vpop.f32.mrb[162].mxu0 }
 0x345   :  { %v19312_v2 = vpack.c.bf16 %v9554_v63, %v9522_v44  ;;  %v19314_v53 = vpop.f32.mrb[162].mxu1  ;;  %v19316_v10 = vpop.f32.mrb[163].mxu0  ;;  %13643 = vmatmul.mubr.msk.f32.gmra.mrb[12].mxu0 %vm7327_vm9, %v18876_v29 }
 0x346   :  { %v19320_v59 = vpop.f32.mrb[163].mxu1  ;;  %13652 = vmatmul.mubr.msk.f32.gmra.mrb[12].mxu1 %vm7327_vm9, %v18876_v29  ;;  %9133 = vmatprep.mubr.f32.mxu0 %v20143_v36  ;;  %v19334_v29 = vld [vmem:[%s20109_s5] sm:$0xff] }
 0x347   :  { %9252 = vmatprep.mubr.f32.mxu1 %v20143_v36 }
 0x348   :  { %v7897_v33 = vpop.f32.mrb[164].mxu0 }
 0x349   :  { %v8016_v55 = vpop.f32.mrb[164].mxu1  ;;  %v7899_v19 = vpop.f32.mrb[165].mxu0  ;;  %13644 = vmatmul.mubr.msk.f32.gmra.mrb[14].mxu0 %vm7327_vm9, %v18911_v18  ;;  %v9331_v56 = vmax.f32 %v7897_v33, 0.0 }
 0x34a   :  { %v8018_v62 = vpop.f32.mrb[165].mxu1  ;;  %13653 = vmatmul.mubr.msk.f32.gmra.mrb[14].mxu1 %vm7327_vm9, %v18911_v18  ;;  %9675 = vmatprep.mubr.f32.mxu0 %v20143_v36  ;;  %v9333_v42 = vmax.f32 %v8016_v55, 0.0  ;;  %v9332_v32 = vmax.f32 %v7899_v19, 0.0 }
 0x34b   :  { %9788 = vmatprep.mubr.f32.mxu1 %v20143_v36  ;;  %v9334_v21 = vmax.f32 %v8018_v62, 0.0 }
 0x34c   :  { %v7903_v43 = vpop.f32.mrb[166].mxu0 }
 0x34d   :  { %v9363_v27 = vmax.f32 %v7903_v43, 0.0  ;;  %v8022_v15 = vpop.f32.mrb[166].mxu1  ;;  %v7905_v20 = vpop.f32.mrb[167].mxu0  ;;  %13654 = vmatmul.mubr.msk.f32.vlgmr.msra.gmra.mrb[16].mxu0 %vm5395_vm1, %v19334_v29 }
 0x34e   :  { %v9365_v18 = vmax.f32 %v8022_v15, 0.0  ;;  %v9364_v57 = vmax.f32 %v7905_v20, 0.0  ;;  %v8024_v61 = vpop.f32.mrb[167].mxu1  ;;  %13662 = vmatmul.mubr.msk.f32.vlgmr.msra.gmra.mrb[16].mxu1 %vm5395_vm1, %v19334_v29  ;;  %14313 = vmatpush1.bf16.msra.mxu0 %v19228_v38 }
 0x34f   :  { %v19347_v8 = vpack.c.bf16 %v9363_v27, %v9331_v56  ;;  %v9366_v3 = vmax.f32 %v8024_v61, 0.0  ;;  %14329 = vmatpush1.bf16.msra.mxu1 %v19232_v4  ;;  %14315 = vmatprep.subr.bf16.mxu0 %v19262_v1  ;;  %v19364_v4 = vld [vmem:[%s20109_s5 + $0x10] sm:$0xff] }
 0x350   :  { %v19351_v39 = vpack.c.bf16 %v9365_v18, %v9333_v42  ;;  %v14342_v9 = vpack.c.bf16 %v9364_v57, %v9332_v32  ;;  %14331 = vmatprep.subr.bf16.mxu1 %v19269_v23  ;;  %v7909_v24 = vpop.f32.mrb[168].mxu0  ;;  %9681 = vmatprep.mubr.f32.mxu0 %v20143_v36 }
 0x351   :  { %v14358_v38 = vpack.c.bf16 %v9366_v3, %v9334_v21  ;;  %v8028_v47 = vpop.f32.mrb[168].mxu1  ;;  %9794 = vmatprep.mubr.f32.mxu1 %v20143_v36  ;;  %v7911_v14 = vpop.f32.mrb[169].mxu0  ;;  %13655 = vmatmul.mubr.msk.f32.gmra.mrb[18].mxu0 %vm5395_vm1, %v19345_v41  ;;  %v9395_v23 = vmax.f32 %v7909_v24, 0.0  ;;  %v19434_v3 = vld [vmem:[%s20109_s5 + $0x30] sm:$0xff] }
 0x352   :  { %v8030_v45 = vpop.f32.mrb[169].mxu1  ;;  %13663 = vmatmul.mubr.msk.f32.gmra.mrb[18].mxu1 %vm5395_vm1, %v19345_v41  ;;  %14317 = vmatpush1.bf16.msra.mxu0 %v19254_v13  ;;  %v9397_v50 = vmax.f32 %v8028_v47, 0.0  ;;  %v9396_v22 = vmax.f32 %v7911_v14, 0.0 }
 0x353   :  { %14333 = vmatpush1.bf16.msra.mxu1 %v19258_v37  ;;  %14319 = vmatprep.subr.bf16.mxu0 %v19287_v5  ;;  %v19379_v5 = vld [vmem:[%s20109_s5 + $0x18] sm:$0xff] }
 0x354   :  { %14335 = vmatprep.subr.bf16.mxu1 %v19293_v12  ;;  %v7915_v1 = vpop.f32.mrb[170].mxu0  ;;  %9687 = vmatprep.mubr.f32.mxu0 %v20143_v36  ;;  %v9398_v12 = vmax.f32 %v8030_v45, 0.0 }
 0x355   :  { %v9427_v60 = vmax.f32 %v7915_v1, 0.0  ;;  %v8034_v11 = vpop.f32.mrb[170].mxu1  ;;  %9800 = vmatprep.mubr.f32.mxu1 %v20143_v36  ;;  %v7917_v13 = vpop.f32.mrb[171].mxu0  ;;  %13656 = vmatmul.mubr.msk.f32.gmra.mrb[20].mxu0 %vm5395_vm1, %v19364_v4 }
 0x356   :  { %v9429_v46 = vmax.f32 %v8034_v11, 0.0  ;;  %v9428_v37 = vmax.f32 %v7917_v13, 0.0  ;;  %v8036_v7 = vpop.f32.mrb[171].mxu1  ;;  %13664 = vmatmul.mubr.msk.f32.gmra.mrb[20].mxu1 %vm5395_vm1, %v19364_v4  ;;  %14321 = vmatpush1.bf16.msra.mxu0 %v19282_v0  ;;  %v19445_v13 = vld [vmem:[%s20109_s5 + $0x38] sm:$0xff] }
 0x357   :  { %v19381_v17 = vpack.c.bf16 %v9427_v60, %v9395_v23  ;;  %v9430_v52 = vmax.f32 %v8036_v7, 0.0  ;;  %14337 = vmatpush1.bf16.msra.mxu1 %v19285_v31  ;;  %14323 = vmatprep.subr.bf16.mxu0 %v19308_v35 }
 0x358   :  { %v19385_v40 = vpack.c.bf16 %v9429_v46, %v9397_v50  ;;  %v19387_v26 = vpack.c.bf16 %v9428_v37, %v9396_v22  ;;  %14339 = vmatprep.subr.bf16.mxu1 %v19312_v2  ;;  %v7921_v0 = vpop.f32.mrb[172].mxu0  ;;  %9693 = vmatprep.mubr.f32.mxu0 %v20143_v36 }
 0x359   :  { %v19391_v28 = vpack.c.bf16 %v9430_v52, %v9398_v12  ;;  %v8040_v16 = vpop.f32.mrb[172].mxu1  ;;  %9806 = vmatprep.mubr.f32.mxu1 %v20143_v36  ;;  %v7923_v49 = vpop.f32.mrb[173].mxu0  ;;  %13657 = vmatmul.mubr.msk.f32.gmra.mrb[22].mxu0 %vm5395_vm1, %v19379_v5  ;;  %v9459_v63 = vmax.f32 %v7921_v0, 0.0 }
 0x35a   :  { %v8042_v31 = vpop.f32.mrb[173].mxu1  ;;  %13665 = vmatmul.mubr.msk.f32.gmra.mrb[22].mxu1 %vm5395_vm1, %v19379_v5  ;;  %14325 = vmatpush1.bf16.msra.mxu0 %v19303_v34  ;;  %v9461_v34 = vmax.f32 %v8040_v16, 0.0  ;;  %v9460_v55 = vmax.f32 %v7923_v49, 0.0 }
 0x35b   :  { %14341 = vmatpush1.bf16.msra.mxu1 %v19306_v51  ;;  %14343 = vmatprep.subr.bf16.mxu0 %v14342_v9  ;;  %v19415_v51 = vld [vmem:[%s20109_s5 + $0x28] sm:$0xff]  ;;  %v9462_v56 = vmax.f32 %v8042_v31, 0.0 }
 0x35c   :  { %14359 = vmatprep.subr.bf16.mxu1 %v14358_v38  ;;  %v7927_v44 = vpop.f32.mrb[174].mxu0  ;;  %9699 = vmatprep.mubr.f32.mxu0 %v20143_v36 }
 0x35d   :  { %v9491_v35 = vmax.f32 %v7927_v44, 0.0  ;;  %v8046_v2 = vpop.f32.mrb[174].mxu1  ;;  %9812 = vmatprep.mubr.f32.mxu1 %v20143_v36  ;;  %v7929_v33 = vpop.f32.mrb[175].mxu0  ;;  %13658 = vmatmul.mubr.msk.f32.gmra.mrb[24].mxu0 %vm5395_vm1, %v19402_v58 }
 0x35e   :  { %v9493_v19 = vmax.f32 %v8046_v2, 0.0  ;;  %v9492_v62 = vmax.f32 %v7929_v33, 0.0  ;;  %v8048_v43 = vpop.f32.mrb[175].mxu1  ;;  %13666 = vmatmul.mubr.msk.f32.gmra.mrb[24].mxu1 %vm5395_vm1, %v19402_v58  ;;  %9705 = vmatprep.mubr.f32.mxu0 %v20143_v36 }
 0x35f   :  { %v19417_v27 = vpack.c.bf16 %v9491_v35, %v9459_v63  ;;  %v9494_v15 = vmax.f32 %v8048_v43, 0.0  ;;  %9818 = vmatprep.mubr.f32.mxu1 %v20143_v36 }
 0x360   :  { %v19420_v20 = vpack.c.bf16 %v9493_v19, %v9461_v34  ;;  %v19422_v42 = vpack.c.bf16 %v9492_v62, %v9460_v55  ;;  %v7933_v32 = vpop.f32.mrb[176].mxu0 }
 0x361   :  { %v19424_v18 = vpack.c.bf16 %v9494_v15, %v9462_v56  ;;  %v8052_v57 = vpop.f32.mrb[176].mxu1  ;;  %v7935_v61 = vpop.f32.mrb[177].mxu0  ;;  %13659 = vmatmul.mubr.msk.f32.gmra.mrb[26].mxu0 %vm5395_vm1, %v19415_v51  ;;  %v9523_v24 = vmax.f32 %v7933_v32, 0.0 }
 0x362   :  { %v8054_v21 = vpop.f32.mrb[177].mxu1  ;;  %13667 = vmatmul.mubr.msk.f32.gmra.mrb[26].mxu1 %vm5395_vm1, %v19415_v51  ;;  %9711 = vmatprep.mubr.f32.mxu0 %v20143_v36  ;;  %v9525_v45 = vmax.f32 %v8052_v57, 0.0  ;;  %v9524_v1 = vmax.f32 %v7935_v61, 0.0 }
 0x363   :  { %9824 = vmatprep.mubr.f32.mxu1 %v20143_v36  ;;  %v9526_v50 = vmax.f32 %v8054_v21, 0.0 }
 0x364   :  { %v7939_v9 = vpop.f32.mrb[178].mxu0 }
 0x365   :  { %v9555_v38 = vmax.f32 %v7939_v9, 0.0  ;;  %v8058_v47 = vpop.f32.mrb[178].mxu1  ;;  %v7941_v14 = vpop.f32.mrb[179].mxu0  ;;  %13660 = vmatmul.mubr.msk.f32.gmra.mrb[28].mxu0 %vm5395_vm1, %v19434_v3 }
 0x366   :  { %v9557_v23 = vmax.f32 %v8058_v47, 0.0  ;;  %v9556_v60 = vmax.f32 %v7941_v14, 0.0  ;;  %v8060_v11 = vpop.f32.mrb[179].mxu1  ;;  %13668 = vmatmul.mubr.msk.f32.gmra.mrb[28].mxu1 %vm5395_vm1, %v19434_v3  ;;  %9717 = vmatprep.mubr.f32.mxu0 %v20143_v36 }
 0x367   :  { %v19447_v22 = vpack.c.bf16 %v9555_v38, %v9523_v24  ;;  %v9558_v46 = vmax.f32 %v8060_v11, 0.0  ;;  %9830 = vmatprep.mubr.f32.mxu1 %v20143_v36 }
 0x368   :  { %v19450_v37 = vpack.c.bf16 %v9557_v23, %v9525_v45  ;;  %v14354_v7 = vpack.c.bf16 %v9556_v60, %v9524_v1  ;;  %v19452_v12 = vpop.f32.mrb[180].mxu0 }
 0x369   :  { %v14370_v52 = vpack.c.bf16 %v9558_v46, %v9526_v50  ;;  %v19454_v0 = vpop.f32.mrb[180].mxu1  ;;  %v19456_v16 = vpop.f32.mrb[181].mxu0  ;;  %13661 = vmatmul.mubr.msk.f32.gmra.mrb[30].mxu0 %vm5395_vm1, %v19445_v13 }
 0x36a   :  { %v19460_v49 = vpop.f32.mrb[181].mxu1  ;;  %13669 = vmatmul.mubr.msk.f32.gmra.mrb[30].mxu1 %vm5395_vm1, %v19445_v13  ;;  %9901 = vmatprep.mubr.f32.mxu0 %v20143_v36 }
 0x36b   :  { %10014 = vmatprep.mubr.f32.mxu1 %v20143_v36 }
 0x36c   :  { %v8135_v31 = vpop.f32.mrb[182].mxu0 }
 0x36d   :  { %v8254_v44 = vpop.f32.mrb[182].mxu1  ;;  %v8137_v63 = vpop.f32.mrb[183].mxu0  ;;  %13670 = vmatmul.mubr.msk.f32.vlgmr.msra.gmra.mrb[32].mxu0 %vm5395_vm1, %v19334_v29  ;;  %v9335_v33 = vmax.f32 %v8135_v31, 0.0 }
 0x36e   :  { %v8256_v35 = vpop.f32.mrb[183].mxu1  ;;  %13678 = vmatmul.mubr.msk.f32.vlgmr.msra.gmra.mrb[32].mxu1 %vm5395_vm1, %v19334_v29  ;;  %14345 = vmatpush1.bf16.msra.mxu0 %v19347_v8  ;;  %v9337_v62 = vmax.f32 %v8254_v44, 0.0  ;;  %v9336_v8 = vmax.f32 %v8137_v63, 0.0 }
 0x36f   :  { %14361 = vmatpush1.bf16.msra.mxu1 %v19351_v39  ;;  %14347 = vmatprep.subr.bf16.mxu0 %v19387_v26  ;;  %v9338_v26 = vmax.f32 %v8256_v35, 0.0 }
 0x370   :  { %14363 = vmatprep.subr.bf16.mxu1 %v19391_v28  ;;  %v8141_v2 = vpop.f32.mrb[184].mxu0  ;;  %9907 = vmatprep.mubr.f32.mxu0 %v20143_v36 }
 0x371   :  { %v9367_v34 = vmax.f32 %v8141_v2, 0.0  ;;  %v8260_v55 = vpop.f32.mrb[184].mxu1  ;;  %10020 = vmatprep.mubr.f32.mxu1 %v20143_v36  ;;  %v8143_v19 = vpop.f32.mrb[185].mxu0  ;;  %13671 = vmatmul.mubr.msk.f32.gmra.mrb[34].mxu0 %vm5395_vm1, %v19345_v41 }
 0x372   :  { %v9369_v43 = vmax.f32 %v8260_v55, 0.0  ;;  %v9368_v39 = vmax.f32 %v8143_v19, 0.0  ;;  %v8262_v56 = vpop.f32.mrb[185].mxu1  ;;  %13679 = vmatmul.mubr.msk.f32.gmra.mrb[34].mxu1 %vm5395_vm1, %v19345_v41  ;;  %14349 = vmatpush1.bf16.msra.mxu0 %v19381_v17 }
 0x373   :  { %v19481_v28 = vpack.c.bf16 %v9367_v34, %v9335_v33  ;;  %v9370_v15 = vmax.f32 %v8262_v56, 0.0  ;;  %14365 = vmatpush1.bf16.msra.mxu1 %v19385_v40  ;;  %14351 = vmatprep.subr.bf16.mxu0 %v19422_v42 }
 0x374   :  { %v19485_v32 = vpack.c.bf16 %v9369_v43, %v9337_v62  ;;  %v14374_v57 = vpack.c.bf16 %v9368_v39, %v9336_v8  ;;  %14367 = vmatprep.subr.bf16.mxu1 %v19424_v18  ;;  %v8147_v61 = vpop.f32.mrb[186].mxu0  ;;  %9913 = vmatprep.mubr.f32.mxu0 %v20143_v36 }
 0x375   :  { %v14390_v21 = vpack.c.bf16 %v9370_v15, %v9338_v26  ;;  %v8266_v9 = vpop.f32.mrb[186].mxu1  ;;  %10026 = vmatprep.mubr.f32.mxu1 %v20143_v36  ;;  %v8149_v17 = vpop.f32.mrb[187].mxu0  ;;  %13672 = vmatmul.mubr.msk.f32.gmra.mrb[36].mxu0 %vm5395_vm1, %v19364_v4  ;;  %v9399_v42 = vmax.f32 %v8147_v61, 0.0 }
 0x376   :  { %v8268_v24 = vpop.f32.mrb[187].mxu1  ;;  %13680 = vmatmul.mubr.msk.f32.gmra.mrb[36].mxu1 %vm5395_vm1, %v19364_v4  ;;  %14353 = vmatpush1.bf16.msra.mxu0 %v19417_v27  ;;  %v9401_v14 = vmax.f32 %v8266_v9, 0.0  ;;  %v9400_v45 = vmax.f32 %v8149_v17, 0.0 }
 0x377   :  { %14369 = vmatpush1.bf16.msra.mxu1 %v19420_v20  ;;  %14355 = vmatprep.subr.bf16.mxu0 %v14354_v7  ;;  %v9402_v20 = vmax.f32 %v8268_v24, 0.0 }
 0x378   :  { %14371 = vmatprep.subr.bf16.mxu1 %v14370_v52  ;;  %v8153_v40 = vpop.f32.mrb[188].mxu0  ;;  %9919 = vmatprep.mubr.f32.mxu0 %v20143_v36 }
 0x379   :  { %v9431_v18 = vmax.f32 %v8153_v40, 0.0  ;;  %v8272_v38 = vpop.f32.mrb[188].mxu1  ;;  %10032 = vmatprep.mubr.f32.mxu1 %v20143_v36  ;;  %v8155_v47 = vpop.f32.mrb[189].mxu0  ;;  %13673 = vmatmul.mubr.msk.f32.gmra.mrb[38].mxu0 %vm5395_vm1, %v19379_v5 }
 0x37a   :  { %v9433_v1 = vmax.f32 %v8272_v38, 0.0  ;;  %v9432_v27 = vmax.f32 %v8155_v47, 0.0  ;;  %v8274_v23 = vpop.f32.mrb[189].mxu1  ;;  %13681 = vmatmul.mubr.msk.f32.gmra.mrb[38].mxu1 %vm5395_vm1, %v19379_v5  ;;  %14357 = vmatpush1.bf16.msra.mxu0 %v19447_v22 }
 0x37b   :  { %v19503_v60 = vpack.c.bf16 %v9431_v18, %v9399_v42  ;;  %v9434_v11 = vmax.f32 %v8274_v23, 0.0  ;;  %14373 = vmatpush1.bf16.msra.mxu1 %v19450_v37  ;;  %14375 = vmatprep.subr.bf16.mxu0 %v14374_v57 }
 0x37c   :  { %v19506_v50 = vpack.c.bf16 %v9433_v1, %v9401_v14  ;;  %v19508_v46 = vpack.c.bf16 %v9432_v27, %v9400_v45  ;;  %14391 = vmatprep.subr.bf16.mxu1 %v14390_v21  ;;  %v8159_v7 = vpop.f32.mrb[190].mxu0  ;;  %9925 = vmatprep.mubr.f32.mxu0 %v20143_v36 }
 0x37d   :  { %v19511_v52 = vpack.c.bf16 %v9434_v11, %v9402_v20  ;;  %v8278_v31 = vpop.f32.mrb[190].mxu1  ;;  %10038 = vmatprep.mubr.f32.mxu1 %v20143_v36  ;;  %v8161_v22 = vpop.f32.mrb[191].mxu0  ;;  %13674 = vmatmul.mubr.msk.f32.gmra.mrb[40].mxu0 %vm5395_vm1, %v19402_v58  ;;  %v9463_v63 = vmax.f32 %v8159_v7, 0.0 }
 0x37e   :  { %v8280_v44 = vpop.f32.mrb[191].mxu1  ;;  %13682 = vmatmul.mubr.msk.f32.gmra.mrb[40].mxu1 %vm5395_vm1, %v19402_v58  ;;  %9931 = vmatprep.mubr.f32.mxu0 %v20143_v36  ;;  %v9465_v34 = vmax.f32 %v8278_v31, 0.0  ;;  %v9464_v55 = vmax.f32 %v8161_v22, 0.0 }
 0x37f   :  { %10044 = vmatprep.mubr.f32.mxu1 %v20143_v36  ;;  %v9466_v43 = vmax.f32 %v8280_v44, 0.0 }
 0x380   :  { %v8165_v37 = vpop.f32.mrb[192].mxu0 }
 0x381   :  { %v9495_v35 = vmax.f32 %v8165_v37, 0.0  ;;  %v8284_v2 = vpop.f32.mrb[192].mxu1  ;;  %v8167_v33 = vpop.f32.mrb[193].mxu0  ;;  %13675 = vmatmul.mubr.msk.f32.gmra.mrb[42].mxu0 %vm5395_vm1, %v19415_v51 }
 0x382   :  { %v9497_v19 = vmax.f32 %v8284_v2, 0.0  ;;  %v9496_v62 = vmax.f32 %v8167_v33, 0.0  ;;  %v8286_v8 = vpop.f32.mrb[193].mxu1  ;;  %13683 = vmatmul.mubr.msk.f32.gmra.mrb[42].mxu1 %vm5395_vm1, %v19415_v51  ;;  %9937 = vmatprep.mubr.f32.mxu0 %v20143_v36 }
 0x383   :  { %v19525_v39 = vpack.c.bf16 %v9495_v35, %v9463_v63  ;;  %v9498_v56 = vmax.f32 %v8286_v8, 0.0  ;;  %10050 = vmatprep.mubr.f32.mxu1 %v20143_v36 }
 0x384   :  { %v19528_v26 = vpack.c.bf16 %v9497_v19, %v9465_v34  ;;  %v14382_v15 = vpack.c.bf16 %v9496_v62, %v9464_v55  ;;  %v8171_v57 = vpop.f32.mrb[194].mxu0 }
 0x385   :  { %v14398_v61 = vpack.c.bf16 %v9498_v56, %v9466_v43  ;;  %v8290_v21 = vpop.f32.mrb[194].mxu1  ;;  %v8173_v9 = vpop.f32.mrb[195].mxu0  ;;  %13676 = vmatmul.mubr.msk.f32.gmra.mrb[44].mxu0 %vm5395_vm1, %v19434_v3  ;;  %v9527_v40 = vmax.f32 %v8171_v57, 0.0 }
 0x386   :  { %v8292_v17 = vpop.f32.mrb[195].mxu1  ;;  %13684 = vmatmul.mubr.msk.f32.gmra.mrb[44].mxu1 %vm5395_vm1, %v19434_v3  ;;  %9943 = vmatprep.mubr.f32.mxu0 %v20143_v36  ;;  %v9529_v47 = vmax.f32 %v8290_v21, 0.0  ;;  %v9528_v14 = vmax.f32 %v8173_v9, 0.0 }
 0x387   :  { %10056 = vmatprep.mubr.f32.mxu1 %v20143_v36  ;;  %v9530_v23 = vmax.f32 %v8292_v17, 0.0 }
 0x388   :  { %v8177_v24 = vpop.f32.mrb[196].mxu0 }
 0x389   :  { %v9559_v42 = vmax.f32 %v8177_v24, 0.0  ;;  %v8296_v18 = vpop.f32.mrb[196].mxu1  ;;  %v8179_v38 = vpop.f32.mrb[197].mxu0  ;;  %13677 = vmatmul.mubr.msk.f32.gmra.mrb[46].mxu0 %vm5395_vm1, %v19445_v13 }
 0x38a   :  { %v9561_v45 = vmax.f32 %v8296_v18, 0.0  ;;  %v9560_v1 = vmax.f32 %v8179_v38, 0.0  ;;  %v8298_v27 = vpop.f32.mrb[197].mxu1  ;;  %13685 = vmatmul.mubr.msk.f32.gmra.mrb[46].mxu1 %vm5395_vm1, %v19445_v13  ;;  %10127 = vmatprep.mubr.f32.mxu0 %v20143_v36 }
 0x38b   :  { %v14388_v20 = vpack.c.bf16 %v9559_v42, %v9527_v40  ;;  %v9562_v11 = vmax.f32 %v8298_v27, 0.0  ;;  %10240 = vmatprep.mubr.f32.mxu1 %v20143_v36 }
 0x38c   :  { %v14404_v7 = vpack.c.bf16 %v9561_v45, %v9529_v47  ;;  %v14386_v31 = vpack.c.bf16 %v9560_v1, %v9528_v14  ;;  %v19542_v22 = vpop.f32.mrb[198].mxu0 }
 0x38d   :  { %v14402_v44 = vpack.c.bf16 %v9562_v11, %v9530_v23  ;;  %v19544_v37 = vpop.f32.mrb[198].mxu1  ;;  %v19546_v63 = vpop.f32.mrb[199].mxu0  ;;  %13686 = vmatmul.mubr.msk.f32.vlgmr.msra.gmra.mrb[48].mxu0 %vm5395_vm1, %v19334_v29 }
 0x38e   :  { %v19550_v35 = vpop.f32.mrb[199].mxu1  ;;  %13694 = vmatmul.mubr.msk.f32.vlgmr.msra.gmra.mrb[48].mxu1 %vm5395_vm1, %v19334_v29  ;;  %14377 = vmatpush1.bf16.msra.mxu0 %v19481_v28 }
 0x38f   :  { %14393 = vmatpush1.bf16.msra.mxu1 %v19485_v32  ;;  %14379 = vmatprep.subr.bf16.mxu0 %v19508_v46 }
 0x390   :  { %14395 = vmatprep.subr.bf16.mxu1 %v19511_v52  ;;  %v8373_v2 = vpop.f32.mrb[200].mxu0  ;;  %10133 = vmatprep.mubr.f32.mxu0 %v20143_v36 }
 0x391   :  { %v8492_v33 = vpop.f32.mrb[200].mxu1  ;;  %10246 = vmatprep.mubr.f32.mxu1 %v20143_v36  ;;  %v8375_v34 = vpop.f32.mrb[201].mxu0  ;;  %13687 = vmatmul.mubr.msk.f32.gmra.mrb[50].mxu0 %vm5395_vm1, %v19345_v41  ;;  %v9339_v32 = vmax.f32 %v8373_v2, 0.0 }
 0x392   :  { %v8494_v55 = vpop.f32.mrb[201].mxu1  ;;  %13695 = vmatmul.mubr.msk.f32.gmra.mrb[50].mxu1 %vm5395_vm1, %v19345_v41  ;;  %14381 = vmatpush1.bf16.msra.mxu0 %v19503_v60  ;;  %v9341_v62 = vmax.f32 %v8492_v33, 0.0  ;;  %v9340_v8 = vmax.f32 %v8375_v34, 0.0 }
 0x393   :  { %14397 = vmatpush1.bf16.msra.mxu1 %v19506_v50  ;;  %14383 = vmatprep.subr.bf16.mxu0 %v14382_v15  ;;  %v9342_v50 = vmax.f32 %v8494_v55, 0.0 }
 0x394   :  { %14399 = vmatprep.subr.bf16.mxu1 %v14398_v61  ;;  %v8379_v28 = vpop.f32.mrb[202].mxu0  ;;  %10139 = vmatprep.mubr.f32.mxu0 %v20143_v36 }
 0x395   :  { %v9371_v46 = vmax.f32 %v8379_v28, 0.0  ;;  %v8498_v52 = vpop.f32.mrb[202].mxu1  ;;  %10252 = vmatprep.mubr.f32.mxu1 %v20143_v36  ;;  %v8381_v19 = vpop.f32.mrb[203].mxu0  ;;  %13688 = vmatmul.mubr.msk.f32.gmra.mrb[52].mxu0 %vm5395_vm1, %v19364_v4 }
 0x396   :  { %v9373_v43 = vmax.f32 %v8498_v52, 0.0  ;;  %v9372_v60 = vmax.f32 %v8381_v19, 0.0  ;;  %v8500_v56 = vpop.f32.mrb[203].mxu1  ;;  %13696 = vmatmul.mubr.msk.f32.gmra.mrb[52].mxu1 %vm5395_vm1, %v19364_v4  ;;  %14385 = vmatpush1.bf16.msra.mxu0 %v19525_v39 }
 0x397   :  { %v19573_v15 = vpack.c.bf16 %v9371_v46, %v9339_v32  ;;  %v9374_v57 = vmax.f32 %v8500_v56, 0.0  ;;  %14401 = vmatpush1.bf16.msra.mxu1 %v19528_v26  ;;  %14387 = vmatprep.subr.bf16.mxu0 %v14386_v31 }
 0x398   :  { %v19576_v61 = vpack.c.bf16 %v9373_v43, %v9341_v62  ;;  %v14406_v21 = vpack.c.bf16 %v9372_v60, %v9340_v8  ;;  %14403 = vmatprep.subr.bf16.mxu1 %v14402_v44  ;;  %v8385_v9 = vpop.f32.mrb[204].mxu0  ;;  %10145 = vmatprep.mubr.f32.mxu0 %v20143_v36 }
 0x399   :  { %v14422_v17 = vpack.c.bf16 %v9374_v57, %v9342_v50  ;;  %v8504_v24 = vpop.f32.mrb[204].mxu1  ;;  %10258 = vmatprep.mubr.f32.mxu1 %v20143_v36  ;;  %v8387_v40 = vpop.f32.mrb[205].mxu0  ;;  %13689 = vmatmul.mubr.msk.f32.gmra.mrb[54].mxu0 %vm5395_vm1, %v19379_v5  ;;  %v9403_v42 = vmax.f32 %v8385_v9, 0.0 }
 0x39a   :  { %v8506_v39 = vpop.f32.mrb[205].mxu1  ;;  %13697 = vmatmul.mubr.msk.f32.gmra.mrb[54].mxu1 %vm5395_vm1, %v19379_v5  ;;  %14389 = vmatpush1.bf16.msra.mxu0 %v14388_v20  ;;  %v9405_v14 = vmax.f32 %v8504_v24, 0.0  ;;  %v9404_v45 = vmax.f32 %v8387_v40, 0.0 }
 0x39b   :  { %14405 = vmatpush1.bf16.msra.mxu1 %v14404_v7  ;;  %14407 = vmatprep.subr.bf16.mxu0 %v14406_v21  ;;  %v9406_v20 = vmax.f32 %v8506_v39, 0.0 }
 0x39c   :  { %14423 = vmatprep.subr.bf16.mxu1 %v14422_v17  ;;  %v8391_v26 = vpop.f32.mrb[206].mxu0  ;;  %10151 = vmatprep.mubr.f32.mxu0 %v20143_v36 }
 0x39d   :  { %v9435_v18 = vmax.f32 %v8391_v26, 0.0  ;;  %v8510_v38 = vpop.f32.mrb[206].mxu1  ;;  %10264 = vmatprep.mubr.f32.mxu1 %v20143_v36  ;;  %v8393_v47 = vpop.f32.mrb[207].mxu0  ;;  %13690 = vmatmul.mubr.msk.f32.gmra.mrb[56].mxu0 %vm5395_vm1, %v19402_v58 }
 0x39e   :  { %v9437_v1 = vmax.f32 %v8510_v38, 0.0  ;;  %v9436_v27 = vmax.f32 %v8393_v47, 0.0  ;;  %v8512_v23 = vpop.f32.mrb[207].mxu1  ;;  %13698 = vmatmul.mubr.msk.f32.gmra.mrb[56].mxu1 %vm5395_vm1, %v19402_v58  ;;  %10157 = vmatprep.mubr.f32.mxu0 %v20143_v36 }
 0x39f   :  { %v19591_v11 = vpack.c.bf16 %v9435_v18, %v9403_v42  ;;  %v9438_v7 = vmax.f32 %v8512_v23, 0.0  ;;  %10270 = vmatprep.mubr.f32.mxu1 %v20143_v36 }
 0x3a0   :  { %v19594_v31 = vpack.c.bf16 %v9437_v1, %v9405_v14  ;;  %v14410_v44 = vpack.c.bf16 %v9436_v27, %v9404_v45  ;;  %v8397_v2 = vpop.f32.mrb[208].mxu0 }
 0x3a1   :  { %v14426_v33 = vpack.c.bf16 %v9438_v7, %v9406_v20  ;;  %v8516_v34 = vpop.f32.mrb[208].mxu1  ;;  %v8399_v55 = vpop.f32.mrb[209].mxu0  ;;  %13691 = vmatmul.mubr.msk.f32.gmra.mrb[58].mxu0 %vm5395_vm1, %v19415_v51  ;;  %v9467_v46 = vmax.f32 %v8397_v2, 0.0 }
 0x3a2   :  { %v8518_v28 = vpop.f32.mrb[209].mxu1  ;;  %13699 = vmatmul.mubr.msk.f32.gmra.mrb[58].mxu1 %vm5395_vm1, %v19415_v51  ;;  %10163 = vmatprep.mubr.f32.mxu0 %v20143_v36  ;;  %v9469_v8 = vmax.f32 %v8516_v34, 0.0  ;;  %v9468_v43 = vmax.f32 %v8399_v55, 0.0 }
 0x3a3   :  { %10276 = vmatprep.mubr.f32.mxu1 %v20143_v36  ;;  %v9470_v57 = vmax.f32 %v8518_v28, 0.0 }
 0x3a4   :  { %v8403_v32 = vpop.f32.mrb[210].mxu0 }
 0x3a5   :  { %v9499_v52 = vmax.f32 %v8403_v32, 0.0  ;;  %v8522_v19 = vpop.f32.mrb[210].mxu1  ;;  %v8405_v62 = vpop.f32.mrb[211].mxu0  ;;  %13692 = vmatmul.mubr.msk.f32.gmra.mrb[60].mxu0 %vm5395_vm1, %v19434_v3 }
 0x3a6   :  { %v9501_v60 = vmax.f32 %v8522_v19, 0.0  ;;  %v9500_v56 = vmax.f32 %v8405_v62, 0.0  ;;  %v8524_v50 = vpop.f32.mrb[211].mxu1  ;;  %13700 = vmatmul.mubr.msk.f32.gmra.mrb[60].mxu1 %vm5395_vm1, %v19434_v3  ;;  %10169 = vmatprep.mubr.f32.mxu0 %v20143_v36 }
 0x3a7   :  { %v14416_v21 = vpack.c.bf16 %v9499_v52, %v9467_v46  ;;  %v9502_v9 = vmax.f32 %v8524_v50, 0.0  ;;  %10282 = vmatprep.mubr.f32.mxu1 %v20143_v36 }
 0x3a8   :  { %v14432_v17 = vpack.c.bf16 %v9501_v60, %v9469_v8  ;;  %v14414_v24 = vpack.c.bf16 %v9500_v56, %v9468_v43  ;;  %v8409_v40 = vpop.f32.mrb[212].mxu0 }
 0x3a9   :  { %v14430_v39 = vpack.c.bf16 %v9502_v9, %v9470_v57  ;;  %v8528_v26 = vpop.f32.mrb[212].mxu1  ;;  %v8411_v42 = vpop.f32.mrb[213].mxu0  ;;  %13693 = vmatmul.mubr.msk.f32.gmra.mrb[62].mxu0 %vm5395_vm1, %v19445_v13  ;;  %v9531_v47 = vmax.f32 %v8409_v40, 0.0 }
 0x3aa   :  { %v8530_v18 = vpop.f32.mrb[213].mxu1  ;;  %13701 = vmatmul.mubr.msk.f32.gmra.mrb[62].mxu1 %vm5395_vm1, %v19445_v13  ;;  %10353 = vmatprep.mubr.f32.mxu0 %v20143_v36  ;;  %v9533_v27 = vmax.f32 %v8528_v26, 0.0  ;;  %v9532_v23 = vmax.f32 %v8411_v42, 0.0 }
 0x3ab   :  { %10466 = vmatprep.mubr.f32.mxu1 %v20143_v36  ;;  %v9534_v34 = vmax.f32 %v8530_v18, 0.0 }
 0x3ac   :  { %v8415_v38 = vpop.f32.mrb[214].mxu0 }
 0x3ad   :  { %v9563_v14 = vmax.f32 %v8415_v38, 0.0  ;;  %v8534_v45 = vpop.f32.mrb[214].mxu1  ;;  %v8417_v1 = vpop.f32.mrb[215].mxu0  ;;  %13702 = vmatmul.mubr.msk.f32.vlgmr.msra.gmra.mrb[64].mxu0 %vm5395_vm1, %v19334_v29 }
 0x3ae   :  { %v9565_v20 = vmax.f32 %v8534_v45, 0.0  ;;  %v9564_v7 = vmax.f32 %v8417_v1, 0.0  ;;  %v8536_v2 = vpop.f32.mrb[215].mxu1  ;;  %13710 = vmatmul.mubr.msk.f32.vlgmr.msra.gmra.mrb[64].mxu1 %vm5395_vm1, %v19334_v29  ;;  %14409 = vmatpush1.bf16.msra.mxu0 %v19573_v15 }
 0x3af   :  { %v14420_v55 = vpack.c.bf16 %v9563_v14, %v9531_v47  ;;  %v9566_v28 = vmax.f32 %v8536_v2, 0.0  ;;  %14425 = vmatpush1.bf16.msra.mxu1 %v19576_v61  ;;  %14411 = vmatprep.subr.bf16.mxu0 %v14410_v44 }
 0x3b0   :  { %v14436_v32 = vpack.c.bf16 %v9565_v20, %v9533_v27  ;;  %v14418_v46 = vpack.c.bf16 %v9564_v7, %v9532_v23  ;;  %14427 = vmatprep.subr.bf16.mxu1 %v14426_v33  ;;  %v19620_v52 = vpop.f32.mrb[216].mxu0  ;;  %10359 = vmatprep.mubr.f32.mxu0 %v20143_v36 }
 0x3b1   :  { %v14434_v19 = vpack.c.bf16 %v9566_v28, %v9534_v34  ;;  %v19623_v62 = vpop.f32.mrb[216].mxu1  ;;  %10472 = vmatprep.mubr.f32.mxu1 %v20143_v36  ;;  %v19626_v29 = vpop.f32.mrb[217].mxu0  ;;  %13703 = vmatmul.mubr.msk.f32.gmra.mrb[66].mxu0 %vm5395_vm1, %v19345_v41 }
 0x3b2   :  { %v19630_v15 = vpop.f32.mrb[217].mxu1  ;;  %13711 = vmatmul.mubr.msk.f32.gmra.mrb[66].mxu1 %vm5395_vm1, %v19345_v41  ;;  %14413 = vmatpush1.bf16.msra.mxu0 %v19591_v11 }
 0x3b3   :  { %14429 = vmatpush1.bf16.msra.mxu1 %v19594_v31  ;;  %14415 = vmatprep.subr.bf16.mxu0 %v14414_v24 }
 0x3b4   :  { %14431 = vmatprep.subr.bf16.mxu1 %v14430_v39  ;;  %v8611_v61 = vpop.f32.mrb[218].mxu0  ;;  %10365 = vmatprep.mubr.f32.mxu0 %v20143_v36 }
 0x3b5   :  { %v8730_v44 = vpop.f32.mrb[218].mxu1  ;;  %10478 = vmatprep.mubr.f32.mxu1 %v20143_v36  ;;  %v8613_v33 = vpop.f32.mrb[219].mxu0  ;;  %13704 = vmatmul.mubr.msk.f32.gmra.mrb[68].mxu0 %vm5395_vm1, %v19364_v4  ;;  %v9343_v31 = vmax.f32 %v8611_v61, 0.0 }
 0x3b6   :  { %v8732_v8 = vpop.f32.mrb[219].mxu1  ;;  %13712 = vmatmul.mubr.msk.f32.gmra.mrb[68].mxu1 %vm5395_vm1, %v19364_v4  ;;  %14417 = vmatpush1.bf16.msra.mxu0 %v14416_v21  ;;  %v9345_v50 = vmax.f32 %v8730_v44, 0.0  ;;  %v9344_v57 = vmax.f32 %v8613_v33, 0.0 }
 0x3b7   :  { %14433 = vmatpush1.bf16.msra.mxu1 %v14432_v17  ;;  %14419 = vmatprep.subr.bf16.mxu0 %v14418_v46  ;;  %v9346_v17 = vmax.f32 %v8732_v8, 0.0 }
 0x3b8   :  { %14435 = vmatprep.subr.bf16.mxu1 %v14434_v19  ;;  %v8617_v11 = vpop.f32.mrb[220].mxu0  ;;  %10371 = vmatprep.mubr.f32.mxu0 %v20143_v36 }
 0x3b9   :  { %v9375_v43 = vmax.f32 %v8617_v11, 0.0  ;;  %v8736_v60 = vpop.f32.mrb[220].mxu1  ;;  %10484 = vmatprep.mubr.f32.mxu1 %v20143_v36  ;;  %v8619_v56 = vpop.f32.mrb[221].mxu0  ;;  %13705 = vmatmul.mubr.msk.f32.gmra.mrb[70].mxu0 %vm5395_vm1, %v19379_v5 }
 0x3ba   :  { %v9377_v9 = vmax.f32 %v8736_v60, 0.0  ;;  %v9376_v4 = vmax.f32 %v8619_v56, 0.0  ;;  %v8738_v21 = vpop.f32.mrb[221].mxu1  ;;  %13713 = vmatmul.mubr.msk.f32.gmra.mrb[70].mxu1 %vm5395_vm1, %v19379_v5  ;;  %14421 = vmatpush1.bf16.msra.mxu0 %v14420_v55 }
 0x3bb   :  { %v19648_v24 = vpack.c.bf16 %v9375_v43, %v9343_v31  ;;  %v9378_v40 = vmax.f32 %v8738_v21, 0.0  ;;  %14437 = vmatpush1.bf16.msra.mxu1 %v14436_v32  ;;  %10377 = vmatprep.mubr.f32.mxu0 %v20143_v36 }
 0x3bc   :  { %v19651_v39 = vpack.c.bf16 %v9377_v9, %v9345_v50  ;;  %v14438_v26 = vpack.c.bf16 %v9376_v4, %v9344_v57  ;;  %v8623_v42 = vpop.f32.mrb[222].mxu0  ;;  %10490 = vmatprep.mubr.f32.mxu1 %v20143_v36 }
 0x3bd   :  { %v14454_v18 = vpack.c.bf16 %v9378_v40, %v9346_v17  ;;  %v8742_v38 = vpop.f32.mrb[222].mxu1  ;;  %v8625_v47 = vpop.f32.mrb[223].mxu0  ;;  %13706 = vmatmul.mubr.msk.f32.gmra.mrb[72].mxu0 %vm5395_vm1, %v19402_v58  ;;  %v9407_v1 = vmax.f32 %v8623_v42, 0.0 }
 0x3be   :  { %v8744_v14 = vpop.f32.mrb[223].mxu1  ;;  %13714 = vmatmul.mubr.msk.f32.gmra.mrb[72].mxu1 %vm5395_vm1, %v19402_v58  ;;  %14439 = vmatprep.subr.bf16.mxu0 %v14438_v26  ;;  %v9409_v7 = vmax.f32 %v8742_v38, 0.0  ;;  %v9408_v2 = vmax.f32 %v8625_v47, 0.0 }
 0x3bf   :  { %14455 = vmatprep.subr.bf16.mxu1 %v14454_v18  ;;  %10383 = vmatprep.mubr.f32.mxu0 %v20143_v36  ;;  %v9410_v32 = vmax.f32 %v8744_v14, 0.0 }
 0x3c0   :  { %v8629_v45 = vpop.f32.mrb[224].mxu0  ;;  %10496 = vmatprep.mubr.f32.mxu1 %v20143_v36 }
 0x3c1   :  { %v9439_v27 = vmax.f32 %v8629_v45, 0.0  ;;  %v8748_v23 = vpop.f32.mrb[224].mxu1  ;;  %v8631_v20 = vpop.f32.mrb[225].mxu0  ;;  %13707 = vmatmul.mubr.msk.f32.gmra.mrb[74].mxu0 %vm5395_vm1, %v19415_v51 }
 0x3c2   :  { %v9441_v34 = vmax.f32 %v8748_v23, 0.0  ;;  %v9440_v55 = vmax.f32 %v8631_v20, 0.0  ;;  %v8750_v28 = vpop.f32.mrb[225].mxu1  ;;  %13715 = vmatmul.mubr.msk.f32.gmra.mrb[74].mxu1 %vm5395_vm1, %v19415_v51  ;;  %10389 = vmatprep.mubr.f32.mxu0 %v20143_v36  ;;  %v19681_v20 = vld [vmem:[%s20109_s5] sm:$0xff] }
 0x3c3   :  { %v14444_v46 = vpack.c.bf16 %v9439_v27, %v9407_v1  ;;  %v9442_v19 = vmax.f32 %v8750_v28, 0.0  ;;  %10502 = vmatprep.mubr.f32.mxu1 %v20143_v36 }
 0x3c4   :  { %v14460_v61 = vpack.c.bf16 %v9441_v34, %v9409_v7  ;;  %v14442_v44 = vpack.c.bf16 %v9440_v55, %v9408_v2  ;;  %v8635_v33 = vpop.f32.mrb[226].mxu0 }
 0x3c5   :  { %v14458_v8 = vpack.c.bf16 %v9442_v19, %v9410_v32  ;;  %v8754_v11 = vpop.f32.mrb[226].mxu1  ;;  %v8637_v31 = vpop.f32.mrb[227].mxu0  ;;  %13708 = vmatmul.mubr.msk.f32.gmra.mrb[76].mxu0 %vm5395_vm1, %v19434_v3  ;;  %v9471_v56 = vmax.f32 %v8635_v33, 0.0 }
 0x3c6   :  { %v8756_v43 = vpop.f32.mrb[227].mxu1  ;;  %13716 = vmatmul.mubr.msk.f32.gmra.mrb[76].mxu1 %vm5395_vm1, %v19434_v3  ;;  %10395 = vmatprep.mubr.f32.mxu0 %v20143_v36  ;;  %v9473_v4 = vmax.f32 %v8754_v11, 0.0  ;;  %v9472_v21 = vmax.f32 %v8637_v31, 0.0 }
 0x3c7   :  { %10508 = vmatprep.mubr.f32.mxu1 %v20143_v36  ;;  %v9474_v42 = vmax.f32 %v8756_v43, 0.0 }
 0x3c8   :  { %v8641_v60 = vpop.f32.mrb[228].mxu0 }
 0x3c9   :  { %v9503_v50 = vmax.f32 %v8641_v60, 0.0  ;;  %v8760_v57 = vpop.f32.mrb[228].mxu1  ;;  %v8643_v9 = vpop.f32.mrb[229].mxu0  ;;  %13709 = vmatmul.mubr.msk.f32.gmra.mrb[78].mxu0 %vm5395_vm1, %v19445_v13 }
 0x3ca   :  { %v9505_v17 = vmax.f32 %v8760_v57, 0.0  ;;  %v9504_v40 = vmax.f32 %v8643_v9, 0.0  ;;  %v8762_v26 = vpop.f32.mrb[229].mxu1  ;;  %13717 = vmatmul.mubr.msk.f32.gmra.mrb[78].mxu1 %vm5395_vm1, %v19445_v13  ;;  %10579 = vmatprep.mubr.f32.mxu0 %v20143_v36 }
 0x3cb   :  { %v14448_v18 = vpack.c.bf16 %v9503_v50, %v9471_v56  ;;  %v9506_v38 = vmax.f32 %v8762_v26, 0.0  ;;  %10692 = vmatprep.mubr.f32.mxu1 %v20143_v36 }
 0x3cc   :  { %v14464_v47 = vpack.c.bf16 %v9505_v17, %v9473_v4  ;;  %v14446_v14 = vpack.c.bf16 %v9504_v40, %v9472_v21  ;;  %v8647_v45 = vpop.f32.mrb[230].mxu0 }
 0x3cd   :  { %v14462_v1 = vpack.c.bf16 %v9506_v38, %v9474_v42  ;;  %v8766_v27 = vpop.f32.mrb[230].mxu1  ;;  %v8649_v23 = vpop.f32.mrb[231].mxu0  ;;  %13718 = vmatmul.mubr.msk.f32.vlgmr.msra.gmra.mrb[80].mxu0 %vm5395_vm1, %v19681_v20  ;;  %v9535_v34 = vmax.f32 %v8647_v45, 0.0 }
 0x3ce   :  { %v8768_v7 = vpop.f32.mrb[231].mxu1  ;;  %13726 = vmatmul.mubr.msk.f32.vlgmr.msra.gmra.mrb[80].mxu1 %vm5395_vm1, %v19681_v20  ;;  %14441 = vmatpush1.bf16.msra.mxu0 %v19648_v24  ;;  %v9537_v19 = vmax.f32 %v8766_v27, 0.0  ;;  %v9536_v33 = vmax.f32 %v8649_v23, 0.0 }
 0x3cf   :  { %14457 = vmatpush1.bf16.msra.mxu1 %v19651_v39  ;;  %14443 = vmatprep.subr.bf16.mxu0 %v14442_v44  ;;  %v19696_v39 = vld [vmem:[%s20109_s5 + $0x8] sm:$0xff]  ;;  %v9538_v44 = vmax.f32 %v8768_v7, 0.0 }
 0x3d0   :  { %14459 = vmatprep.subr.bf16.mxu1 %v14458_v8  ;;  %v8653_v2 = vpop.f32.mrb[232].mxu0  ;;  %10585 = vmatprep.mubr.f32.mxu0 %v20143_v36 }
 0x3d1   :  { %v9567_v55 = vmax.f32 %v8653_v2, 0.0  ;;  %v8772_v28 = vpop.f32.mrb[232].mxu1  ;;  %10698 = vmatprep.mubr.f32.mxu1 %v20143_v36  ;;  %v8655_v32 = vpop.f32.mrb[233].mxu0  ;;  %13719 = vmatmul.mubr.msk.f32.gmra.mrb[82].mxu0 %vm5395_vm1, %v19345_v41 }
 0x3d2   :  { %v9569_v11 = vmax.f32 %v8772_v28, 0.0  ;;  %v9568_v24 = vmax.f32 %v8655_v32, 0.0  ;;  %v8774_v31 = vpop.f32.mrb[233].mxu1  ;;  %13727 = vmatmul.mubr.msk.f32.gmra.mrb[82].mxu1 %vm5395_vm1, %v19696_v39  ;;  %14445 = vmatpush1.bf16.msra.mxu0 %v14444_v46  ;;  %v19711_v46 = vld [vmem:[%s20109_s5 + $0x10] sm:$0xff] }
 0x3d3   :  { %v14452_v8 = vpack.c.bf16 %v9567_v55, %v9535_v34  ;;  %v9570_v43 = vmax.f32 %v8774_v31, 0.0  ;;  %14461 = vmatpush1.bf16.msra.mxu1 %v14460_v61  ;;  %14447 = vmatprep.subr.bf16.mxu0 %v14446_v14 }
 0x3d4   :  { %v14468_v41 = vpack.c.bf16 %v9569_v11, %v9537_v19  ;;  %v14450_v60 = vpack.c.bf16 %v9568_v24, %v9536_v33  ;;  %14463 = vmatprep.subr.bf16.mxu1 %v14462_v1  ;;  %v19700_v56 = vpop.f32.mrb[234].mxu0  ;;  %10591 = vmatprep.mubr.f32.mxu0 %v20143_v36 }
 0x3d5   :  { %v14466_v50 = vpack.c.bf16 %v9570_v43, %v9538_v44  ;;  %v19703_v57 = vpop.f32.mrb[234].mxu1  ;;  %10704 = vmatprep.mubr.f32.mxu1 %v20143_v36  ;;  %v19706_v9 = vpop.f32.mrb[235].mxu0  ;;  %13720 = vmatmul.mubr.msk.f32.gmra.mrb[84].mxu0 %vm5395_vm1, %v19711_v46 }
 0x3d6   :  { %v19715_v61 = vpop.f32.mrb[235].mxu1  ;;  %13728 = vmatmul.mubr.msk.f32.gmra.mrb[84].mxu1 %vm5395_vm1, %v19711_v46  ;;  %14449 = vmatpush1.bf16.msra.mxu0 %v14448_v18 }
 0x3d7   :  { %14465 = vmatpush1.bf16.msra.mxu1 %v14464_v47  ;;  %14451 = vmatprep.subr.bf16.mxu0 %v14450_v60 }
 0x3d8   :  { %14467 = vmatprep.subr.bf16.mxu1 %v14466_v50  ;;  %v8849_v4 = vpop.f32.mrb[236].mxu0  ;;  %10597 = vmatprep.mubr.f32.mxu0 %v20143_v36 }
 0x3d9   :  { %v8968_v21 = vpop.f32.mrb[236].mxu1  ;;  %10710 = vmatprep.mubr.f32.mxu1 %v20143_v36  ;;  %v8851_v17 = vpop.f32.mrb[237].mxu0  ;;  %13721 = vmatmul.mubr.msk.f32.gmra.mrb[86].mxu0 %vm5395_vm1, %v19379_v5  ;;  %v9347_v42 = vmax.f32 %v8849_v4, 0.0 }
 0x3da   :  { %v8970_v40 = vpop.f32.mrb[237].mxu1  ;;  %13729 = vmatmul.mubr.msk.f32.gmra.mrb[86].mxu1 %vm5395_vm1, %v19379_v5  ;;  %14453 = vmatpush1.bf16.msra.mxu0 %v14452_v8  ;;  %v9349_v14 = vmax.f32 %v8968_v21, 0.0  ;;  %v9348_v45 = vmax.f32 %v8851_v17, 0.0 }
 0x3db   :  { %14469 = vmatpush1.bf16.msra.mxu1 %v14468_v41  ;;  %10603 = vmatprep.mubr.f32.mxu0 %v20143_v36  ;;  %v9350_v5 = vmax.f32 %v8970_v40, 0.0 }
 0x3dc   :  { %v8855_v26 = vpop.f32.mrb[238].mxu0  ;;  %10716 = vmatprep.mubr.f32.mxu1 %v20143_v36 }
 0x3dd   :  { %v9379_v18 = vmax.f32 %v8855_v26, 0.0  ;;  %v8974_v38 = vpop.f32.mrb[238].mxu1  ;;  %v8857_v47 = vpop.f32.mrb[239].mxu0  ;;  %13722 = vmatmul.mubr.msk.f32.gmra.mrb[88].mxu0 %vm5395_vm1, %v19402_v58 }
 0x3de   :  { %v9381_v1 = vmax.f32 %v8974_v38, 0.0  ;;  %v9380_v27 = vmax.f32 %v8857_v47, 0.0  ;;  %v8976_v23 = vpop.f32.mrb[239].mxu1  ;;  %13730 = vmatmul.mubr.msk.f32.gmra.mrb[88].mxu1 %vm5395_vm1, %v19402_v58  ;;  %10609 = vmatprep.mubr.f32.mxu0 %v20143_v36 }
 0x3df   :  { %v14472_v7 = vpack.c.bf16 %v9379_v18, %v9347_v42  ;;  %v9382_v2 = vmax.f32 %v8976_v23, 0.0  ;;  %10722 = vmatprep.mubr.f32.mxu1 %v20143_v36 }
 0x3e0   :  { %v14488_v34 = vpack.c.bf16 %v9381_v1, %v9349_v14  ;;  %v14470_v55 = vpack.c.bf16 %v9380_v27, %v9348_v45  ;;  %v8861_v28 = vpop.f32.mrb[240].mxu0 }
 0x3e1   :  { %v14486_v32 = vpack.c.bf16 %v9382_v2, %v9350_v5  ;;  %v8980_v19 = vpop.f32.mrb[240].mxu1  ;;  %v8863_v33 = vpop.f32.mrb[241].mxu0  ;;  %13723 = vmatmul.mubr.msk.f32.gmra.mrb[90].mxu0 %vm5395_vm1, %v19415_v51  ;;  %v9411_v24 = vmax.f32 %v8861_v28, 0.0 }
 0x3e2   :  { %v8982_v11 = vpop.f32.mrb[241].mxu1  ;;  %13731 = vmatmul.mubr.msk.f32.gmra.mrb[90].mxu1 %vm5395_vm1, %v19415_v51  ;;  %14471 = vmatprep.subr.bf16.mxu0 %v14470_v55  ;;  %v9413_v43 = vmax.f32 %v8980_v19, 0.0  ;;  %v9412_v41 = vmax.f32 %v8863_v33, 0.0 }
 0x3e3   :  { %14487 = vmatprep.subr.bf16.mxu1 %v14486_v32  ;;  %10615 = vmatprep.mubr.f32.mxu0 %v20143_v36  ;;  %v9414_v51 = vmax.f32 %v8982_v11, 0.0 }
 0x3e4   :  { %v8867_v58 = vpop.f32.mrb[242].mxu0  ;;  %10728 = vmatprep.mubr.f32.mxu1 %v20143_v36 }
 0x3e5   :  { %v9443_v31 = vmax.f32 %v8867_v58, 0.0  ;;  %v8986_v44 = vpop.f32.mrb[242].mxu1  ;;  %v8869_v8 = vpop.f32.mrb[243].mxu0  ;;  %13724 = vmatmul.mubr.msk.f32.gmra.mrb[92].mxu0 %vm5395_vm1, %v19434_v3 }
 0x3e6   :  { %v9445_v60 = vmax.f32 %v8986_v44, 0.0  ;;  %v9444_v50 = vmax.f32 %v8869_v8, 0.0  ;;  %v8988_v4 = vpop.f32.mrb[243].mxu1  ;;  %13732 = vmatmul.mubr.msk.f32.gmra.mrb[92].mxu1 %vm5395_vm1, %v19434_v3  ;;  %10621 = vmatprep.mubr.f32.mxu0 %v20143_v36 }
 0x3e7   :  { %v14476_v21 = vpack.c.bf16 %v9443_v31, %v9411_v24  ;;  %v9446_v17 = vmax.f32 %v8988_v4, 0.0  ;;  %10734 = vmatprep.mubr.f32.mxu1 %v20143_v36 }
 0x3e8   :  { %v14492_v40 = vpack.c.bf16 %v9445_v60, %v9413_v43  ;;  %v14474_v26 = vpack.c.bf16 %v9444_v50, %v9412_v41  ;;  %v8873_v42 = vpop.f32.mrb[244].mxu0 }
 0x3e9   :  { %v14490_v18 = vpack.c.bf16 %v9446_v17, %v9414_v51  ;;  %v8992_v38 = vpop.f32.mrb[244].mxu1  ;;  %v8875_v47 = vpop.f32.mrb[245].mxu0  ;;  %13725 = vmatmul.mubr.msk.f32.gmra.mrb[94].mxu0 %vm5395_vm1, %v19445_v13  ;;  %v9475_v45 = vmax.f32 %v8873_v42, 0.0 }
 0x3ea   :  { %v8994_v14 = vpop.f32.mrb[245].mxu1  ;;  %13733 = vmatmul.mubr.msk.f32.gmra.mrb[94].mxu1 %vm5395_vm1, %v19445_v13  ;;  %10805 = vmatprep.mubr.f32.mxu0 %v20143_v36  ;;  %v9477_v5 = vmax.f32 %v8992_v38, 0.0  ;;  %v9476_v2 = vmax.f32 %v8875_v47, 0.0 }
 0x3eb   :  { %10918 = vmatprep.mubr.f32.mxu1 %v20143_v36  ;;  %v9478_v13 = vmax.f32 %v8994_v14, 0.0 }
 0x3ec   :  { %v8879_v3 = vpop.f32.mrb[246].mxu0 }
 0x3ed   :  { %v9507_v1 = vmax.f32 %v8879_v3, 0.0  ;;  %v8998_v27 = vpop.f32.mrb[246].mxu1  ;;  %v8881_v23 = vpop.f32.mrb[247].mxu0  ;;  %13734 = vmatmul.mubr.msk.f32.vlgmr.msra.gmra.mrb[96].mxu0 %vm5395_vm1, %v19681_v20 }
 0x3ee   :  { %v9509_v55 = vmax.f32 %v8998_v27, 0.0  ;;  %v9508_v28 = vmax.f32 %v8881_v23, 0.0  ;;  %v9000_v32 = vpop.f32.mrb[247].mxu1  ;;  %13742 = vmatmul.mubr.msk.f32.vlgmr.msra.gmra.mrb[96].mxu1 %vm5395_vm1, %v19681_v20  ;;  %14473 = vmatpush1.bf16.msra.mxu0 %v14472_v7  ;;  %v19778_v27 = vld [vmem:[%s20109_s5 + $0x18] sm:$0xff] }
 0x3ef   :  { %v14480_v19 = vpack.c.bf16 %v9507_v1, %v9475_v45  ;;  %v9510_v33 = vmax.f32 %v9000_v32, 0.0  ;;  %14489 = vmatpush1.bf16.msra.mxu1 %v14488_v34  ;;  %14475 = vmatprep.subr.bf16.mxu0 %v14474_v26 }
 0x3f0   :  { %v14496_v11 = vpack.c.bf16 %v9509_v55, %v9477_v5  ;;  %v14478_v58 = vpack.c.bf16 %v9508_v28, %v9476_v2  ;;  %14491 = vmatprep.subr.bf16.mxu1 %v14490_v18  ;;  %v8885_v24 = vpop.f32.mrb[248].mxu0  ;;  %10811 = vmatprep.mubr.f32.mxu0 %v20143_v36  ;;  %v19791_v28 = vld [vmem:[%s20109_s5 + $0x20] sm:$0xff] }
 0x3f1   :  { %v14494_v31 = vpack.c.bf16 %v9510_v33, %v9478_v13  ;;  %v9004_v44 = vpop.f32.mrb[248].mxu1  ;;  %10924 = vmatprep.mubr.f32.mxu1 %v20143_v36  ;;  %v8887_v8 = vpop.f32.mrb[249].mxu0  ;;  %13735 = vmatmul.mubr.msk.f32.gmra.mrb[98].mxu0 %vm5395_vm1, %v19696_v39  ;;  %v9539_v43 = vmax.f32 %v8885_v24, 0.0  ;;  %v19802_v24 = vld [vmem:[%s20109_s5 + $0x28] sm:$0xff] }
 0x3f2   :  { %v9006_v7 = vpop.f32.mrb[249].mxu1  ;;  %13743 = vmatmul.mubr.msk.f32.gmra.mrb[98].mxu1 %vm5395_vm1, %v19696_v39  ;;  %14477 = vmatpush1.bf16.msra.mxu0 %v14476_v21  ;;  %v9541_v4 = vmax.f32 %v9004_v44, 0.0  ;;  %v9540_v51 = vmax.f32 %v8887_v8, 0.0 }
 0x3f3   :  { %14493 = vmatpush1.bf16.msra.mxu1 %v14492_v40  ;;  %14479 = vmatprep.subr.bf16.mxu0 %v14478_v58  ;;  %v9542_v40 = vmax.f32 %v9006_v7, 0.0 }
 0x3f4   :  { %14495 = vmatprep.subr.bf16.mxu1 %v14494_v31  ;;  %v8891_v34 = vpop.f32.mrb[250].mxu0  ;;  %10817 = vmatprep.mubr.f32.mxu0 %v20143_v36 }
 0x3f5   :  { %v9571_v41 = vmax.f32 %v8891_v34, 0.0  ;;  %v9010_v60 = vpop.f32.mrb[250].mxu1  ;;  %10930 = vmatprep.mubr.f32.mxu1 %v20143_v36  ;;  %v8893_v50 = vpop.f32.mrb[251].mxu0  ;;  %13736 = vmatmul.mubr.msk.f32.gmra.mrb[100].mxu0 %vm5395_vm1, %v19711_v46 }
 0x3f6   :  { %v9573_v17 = vmax.f32 %v9010_v60, 0.0  ;;  %v9572_v26 = vmax.f32 %v8893_v50, 0.0  ;;  %v9012_v21 = vpop.f32.mrb[251].mxu1  ;;  %13744 = vmatmul.mubr.msk.f32.gmra.mrb[100].mxu1 %vm5395_vm1, %v19711_v46  ;;  %14481 = vmatpush1.bf16.msra.mxu0 %v14480_v19 }
 0x3f7   :  { %v14484_v42 = vpack.c.bf16 %v9571_v41, %v9539_v43  ;;  %v9574_v18 = vmax.f32 %v9012_v21, 0.0  ;;  %14497 = vmatpush1.bf16.msra.mxu1 %v14496_v11  ;;  %10823 = vmatprep.mubr.f32.mxu0 %v20143_v36 }
 0x3f8   :  { %v14500_v38 = vpack.c.bf16 %v9573_v17, %v9541_v4  ;;  %v14482_v47 = vpack.c.bf16 %v9572_v26, %v9540_v51  ;;  %v19768_v14 = vpop.f32.mrb[252].mxu0  ;;  %10936 = vmatprep.mubr.f32.mxu1 %v20143_v36 }
 0x3f9   :  { %v14498_v3 = vpack.c.bf16 %v9574_v18, %v9542_v40  ;;  %v19771_v45 = vpop.f32.mrb[252].mxu1  ;;  %v19773_v1 = vpop.f32.mrb[253].mxu0  ;;  %13737 = vmatmul.mubr.msk.f32.gmra.mrb[102].mxu0 %vm5395_vm1, %v19778_v27  ;;  %v19813_v40 = vld [vmem:[%s20109_s5 + $0x30] sm:$0xff] }
 0x3fa   :  { %v19782_v23 = vpop.f32.mrb[253].mxu1  ;;  %13745 = vmatmul.mubr.msk.f32.gmra.mrb[102].mxu1 %vm5395_vm1, %v19778_v27  ;;  %14483 = vmatprep.subr.bf16.mxu0 %v14482_v47 }
 0x3fb   :  { %14499 = vmatprep.subr.bf16.mxu1 %v14498_v3  ;;  %14485 = vmatpush1.bf16.msra.mxu0 %v14484_v42 }
 0x3fc   :  { %14501 = vmatpush1.bf16.msra.mxu1 %v14500_v38  ;;  %v9087_v5 = vpop.f32.mrb[254].mxu0  ;;  %10829 = vmatprep.mubr.f32.mxu0 %v20143_v36 }
 0x3fd   :  { %v9206_v2 = vpop.f32.mrb[254].mxu1  ;;  %10942 = vmatprep.mubr.f32.mxu1 %v20143_v36  ;;  %v9089_v55 = vpop.f32.mrb[255].mxu0  ;;  %13738 = vmatmul.mubr.msk.f32.gmra.mrb[104].mxu0 %vm5395_vm1, %v19791_v28  ;;  %v9351_v19 = vmax.f32 %v9087_v5, 0.0 }
 0x3fe   :  { %v9208_v32 = vpop.f32.mrb[255].mxu1  ;;  %13746 = vmatmul.mubr.msk.f32.gmra.mrb[104].mxu1 %vm5395_vm1, %v19791_v28  ;;  %10835 = vmatprep.mubr.f32.mxu0 %v20143_v36  ;;  %v9353_v31 = vmax.f32 %v9206_v2, 0.0  ;;  %v9352_v44 = vmax.f32 %v9089_v55, 0.0  ;;  %v19824_v2 = vld [vmem:[%s20109_s5 + $0x38] sm:$0xff] }
 0x3ff   :  { %10948 = vmatprep.mubr.f32.mxu1 %v20143_v36  ;;  %v9354_v43 = vmax.f32 %v9208_v32, 0.0 }
 0x400   :  { %v9093_v13 = vpop.f32.mrb[0].mxu0 }
 0x401   :  { %v9383_v33 = vmax.f32 %v9093_v13, 0.0  ;;  %v9212_v11 = vpop.f32.mrb[0].mxu1  ;;  %v9095_v58 = vpop.f32.mrb[1].mxu0  ;;  %13739 = vmatmul.mubr.msk.f32.gmra.mrb[106].mxu0 %vm5395_vm1, %v19802_v24 }
 0x402   :  { %v9385_v8 = vmax.f32 %v9212_v11, 0.0  ;;  %v9384_v7 = vmax.f32 %v9095_v58, 0.0  ;;  %v9214_v34 = vpop.f32.mrb[1].mxu1  ;;  %13747 = vmatmul.mubr.msk.f32.gmra.mrb[106].mxu1 %vm5395_vm1, %v19802_v24  ;;  %10841 = vmatprep.mubr.f32.mxu0 %v20143_v36 }
 0x403   :  { %v14504_v41 = vpack.c.bf16 %v9383_v33, %v9351_v19  ;;  %v9386_v60 = vmax.f32 %v9214_v34, 0.0  ;;  %10954 = vmatprep.mubr.f32.mxu1 %v20143_v36 }
 0x404   :  { %v14520_v50 = vpack.c.bf16 %v9385_v8, %v9353_v31  ;;  %v14502_v4 = vpack.c.bf16 %v9384_v7, %v9352_v44  ;;  %v9099_v51 = vpop.f32.mrb[2].mxu0 }
 0x405   :  { %v14518_v17 = vpack.c.bf16 %v9386_v60, %v9354_v43  ;;  %v9218_v26 = vpop.f32.mrb[2].mxu1  ;;  %v9101_v21 = vpop.f32.mrb[3].mxu0  ;;  %13740 = vmatmul.mubr.msk.f32.gmra.mrb[108].mxu0 %vm5395_vm1, %v19813_v40  ;;  %v9415_v38 = vmax.f32 %v9099_v51, 0.0 }
 0x406   :  { %v9220_v42 = vpop.f32.mrb[3].mxu1  ;;  %13748 = vmatmul.mubr.msk.f32.gmra.mrb[108].mxu1 %vm5395_vm1, %v19813_v40  ;;  %14503 = vmatprep.subr.bf16.mxu0 %v14502_v4  ;;  %v9417_v55 = vmax.f32 %v9218_v26, 0.0  ;;  %v9416_v32 = vmax.f32 %v9101_v21, 0.0 }
 0x407   :  { %14519 = vmatprep.subr.bf16.mxu1 %v14518_v17  ;;  %10847 = vmatprep.mubr.f32.mxu0 %v20143_v36  ;;  %v9418_v11 = vmax.f32 %v9220_v42, 0.0 }
 0x408   :  { %v9105_v18 = vpop.f32.mrb[4].mxu0  ;;  %10960 = vmatprep.mubr.f32.mxu1 %v20143_v36 }
 0x409   :  { %v9447_v47 = vmax.f32 %v9105_v18, 0.0  ;;  %v9224_v3 = vpop.f32.mrb[4].mxu1  ;;  %v9107_v5 = vpop.f32.mrb[5].mxu0  ;;  %13741 = vmatmul.mubr.msk.f32.gmra.mrb[110].mxu0 %vm5395_vm1, %v19824_v2 }
 0x40a   :  { %v9449_v13 = vmax.f32 %v9224_v3, 0.0  ;;  %v9448_v19 = vmax.f32 %v9107_v5, 0.0  ;;  %v9226_v33 = vpop.f32.mrb[5].mxu1  ;;  %13749 = vmatmul.mubr.msk.f32.gmra.mrb[110].mxu1 %vm5395_vm1, %v19824_v2  ;;  %11031 = vmatprep.mubr.f32.mxu0 %v20143_v36 }
 0x40b   :  { %v14508_v58 = vpack.c.bf16 %v9447_v47, %v9415_v38  ;;  %v9450_v31 = vmax.f32 %v9226_v33, 0.0  ;;  %11144 = vmatprep.mubr.f32.mxu1 %v20143_v36 }
 0x40c   :  { %v14524_v44 = vpack.c.bf16 %v9449_v13, %v9417_v55  ;;  %v14506_v8 = vpack.c.bf16 %v9448_v19, %v9416_v32  ;;  %v9111_v7 = vpop.f32.mrb[6].mxu0 }
 0x40d   :  { %v14522_v34 = vpack.c.bf16 %v9450_v31, %v9418_v11  ;;  %v9230_v43 = vpop.f32.mrb[6].mxu1  ;;  %v9113_v60 = vpop.f32.mrb[7].mxu0  ;;  %13750 = vmatmul.mubr.msk.f32.vlgmr.msra.gmra.mrb[112].mxu0 %vm5395_vm1, %v19681_v20  ;;  %v9479_v17 = vmax.f32 %v9111_v7, 0.0 }
 0x40e   :  { %v9232_v4 = vpop.f32.mrb[7].mxu1  ;;  %13758 = vmatmul.mubr.msk.f32.vlgmr.msra.gmra.mrb[112].mxu1 %vm5395_vm1, %v19681_v20  ;;  %14505 = vmatpush1.bf16.msra.mxu0 %v14504_v41  ;;  %v9481_v18 = vmax.f32 %v9230_v43, 0.0  ;;  %v9480_v38 = vmax.f32 %v9113_v60, 0.0 }
 0x40f   :  { %14521 = vmatpush1.bf16.msra.mxu1 %v14520_v50  ;;  %14507 = vmatprep.subr.bf16.mxu0 %v14506_v8  ;;  %v9482_v50 = vmax.f32 %v9232_v4, 0.0 }
 0x410   :  { %14523 = vmatprep.subr.bf16.mxu1 %v14522_v34  ;;  %v9117_v51 = vpop.f32.mrb[8].mxu0  ;;  %11037 = vmatprep.mubr.f32.mxu0 %v20143_v36 }
 0x411   :  { %v9511_v26 = vmax.f32 %v9117_v51, 0.0  ;;  %v9236_v21 = vpop.f32.mrb[8].mxu1  ;;  %11150 = vmatprep.mubr.f32.mxu1 %v20143_v36  ;;  %v9119_v42 = vpop.f32.mrb[9].mxu0  ;;  %13751 = vmatmul.mubr.msk.f32.gmra.mrb[114].mxu0 %vm5395_vm1, %v19696_v39 }
 0x412   :  { %v9513_v47 = vmax.f32 %v9236_v21, 0.0  ;;  %v9512_v3 = vmax.f32 %v9119_v42, 0.0  ;;  %v9238_v41 = vpop.f32.mrb[9].mxu1  ;;  %13759 = vmatmul.mubr.msk.f32.gmra.mrb[114].mxu1 %vm5395_vm1, %v19696_v39  ;;  %14509 = vmatpush1.bf16.msra.mxu0 %v14508_v58 }
 0x413   :  { %v14512_v5 = vpack.c.bf16 %v9511_v26, %v9479_v17  ;;  %v9514_v55 = vmax.f32 %v9238_v41, 0.0  ;;  %14525 = vmatpush1.bf16.msra.mxu1 %v14524_v44  ;;  %11043 = vmatprep.mubr.f32.mxu0 %v20143_v36 }
 0x414   :  { %v14528_v32 = vpack.c.bf16 %v9513_v47, %v9481_v18  ;;  %v14510_v13 = vpack.c.bf16 %v9512_v3, %v9480_v38  ;;  %v9123_v19 = vpop.f32.mrb[10].mxu0  ;;  %11156 = vmatprep.mubr.f32.mxu1 %v20143_v36 }
 0x415   :  { %v14526_v33 = vpack.c.bf16 %v9514_v55, %v9482_v50  ;;  %v9242_v11 = vpop.f32.mrb[10].mxu1  ;;  %v9125_v31 = vpop.f32.mrb[11].mxu0  ;;  %13752 = vmatmul.mubr.msk.f32.gmra.mrb[116].mxu0 %vm5395_vm1, %v19711_v46  ;;  %v9543_v44 = vmax.f32 %v9123_v19, 0.0 }
 0x416   :  { %v9244_v8 = vpop.f32.mrb[11].mxu1  ;;  %13760 = vmatmul.mubr.msk.f32.gmra.mrb[116].mxu1 %vm5395_vm1, %v19711_v46  ;;  %14511 = vmatprep.subr.bf16.mxu0 %v14510_v13  ;;  %v9545_v60 = vmax.f32 %v9242_v11, 0.0  ;;  %v9544_v4 = vmax.f32 %v9125_v31, 0.0 }
 0x417   :  { %14527 = vmatprep.subr.bf16.mxu1 %v14526_v33  ;;  %14513 = vmatpush1.bf16.msra.mxu0 %v14512_v5  ;;  %v9546_v21 = vmax.f32 %v9244_v8, 0.0 }
 0x418   :  { %14529 = vmatpush1.bf16.msra.mxu1 %v14528_v32  ;;  %v9129_v58 = vpop.f32.mrb[12].mxu0  ;;  %11049 = vmatprep.mubr.f32.mxu0 %v20143_v36 }
 0x419   :  { %v9575_v7 = vmax.f32 %v9129_v58, 0.0  ;;  %v9248_v34 = vpop.f32.mrb[12].mxu1  ;;  %11162 = vmatprep.mubr.f32.mxu1 %v20143_v36  ;;  %v9131_v43 = vpop.f32.mrb[13].mxu0  ;;  %13753 = vmatmul.mubr.msk.f32.gmra.mrb[118].mxu0 %vm5395_vm1, %v19778_v27 }
 0x41a   :  { %v9577_v51 = vmax.f32 %v9248_v34, 0.0  ;;  %v9576_v17 = vmax.f32 %v9131_v43, 0.0  ;;  %v9250_v26 = vpop.f32.mrb[13].mxu1  ;;  %13761 = vmatmul.mubr.msk.f32.gmra.mrb[118].mxu1 %vm5395_vm1, %v19778_v27  ;;  %11055 = vmatprep.mubr.f32.mxu0 %v20143_v36 }
 0x41b   :  { %v14516_v42 = vpack.c.bf16 %v9575_v7, %v9543_v44  ;;  %v9578_v18 = vmax.f32 %v9250_v26, 0.0  ;;  %11168 = vmatprep.mubr.f32.mxu1 %v20143_v36 }
 0x41c   :  { %v14532_v38 = vpack.c.bf16 %v9577_v51, %v9545_v60  ;;  %v14514_v47 = vpack.c.bf16 %v9576_v17, %v9544_v4  ;;  %v19856_v3 = vpop.f32.mrb[14].mxu0 }
 0x41d   :  { %v14530_v41 = vpack.c.bf16 %v9578_v18, %v9546_v21  ;;  %v19858_v50 = vpop.f32.mrb[14].mxu1  ;;  %v19860_v5 = vpop.f32.mrb[15].mxu0  ;;  %13754 = vmatmul.mubr.msk.f32.gmra.mrb[120].mxu0 %vm5395_vm1, %v19791_v28 }
 0x41e   :  { %v19864_v55 = vpop.f32.mrb[15].mxu1  ;;  %13762 = vmatmul.mubr.msk.f32.gmra.mrb[120].mxu1 %vm5395_vm1, %v19791_v28  ;;  %14515 = vmatprep.subr.bf16.mxu0 %v14514_v47 }
 0x41f   :  { %14531 = vmatprep.subr.bf16.mxu1 %v14530_v41  ;;  %14517 = vmatpush1.bf16.msra.mxu0 %v14516_v42 }
 0x420   :  { %14533 = vmatpush1.bf16.msra.mxu1 %v14532_v38  ;;  %v9677_v32 = vpop.f32.mrb[16].mxu0  ;;  %11061 = vmatprep.mubr.f32.mxu0 %v20143_v36 }
 0x421   :  { %v9790_v13 = vpop.f32.mrb[16].mxu1  ;;  %11174 = vmatprep.mubr.f32.mxu1 %v20143_v36  ;;  %v9679_v19 = vpop.f32.mrb[17].mxu0  ;;  %13755 = vmatmul.mubr.msk.f32.gmra.mrb[122].mxu0 %vm5395_vm1, %v19802_v24  ;;  %v11419_v31 = vmax.f32 %v9677_v32, 0.0 }
 0x422   :  { %v9792_v33 = vpop.f32.mrb[17].mxu1  ;;  %13763 = vmatmul.mubr.msk.f32.gmra.mrb[122].mxu1 %vm5395_vm1, %v19802_v24  ;;  %11067 = vmatprep.mubr.f32.mxu0 %v20143_v36  ;;  %v11421_v7 = vmax.f32 %v9790_v13, 0.0  ;;  %v11420_v34 = vmax.f32 %v9679_v19, 0.0 }
 0x423   :  { %11180 = vmatprep.mubr.f32.mxu1 %v20143_v36  ;;  %v11422_v51 = vmax.f32 %v9792_v33, 0.0 }
 0x424   :  { %v9683_v11 = vpop.f32.mrb[18].mxu0 }
 0x425   :  { %v11451_v8 = vmax.f32 %v9683_v11, 0.0  ;;  %v9796_v58 = vpop.f32.mrb[18].mxu1  ;;  %v9685_v44 = vpop.f32.mrb[19].mxu0  ;;  %13756 = vmatmul.mubr.msk.f32.gmra.mrb[124].mxu0 %vm5395_vm1, %v19813_v40 }
 0x426   :  { %v11453_v43 = vmax.f32 %v9796_v58, 0.0  ;;  %v11452_v60 = vmax.f32 %v9685_v44, 0.0  ;;  %v9798_v4 = vpop.f32.mrb[19].mxu1  ;;  %13764 = vmatmul.mubr.msk.f32.gmra.mrb[124].mxu1 %vm5395_vm1, %v19813_v40  ;;  %11073 = vmatprep.mubr.f32.mxu0 %v20143_v36 }
 0x427   :  { %v14536_v17 = vpack.c.bf16 %v11451_v8, %v11419_v31  ;;  %v11454_v26 = vmax.f32 %v9798_v4, 0.0  ;;  %11186 = vmatprep.mubr.f32.mxu1 %v20143_v36 }
 0x428   :  { %v14552_v21 = vpack.c.bf16 %v11453_v43, %v11421_v7  ;;  %v14534_v42 = vpack.c.bf16 %v11452_v60, %v11420_v34  ;;  %v9689_v18 = vpop.f32.mrb[20].mxu0 }
 0x429   :  { %v14550_v38 = vpack.c.bf16 %v11454_v26, %v11422_v51  ;;  %v9802_v47 = vpop.f32.mrb[20].mxu1  ;;  %v9691_v41 = vpop.f32.mrb[21].mxu0  ;;  %13757 = vmatmul.mubr.msk.f32.gmra.mrb[126].mxu0 %vm5395_vm1, %v19824_v2  ;;  %v11483_v19 = vmax.f32 %v9689_v18, 0.0 }
 0x42a   :  { %v9804_v32 = vpop.f32.mrb[21].mxu1  ;;  %13765 = vmatmul.mubr.msk.f32.gmra.mrb[126].mxu1 %vm5395_vm1, %v19824_v2  ;;  %14535 = vmatprep.subr.bf16.mxu0 %v14534_v42  ;;  %v11485_v8 = vmax.f32 %v9802_v47, 0.0  ;;  %v11484_v58 = vmax.f32 %v9691_v41, 0.0 }
 0x42b   :  { %14551 = vmatprep.subr.bf16.mxu1 %v14550_v38  ;;  %11257 = vmatprep.mubr.f32.mxu0 %v20143_v36  ;;  %v11486_v43 = vmax.f32 %v9804_v32, 0.0 }
 0x42c   :  { %v9695_v13 = vpop.f32.mrb[22].mxu0  ;;  %11370 = vmatprep.mubr.f32.mxu1 %v20143_v36 }
 0x42d   :  { %v11515_v33 = vmax.f32 %v9695_v13, 0.0  ;;  %v9808_v11 = vpop.f32.mrb[22].mxu1  ;;  %v9697_v31 = vpop.f32.mrb[23].mxu0  ;;  %13766 = vmatmul.mubr.msk.f32.vlgmr.msra.gmra.mrb[128].mxu0 %vm5395_vm1, %v19681_v20 }
 0x42e   :  { %v11517_v44 = vmax.f32 %v9808_v11, 0.0  ;;  %v11516_v7 = vmax.f32 %v9697_v31, 0.0  ;;  %v9810_v34 = vpop.f32.mrb[23].mxu1  ;;  %13774 = vmatmul.mubr.msk.f32.vlgmr.msra.gmra.mrb[128].mxu1 %vm5395_vm1, %v19681_v20  ;;  %14537 = vmatpush1.bf16.msra.mxu0 %v14536_v17 }
 0x42f   :  { %v14540_v60 = vpack.c.bf16 %v11515_v33, %v11483_v19  ;;  %v11518_v4 = vmax.f32 %v9810_v34, 0.0  ;;  %14553 = vmatpush1.bf16.msra.mxu1 %v14552_v21  ;;  %11263 = vmatprep.mubr.f32.mxu0 %v20143_v36 }
 0x430   :  { %v14556_v51 = vpack.c.bf16 %v11517_v44, %v11485_v8  ;;  %v14538_v26 = vpack.c.bf16 %v11516_v7, %v11484_v58  ;;  %v9701_v42 = vpop.f32.mrb[24].mxu0  ;;  %11376 = vmatprep.mubr.f32.mxu1 %v20143_v36 }
 0x431   :  { %v14554_v18 = vpack.c.bf16 %v11518_v4, %v11486_v43  ;;  %v9814_v38 = vpop.f32.mrb[24].mxu1  ;;  %v9703_v47 = vpop.f32.mrb[25].mxu0  ;;  %13767 = vmatmul.mubr.msk.f32.gmra.mrb[130].mxu0 %vm5395_vm1, %v19696_v39  ;;  %v11547_v17 = vmax.f32 %v9701_v42, 0.0 }
 0x432   :  { %v9816_v41 = vpop.f32.mrb[25].mxu1  ;;  %13775 = vmatmul.mubr.msk.f32.gmra.mrb[130].mxu1 %vm5395_vm1, %v19696_v39  ;;  %14539 = vmatprep.subr.bf16.mxu0 %v14538_v26  ;;  %v11549_v19 = vmax.f32 %v9814_v38, 0.0  ;;  %v11548_v33 = vmax.f32 %v9703_v47, 0.0 }
 0x433   :  { %14555 = vmatprep.subr.bf16.mxu1 %v14554_v18  ;;  %14541 = vmatpush1.bf16.msra.mxu0 %v14540_v60  ;;  %v11550_v8 = vmax.f32 %v9816_v41, 0.0 }
 0x434   :  { %14557 = vmatpush1.bf16.msra.mxu1 %v14556_v51  ;;  %v9707_v20 = vpop.f32.mrb[26].mxu0  ;;  %11269 = vmatprep.mubr.f32.mxu0 %v20143_v36 }
 0x435   :  { %v11579_v21 = vmax.f32 %v9707_v20, 0.0  ;;  %v9820_v32 = vpop.f32.mrb[26].mxu1  ;;  %11382 = vmatprep.mubr.f32.mxu1 %v20143_v36  ;;  %v9709_v13 = vpop.f32.mrb[27].mxu0  ;;  %13768 = vmatmul.mubr.msk.f32.gmra.mrb[132].mxu0 %vm5395_vm1, %v19711_v46 }
 0x436   :  { %v11581_v11 = vmax.f32 %v9820_v32, 0.0  ;;  %v11580_v39 = vmax.f32 %v9709_v13, 0.0  ;;  %v9822_v31 = vpop.f32.mrb[27].mxu1  ;;  %13776 = vmatmul.mubr.msk.f32.gmra.mrb[132].mxu1 %vm5395_vm1, %v19711_v46  ;;  %11275 = vmatprep.mubr.f32.mxu0 %v20143_v36 }
 0x437   :  { %v14544_v58 = vpack.c.bf16 %v11579_v21, %v11547_v17  ;;  %v11582_v44 = vmax.f32 %v9822_v31, 0.0  ;;  %11388 = vmatprep.mubr.f32.mxu1 %v20143_v36 }
 0x438   :  { %v14560_v7 = vpack.c.bf16 %v11581_v11, %v11549_v19  ;;  %v14542_v34 = vpack.c.bf16 %v11580_v39, %v11548_v33  ;;  %v9713_v43 = vpop.f32.mrb[28].mxu0 }
 0x439   :  { %v14558_v60 = vpack.c.bf16 %v11582_v44, %v11550_v8  ;;  %v9826_v4 = vpop.f32.mrb[28].mxu1  ;;  %v9715_v51 = vpop.f32.mrb[29].mxu0  ;;  %13769 = vmatmul.mubr.msk.f32.gmra.mrb[134].mxu0 %vm5395_vm1, %v19778_v27  ;;  %v11611_v42 = vmax.f32 %v9713_v43, 0.0 }
 0x43a   :  { %v9828_v26 = vpop.f32.mrb[29].mxu1  ;;  %13777 = vmatmul.mubr.msk.f32.gmra.mrb[134].mxu1 %vm5395_vm1, %v19778_v27  ;;  %14543 = vmatprep.subr.bf16.mxu0 %v14542_v34  ;;  %v11613_v41 = vmax.f32 %v9826_v4, 0.0  ;;  %v11612_v20 = vmax.f32 %v9715_v51, 0.0 }
 0x43b   :  { %14559 = vmatprep.subr.bf16.mxu1 %v14558_v60  ;;  %14545 = vmatpush1.bf16.msra.mxu0 %v14544_v58  ;;  %v11614_v32 = vmax.f32 %v9828_v26, 0.0 }
 0x43c   :  { %14561 = vmatpush1.bf16.msra.mxu1 %v14560_v7  ;;  %v9719_v46 = vpop.f32.mrb[30].mxu0  ;;  %11281 = vmatprep.mubr.f32.mxu0 %v20143_v36 }
 0x43d   :  { %v11643_v18 = vmax.f32 %v9719_v46, 0.0  ;;  %v9832_v38 = vpop.f32.mrb[30].mxu1  ;;  %11394 = vmatprep.mubr.f32.mxu1 %v20143_v36  ;;  %v9721_v47 = vpop.f32.mrb[31].mxu0  ;;  %13770 = vmatmul.mubr.msk.f32.gmra.mrb[136].mxu0 %vm5395_vm1, %v19791_v28 }
 0x43e   :  { %v11645_v17 = vmax.f32 %v9832_v38, 0.0  ;;  %v11644_v27 = vmax.f32 %v9721_v47, 0.0  ;;  %v9834_v21 = vpop.f32.mrb[31].mxu1  ;;  %13778 = vmatmul.mubr.msk.f32.gmra.mrb[136].mxu1 %vm5395_vm1, %v19791_v28  ;;  %11287 = vmatprep.mubr.f32.mxu0 %v20143_v36 }
 0x43f   :  { %v14548_v13 = vpack.c.bf16 %v11643_v18, %v11611_v42  ;;  %v11646_v19 = vmax.f32 %v9834_v21, 0.0  ;;  %11400 = vmatprep.mubr.f32.mxu1 %v20143_v36 }
 0x440   :  { %v14564_v33 = vpack.c.bf16 %v11645_v17, %v11613_v41  ;;  %v14546_v11 = vpack.c.bf16 %v11644_v27, %v11612_v20  ;;  %v9903_v39 = vpop.f32.mrb[32].mxu0 }
 0x441   :  { %v14562_v31 = vpack.c.bf16 %v11646_v19, %v11614_v32  ;;  %v10016_v8 = vpop.f32.mrb[32].mxu1  ;;  %v9905_v58 = vpop.f32.mrb[33].mxu0  ;;  %13771 = vmatmul.mubr.msk.f32.gmra.mrb[138].mxu0 %vm5395_vm1, %v19802_v24  ;;  %v11423_v7 = vmax.f32 %v9903_v39, 0.0 }
 0x442   :  { %v10018_v44 = vpop.f32.mrb[33].mxu1  ;;  %13779 = vmatmul.mubr.msk.f32.gmra.mrb[138].mxu1 %vm5395_vm1, %v19802_v24  ;;  %14547 = vmatprep.subr.bf16.mxu0 %v14546_v11  ;;  %v11425_v4 = vmax.f32 %v10016_v8, 0.0  ;;  %v11424_v51 = vmax.f32 %v9905_v58, 0.0 }
 0x443   :  { %14563 = vmatprep.subr.bf16.mxu1 %v14562_v31  ;;  %14549 = vmatpush1.bf16.msra.mxu0 %v14548_v13  ;;  %v11426_v42 = vmax.f32 %v10018_v44, 0.0 }
 0x444   :  { %14565 = vmatpush1.bf16.msra.mxu1 %v14564_v33  ;;  %v9909_v28 = vpop.f32.mrb[34].mxu0  ;;  %11293 = vmatprep.mubr.f32.mxu0 %v20143_v36 }
 0x445   :  { %v11455_v34 = vmax.f32 %v9909_v28, 0.0  ;;  %v10022_v43 = vpop.f32.mrb[34].mxu1  ;;  %11406 = vmatprep.mubr.f32.mxu1 %v20143_v36  ;;  %v9911_v60 = vpop.f32.mrb[35].mxu0  ;;  %13772 = vmatmul.mubr.msk.f32.gmra.mrb[140].mxu0 %vm5395_vm1, %v19813_v40 }
 0x446   :  { %v11457_v26 = vmax.f32 %v10022_v43, 0.0  ;;  %v11456_v24 = vmax.f32 %v9911_v60, 0.0  ;;  %v10024_v46 = vpop.f32.mrb[35].mxu1  ;;  %13780 = vmatmul.mubr.msk.f32.gmra.mrb[140].mxu1 %vm5395_vm1, %v19813_v40  ;;  %11299 = vmatprep.mubr.f32.mxu0 %v20143_v36  ;;  %v19937_v40 = vld [vmem:[%s20110_s6] sm:$0x7] }
 0x447   :  { %v14568_v18 = vpack.c.bf16 %v11455_v34, %v11423_v7  ;;  %v11458_v38 = vmax.f32 %v10024_v46, 0.0  ;;  %11412 = vmatprep.mubr.f32.mxu1 %v20143_v36 }
 0x448   :  { %v14584_v47 = vpack.c.bf16 %v11457_v26, %v11425_v4  ;;  %v14566_v41 = vpack.c.bf16 %v11456_v24, %v11424_v51  ;;  %v9915_v20 = vpop.f32.mrb[36].mxu0 }
 0x449   :  { %v14582_v17 = vpack.c.bf16 %v11458_v38, %v11426_v42  ;;  %v10028_v27 = vpop.f32.mrb[36].mxu1  ;;  %v9917_v21 = vpop.f32.mrb[37].mxu0  ;;  %13773 = vmatmul.mubr.msk.f32.gmra.mrb[142].mxu0 %vm5395_vm1, %v19824_v2  ;;  %v11487_v19 = vmax.f32 %v9915_v20, 0.0 }
 0x44a   :  { %v10030_v32 = vpop.f32.mrb[37].mxu1  ;;  %13781 = vmatmul.mubr.msk.f32.gmra.mrb[142].mxu1 %vm5395_vm1, %v19824_v2  ;;  %14567 = vmatprep.subr.bf16.mxu0 %v14566_v41  ;;  %v11489_v2 = vmax.f32 %v10028_v27, 0.0  ;;  %v11488_v31 = vmax.f32 %v9917_v21, 0.0 }
 0x44b   :  { %14583 = vmatprep.subr.bf16.mxu1 %v14582_v17  ;;  %11743 = vmatprep.mubr.f32.mxu0 %v20143_v36  ;;  %v11490_v28 = vmax.f32 %v10030_v32, 0.0 }
 0x44c   :  { %v9921_v13 = vpop.f32.mrb[38].mxu0  ;;  %11814 = vmatprep.mubr.f32.mxu1 %v20143_v36 }
 0x44d   :  { %v11519_v33 = vmax.f32 %v9921_v13, 0.0  ;;  %v10034_v11 = vpop.f32.mrb[38].mxu1  ;;  %v9923_v39 = vpop.f32.mrb[39].mxu0  ;;  %13782 = vmatmul.mubr.msk.f32.vlgmr.msra.gmra.mrb[144].mxu0 %vm5395_vm1, %v19937_v40 }
 0x44e   :  { %v11521_v8 = vmax.f32 %v10034_v11, 0.0  ;;  %v11520_v58 = vmax.f32 %v9923_v39, 0.0  ;;  %v10036_v44 = vpop.f32.mrb[39].mxu1  ;;  %13783 = vmatmul.mubr.msk.f32.vlgmr.msra.gmra.mrb[144].mxu1 %vm5395_vm1, %v19937_v40  ;;  %14569 = vmatpush1.bf16.msra.mxu0 %v14568_v18 }
 0x44f   :  { %v14572_v7 = vpack.c.bf16 %v11519_v33, %v11487_v19  ;;  %v11522_v34 = vmax.f32 %v10036_v44, 0.0  ;;  %14585 = vmatpush1.bf16.msra.mxu1 %v14584_v47  ;;  %11885 = vmatprep.mubr.f32.mxu0 %v20143_v36 }
 0x450   :  { %v14588_v43 = vpack.c.bf16 %v11521_v8, %v11489_v2  ;;  %v14570_v60 = vpack.c.bf16 %v11520_v58, %v11488_v31  ;;  %v9927_v4 = vpop.f32.mrb[40].mxu0  ;;  %11956 = vmatprep.mubr.f32.mxu1 %v20143_v36 }
 0x451   :  { %v14586_v51 = vpack.c.bf16 %v11522_v34, %v11490_v28  ;;  %v10040_v26 = vpop.f32.mrb[40].mxu1  ;;  %v9929_v24 = vpop.f32.mrb[41].mxu0  ;;  %v11551_v18 = vmax.f32 %v9927_v4, 0.0 }
 0x452   :  { %v10042_v46 = vpop.f32.mrb[41].mxu1  ;;  %14571 = vmatprep.subr.bf16.mxu0 %v14570_v60  ;;  %v11553_v20 = vmax.f32 %v10040_v26, 0.0  ;;  %v11552_v17 = vmax.f32 %v9929_v24, 0.0 }
 0x453   :  { %14587 = vmatprep.subr.bf16.mxu1 %v14586_v51  ;;  %14573 = vmatpush1.bf16.msra.mxu0 %v14572_v7  ;;  %v11554_v13 = vmax.f32 %v10042_v46, 0.0 }
 0x454   :  { %14589 = vmatpush1.bf16.msra.mxu1 %v14588_v43  ;;  %v9933_v42 = vpop.f32.mrb[42].mxu0 }
 0x455   :  { %v11583_v38 = vmax.f32 %v9933_v42, 0.0  ;;  %v10046_v41 = vpop.f32.mrb[42].mxu1  ;;  %v9935_v47 = vpop.f32.mrb[43].mxu0 }
 0x456   :  { %v11585_v27 = vmax.f32 %v10046_v41, 0.0  ;;  %v11584_v21 = vmax.f32 %v9935_v47, 0.0  ;;  %v10048_v32 = vpop.f32.mrb[43].mxu1 }
 0x457   :  { %v14576_v19 = vpack.c.bf16 %v11583_v38, %v11551_v18  ;;  %v11586_v33 = vmax.f32 %v10048_v32, 0.0 }
 0x458   :  { %v14592_v11 = vpack.c.bf16 %v11585_v27, %v11553_v20  ;;  %v14574_v39 = vpack.c.bf16 %v11584_v21, %v11552_v17  ;;  %v9939_v2 = vpop.f32.mrb[44].mxu0 }
 0x459   :  { %v14590_v31 = vpack.c.bf16 %v11586_v33, %v11554_v13  ;;  %v10052_v8 = vpop.f32.mrb[44].mxu1  ;;  %v9941_v58 = vpop.f32.mrb[45].mxu0  ;;  %v11615_v7 = vmax.f32 %v9939_v2, 0.0 }
 0x45a   :  { %v10054_v44 = vpop.f32.mrb[45].mxu1  ;;  %14575 = vmatprep.subr.bf16.mxu0 %v14574_v39  ;;  %v11617_v4 = vmax.f32 %v10052_v8, 0.0  ;;  %v11616_v51 = vmax.f32 %v9941_v58, 0.0 }
 0x45b   :  { %14591 = vmatprep.subr.bf16.mxu1 %v14590_v31  ;;  %14577 = vmatpush1.bf16.msra.mxu0 %v14576_v19  ;;  %v11618_v42 = vmax.f32 %v10054_v44, 0.0 }
 0x45c   :  { %14593 = vmatpush1.bf16.msra.mxu1 %v14592_v11  ;;  %v9945_v28 = vpop.f32.mrb[46].mxu0 }
 0x45d   :  { %v11647_v34 = vmax.f32 %v9945_v28, 0.0  ;;  %v10058_v43 = vpop.f32.mrb[46].mxu1  ;;  %v9947_v60 = vpop.f32.mrb[47].mxu0 }
 0x45e   :  { %v11649_v26 = vmax.f32 %v10058_v43, 0.0  ;;  %v11648_v24 = vmax.f32 %v9947_v60, 0.0  ;;  %v10060_v46 = vpop.f32.mrb[47].mxu1 }
 0x45f   :  { %v14580_v18 = vpack.c.bf16 %v11647_v34, %v11615_v7  ;;  %v11650_v38 = vmax.f32 %v10060_v46, 0.0 }
 0x460   :  { %v14596_v41 = vpack.c.bf16 %v11649_v26, %v11617_v4  ;;  %v14578_v47 = vpack.c.bf16 %v11648_v24, %v11616_v51  ;;  %v10129_v20 = vpop.f32.mrb[48].mxu0 }
 0x461   :  { %v14594_v17 = vpack.c.bf16 %v11650_v38, %v11618_v42  ;;  %v10242_v27 = vpop.f32.mrb[48].mxu1  ;;  %v10131_v21 = vpop.f32.mrb[49].mxu0  ;;  %v11427_v19 = vmax.f32 %v10129_v20, 0.0 }
 0x462   :  { %v10244_v32 = vpop.f32.mrb[49].mxu1  ;;  %14579 = vmatprep.subr.bf16.mxu0 %v14578_v47  ;;  %v11429_v2 = vmax.f32 %v10242_v27, 0.0  ;;  %v11428_v31 = vmax.f32 %v10131_v21, 0.0 }
 0x463   :  { %14595 = vmatprep.subr.bf16.mxu1 %v14594_v17  ;;  %14581 = vmatpush1.bf16.msra.mxu0 %v14580_v18  ;;  %v11430_v28 = vmax.f32 %v10244_v32, 0.0 }
 0x464   :  { %14597 = vmatpush1.bf16.msra.mxu1 %v14596_v41  ;;  %v10135_v13 = vpop.f32.mrb[50].mxu0 }
 0x465   :  { %v11459_v33 = vmax.f32 %v10135_v13, 0.0  ;;  %v10248_v11 = vpop.f32.mrb[50].mxu1  ;;  %v10137_v39 = vpop.f32.mrb[51].mxu0 }
 0x466   :  { %v11461_v8 = vmax.f32 %v10248_v11, 0.0  ;;  %v11460_v58 = vmax.f32 %v10137_v39, 0.0  ;;  %v10250_v44 = vpop.f32.mrb[51].mxu1  ;;  %13784 = vmatmul.mubr.msk.f32.vlgmr.msra.gmra.mrb[146].mxu0 %vm5395_vm1, %v19937_v40 }
 0x467   :  { %v14600_v7 = vpack.c.bf16 %v11459_v33, %v11427_v19  ;;  %v11462_v34 = vmax.f32 %v10250_v44, 0.0  ;;  %13785 = vmatmul.mubr.msk.f32.vlgmr.msra.gmra.mrb[146].mxu1 %vm5395_vm1, %v19937_v40  ;;  %12027 = vmatprep.mubr.f32.mxu0 %v20143_v36 }
 0x468   :  { %v14616_v43 = vpack.c.bf16 %v11461_v8, %v11429_v2  ;;  %v14598_v60 = vpack.c.bf16 %v11460_v58, %v11428_v31  ;;  %v10141_v4 = vpop.f32.mrb[52].mxu0  ;;  %12098 = vmatprep.mubr.f32.mxu1 %v20143_v36 }
 0x469   :  { %v14614_v51 = vpack.c.bf16 %v11462_v34, %v11430_v28  ;;  %v10254_v26 = vpop.f32.mrb[52].mxu1  ;;  %v10143_v24 = vpop.f32.mrb[53].mxu0  ;;  %v11491_v18 = vmax.f32 %v10141_v4, 0.0 }
 0x46a   :  { %v10256_v46 = vpop.f32.mrb[53].mxu1  ;;  %14599 = vmatprep.subr.bf16.mxu0 %v14598_v60  ;;  %v11493_v20 = vmax.f32 %v10254_v26, 0.0  ;;  %v11492_v17 = vmax.f32 %v10143_v24, 0.0 }
 0x46b   :  { %14615 = vmatprep.subr.bf16.mxu1 %v14614_v51  ;;  %14601 = vmatpush1.bf16.msra.mxu0 %v14600_v7  ;;  %v11494_v13 = vmax.f32 %v10256_v46, 0.0 }
 0x46c   :  { %14617 = vmatpush1.bf16.msra.mxu1 %v14616_v43  ;;  %v10147_v42 = vpop.f32.mrb[54].mxu0 }
 0x46d   :  { %v11523_v38 = vmax.f32 %v10147_v42, 0.0  ;;  %v10260_v41 = vpop.f32.mrb[54].mxu1  ;;  %v10149_v47 = vpop.f32.mrb[55].mxu0 }
 0x46e   :  { %v11525_v27 = vmax.f32 %v10260_v41, 0.0  ;;  %v11524_v21 = vmax.f32 %v10149_v47, 0.0  ;;  %v10262_v32 = vpop.f32.mrb[55].mxu1 }
 0x46f   :  { %v14604_v19 = vpack.c.bf16 %v11523_v38, %v11491_v18  ;;  %v11526_v33 = vmax.f32 %v10262_v32, 0.0 }
 0x470   :  { %v14620_v11 = vpack.c.bf16 %v11525_v27, %v11493_v20  ;;  %v14602_v39 = vpack.c.bf16 %v11524_v21, %v11492_v17  ;;  %v10153_v2 = vpop.f32.mrb[56].mxu0 }
 0x471   :  { %v14618_v31 = vpack.c.bf16 %v11526_v33, %v11494_v13  ;;  %v10266_v8 = vpop.f32.mrb[56].mxu1  ;;  %v10155_v58 = vpop.f32.mrb[57].mxu0  ;;  %v11555_v7 = vmax.f32 %v10153_v2, 0.0 }
 0x472   :  { %v10268_v44 = vpop.f32.mrb[57].mxu1  ;;  %14603 = vmatprep.subr.bf16.mxu0 %v14602_v39  ;;  %v11557_v4 = vmax.f32 %v10266_v8, 0.0  ;;  %v11556_v51 = vmax.f32 %v10155_v58, 0.0 }
 0x473   :  { %14619 = vmatprep.subr.bf16.mxu1 %v14618_v31  ;;  %14605 = vmatpush1.bf16.msra.mxu0 %v14604_v19  ;;  %v11558_v42 = vmax.f32 %v10268_v44, 0.0 }
 0x474   :  { %14621 = vmatpush1.bf16.msra.mxu1 %v14620_v11  ;;  %v10159_v28 = vpop.f32.mrb[58].mxu0 }
 0x475   :  { %v11587_v34 = vmax.f32 %v10159_v28, 0.0  ;;  %v10272_v43 = vpop.f32.mrb[58].mxu1  ;;  %v10161_v60 = vpop.f32.mrb[59].mxu0 }
 0x476   :  { %v11589_v26 = vmax.f32 %v10272_v43, 0.0  ;;  %v11588_v24 = vmax.f32 %v10161_v60, 0.0  ;;  %v10274_v46 = vpop.f32.mrb[59].mxu1 }
 0x477   :  { %v14608_v18 = vpack.c.bf16 %v11587_v34, %v11555_v7  ;;  %v11590_v38 = vmax.f32 %v10274_v46, 0.0 }
 0x478   :  { %v14624_v41 = vpack.c.bf16 %v11589_v26, %v11557_v4  ;;  %v14606_v47 = vpack.c.bf16 %v11588_v24, %v11556_v51  ;;  %v10165_v20 = vpop.f32.mrb[60].mxu0 }
 0x479   :  { %v14622_v17 = vpack.c.bf16 %v11590_v38, %v11558_v42  ;;  %v10278_v27 = vpop.f32.mrb[60].mxu1  ;;  %v10167_v21 = vpop.f32.mrb[61].mxu0  ;;  %v11619_v19 = vmax.f32 %v10165_v20, 0.0 }
 0x47a   :  { %v10280_v32 = vpop.f32.mrb[61].mxu1  ;;  %14607 = vmatprep.subr.bf16.mxu0 %v14606_v47  ;;  %v11621_v2 = vmax.f32 %v10278_v27, 0.0  ;;  %v11620_v31 = vmax.f32 %v10167_v21, 0.0 }
 0x47b   :  { %14623 = vmatprep.subr.bf16.mxu1 %v14622_v17  ;;  %14609 = vmatpush1.bf16.msra.mxu0 %v14608_v18  ;;  %v11622_v28 = vmax.f32 %v10280_v32, 0.0 }
 0x47c   :  { %14625 = vmatpush1.bf16.msra.mxu1 %v14624_v41  ;;  %v10171_v13 = vpop.f32.mrb[62].mxu0 }
 0x47d   :  { %v11651_v33 = vmax.f32 %v10171_v13, 0.0  ;;  %v10284_v11 = vpop.f32.mrb[62].mxu1  ;;  %v10173_v39 = vpop.f32.mrb[63].mxu0 }
 0x47e   :  { %v11653_v8 = vmax.f32 %v10284_v11, 0.0  ;;  %v11652_v58 = vmax.f32 %v10173_v39, 0.0  ;;  %v10286_v44 = vpop.f32.mrb[63].mxu1 }
 0x47f   :  { %v14612_v7 = vpack.c.bf16 %v11651_v33, %v11619_v19  ;;  %v11654_v34 = vmax.f32 %v10286_v44, 0.0 }
 0x480   :  { %v14628_v43 = vpack.c.bf16 %v11653_v8, %v11621_v2  ;;  %v14610_v60 = vpack.c.bf16 %v11652_v58, %v11620_v31  ;;  %v10355_v4 = vpop.f32.mrb[64].mxu0 }
 0x481   :  { %v14626_v51 = vpack.c.bf16 %v11654_v34, %v11622_v28  ;;  %v10468_v26 = vpop.f32.mrb[64].mxu1  ;;  %v10357_v24 = vpop.f32.mrb[65].mxu0  ;;  %v11431_v18 = vmax.f32 %v10355_v4, 0.0 }
 0x482   :  { %v10470_v46 = vpop.f32.mrb[65].mxu1  ;;  %14611 = vmatprep.subr.bf16.mxu0 %v14610_v60  ;;  %v11433_v20 = vmax.f32 %v10468_v26, 0.0  ;;  %v11432_v17 = vmax.f32 %v10357_v24, 0.0 }
 0x483   :  { %14627 = vmatprep.subr.bf16.mxu1 %v14626_v51  ;;  %14613 = vmatpush1.bf16.msra.mxu0 %v14612_v7  ;;  %v11434_v13 = vmax.f32 %v10470_v46, 0.0 }
 0x484   :  { %14629 = vmatpush1.bf16.msra.mxu1 %v14628_v43  ;;  %v10361_v42 = vpop.f32.mrb[66].mxu0 }
 0x485   :  { %v11463_v38 = vmax.f32 %v10361_v42, 0.0  ;;  %v10474_v41 = vpop.f32.mrb[66].mxu1  ;;  %v10363_v47 = vpop.f32.mrb[67].mxu0 }
 0x486   :  { %v11465_v27 = vmax.f32 %v10474_v41, 0.0  ;;  %v11464_v21 = vmax.f32 %v10363_v47, 0.0  ;;  %v10476_v32 = vpop.f32.mrb[67].mxu1  ;;  %13786 = vmatmul.mubr.msk.f32.vlgmr.msra.gmra.mrb[148].mxu0 %vm5395_vm1, %v19937_v40 }
 0x487   :  { %v14632_v19 = vpack.c.bf16 %v11463_v38, %v11431_v18  ;;  %v11466_v33 = vmax.f32 %v10476_v32, 0.0  ;;  %13787 = vmatmul.mubr.msk.f32.vlgmr.msra.gmra.mrb[148].mxu1 %vm5395_vm1, %v19937_v40  ;;  %12169 = vmatprep.mubr.f32.mxu0 %v20143_v36 }
 0x488   :  { %v14648_v11 = vpack.c.bf16 %v11465_v27, %v11433_v20  ;;  %v14630_v39 = vpack.c.bf16 %v11464_v21, %v11432_v17  ;;  %v10367_v2 = vpop.f32.mrb[68].mxu0  ;;  %12240 = vmatprep.mubr.f32.mxu1 %v20143_v36 }
 0x489   :  { %v14646_v31 = vpack.c.bf16 %v11466_v33, %v11434_v13  ;;  %v10480_v8 = vpop.f32.mrb[68].mxu1  ;;  %v10369_v58 = vpop.f32.mrb[69].mxu0  ;;  %v11495_v7 = vmax.f32 %v10367_v2, 0.0 }
 0x48a   :  { %v10482_v44 = vpop.f32.mrb[69].mxu1  ;;  %14631 = vmatprep.subr.bf16.mxu0 %v14630_v39  ;;  %v11497_v4 = vmax.f32 %v10480_v8, 0.0  ;;  %v11496_v51 = vmax.f32 %v10369_v58, 0.0 }
 0x48b   :  { %14647 = vmatprep.subr.bf16.mxu1 %v14646_v31  ;;  %14633 = vmatpush1.bf16.msra.mxu0 %v14632_v19  ;;  %v11498_v42 = vmax.f32 %v10482_v44, 0.0 }
 0x48c   :  { %14649 = vmatpush1.bf16.msra.mxu1 %v14648_v11  ;;  %v10373_v28 = vpop.f32.mrb[70].mxu0 }
 0x48d   :  { %v11527_v34 = vmax.f32 %v10373_v28, 0.0  ;;  %v10486_v43 = vpop.f32.mrb[70].mxu1  ;;  %v10375_v60 = vpop.f32.mrb[71].mxu0 }
 0x48e   :  { %v11529_v26 = vmax.f32 %v10486_v43, 0.0  ;;  %v11528_v24 = vmax.f32 %v10375_v60, 0.0  ;;  %v10488_v46 = vpop.f32.mrb[71].mxu1 }
 0x48f   :  { %v14636_v18 = vpack.c.bf16 %v11527_v34, %v11495_v7  ;;  %v11530_v38 = vmax.f32 %v10488_v46, 0.0 }
 0x490   :  { %v14652_v41 = vpack.c.bf16 %v11529_v26, %v11497_v4  ;;  %v14634_v47 = vpack.c.bf16 %v11528_v24, %v11496_v51  ;;  %v10379_v20 = vpop.f32.mrb[72].mxu0 }
 0x491   :  { %v14650_v17 = vpack.c.bf16 %v11530_v38, %v11498_v42  ;;  %v10492_v27 = vpop.f32.mrb[72].mxu1  ;;  %v10381_v21 = vpop.f32.mrb[73].mxu0  ;;  %v11559_v19 = vmax.f32 %v10379_v20, 0.0 }
 0x492   :  { %v10494_v32 = vpop.f32.mrb[73].mxu1  ;;  %14635 = vmatprep.subr.bf16.mxu0 %v14634_v47  ;;  %v11561_v2 = vmax.f32 %v10492_v27, 0.0  ;;  %v11560_v31 = vmax.f32 %v10381_v21, 0.0 }
 0x493   :  { %14651 = vmatprep.subr.bf16.mxu1 %v14650_v17  ;;  %14637 = vmatpush1.bf16.msra.mxu0 %v14636_v18  ;;  %v11562_v28 = vmax.f32 %v10494_v32, 0.0 }
 0x494   :  { %14653 = vmatpush1.bf16.msra.mxu1 %v14652_v41  ;;  %v10385_v13 = vpop.f32.mrb[74].mxu0 }
 0x495   :  { %v11591_v33 = vmax.f32 %v10385_v13, 0.0  ;;  %v10498_v11 = vpop.f32.mrb[74].mxu1  ;;  %v10387_v39 = vpop.f32.mrb[75].mxu0 }
 0x496   :  { %v11593_v8 = vmax.f32 %v10498_v11, 0.0  ;;  %v11592_v58 = vmax.f32 %v10387_v39, 0.0  ;;  %v10500_v44 = vpop.f32.mrb[75].mxu1 }
 0x497   :  { %v14640_v7 = vpack.c.bf16 %v11591_v33, %v11559_v19  ;;  %v11594_v34 = vmax.f32 %v10500_v44, 0.0 }
 0x498   :  { %v14656_v43 = vpack.c.bf16 %v11593_v8, %v11561_v2  ;;  %v14638_v60 = vpack.c.bf16 %v11592_v58, %v11560_v31  ;;  %v10391_v4 = vpop.f32.mrb[76].mxu0 }
 0x499   :  { %v14654_v51 = vpack.c.bf16 %v11594_v34, %v11562_v28  ;;  %v10504_v26 = vpop.f32.mrb[76].mxu1  ;;  %v10393_v24 = vpop.f32.mrb[77].mxu0  ;;  %v11623_v18 = vmax.f32 %v10391_v4, 0.0 }
 0x49a   :  { %v10506_v46 = vpop.f32.mrb[77].mxu1  ;;  %14639 = vmatprep.subr.bf16.mxu0 %v14638_v60  ;;  %v11625_v20 = vmax.f32 %v10504_v26, 0.0  ;;  %v11624_v17 = vmax.f32 %v10393_v24, 0.0 }
 0x49b   :  { %14655 = vmatprep.subr.bf16.mxu1 %v14654_v51  ;;  %14641 = vmatpush1.bf16.msra.mxu0 %v14640_v7  ;;  %v11626_v13 = vmax.f32 %v10506_v46, 0.0 }
 0x49c   :  { %14657 = vmatpush1.bf16.msra.mxu1 %v14656_v43  ;;  %v10397_v42 = vpop.f32.mrb[78].mxu0 }
 0x49d   :  { %v11655_v38 = vmax.f32 %v10397_v42, 0.0  ;;  %v10510_v41 = vpop.f32.mrb[78].mxu1  ;;  %v10399_v47 = vpop.f32.mrb[79].mxu0 }
 0x49e   :  { %v11657_v27 = vmax.f32 %v10510_v41, 0.0  ;;  %v11656_v21 = vmax.f32 %v10399_v47, 0.0  ;;  %v10512_v32 = vpop.f32.mrb[79].mxu1 }
 0x49f   :  { %v14644_v19 = vpack.c.bf16 %v11655_v38, %v11623_v18  ;;  %v11658_v33 = vmax.f32 %v10512_v32, 0.0 }
 0x4a0   :  { %v14660_v11 = vpack.c.bf16 %v11657_v27, %v11625_v20  ;;  %v14642_v39 = vpack.c.bf16 %v11656_v21, %v11624_v17  ;;  %v10581_v2 = vpop.f32.mrb[80].mxu0 }
 0x4a1   :  { %v14658_v31 = vpack.c.bf16 %v11658_v33, %v11626_v13  ;;  %v10694_v8 = vpop.f32.mrb[80].mxu1  ;;  %v10583_v58 = vpop.f32.mrb[81].mxu0  ;;  %v11435_v7 = vmax.f32 %v10581_v2, 0.0 }
 0x4a2   :  { %v10696_v44 = vpop.f32.mrb[81].mxu1  ;;  %14643 = vmatprep.subr.bf16.mxu0 %v14642_v39  ;;  %v11437_v4 = vmax.f32 %v10694_v8, 0.0  ;;  %v11436_v51 = vmax.f32 %v10583_v58, 0.0 }
 0x4a3   :  { %14659 = vmatprep.subr.bf16.mxu1 %v14658_v31  ;;  %14645 = vmatpush1.bf16.msra.mxu0 %v14644_v19  ;;  %v11438_v42 = vmax.f32 %v10696_v44, 0.0 }
 0x4a4   :  { %14661 = vmatpush1.bf16.msra.mxu1 %v14660_v11  ;;  %v10587_v28 = vpop.f32.mrb[82].mxu0 }
 0x4a5   :  { %v11467_v34 = vmax.f32 %v10587_v28, 0.0  ;;  %v10700_v43 = vpop.f32.mrb[82].mxu1  ;;  %v10589_v60 = vpop.f32.mrb[83].mxu0 }
 0x4a6   :  { %v11469_v26 = vmax.f32 %v10700_v43, 0.0  ;;  %v11468_v24 = vmax.f32 %v10589_v60, 0.0  ;;  %v10702_v46 = vpop.f32.mrb[83].mxu1  ;;  %13788 = vmatmul.mubr.msk.f32.vlgmr.msra.gmra.mrb[150].mxu0 %vm5395_vm1, %v19937_v40 }
 0x4a7   :  { %v14664_v18 = vpack.c.bf16 %v11467_v34, %v11435_v7  ;;  %v11470_v38 = vmax.f32 %v10702_v46, 0.0  ;;  %13789 = vmatmul.mubr.msk.f32.vlgmr.msra.gmra.mrb[150].mxu1 %vm5395_vm1, %v19937_v40  ;;  %12311 = vmatprep.mubr.f32.mxu0 %v20143_v36 }
 0x4a8   :  { %v14680_v41 = vpack.c.bf16 %v11469_v26, %v11437_v4  ;;  %v14662_v47 = vpack.c.bf16 %v11468_v24, %v11436_v51  ;;  %v10593_v20 = vpop.f32.mrb[84].mxu0  ;;  %12382 = vmatprep.mubr.f32.mxu1 %v20143_v36 }
 0x4a9   :  { %v14678_v17 = vpack.c.bf16 %v11470_v38, %v11438_v42  ;;  %v10706_v27 = vpop.f32.mrb[84].mxu1  ;;  %v10595_v21 = vpop.f32.mrb[85].mxu0  ;;  %v11499_v19 = vmax.f32 %v10593_v20, 0.0 }
 0x4aa   :  { %v10708_v32 = vpop.f32.mrb[85].mxu1  ;;  %14663 = vmatprep.subr.bf16.mxu0 %v14662_v47  ;;  %v11501_v2 = vmax.f32 %v10706_v27, 0.0  ;;  %v11500_v31 = vmax.f32 %v10595_v21, 0.0 }
 0x4ab   :  { %14679 = vmatprep.subr.bf16.mxu1 %v14678_v17  ;;  %14665 = vmatpush1.bf16.msra.mxu0 %v14664_v18  ;;  %v11502_v28 = vmax.f32 %v10708_v32, 0.0 }
 0x4ac   :  { %14681 = vmatpush1.bf16.msra.mxu1 %v14680_v41  ;;  %v10599_v13 = vpop.f32.mrb[86].mxu0 }
 0x4ad   :  { %v11531_v33 = vmax.f32 %v10599_v13, 0.0  ;;  %v10712_v11 = vpop.f32.mrb[86].mxu1  ;;  %v10601_v39 = vpop.f32.mrb[87].mxu0 }
 0x4ae   :  { %v11533_v8 = vmax.f32 %v10712_v11, 0.0  ;;  %v11532_v58 = vmax.f32 %v10601_v39, 0.0  ;;  %v10714_v44 = vpop.f32.mrb[87].mxu1 }
 0x4af   :  { %v14668_v7 = vpack.c.bf16 %v11531_v33, %v11499_v19  ;;  %v11534_v34 = vmax.f32 %v10714_v44, 0.0 }
 0x4b0   :  { %v14684_v43 = vpack.c.bf16 %v11533_v8, %v11501_v2  ;;  %v14666_v60 = vpack.c.bf16 %v11532_v58, %v11500_v31  ;;  %v10605_v4 = vpop.f32.mrb[88].mxu0 }
 0x4b1   :  { %v14682_v51 = vpack.c.bf16 %v11534_v34, %v11502_v28  ;;  %v10718_v26 = vpop.f32.mrb[88].mxu1  ;;  %v10607_v24 = vpop.f32.mrb[89].mxu0  ;;  %v11563_v18 = vmax.f32 %v10605_v4, 0.0 }
 0x4b2   :  { %v10720_v46 = vpop.f32.mrb[89].mxu1  ;;  %14667 = vmatprep.subr.bf16.mxu0 %v14666_v60  ;;  %v11565_v20 = vmax.f32 %v10718_v26, 0.0  ;;  %v11564_v17 = vmax.f32 %v10607_v24, 0.0 }
 0x4b3   :  { %14683 = vmatprep.subr.bf16.mxu1 %v14682_v51  ;;  %14669 = vmatpush1.bf16.msra.mxu0 %v14668_v7  ;;  %v11566_v13 = vmax.f32 %v10720_v46, 0.0 }
 0x4b4   :  { %14685 = vmatpush1.bf16.msra.mxu1 %v14684_v43  ;;  %v10611_v42 = vpop.f32.mrb[90].mxu0 }
 0x4b5   :  { %v11595_v38 = vmax.f32 %v10611_v42, 0.0  ;;  %v10724_v41 = vpop.f32.mrb[90].mxu1  ;;  %v10613_v47 = vpop.f32.mrb[91].mxu0 }
 0x4b6   :  { %v11597_v27 = vmax.f32 %v10724_v41, 0.0  ;;  %v11596_v21 = vmax.f32 %v10613_v47, 0.0  ;;  %v10726_v32 = vpop.f32.mrb[91].mxu1 }
 0x4b7   :  { %v14672_v19 = vpack.c.bf16 %v11595_v38, %v11563_v18  ;;  %v11598_v33 = vmax.f32 %v10726_v32, 0.0 }
 0x4b8   :  { %v14688_v11 = vpack.c.bf16 %v11597_v27, %v11565_v20  ;;  %v14670_v39 = vpack.c.bf16 %v11596_v21, %v11564_v17  ;;  %v10617_v2 = vpop.f32.mrb[92].mxu0 }
 0x4b9   :  { %v14686_v31 = vpack.c.bf16 %v11598_v33, %v11566_v13  ;;  %v10730_v8 = vpop.f32.mrb[92].mxu1  ;;  %v10619_v58 = vpop.f32.mrb[93].mxu0  ;;  %v11627_v7 = vmax.f32 %v10617_v2, 0.0 }
 0x4ba   :  { %v10732_v44 = vpop.f32.mrb[93].mxu1  ;;  %14671 = vmatprep.subr.bf16.mxu0 %v14670_v39  ;;  %v11629_v4 = vmax.f32 %v10730_v8, 0.0  ;;  %v11628_v51 = vmax.f32 %v10619_v58, 0.0 }
 0x4bb   :  { %14687 = vmatprep.subr.bf16.mxu1 %v14686_v31  ;;  %14673 = vmatpush1.bf16.msra.mxu0 %v14672_v19  ;;  %v11630_v42 = vmax.f32 %v10732_v44, 0.0 }
 0x4bc   :  { %14689 = vmatpush1.bf16.msra.mxu1 %v14688_v11  ;;  %v10623_v28 = vpop.f32.mrb[94].mxu0 }
 0x4bd   :  { %v11659_v34 = vmax.f32 %v10623_v28, 0.0  ;;  %v10736_v43 = vpop.f32.mrb[94].mxu1  ;;  %v10625_v60 = vpop.f32.mrb[95].mxu0 }
 0x4be   :  { %v11661_v26 = vmax.f32 %v10736_v43, 0.0  ;;  %v11660_v24 = vmax.f32 %v10625_v60, 0.0  ;;  %v10738_v46 = vpop.f32.mrb[95].mxu1 }
 0x4bf   :  { %v14676_v18 = vpack.c.bf16 %v11659_v34, %v11627_v7  ;;  %v11662_v38 = vmax.f32 %v10738_v46, 0.0 }
 0x4c0   :  { %v14692_v41 = vpack.c.bf16 %v11661_v26, %v11629_v4  ;;  %v14674_v47 = vpack.c.bf16 %v11660_v24, %v11628_v51  ;;  %v10807_v20 = vpop.f32.mrb[96].mxu0 }
 0x4c1   :  { %v14690_v17 = vpack.c.bf16 %v11662_v38, %v11630_v42  ;;  %v10920_v27 = vpop.f32.mrb[96].mxu1  ;;  %v10809_v21 = vpop.f32.mrb[97].mxu0  ;;  %v11439_v19 = vmax.f32 %v10807_v20, 0.0 }
 0x4c2   :  { %v10922_v32 = vpop.f32.mrb[97].mxu1  ;;  %14675 = vmatprep.subr.bf16.mxu0 %v14674_v47  ;;  %v11441_v2 = vmax.f32 %v10920_v27, 0.0  ;;  %v11440_v31 = vmax.f32 %v10809_v21, 0.0 }
 0x4c3   :  { %14691 = vmatprep.subr.bf16.mxu1 %v14690_v17  ;;  %14677 = vmatpush1.bf16.msra.mxu0 %v14676_v18  ;;  %v11442_v28 = vmax.f32 %v10922_v32, 0.0 }
 0x4c4   :  { %14693 = vmatpush1.bf16.msra.mxu1 %v14692_v41  ;;  %v10813_v13 = vpop.f32.mrb[98].mxu0 }
 0x4c5   :  { %v11471_v33 = vmax.f32 %v10813_v13, 0.0  ;;  %v10926_v11 = vpop.f32.mrb[98].mxu1  ;;  %v10815_v39 = vpop.f32.mrb[99].mxu0 }
 0x4c6   :  { %v11473_v8 = vmax.f32 %v10926_v11, 0.0  ;;  %v11472_v58 = vmax.f32 %v10815_v39, 0.0  ;;  %v10928_v44 = vpop.f32.mrb[99].mxu1  ;;  %13790 = vmatmul.mubr.msk.f32.vlgmr.msra.gmra.mrb[152].mxu0 %vm5395_vm1, %v19937_v40 }
 0x4c7   :  { %v14696_v7 = vpack.c.bf16 %v11471_v33, %v11439_v19  ;;  %v11474_v34 = vmax.f32 %v10928_v44, 0.0  ;;  %13791 = vmatmul.mubr.msk.f32.vlgmr.msra.gmra.mrb[152].mxu1 %vm5395_vm1, %v19937_v40  ;;  %12453 = vmatprep.mubr.f32.mxu0 %v20143_v36 }
 0x4c8   :  { %v14712_v43 = vpack.c.bf16 %v11473_v8, %v11441_v2  ;;  %v14694_v60 = vpack.c.bf16 %v11472_v58, %v11440_v31  ;;  %v10819_v4 = vpop.f32.mrb[100].mxu0  ;;  %12524 = vmatprep.mubr.f32.mxu1 %v20143_v36 }
 0x4c9   :  { %v14710_v51 = vpack.c.bf16 %v11474_v34, %v11442_v28  ;;  %v10932_v26 = vpop.f32.mrb[100].mxu1  ;;  %v10821_v24 = vpop.f32.mrb[101].mxu0  ;;  %v11503_v18 = vmax.f32 %v10819_v4, 0.0 }
 0x4ca   :  { %v10934_v46 = vpop.f32.mrb[101].mxu1  ;;  %14695 = vmatprep.subr.bf16.mxu0 %v14694_v60  ;;  %v11505_v20 = vmax.f32 %v10932_v26, 0.0  ;;  %v11504_v17 = vmax.f32 %v10821_v24, 0.0 }
 0x4cb   :  { %14711 = vmatprep.subr.bf16.mxu1 %v14710_v51  ;;  %14697 = vmatpush1.bf16.msra.mxu0 %v14696_v7  ;;  %v11506_v13 = vmax.f32 %v10934_v46, 0.0 }
 0x4cc   :  { %14713 = vmatpush1.bf16.msra.mxu1 %v14712_v43  ;;  %v10825_v42 = vpop.f32.mrb[102].mxu0 }
 0x4cd   :  { %v11535_v38 = vmax.f32 %v10825_v42, 0.0  ;;  %v10938_v41 = vpop.f32.mrb[102].mxu1  ;;  %v10827_v47 = vpop.f32.mrb[103].mxu0 }
 0x4ce   :  { %v11537_v27 = vmax.f32 %v10938_v41, 0.0  ;;  %v11536_v21 = vmax.f32 %v10827_v47, 0.0  ;;  %v10940_v32 = vpop.f32.mrb[103].mxu1 }
 0x4cf   :  { %v14700_v19 = vpack.c.bf16 %v11535_v38, %v11503_v18  ;;  %v11538_v33 = vmax.f32 %v10940_v32, 0.0 }
 0x4d0   :  { %v14716_v11 = vpack.c.bf16 %v11537_v27, %v11505_v20  ;;  %v14698_v39 = vpack.c.bf16 %v11536_v21, %v11504_v17  ;;  %v10831_v2 = vpop.f32.mrb[104].mxu0 }
 0x4d1   :  { %v14714_v31 = vpack.c.bf16 %v11538_v33, %v11506_v13  ;;  %v10944_v8 = vpop.f32.mrb[104].mxu1  ;;  %v10833_v58 = vpop.f32.mrb[105].mxu0  ;;  %v11567_v7 = vmax.f32 %v10831_v2, 0.0 }
 0x4d2   :  { %v10946_v44 = vpop.f32.mrb[105].mxu1  ;;  %14699 = vmatprep.subr.bf16.mxu0 %v14698_v39  ;;  %v11569_v4 = vmax.f32 %v10944_v8, 0.0  ;;  %v11568_v51 = vmax.f32 %v10833_v58, 0.0 }
 0x4d3   :  { %14715 = vmatprep.subr.bf16.mxu1 %v14714_v31  ;;  %14701 = vmatpush1.bf16.msra.mxu0 %v14700_v19  ;;  %v11570_v42 = vmax.f32 %v10946_v44, 0.0 }
 0x4d4   :  { %14717 = vmatpush1.bf16.msra.mxu1 %v14716_v11  ;;  %v10837_v28 = vpop.f32.mrb[106].mxu0 }
 0x4d5   :  { %v11599_v34 = vmax.f32 %v10837_v28, 0.0  ;;  %v10950_v43 = vpop.f32.mrb[106].mxu1  ;;  %v10839_v60 = vpop.f32.mrb[107].mxu0 }
 0x4d6   :  { %v11601_v26 = vmax.f32 %v10950_v43, 0.0  ;;  %v11600_v24 = vmax.f32 %v10839_v60, 0.0  ;;  %v10952_v46 = vpop.f32.mrb[107].mxu1 }
 0x4d7   :  { %v14704_v18 = vpack.c.bf16 %v11599_v34, %v11567_v7  ;;  %v11602_v38 = vmax.f32 %v10952_v46, 0.0 }
 0x4d8   :  { %v14720_v41 = vpack.c.bf16 %v11601_v26, %v11569_v4  ;;  %v14702_v47 = vpack.c.bf16 %v11600_v24, %v11568_v51  ;;  %v10843_v20 = vpop.f32.mrb[108].mxu0 }
 0x4d9   :  { %v14718_v17 = vpack.c.bf16 %v11602_v38, %v11570_v42  ;;  %v10956_v27 = vpop.f32.mrb[108].mxu1  ;;  %v10845_v21 = vpop.f32.mrb[109].mxu0  ;;  %v11631_v19 = vmax.f32 %v10843_v20, 0.0 }
 0x4da   :  { %v10958_v32 = vpop.f32.mrb[109].mxu1  ;;  %14703 = vmatprep.subr.bf16.mxu0 %v14702_v47  ;;  %v11633_v2 = vmax.f32 %v10956_v27, 0.0  ;;  %v11632_v31 = vmax.f32 %v10845_v21, 0.0 }
 0x4db   :  { %14719 = vmatprep.subr.bf16.mxu1 %v14718_v17  ;;  %14705 = vmatpush1.bf16.msra.mxu0 %v14704_v18  ;;  %v11634_v28 = vmax.f32 %v10958_v32, 0.0 }
 0x4dc   :  { %14721 = vmatpush1.bf16.msra.mxu1 %v14720_v41  ;;  %v10849_v13 = vpop.f32.mrb[110].mxu0 }
 0x4dd   :  { %v11663_v33 = vmax.f32 %v10849_v13, 0.0  ;;  %v10962_v11 = vpop.f32.mrb[110].mxu1  ;;  %v10851_v39 = vpop.f32.mrb[111].mxu0 }
 0x4de   :  { %v11665_v8 = vmax.f32 %v10962_v11, 0.0  ;;  %v11664_v58 = vmax.f32 %v10851_v39, 0.0  ;;  %v10964_v44 = vpop.f32.mrb[111].mxu1 }
 0x4df   :  { %v14708_v7 = vpack.c.bf16 %v11663_v33, %v11631_v19  ;;  %v11666_v34 = vmax.f32 %v10964_v44, 0.0 }
 0x4e0   :  { %v14724_v43 = vpack.c.bf16 %v11665_v8, %v11633_v2  ;;  %v14706_v60 = vpack.c.bf16 %v11664_v58, %v11632_v31  ;;  %v11033_v4 = vpop.f32.mrb[112].mxu0 }
 0x4e1   :  { %v14722_v51 = vpack.c.bf16 %v11666_v34, %v11634_v28  ;;  %v11146_v26 = vpop.f32.mrb[112].mxu1  ;;  %v11035_v24 = vpop.f32.mrb[113].mxu0  ;;  %v11443_v18 = vmax.f32 %v11033_v4, 0.0 }
 0x4e2   :  { %v11148_v46 = vpop.f32.mrb[113].mxu1  ;;  %14707 = vmatprep.subr.bf16.mxu0 %v14706_v60  ;;  %v11445_v20 = vmax.f32 %v11146_v26, 0.0  ;;  %v11444_v17 = vmax.f32 %v11035_v24, 0.0 }
 0x4e3   :  { %14723 = vmatprep.subr.bf16.mxu1 %v14722_v51  ;;  %14709 = vmatpush1.bf16.msra.mxu0 %v14708_v7  ;;  %v11446_v13 = vmax.f32 %v11148_v46, 0.0 }
 0x4e4   :  { %14725 = vmatpush1.bf16.msra.mxu1 %v14724_v43  ;;  %v11039_v42 = vpop.f32.mrb[114].mxu0 }
 0x4e5   :  { %v11475_v38 = vmax.f32 %v11039_v42, 0.0  ;;  %v11152_v41 = vpop.f32.mrb[114].mxu1  ;;  %v11041_v47 = vpop.f32.mrb[115].mxu0 }
 0x4e6   :  { %v11477_v27 = vmax.f32 %v11152_v41, 0.0  ;;  %v11476_v21 = vmax.f32 %v11041_v47, 0.0  ;;  %v11154_v32 = vpop.f32.mrb[115].mxu1  ;;  %13792 = vmatmul.mubr.msk.f32.vlgmr.msra.gmra.mrb[154].mxu0 %vm5395_vm1, %v19937_v40 }
 0x4e7   :  { %v14728_v19 = vpack.c.bf16 %v11475_v38, %v11443_v18  ;;  %v11478_v33 = vmax.f32 %v11154_v32, 0.0  ;;  %13793 = vmatmul.mubr.msk.f32.vlgmr.msra.gmra.mrb[154].mxu1 %vm5395_vm1, %v19937_v40  ;;  %12595 = vmatprep.mubr.f32.mxu0 %v20143_v36 }
 0x4e8   :  { %v14744_v11 = vpack.c.bf16 %v11477_v27, %v11445_v20  ;;  %v14726_v39 = vpack.c.bf16 %v11476_v21, %v11444_v17  ;;  %v11045_v2 = vpop.f32.mrb[116].mxu0  ;;  %12666 = vmatprep.mubr.f32.mxu1 %v20143_v36 }
 0x4e9   :  { %v14742_v31 = vpack.c.bf16 %v11478_v33, %v11446_v13  ;;  %v11158_v8 = vpop.f32.mrb[116].mxu1  ;;  %v11047_v58 = vpop.f32.mrb[117].mxu0  ;;  %v11507_v7 = vmax.f32 %v11045_v2, 0.0 }
 0x4ea   :  { %v11160_v44 = vpop.f32.mrb[117].mxu1  ;;  %14727 = vmatprep.subr.bf16.mxu0 %v14726_v39  ;;  %v11509_v60 = vmax.f32 %v11158_v8, 0.0  ;;  %v11508_v4 = vmax.f32 %v11047_v58, 0.0 }
 0x4eb   :  { %14743 = vmatprep.subr.bf16.mxu1 %v14742_v31  ;;  %14729 = vmatpush1.bf16.msra.mxu0 %v14728_v19  ;;  %v11510_v46 = vmax.f32 %v11160_v44, 0.0 }
 0x4ec   :  { %14745 = vmatpush1.bf16.msra.mxu1 %v14744_v11  ;;  %v11051_v28 = vpop.f32.mrb[118].mxu0 }
 0x4ed   :  { %v11539_v34 = vmax.f32 %v11051_v28, 0.0  ;;  %v11164_v43 = vpop.f32.mrb[118].mxu1  ;;  %v11053_v40 = vpop.f32.mrb[119].mxu0 }
 0x4ee   :  { %v11541_v51 = vmax.f32 %v11164_v43, 0.0  ;;  %v11540_v26 = vmax.f32 %v11053_v40, 0.0  ;;  %v11166_v24 = vpop.f32.mrb[119].mxu1 }
 0x4ef   :  { %v14732_v42 = vpack.c.bf16 %v11539_v34, %v11507_v7  ;;  %v11542_v18 = vmax.f32 %v11166_v24, 0.0 }
 0x4f0   :  { %v14748_v38 = vpack.c.bf16 %v11541_v51, %v11509_v60  ;;  %v14730_v41 = vpack.c.bf16 %v11540_v26, %v11508_v4  ;;  %v11057_v47 = vpop.f32.mrb[120].mxu0 }
 0x4f1   :  { %v14746_v20 = vpack.c.bf16 %v11542_v18, %v11510_v46  ;;  %v11170_v17 = vpop.f32.mrb[120].mxu1  ;;  %v11059_v27 = vpop.f32.mrb[121].mxu0  ;;  %v11571_v13 = vmax.f32 %v11057_v47, 0.0 }
 0x4f2   :  { %v11172_v21 = vpop.f32.mrb[121].mxu1  ;;  %14731 = vmatprep.subr.bf16.mxu0 %v14730_v41  ;;  %v11573_v39 = vmax.f32 %v11170_v17, 0.0  ;;  %v11572_v2 = vmax.f32 %v11059_v27, 0.0 }
 0x4f3   :  { %14747 = vmatprep.subr.bf16.mxu1 %v14746_v20  ;;  %14733 = vmatpush1.bf16.msra.mxu0 %v14732_v42  ;;  %v11574_v44 = vmax.f32 %v11172_v21, 0.0 }
 0x4f4   :  { %14749 = vmatpush1.bf16.msra.mxu1 %v14748_v38  ;;  %v11063_v32 = vpop.f32.mrb[122].mxu0 }
 0x4f5   :  { %v11603_v19 = vmax.f32 %v11063_v32, 0.0  ;;  %v11176_v33 = vpop.f32.mrb[122].mxu1  ;;  %v11065_v11 = vpop.f32.mrb[123].mxu0 }
 0x4f6   :  { %v11605_v31 = vmax.f32 %v11176_v33, 0.0  ;;  %v11604_v8 = vmax.f32 %v11065_v11, 0.0  ;;  %v11178_v58 = vpop.f32.mrb[123].mxu1 }
 0x4f7   :  { %v14736_v28 = vpack.c.bf16 %v11603_v19, %v11571_v13  ;;  %v11606_v7 = vmax.f32 %v11178_v58, 0.0 }
 0x4f8   :  { %v14752_v34 = vpack.c.bf16 %v11605_v31, %v11573_v39  ;;  %v14734_v43 = vpack.c.bf16 %v11604_v8, %v11572_v2  ;;  %v11069_v40 = vpop.f32.mrb[124].mxu0 }
 0x4f9   :  { %v14750_v60 = vpack.c.bf16 %v11606_v7, %v11574_v44  ;;  %v11182_v4 = vpop.f32.mrb[124].mxu1  ;;  %v11071_v51 = vpop.f32.mrb[125].mxu0  ;;  %v11635_v46 = vmax.f32 %v11069_v40, 0.0 }
 0x4fa   :  { %v11184_v26 = vpop.f32.mrb[125].mxu1  ;;  %14735 = vmatprep.subr.bf16.mxu0 %v14734_v43  ;;  %v11637_v41 = vmax.f32 %v11182_v4, 0.0  ;;  %v11636_v47 = vmax.f32 %v11071_v51, 0.0 }
 0x4fb   :  { %14751 = vmatprep.subr.bf16.mxu1 %v14750_v60  ;;  %14737 = vmatpush1.bf16.msra.mxu0 %v14736_v28  ;;  %v11638_v21 = vmax.f32 %v11184_v26, 0.0  ;;  %v19980_v26 = vld [vmem:[%s20110_s6] sm:$0x7] }
 0x4fc   :  { %14753 = vmatpush1.bf16.msra.mxu1 %v14752_v34  ;;  %v11075_v24 = vpop.f32.mrb[126].mxu0 }
 0x4fd   :  { %v11667_v42 = vmax.f32 %v11075_v24, 0.0  ;;  %v11188_v18 = vpop.f32.mrb[126].mxu1  ;;  %v11077_v38 = vpop.f32.mrb[127].mxu0 }
 0x4fe   :  { %v11669_v20 = vmax.f32 %v11188_v18, 0.0  ;;  %v11668_v17 = vmax.f32 %v11077_v38, 0.0  ;;  %v11190_v27 = vpop.f32.mrb[127].mxu1 }
 0x4ff   :  { %v14740_v32 = vpack.c.bf16 %v11667_v42, %v11635_v46  ;;  %v11670_v13 = vmax.f32 %v11190_v27, 0.0 }
 0x500   :  { %v14756_v19 = vpack.c.bf16 %v11669_v20, %v11637_v41  ;;  %v14738_v33 = vpack.c.bf16 %v11668_v17, %v11636_v47  ;;  %v11259_v11 = vpop.f32.mrb[128].mxu0 }
 0x501   :  { %v14754_v39 = vpack.c.bf16 %v11670_v13, %v11638_v21  ;;  %v11372_v2 = vpop.f32.mrb[128].mxu1  ;;  %v11261_v31 = vpop.f32.mrb[129].mxu0  ;;  %v11447_v44 = vmax.f32 %v11259_v11, 0.0 }
 0x502   :  { %v11374_v8 = vpop.f32.mrb[129].mxu1  ;;  %14739 = vmatprep.subr.bf16.mxu0 %v14738_v33  ;;  %v11449_v43 = vmax.f32 %v11372_v2, 0.0  ;;  %v11448_v40 = vmax.f32 %v11261_v31, 0.0 }
 0x503   :  { %14755 = vmatprep.subr.bf16.mxu1 %v14754_v39  ;;  %14741 = vmatpush1.bf16.msra.mxu0 %v14740_v32  ;;  %v11450_v24 = vmax.f32 %v11374_v8, 0.0 }
 0x504   :  { %14757 = vmatpush1.bf16.msra.mxu1 %v14756_v19  ;;  %v11265_v58 = vpop.f32.mrb[130].mxu0 }
 0x505   :  { %v11479_v28 = vmax.f32 %v11265_v58, 0.0  ;;  %v11378_v7 = vpop.f32.mrb[130].mxu1  ;;  %v11267_v34 = vpop.f32.mrb[131].mxu0 }
 0x506   :  { %v11481_v60 = vmax.f32 %v11378_v7, 0.0  ;;  %v11480_v4 = vmax.f32 %v11267_v34, 0.0  ;;  %v11380_v51 = vpop.f32.mrb[131].mxu1  ;;  %13794 = vmatmul.mubr.msk.f32.vlgmr.msra.gmra.mrb[156].mxu0 %vm5395_vm1, %v19980_v26 }
 0x507   :  { %v14760_v46 = vpack.c.bf16 %v11479_v28, %v11447_v44  ;;  %v11482_v42 = vmax.f32 %v11380_v51, 0.0  ;;  %13795 = vmatmul.mubr.msk.f32.vlgmr.msra.gmra.mrb[156].mxu1 %vm5395_vm1, %v19980_v26  ;;  %12737 = vmatprep.mubr.f32.mxu0 %v20143_v36 }
 0x508   :  { %v14776_v18 = vpack.c.bf16 %v11481_v60, %v11449_v43  ;;  %v14758_v38 = vpack.c.bf16 %v11480_v4, %v11448_v40  ;;  %v11271_v41 = vpop.f32.mrb[132].mxu0  ;;  %12808 = vmatprep.mubr.f32.mxu1 %v20143_v36 }
 0x509   :  { %v14774_v47 = vpack.c.bf16 %v11482_v42, %v11450_v24  ;;  %v11384_v20 = vpop.f32.mrb[132].mxu1  ;;  %v11273_v17 = vpop.f32.mrb[133].mxu0  ;;  %v11511_v32 = vmax.f32 %v11271_v41, 0.0 }
 0x50a   :  { %v11386_v27 = vpop.f32.mrb[133].mxu1  ;;  %14759 = vmatprep.subr.bf16.mxu0 %v14758_v38  ;;  %v11513_v11 = vmax.f32 %v11384_v20, 0.0  ;;  %v11512_v39 = vmax.f32 %v11273_v17, 0.0 }
 0x50b   :  { %14775 = vmatprep.subr.bf16.mxu1 %v14774_v47  ;;  %14761 = vmatpush1.bf16.msra.mxu0 %v14760_v46  ;;  %v11514_v58 = vmax.f32 %v11386_v27, 0.0 }
 0x50c   :  { %14777 = vmatpush1.bf16.msra.mxu1 %v14776_v18  ;;  %v11277_v21 = vpop.f32.mrb[134].mxu0 }
 0x50d   :  { %v11543_v13 = vmax.f32 %v11277_v21, 0.0  ;;  %v11390_v19 = vpop.f32.mrb[134].mxu1  ;;  %v11279_v33 = vpop.f32.mrb[135].mxu0 }
 0x50e   :  { %v11545_v2 = vmax.f32 %v11390_v19, 0.0  ;;  %v11544_v31 = vmax.f32 %v11279_v33, 0.0  ;;  %v11392_v8 = vpop.f32.mrb[135].mxu1 }
 0x50f   :  { %v14764_v36 = vpack.c.bf16 %v11543_v13, %v11511_v32  ;;  %v11546_v44 = vmax.f32 %v11392_v8, 0.0 }
 0x510   :  { %v14780_v28 = vpack.c.bf16 %v11545_v2, %v11513_v11  ;;  %v14762_v7 = vpack.c.bf16 %v11544_v31, %v11512_v39  ;;  %v11283_v34 = vpop.f32.mrb[136].mxu0 }
 0x511   :  { %v14778_v43 = vpack.c.bf16 %v11546_v44, %v11514_v58  ;;  %v11396_v40 = vpop.f32.mrb[136].mxu1  ;;  %v11285_v60 = vpop.f32.mrb[137].mxu0  ;;  %v11575_v24 = vmax.f32 %v11283_v34, 0.0 }
 0x512   :  { %v11398_v4 = vpop.f32.mrb[137].mxu1  ;;  %14763 = vmatprep.subr.bf16.mxu0 %v14762_v7  ;;  %v11577_v38 = vmax.f32 %v11396_v40, 0.0  ;;  %v11576_v41 = vmax.f32 %v11285_v60, 0.0 }
 0x513   :  { %14779 = vmatprep.subr.bf16.mxu1 %v14778_v43  ;;  %14765 = vmatpush1.bf16.msra.mxu0 %v14764_v36  ;;  %v11578_v27 = vmax.f32 %v11398_v4, 0.0 }
 0x514   :  { %14781 = vmatpush1.bf16.msra.mxu1 %v14780_v28  ;;  %v11289_v51 = vpop.f32.mrb[138].mxu0 }
 0x515   :  { %v11607_v46 = vmax.f32 %v11289_v51, 0.0  ;;  %v11402_v42 = vpop.f32.mrb[138].mxu1  ;;  %v11291_v18 = vpop.f32.mrb[139].mxu0 }
 0x516   :  { %v11609_v47 = vmax.f32 %v11402_v42, 0.0  ;;  %v11608_v20 = vmax.f32 %v11291_v18, 0.0  ;;  %v11404_v17 = vpop.f32.mrb[139].mxu1 }
 0x517   :  { %v14768_v21 = vpack.c.bf16 %v11607_v46, %v11575_v24  ;;  %v11610_v32 = vmax.f32 %v11404_v17, 0.0 }
 0x518   :  { %v14784_v13 = vpack.c.bf16 %v11609_v47, %v11577_v38  ;;  %v14766_v19 = vpack.c.bf16 %v11608_v20, %v11576_v41  ;;  %v11295_v33 = vpop.f32.mrb[140].mxu0 }
 0x519   :  { %v14782_v11 = vpack.c.bf16 %v11610_v32, %v11578_v27  ;;  %v11408_v39 = vpop.f32.mrb[140].mxu1  ;;  %v11297_v2 = vpop.f32.mrb[141].mxu0  ;;  %v11639_v58 = vmax.f32 %v11295_v33, 0.0  ;;  %v9261_v33 = vmul.f32 1.442695, %v19204_v30 }
 0x51a   :  { %v11410_v31 = vpop.f32.mrb[141].mxu1  ;;  %14767 = vmatprep.subr.bf16.mxu0 %v14766_v19  ;;  %v11641_v7 = vmax.f32 %v11408_v39, 0.0  ;;  %v11640_v34 = vmax.f32 %v11297_v2, 0.0  ;;  %v9263_v19 = vmul.f32 1.442695, %v19202_v6 }
 0x51b   :  { %14783 = vmatprep.subr.bf16.mxu1 %v14782_v11  ;;  %14769 = vmatpush1.bf16.msra.mxu0 %v14768_v21  ;;  %v11642_v4 = vmax.f32 %v11410_v31, 0.0  ;;  %v9265_v11 = vmul.f32 1.442695, %v19210_v48 }
 0x51c   :  { %14785 = vmatpush1.bf16.msra.mxu1 %v14784_v13  ;;  %v11301_v8 = vpop.f32.mrb[142].mxu0  ;;  %v9259_v13 = vmul.f32 1.442695, %v19198_v54 }
 0x51d   :  { %v11671_v36 = vmax.f32 %v11301_v8, 0.0  ;;  %v11414_v44 = vpop.f32.mrb[142].mxu1  ;;  %v11303_v28 = vpop.f32.mrb[143].mxu0 }
 0x51e   :  { %v11673_v43 = vmax.f32 %v11414_v44, 0.0  ;;  %v11672_v40 = vmax.f32 %v11303_v28, 0.0  ;;  %v11416_v60 = vpop.f32.mrb[143].mxu1 }
 0x51f   :  { %v14772_v51 = vpack.c.bf16 %v11671_v36, %v11639_v58  ;;  %v11674_v24 = vmax.f32 %v11416_v60, 0.0 }
 0x520   :  { %v14788_v46 = vpack.c.bf16 %v11673_v43, %v11641_v7  ;;  %v14770_v42 = vpack.c.bf16 %v11672_v40, %v11640_v34  ;;  %v11745_v18 = vpop.f32.mrb[144].mxu0 }
 0x521   :  { %v14786_v38 = vpack.c.bf16 %v11674_v24, %v11642_v4  ;;  %v13798_v41 = vmul.f32 -1.442695, %v11745_v18  ;;  %v11816_v47 = vpop.f32.mrb[144].mxu1  ;;  %v11747_v20 = vpop.f32.mrb[145].mxu0 }
 0x522   :  { %v13800_v17 = vmul.f32 -1.442695, %v11816_v47  ;;  %v13799_v27 = vmul.f32 -1.442695, %v11747_v20  ;;  %v11818_v21 = vpop.f32.mrb[145].mxu1  ;;  %14771 = vmatprep.subr.bf16.mxu0 %v14770_v42 }
 0x523   :  { %15087 = vpow2.f32 %v13798_v41  ;;  %v13801_v32 = vmul.f32 -1.442695, %v11818_v21  ;;  %14787 = vmatprep.subr.bf16.mxu1 %v14786_v38  ;;  %14773 = vmatpush1.bf16.msra.mxu0 %v14772_v51 }
 0x524   :  { %15089 = vpow2.f32 %v13800_v17  ;;  %14789 = vmatpush1.bf16.msra.mxu1 %v14788_v46 }
 0x525   :  { %15091 = vpow2.f32 %v13799_v27 }
 0x526   :  { %15093 = vpow2.f32 %v13801_v32  ;;  %13796 = vmatmul.mubr.msk.f32.vlgmr.msra.gmra.mrb[158].mxu0 %vm5395_vm1, %v19980_v26 }
 0x527   :  { %13797 = vmatmul.mubr.msk.f32.vlgmr.msra.gmra.mrb[158].mxu1 %vm5395_vm1, %v19980_v26  ;;  %15095 = vpow2.f32 %v9259_v13 }
 0x528   :  { %15097 = vpow2.f32 %v9263_v19 }
 0x529   :  { %15099 = vpow2.f32 %v9261_v33  ;;  %v9267_v33 = vmul.f32 1.442695, %v19310_v25 }
 0x52a   :  { %15101 = vpow2.f32 %v9265_v11  ;;  %v9271_v11 = vmul.f32 1.442695, %v19314_v53 }
 0x52d   :  { %v15088_v39 = vpop.eup %15087 }
 0x52e   :  { %v15090_v2 = vpop.eup %15089  ;;  %v12911_v31 = vadd.f32 1.0, %v15088_v39  ;;  %v9269_v39 = vmul.f32 1.442695, %v19316_v10 }
 0x52f   :  { %v15092_v8 = vpop.eup %15091  ;;  %v12913_v58 = vadd.f32 1.0, %v15090_v2  ;;  %v9273_v2 = vmul.f32 1.442695, %v19320_v59 }
 0x530   :  { %v15094_v36 = vpop.eup %15093  ;;  %15103 = vrcp.f32 %v12911_v31  ;;  %v12912_v26 = vadd.f32 1.0, %v15092_v8 }
 0x531   :  { %15105 = vrcp.f32 %v12913_v58  ;;  %v12914_v54 = vadd.f32 1.0, %v15094_v36  ;;  %v15096_v6 = vpop.eup %15095 }
 0x532   :  { %15107 = vrcp.f32 %v12912_v26  ;;  %v15098_v30 = vpop.eup %15097  ;;  %v13039_v28 = vrot.slane %v15096_v6, 5 }
 0x533   :  { %15109 = vrcp.f32 %v12914_v54  ;;  %v15100_v44 = vpop.eup %15099  ;;  %v13041_v43 = vrot.slane %v15098_v30, 5 }
 0x534   :  { %v15102_v48 = vpop.eup %15101  ;;  %v13040_v24 = vrot.slane %v15100_v44, 5 }
 0x535   :  { %v13042_v47 = vrot.slane %v15102_v48, 5 }
 0x539   :  { %v11887_v7 = vpop.f32.mrb[146].mxu0 }
 0x53a   :  { %v15104_v34 = vpop.eup %15103  ;;  %v13802_v40 = vmul.f32 -1.442695, %v11887_v7  ;;  %v11958_v60 = vpop.f32.mrb[146].mxu1 }
 0x53b   :  { %v11889_v4 = vpop.f32.mrb[147].mxu0  ;;  %v15106_v51 = vpop.eup %15105  ;;  %v13103_v46 = vsel %vm2763_vm4, %v15104_v34, %v13039_v28  ;;  %v13804_v42 = vmul.f32 -1.442695, %v11958_v60 }
 0x53c   :  { %v13803_v18 = vmul.f32 -1.442695, %v11889_v4  ;;  %v11960_v38 = vpop.f32.mrb[147].mxu1  ;;  %v15108_v41 = vpop.eup %15107  ;;  %v13105_v20 = vsel %vm2763_vm4, %v15106_v51, %v13041_v43  ;;  %15111 = vpow2.f32 %v13802_v40 }
 0x53d   :  { %v13805_v17 = vmul.f32 -1.442695, %v11960_v38  ;;  %v15110_v27 = vpop.eup %15109  ;;  %v13104_v21 = vsel %vm2763_vm4, %v15108_v41, %v13040_v24  ;;  %15113 = vpow2.f32 %v13804_v42 }
 0x53e   :  { %v13167_v32 = vcombine.low %v13103_v46, %v13104_v21  ;;  %v13106_v13 = vsel %vm2763_vm4, %v15110_v27, %v13042_v47  ;;  %15115 = vpow2.f32 %v13803_v18 }
 0x53f   :  { %v13168_v19 = vcombine.low %v13105_v20, %v13106_v13  ;;  %15117 = vpow2.f32 %v13805_v17  ;;  %v9275_v13 = vmul.f32 1.442695, %v19452_v12 }
 0x540   :  { %13199 = vst [vmem:[%s20111_s7] sm:$0xff] %v13167_v32  ;;  %15119 = vpow2.f32 %v9267_v33  ;;  %v9277_v33 = vmul.f32 1.442695, %v19456_v16 }
 0x541   :  { %13200 = vst [vmem:[%s20111_s7 + $0x8] sm:$0xff] %v13168_v19  ;;  %15121 = vpow2.f32 %v9271_v11  ;;  %v9279_v19 = vmul.f32 1.442695, %v19454_v0  ;;  %v9281_v11 = vmul.f32 1.442695, %v19460_v49 }
 0x542   :  { %15123 = vpow2.f32 %v9269_v39 }
 0x543   :  { %15125 = vpow2.f32 %v9273_v2 }
 0x546   :  { %v15112_v31 = vpop.eup %15111 }
 0x547   :  { %v15114_v8 = vpop.eup %15113  ;;  %v12915_v58 = vadd.f32 1.0, %v15112_v31 }
 0x548   :  { %v15116_v36 = vpop.eup %15115  ;;  %v12917_v26 = vadd.f32 1.0, %v15114_v8 }
 0x549   :  { %v15118_v25 = vpop.eup %15117  ;;  %15127 = vrcp.f32 %v12915_v58  ;;  %v12916_v54 = vadd.f32 1.0, %v15116_v36 }
 0x54a   :  { %15129 = vrcp.f32 %v12917_v26  ;;  %v12918_v6 = vadd.f32 1.0, %v15118_v25  ;;  %v15120_v53 = vpop.eup %15119 }
 0x54b   :  { %15131 = vrcp.f32 %v12916_v54  ;;  %v15122_v10 = vpop.eup %15121  ;;  %v13043_v44 = vrot.slane %v15120_v53, 5 }
 0x54c   :  { %15133 = vrcp.f32 %v12918_v6  ;;  %v15124_v30 = vpop.eup %15123  ;;  %v13045_v28 = vrot.slane %v15122_v10, 5 }
 0x54d   :  { %v15126_v59 = vpop.eup %15125  ;;  %v13044_v34 = vrot.slane %v15124_v30, 5 }
 0x54e   :  { %v13046_v60 = vrot.slane %v15126_v59, 5 }
 0x553   :  { %v15128_v48 = vpop.eup %15127 }
 0x554   :  { %v15130_v7 = vpop.eup %15129  ;;  %v13107_v43 = vsel %vm2763_vm4, %v15128_v48, %v13043_v44 }
 0x555   :  { %v15132_v40 = vpop.eup %15131  ;;  %v13109_v4 = vsel %vm2763_vm4, %v15130_v7, %v13045_v28 }
 0x556   :  { %v15134_v51 = vpop.eup %15133  ;;  %v13108_v24 = vsel %vm2763_vm4, %v15132_v40, %v13044_v34 }
 0x557   :  { %v13169_v46 = vcombine.low %v13107_v43, %v13108_v24  ;;  %v13110_v42 = vsel %vm2763_vm4, %v15134_v51, %v13046_v60 }
 0x558   :  { %v13170_v18 = vcombine.low %v13109_v4, %v13110_v42 }
 0x559   :  { %13201 = vst [vmem:[%s20111_s7 + $0x10] sm:$0xff] %v13169_v46  ;;  %v12029_v38 = vpop.f32.mrb[148].mxu0 }
 0x55a   :  { %13202 = vst [vmem:[%s20111_s7 + $0x18] sm:$0xff] %v13170_v18  ;;  %v13806_v41 = vmul.f32 -1.442695, %v12029_v38  ;;  %v12100_v47 = vpop.f32.mrb[148].mxu1  ;;  %v12031_v20 = vpop.f32.mrb[149].mxu0 }
 0x55b   :  { %v13808_v17 = vmul.f32 -1.442695, %v12100_v47  ;;  %v13807_v27 = vmul.f32 -1.442695, %v12031_v20  ;;  %v12102_v21 = vpop.f32.mrb[149].mxu1 }
 0x55c   :  { %15135 = vpow2.f32 %v13806_v41  ;;  %v13809_v32 = vmul.f32 -1.442695, %v12102_v21  ;;  %v9283_v47 = vmul.f32 1.442695, %v19542_v22  ;;  %v9287_v20 = vmul.f32 1.442695, %v19544_v37 }
 0x55d   :  { %15137 = vpow2.f32 %v13808_v17  ;;  %v9285_v17 = vmul.f32 1.442695, %v19546_v63 }
 0x55e   :  { %15139 = vpow2.f32 %v13807_v27  ;;  %v9289_v27 = vmul.f32 1.442695, %v19550_v35 }
 0x55f   :  { %15141 = vpow2.f32 %v13809_v32 }
 0x560   :  { %15143 = vpow2.f32 %v9275_v13 }
 0x561   :  { %15145 = vpow2.f32 %v9279_v19 }
 0x562   :  { %15147 = vpow2.f32 %v9277_v33 }
 0x563   :  { %15149 = vpow2.f32 %v9281_v11 }
 0x566   :  { %v15136_v39 = vpop.eup %15135 }
 0x567   :  { %v15138_v2 = vpop.eup %15137  ;;  %v12919_v31 = vadd.f32 1.0, %v15136_v39 }
 0x568   :  { %v15140_v8 = vpop.eup %15139  ;;  %v12921_v58 = vadd.f32 1.0, %v15138_v2 }
 0x569   :  { %v15142_v36 = vpop.eup %15141  ;;  %15151 = vrcp.f32 %v12919_v31  ;;  %v12920_v26 = vadd.f32 1.0, %v15140_v8 }
 0x56a   :  { %15153 = vrcp.f32 %v12921_v58  ;;  %v12922_v12 = vadd.f32 1.0, %v15142_v36  ;;  %v15144_v0 = vpop.eup %15143 }
 0x56b   :  { %15155 = vrcp.f32 %v12920_v26  ;;  %v15146_v16 = vpop.eup %15145  ;;  %v13047_v54 = vrot.slane %v15144_v0, 5 }
 0x56c   :  { %15157 = vrcp.f32 %v12922_v12  ;;  %v15148_v25 = vpop.eup %15147  ;;  %v13049_v53 = vrot.slane %v15146_v16, 5 }
 0x56d   :  { %v15150_v49 = vpop.eup %15149  ;;  %v13048_v30 = vrot.slane %v15148_v25, 5 }
 0x56e   :  { %v13050_v48 = vrot.slane %v15150_v49, 5 }
 0x573   :  { %v15152_v6 = vpop.eup %15151 }
 0x574   :  { %v15154_v10 = vpop.eup %15153  ;;  %v13111_v59 = vsel %vm2763_vm4, %v15152_v6, %v13047_v54 }
 0x575   :  { %v15156_v44 = vpop.eup %15155  ;;  %v13113_v28 = vsel %vm2763_vm4, %v15154_v10, %v13049_v53 }
 0x576   :  { %v15158_v7 = vpop.eup %15157  ;;  %v13112_v34 = vsel %vm2763_vm4, %v15156_v44, %v13048_v30 }
 0x577   :  { %v13171_v43 = vcombine.low %v13111_v59, %v13112_v34  ;;  %v13114_v40 = vsel %vm2763_vm4, %v15158_v7, %v13050_v48 }
 0x578   :  { %v13172_v60 = vcombine.low %v13113_v28, %v13114_v40  ;;  %v9291_v40 = vmul.f32 1.442695, %v19620_v52 }
 0x579   :  { %13203 = vst [vmem:[%s20111_s7 + $0x20] sm:$0xff] %v13171_v43  ;;  %v12171_v4 = vpop.f32.mrb[150].mxu0 }
 0x57a   :  { %13204 = vst [vmem:[%s20111_s7 + $0x28] sm:$0xff] %v13172_v60  ;;  %v13810_v51 = vmul.f32 -1.442695, %v12171_v4  ;;  %v12242_v24 = vpop.f32.mrb[150].mxu1  ;;  %v12173_v46 = vpop.f32.mrb[151].mxu0 }
 0x57b   :  { %v13812_v42 = vmul.f32 -1.442695, %v12242_v24  ;;  %v13811_v18 = vmul.f32 -1.442695, %v12173_v46  ;;  %v12244_v38 = vpop.f32.mrb[151].mxu1 }
 0x57c   :  { %15159 = vpow2.f32 %v13810_v51  ;;  %v13813_v41 = vmul.f32 -1.442695, %v12244_v38  ;;  %v9295_v60 = vmul.f32 1.442695, %v19623_v62  ;;  %v9293_v4 = vmul.f32 1.442695, %v19626_v29 }
 0x57d   :  { %15161 = vpow2.f32 %v13812_v42  ;;  %v9297_v51 = vmul.f32 1.442695, %v19630_v15 }
 0x57e   :  { %15163 = vpow2.f32 %v13811_v18 }
 0x57f   :  { %15165 = vpow2.f32 %v13813_v41 }
 0x580   :  { %15167 = vpow2.f32 %v9283_v47 }
 0x581   :  { %15169 = vpow2.f32 %v9287_v20 }
 0x582   :  { %15171 = vpow2.f32 %v9285_v17 }
 0x583   :  { %15173 = vpow2.f32 %v9289_v27 }
 0x586   :  { %v15160_v21 = vpop.eup %15159 }
 0x587   :  { %v15162_v32 = vpop.eup %15161  ;;  %v12923_v13 = vadd.f32 1.0, %v15160_v21 }
 0x588   :  { %v15164_v19 = vpop.eup %15163  ;;  %v12925_v33 = vadd.f32 1.0, %v15162_v32 }
 0x589   :  { %v15166_v11 = vpop.eup %15165  ;;  %15175 = vrcp.f32 %v12923_v13  ;;  %v12924_v39 = vadd.f32 1.0, %v15164_v19 }
 0x58a   :  { %15177 = vrcp.f32 %v12925_v33  ;;  %v12926_v22 = vadd.f32 1.0, %v15166_v11  ;;  %v15168_v37 = vpop.eup %15167 }
 0x58b   :  { %15179 = vrcp.f32 %v12924_v39  ;;  %v15170_v63 = vpop.eup %15169  ;;  %v13051_v31 = vrot.slane %v15168_v37, 5 }
 0x58c   :  { %15181 = vrcp.f32 %v12926_v22  ;;  %v15172_v2 = vpop.eup %15171  ;;  %v13053_v58 = vrot.slane %v15170_v63, 5 }
 0x58d   :  { %v15174_v35 = vpop.eup %15173  ;;  %v13052_v26 = vrot.slane %v15172_v2, 5 }
 0x58e   :  { %v13054_v16 = vrot.slane %v15174_v35, 5 }
 0x593   :  { %v15176_v8 = vpop.eup %15175 }
 0x594   :  { %v15178_v36 = vpop.eup %15177  ;;  %v13115_v12 = vsel %vm2763_vm4, %v15176_v8, %v13051_v31 }
 0x595   :  { %v15180_v0 = vpop.eup %15179  ;;  %v13117_v25 = vsel %vm2763_vm4, %v15178_v36, %v13053_v58 }
 0x596   :  { %v15182_v49 = vpop.eup %15181  ;;  %v13116_v54 = vsel %vm2763_vm4, %v15180_v0, %v13052_v26 }
 0x597   :  { %v13173_v6 = vcombine.low %v13115_v12, %v13116_v54  ;;  %v13118_v53 = vsel %vm2763_vm4, %v15182_v49, %v13054_v16  ;;  %v9303_v49 = vmul.f32 1.442695, %v19703_v57  ;;  %v9301_v54 = vmul.f32 1.442695, %v19706_v9 }
 0x598   :  { %v13174_v10 = vcombine.low %v13117_v25, %v13118_v53  ;;  %v9299_v25 = vmul.f32 1.442695, %v19700_v56 }
 0x599   :  { %13205 = vst [vmem:[%s20111_s7 + $0x30] sm:$0xff] %v13173_v6  ;;  %v12313_v30 = vpop.f32.mrb[152].mxu0  ;;  %v9305_v6 = vmul.f32 1.442695, %v19715_v61 }
 0x59a   :  { %13206 = vst [vmem:[%s20111_s7 + $0x38] sm:$0xff] %v13174_v10  ;;  %v13814_v59 = vmul.f32 -1.442695, %v12313_v30  ;;  %v12384_v44 = vpop.f32.mrb[152].mxu1  ;;  %v12315_v48 = vpop.f32.mrb[153].mxu0 }
 0x59b   :  { %v13816_v28 = vmul.f32 -1.442695, %v12384_v44  ;;  %v13815_v7 = vmul.f32 -1.442695, %v12315_v48  ;;  %v12386_v34 = vpop.f32.mrb[153].mxu1 }
 0x59c   :  { %15183 = vpow2.f32 %v13814_v59  ;;  %v13817_v43 = vmul.f32 -1.442695, %v12386_v34 }
 0x59d   :  { %15185 = vpow2.f32 %v13816_v28 }
 0x59e   :  { %15187 = vpow2.f32 %v13815_v7 }
 0x59f   :  { %15189 = vpow2.f32 %v13817_v43 }
 0x5a0   :  { %15191 = vpow2.f32 %v9291_v40 }
 0x5a1   :  { %15193 = vpow2.f32 %v9295_v60 }
 0x5a2   :  { %15195 = vpow2.f32 %v9293_v4 }
 0x5a3   :  { %15197 = vpow2.f32 %v9297_v51 }
 0x5a6   :  { %v15184_v24 = vpop.eup %15183 }
 0x5a7   :  { %v15186_v46 = vpop.eup %15185  ;;  %v12927_v42 = vadd.f32 1.0, %v15184_v24 }
 0x5a8   :  { %v15188_v18 = vpop.eup %15187  ;;  %v12929_v38 = vadd.f32 1.0, %v15186_v46 }
 0x5a9   :  { %v15190_v41 = vpop.eup %15189  ;;  %15199 = vrcp.f32 %v12927_v42  ;;  %v12928_v47 = vadd.f32 1.0, %v15188_v18 }
 0x5aa   :  { %15201 = vrcp.f32 %v12929_v38  ;;  %v12930_v52 = vadd.f32 1.0, %v15190_v41  ;;  %v15192_v62 = vpop.eup %15191 }
 0x5ab   :  { %15203 = vrcp.f32 %v12928_v47  ;;  %v15194_v29 = vpop.eup %15193  ;;  %v13055_v17 = vrot.slane %v15192_v62, 5 }
 0x5ac   :  { %15205 = vrcp.f32 %v12930_v52  ;;  %v15196_v20 = vpop.eup %15195  ;;  %v13057_v21 = vrot.slane %v15194_v29, 5 }
 0x5ad   :  { %v15198_v15 = vpop.eup %15197  ;;  %v13056_v13 = vrot.slane %v15196_v20, 5 }
 0x5ae   :  { %v13058_v11 = vrot.slane %v15198_v15, 5 }
 0x5b3   :  { %v15200_v27 = vpop.eup %15199 }
 0x5b4   :  { %v15202_v32 = vpop.eup %15201  ;;  %v13119_v19 = vsel %vm2763_vm4, %v15200_v27, %v13055_v17 }
 0x5b5   :  { %v15204_v33 = vpop.eup %15203  ;;  %v13121_v39 = vsel %vm2763_vm4, %v15202_v32, %v13057_v21 }
 0x5b6   :  { %v15206_v22 = vpop.eup %15205  ;;  %v13120_v37 = vsel %vm2763_vm4, %v15204_v33, %v13056_v13  ;;  %v9307_v13 = vmul.f32 1.442695, %v19768_v14  ;;  %v9309_v33 = vmul.f32 1.442695, %v19773_v1 }
 0x5b7   :  { %v13175_v63 = vcombine.low %v13119_v19, %v13120_v37  ;;  %v13122_v2 = vsel %vm2763_vm4, %v15206_v22, %v13058_v11  ;;  %v9311_v19 = vmul.f32 1.442695, %v19771_v45  ;;  %v9313_v11 = vmul.f32 1.442695, %v19782_v23 }
 0x5b8   :  { %v13176_v35 = vcombine.low %v13121_v39, %v13122_v2 }
 0x5b9   :  { %13207 = vst [vmem:[%s20111_s7 + $0x40] sm:$0xff] %v13175_v63  ;;  %v12455_v31 = vpop.f32.mrb[154].mxu0 }
 0x5ba   :  { %13208 = vst [vmem:[%s20111_s7 + $0x48] sm:$0xff] %v13176_v35  ;;  %v13818_v8 = vmul.f32 -1.442695, %v12455_v31  ;;  %v12526_v58 = vpop.f32.mrb[154].mxu1  ;;  %v12457_v36 = vpop.f32.mrb[155].mxu0 }
 0x5bb   :  { %v13820_v26 = vmul.f32 -1.442695, %v12526_v58  ;;  %v13819_v12 = vmul.f32 -1.442695, %v12457_v36  ;;  %v12528_v0 = vpop.f32.mrb[155].mxu1 }
 0x5bc   :  { %15207 = vpow2.f32 %v13818_v8  ;;  %v13821_v16 = vmul.f32 -1.442695, %v12528_v0 }
 0x5bd   :  { %15209 = vpow2.f32 %v13820_v26 }
 0x5be   :  { %15211 = vpow2.f32 %v13819_v12 }
 0x5bf   :  { %15213 = vpow2.f32 %v13821_v16 }
 0x5c0   :  { %15215 = vpow2.f32 %v9299_v25 }
 0x5c1   :  { %15217 = vpow2.f32 %v9303_v49 }
 0x5c2   :  { %15219 = vpow2.f32 %v9301_v54 }
 0x5c3   :  { %15221 = vpow2.f32 %v9305_v6 }
 0x5c6   :  { %v15208_v53 = vpop.eup %15207 }
 0x5c7   :  { %v15210_v10 = vpop.eup %15209  ;;  %v12931_v30 = vadd.f32 1.0, %v15208_v53 }
 0x5c8   :  { %v15212_v59 = vpop.eup %15211  ;;  %v12933_v44 = vadd.f32 1.0, %v15210_v10 }
 0x5c9   :  { %v15214_v48 = vpop.eup %15213  ;;  %15223 = vrcp.f32 %v12931_v30  ;;  %v12932_v28 = vadd.f32 1.0, %v15212_v59 }
 0x5ca   :  { %15225 = vrcp.f32 %v12933_v44  ;;  %v12934_v56 = vadd.f32 1.0, %v15214_v48  ;;  %v15216_v57 = vpop.eup %15215 }
 0x5cb   :  { %15227 = vrcp.f32 %v12932_v28  ;;  %v15218_v9 = vpop.eup %15217  ;;  %v13059_v34 = vrot.slane %v15216_v57, 5 }
 0x5cc   :  { %15229 = vrcp.f32 %v12934_v56  ;;  %v15220_v7 = vpop.eup %15219  ;;  %v13061_v40 = vrot.slane %v15218_v9, 5 }
 0x5cd   :  { %v15222_v61 = vpop.eup %15221  ;;  %v13060_v4 = vrot.slane %v15220_v7, 5 }
 0x5ce   :  { %v13062_v46 = vrot.slane %v15222_v61, 5 }
 0x5d3   :  { %v15224_v43 = vpop.eup %15223 }
 0x5d4   :  { %v15226_v60 = vpop.eup %15225  ;;  %v13123_v51 = vsel %vm2763_vm4, %v15224_v43, %v13059_v34  ;;  %v9315_v34 = vmul.f32 1.442695, %v19856_v3  ;;  %v9319_v43 = vmul.f32 1.442695, %v19858_v50 }
 0x5d5   :  { %v15228_v24 = vpop.eup %15227  ;;  %v13125_v42 = vsel %vm2763_vm4, %v15226_v60, %v13061_v40  ;;  %v9317_v40 = vmul.f32 1.442695, %v19860_v5  ;;  %v9321_v60 = vmul.f32 1.442695, %v19864_v55 }
 0x5d6   :  { %v15230_v18 = vpop.eup %15229  ;;  %v13124_v38 = vsel %vm2763_vm4, %v15228_v24, %v13060_v4 }
 0x5d7   :  { %v13177_v41 = vcombine.low %v13123_v51, %v13124_v38  ;;  %v13126_v47 = vsel %vm2763_vm4, %v15230_v18, %v13062_v46 }
 0x5d8   :  { %v13178_v52 = vcombine.low %v13125_v42, %v13126_v47 }
 0x5d9   :  { %13209 = vst [vmem:[%s20111_s7 + $0x50] sm:$0xff] %v13177_v41  ;;  %v12597_v62 = vpop.f32.mrb[156].mxu0 }
 0x5da   :  { %13210 = vst [vmem:[%s20111_s7 + $0x58] sm:$0xff] %v13178_v52  ;;  %v13822_v29 = vmul.f32 -1.442695, %v12597_v62  ;;  %v12668_v20 = vpop.f32.mrb[156].mxu1  ;;  %v12599_v15 = vpop.f32.mrb[157].mxu0 }
 0x5db   :  { %v13824_v17 = vmul.f32 -1.442695, %v12668_v20  ;;  %v13823_v27 = vmul.f32 -1.442695, %v12599_v15  ;;  %v12670_v21 = vpop.f32.mrb[157].mxu1 }
 0x5dc   :  { %15231 = vpow2.f32 %v13822_v29  ;;  %v13825_v32 = vmul.f32 -1.442695, %v12670_v21 }
 0x5dd   :  { %15233 = vpow2.f32 %v13824_v17 }
 0x5de   :  { %15235 = vpow2.f32 %v13823_v27 }
 0x5df   :  { %15237 = vpow2.f32 %v13825_v32 }
 0x5e0   :  { %15239 = vpow2.f32 %v9307_v13 }
 0x5e1   :  { %15241 = vpow2.f32 %v9311_v19 }
 0x5e2   :  { %15243 = vpow2.f32 %v9309_v33 }
 0x5e3   :  { %15245 = vpow2.f32 %v9313_v11 }
 0x5e6   :  { %v15232_v39 = vpop.eup %15231 }
 0x5e7   :  { %v15234_v22 = vpop.eup %15233  ;;  %v12935_v37 = vadd.f32 1.0, %v15232_v39 }
 0x5e8   :  { %v15236_v63 = vpop.eup %15235  ;;  %v12937_v2 = vadd.f32 1.0, %v15234_v22 }
 0x5e9   :  { %v15238_v35 = vpop.eup %15237  ;;  %15247 = vrcp.f32 %v12935_v37  ;;  %v12936_v31 = vadd.f32 1.0, %v15236_v63 }
 0x5ea   :  { %15249 = vrcp.f32 %v12937_v2  ;;  %v12938_v14 = vadd.f32 1.0, %v15238_v35  ;;  %v15240_v45 = vpop.eup %15239 }
 0x5eb   :  { %15251 = vrcp.f32 %v12936_v31  ;;  %v15242_v1 = vpop.eup %15241  ;;  %v13063_v58 = vrot.slane %v15240_v45, 5 }
 0x5ec   :  { %15253 = vrcp.f32 %v12938_v14  ;;  %v15244_v8 = vpop.eup %15243  ;;  %v13065_v26 = vrot.slane %v15242_v1, 5 }
 0x5ed   :  { %v15246_v23 = vpop.eup %15245  ;;  %v13064_v0 = vrot.slane %v15244_v8, 5 }
 0x5ee   :  { %v13066_v49 = vrot.slane %v15246_v23, 5 }
 0x5f3   :  { %v15248_v36 = vpop.eup %15247 }
 0x5f4   :  { %v15250_v12 = vpop.eup %15249  ;;  %v13127_v16 = vsel %vm2763_vm4, %v15248_v36, %v13063_v58 }
 0x5f5   :  { %v15252_v25 = vpop.eup %15251  ;;  %v13129_v54 = vsel %vm2763_vm4, %v15250_v12, %v13065_v26 }
 0x5f6   :  { %v15254_v6 = vpop.eup %15253  ;;  %v13128_v53 = vsel %vm2763_vm4, %v15252_v25, %v13064_v0 }
 0x5f7   :  { %v13179_v10 = vcombine.low %v13127_v16, %v13128_v53  ;;  %v13130_v30 = vsel %vm2763_vm4, %v15254_v6, %v13066_v49 }
 0x5f8   :  { %v13180_v59 = vcombine.low %v13129_v54, %v13130_v30 }
 0x5f9   :  { %13211 = vst [vmem:[%s20111_s7 + $0x60] sm:$0xff] %v13179_v10  ;;  %v12739_v44 = vpop.f32.mrb[158].mxu0 }
 0x5fa   :  { %13212 = vst [vmem:[%s20111_s7 + $0x68] sm:$0xff] %v13180_v59  ;;  %v13826_v48 = vmul.f32 -1.442695, %v12739_v44  ;;  %v12810_v28 = vpop.f32.mrb[158].mxu1  ;;  %v12741_v56 = vpop.f32.mrb[159].mxu0 }
 0x5fb   :  { %v13828_v57 = vmul.f32 -1.442695, %v12810_v28  ;;  %v13827_v9 = vmul.f32 -1.442695, %v12741_v56  ;;  %v12812_v7 = vpop.f32.mrb[159].mxu1 }
 0x5fc   :  { %15255 = vpow2.f32 %v13826_v48  ;;  %v13829_v61 = vmul.f32 -1.442695, %v12812_v7 }
 0x5fd   :  { %15257 = vpow2.f32 %v13828_v57 }
 0x5fe   :  { %15259 = vpow2.f32 %v13827_v9 }
 0x5ff   :  { %15261 = vpow2.f32 %v13829_v61 }
 0x600   :  { %15263 = vpow2.f32 %v9315_v34 }
 0x601   :  { %15265 = vpow2.f32 %v9319_v43 }
 0x602   :  { %15267 = vpow2.f32 %v9317_v40 }
 0x603   :  { %15269 = vpow2.f32 %v9321_v60 }
 0x606   :  { %v15256_v4 = vpop.eup %15255 }
 0x607   :  { %v15258_v51 = vpop.eup %15257  ;;  %v12939_v24 = vadd.f32 1.0, %v15256_v4 }
 0x608   :  { %v15260_v46 = vpop.eup %15259  ;;  %v12941_v42 = vadd.f32 1.0, %v15258_v51 }
 0x609   :  { %v15262_v18 = vpop.eup %15261  ;;  %15271 = vrcp.f32 %v12939_v24  ;;  %v12940_v38 = vadd.f32 1.0, %v15260_v46 }
 0x60a   :  { %15273 = vrcp.f32 %v12941_v42  ;;  %v12942_v3 = vadd.f32 1.0, %v15262_v18  ;;  %v15264_v50 = vpop.eup %15263 }
 0x60b   :  { %15275 = vrcp.f32 %v12940_v38  ;;  %v15266_v5 = vpop.eup %15265  ;;  %v13067_v47 = vrot.slane %v15264_v50, 5 }
 0x60c   :  { %15277 = vrcp.f32 %v12942_v3  ;;  %v15268_v41 = vpop.eup %15267  ;;  %v13069_v62 = vrot.slane %v15266_v5, 5 }
 0x60d   :  { %v15270_v55 = vpop.eup %15269  ;;  %v13068_v20 = vrot.slane %v15268_v41, 5 }
 0x60e   :  { %v13070_v27 = vrot.slane %v15270_v55, 5 }
 0x613   :  { %v15272_v52 = vpop.eup %15271 }
 0x614   :  { %v15274_v29 = vpop.eup %15273  ;;  %v13131_v15 = vsel %vm2763_vm4, %v15272_v52, %v13067_v47 }
 0x615   :  { %v15276_v17 = vpop.eup %15275  ;;  %v13133_v21 = vsel %vm2763_vm4, %v15274_v29, %v13069_v62 }
 0x616   :  { %v15278_v32 = vpop.eup %15277  ;;  %v13132_v13 = vsel %vm2763_vm4, %v15276_v17, %v13068_v20 }
 0x617   :  { %v13181_v19 = vcombine.low %v13131_v15, %v13132_v13  ;;  %v13134_v33 = vsel %vm2763_vm4, %v15278_v32, %v13070_v27 }
 0x618   :  { %v13182_v11 = vcombine.low %v13133_v21, %v13134_v33 }
 0x619   :  { %13213 = vst [vmem:[%s20111_s7 + $0x70] sm:$0xff] %v13181_v19 }
 0x61a   :  { %13214 = vst [vmem:[%s20111_s7 + $0x78] sm:$0xff] %v13182_v11 }

</bundles_post_ra>
